<compile_context>
chip_gen: v7x
topology: tpu7x:2x2x1
jax: 0.10.0
libtpu: 0.0.40
codegen_flags: <defaults>
</compile_context>

<pallas_src>
import functools
import math

import jax
import jax.numpy as jnp
from jax import lax
from jax.experimental import pallas as pl
from jax.experimental.pallas import tpu as pltpu

_EPS = 1e-5


def _round_up(x, m):
    return (x + m - 1) // m * m


def _pick_cp_tile(cout):
    """Pad Cout to a multiple of 16 and pick a row tile giving 2-3 grid steps
    on the wider layers (megacore) while keeping bf16 sublane packing clean."""
    cp = _round_up(cout, 16)
    tile = cp
    if cp >= 32:
        for div in (2, 3, 4):
            if cp % div == 0 and (cp // div) % 16 == 0:
                tile = cp // div
                break
    return cp, tile


# ---------------------------------------------------------------------------
# Pallas kernels: conv matmul with fused epilogues.
# ---------------------------------------------------------------------------
def _conv_norm_kernel(w_ref, p_ref, bias_ref, g_ref, b_ref, o_ref, *, eps, n_seg):
    """O = norm(W @ P + bias) * gamma + beta, then ReLU.  Stats per row
    (n_seg=1) or per row-segment (InstanceNorm with batch N=n_seg>1)."""
    acc = jnp.dot(w_ref[...], p_ref[...], preferred_element_type=jnp.float32)
    acc = acc + bias_ref[...]
    g = g_ref[...]
    b = b_ref[...]
    m_total = acc.shape[1]
    seg_len = m_total // n_seg
    inv = 1.0 / float(seg_len)
    if n_seg == 1:
        m1 = jnp.sum(acc, axis=1, keepdims=True) * inv
        m2 = jnp.sum(acc * acc, axis=1, keepdims=True) * inv
        var = jnp.maximum(m2 - m1 * m1, 0.0)
        y = (acc - m1) * jax.lax.rsqrt(var + eps) * g + b
        o_ref[...] = jnp.maximum(y, 0.0).astype(o_ref.dtype)
    else:
        # Per-sample segments (InstanceNorm with N > 1); static unrolled loop.
        for s in range(n_seg):
            seg = acc[:, s * seg_len:(s + 1) * seg_len]
            m1 = jnp.sum(seg, axis=1, keepdims=True) * inv
            m2 = jnp.sum(seg * seg, axis=1, keepdims=True) * inv
            var = jnp.maximum(m2 - m1 * m1, 0.0)
            y = (seg - m1) * jax.lax.rsqrt(var + eps) * g + b
            o_ref[:, s * seg_len:(s + 1) * seg_len] = jnp.maximum(y, 0.0).astype(o_ref.dtype)


def _conv_bias_kernel(w_ref, p_ref, bias_ref, o_ref):
    acc = jnp.dot(w_ref[...], p_ref[...], preferred_element_type=jnp.float32)
    o_ref[...] = (acc + bias_ref[...]).astype(o_ref.dtype)


def _conv_tanh_res_kernel(w_ref, p_ref, res_ref, o_ref):
    acc = jnp.dot(w_ref[...], p_ref[...], preferred_element_type=jnp.float32)
    o_ref[...] = jnp.tanh(acc) + res_ref[...]


def _conv_mm(w2d, patT, *, bias=None, gamma=None, beta=None, n_seg=1,
             tanh_residual=None, eps=_EPS):
    """O = W[Cout,K] @ patches^T[K,M] with a fused epilogue:
       - gamma/beta given  -> norm (+ReLU), bf16 out
       - tanh_residual     -> tanh(O) + residual, f32 out
       - otherwise         -> bias add only, bf16 out."""
    Cout, K = w2d.shape
    K2, M = patT.shape
    assert K == K2
    Kp = _round_up(K, 128)
    Cp, tile_c = _pick_cp_tile(Cout)

    a = w2d.astype(jnp.float32)
    if Cp > Cout or Kp > K:
        a = jnp.pad(a, ((0, Cp - Cout), (0, Kp - K)))
    a = a.astype(jnp.bfloat16)

    pmat = patT if patT.dtype == jnp.bfloat16 else patT.astype(jnp.bfloat16)
    if Kp > K:
        pmat = jnp.pad(pmat, ((0, Kp - K), (0, 0)))

    if bias is None:
        bias = jnp.zeros((Cout,), jnp.float32)
    bias_col = jnp.pad(bias.astype(jnp.float32), (0, Cp - Cout)).reshape(Cp, 1)

    w_spec = pl.BlockSpec((tile_c, Kp), lambda i: (i, 0))
    p_spec = pl.BlockSpec((Kp, M), lambda i: (0, 0))       # resident across row tiles
    col_spec = pl.BlockSpec((tile_c, 1), lambda i: (i, 0))
    out_spec = pl.BlockSpec((tile_c, M), lambda i: (i, 0))

    if gamma is not None:
        g_col = jnp.pad(gamma.astype(jnp.float32), (0, Cp - Cout)).reshape(Cp, 1)
        be_col = jnp.pad(beta.astype(jnp.float32), (0, Cp - Cout)).reshape(Cp, 1)
        kernel = functools.partial(_conv_norm_kernel, eps=eps, n_seg=n_seg)
        in_specs = [w_spec, p_spec, col_spec, col_spec, col_spec]
        args = (a, pmat, bias_col, g_col, be_col)
        out_dtype = jnp.bfloat16
    elif tanh_residual is not None:
        r = tanh_residual.astype(jnp.float32)
        if Cp > Cout:
            r = jnp.pad(r, ((0, Cp - Cout), (0, 0)))
        kernel = _conv_tanh_res_kernel
        res_spec = pl.BlockSpec((tile_c, M), lambda i: (i, 0))
        in_specs = [w_spec, p_spec, res_spec]
        args = (a, pmat, r)
        out_dtype = jnp.float32
    else:
        kernel = _conv_bias_kernel
        in_specs = [w_spec, p_spec, col_spec]
        args = (a, pmat, bias_col)
        out_dtype = jnp.bfloat16

    out = pl.pallas_call(
        kernel,
        out_shape=jax.ShapeDtypeStruct((Cp, M), out_dtype),
        grid_spec=pltpu.PrefetchScalarGridSpec(
            num_scalar_prefetch=0,
            grid=(Cp // tile_c,),
            in_specs=in_specs,
            out_specs=out_spec),
        compiler_params=pltpu.CompilerParams(
            dimension_semantics=("parallel",)),
    )(*args)
    return out[:Cout] if Cp > Cout else out


# ---------------------------------------------------------------------------
# Conv3d wrapper (im2col via one fused XLA op, matmul + epilogue in Pallas).
# ---------------------------------------------------------------------------
def conv3d_block(x, w, *, bias=None, stride=(1, 1, 1), padding=(0, 0, 0),
                 lhs_dilation=(1, 1, 1), norm=None, gamma=None, beta=None,
                 tanh_residual=None):
    # x: [N, Cin, D, H, W]   w: [Cout, Cin, kd, kh, kw]
    N = x.shape[0]
    Cout, _, kd, kh, kw = w.shape
    x_b = x if x.dtype == jnp.bfloat16 else x.astype(jnp.bfloat16)
    patches = lax.conv_general_dilated_patches(
        x_b, (kd, kh, kw), tuple(stride),
        [(padding[0], padding[0]), (padding[1], padding[1]),
         (padding[2], padding[2])],
        lhs_dilation=tuple(lhs_dilation),
        dimension_numbers=("NCDHW", "OIDHW", "NCDHW"))
    # patches: [N, Cin*kd*kh*kw, Do, Ho, Wo]  (feature order = (Cin, kd, kh, kw))
    _, K, Do, Ho, Wo = patches.shape
    M = N * Do * Ho * Wo
    if N == 1:
        patT = patches.reshape(K, M)
    else:
        patT = patches.transpose(1, 0, 2, 3, 4).reshape(K, M)
    w2d = w.reshape(Cout, K)

    res2d = None
    if tanh_residual is not None:
        r = tanh_residual.astype(jnp.float32)
        res2d = r.reshape(Cout, M) if N == 1 else r.transpose(1, 0, 2, 3, 4).reshape(Cout, M)

    n_seg = N if norm == 'instance' else 1
    out2d = _conv_mm(w2d, patT, bias=bias,
                     gamma=gamma if norm else None,
                     beta=beta if norm else None,
                     n_seg=n_seg, tanh_residual=res2d)
    if N == 1:
        return out2d.reshape(1, Cout, Do, Ho, Wo)
    return out2d.reshape(Cout, N, Do, Ho, Wo).transpose(1, 0, 2, 3, 4)


# ---------------------------------------------------------------------------
# ConvTranspose3d + InstanceNorm3d + ReLU, fused, via stride-phase
# (sub-pixel) weight decomposition: no zero taps.
# ---------------------------------------------------------------------------
def _phase_params(k, s, p, din):
    dout = (din - 1) * s - 2 * p + k
    n = k // s
    q = dout // s
    phases = []
    for r in range(s):
        t0 = (r + p) % s
        base = (r + p) // s
        off = base - n + 1
        taps = [t0 + (n - 1 - m) * s for m in range(n)]
        phases.append((taps, off))
    return dout, n, q, phases


def _convT_norm_kernel(w_ref, p_ref, g_ref, b_ref, o_ref, acc_ref, s1_ref, s2_ref, *, eps):
    r = pl.program_id(0)
    part = jnp.dot(w_ref[0], p_ref[0], preferred_element_type=jnp.float32)  # [Cp, Mph]
    acc_ref[r] = part

    @pl.when(r == 0)
    def _():
        s1_ref[...] = jnp.zeros_like(s1_ref)
        s2_ref[...] = jnp.zeros_like(s2_ref)

    s1_ref[...] += jnp.sum(part, axis=1, keepdims=True)
    s2_ref[...] += jnp.sum(part * part, axis=1, keepdims=True)

    n_phase, _, m_ph = acc_ref.shape

    @pl.when(r == n_phase - 1)
    def _():
        inv = 1.0 / float(n_phase * m_ph)
        mean = s1_ref[...] * inv                                   # [Cp, 1]
        var = jnp.maximum(s2_ref[...] * inv - mean * mean, 0.0)
        scale = jax.lax.rsqrt(var + eps) * g_ref[...]
        shift = b_ref[...] - mean * scale
        y = acc_ref[...] * scale + shift                           # [nph, Cp, Mph]
        o_ref[...] = jnp.maximum(y, 0.0).astype(o_ref.dtype)


def conv_transpose3d_norm_relu(x, w, gamma, beta, *, stride, padding, eps=_EPS):
    # x: [N, Cin, D, H, W]   w: [Cin, Cout, kd, kh, kw] (PyTorch layout), bias=False
    N, Cin, Din, Hin, Win = x.shape
    Cout = w.shape[1]
    kd, kh, kw = w.shape[2:]
    sd, sh, sw = stride
    pd, ph, pw = padding

    dD = (Din - 1) * sd - 2 * pd + kd
    dH = (Hin - 1) * sh - 2 * ph + kh
    dW = (Win - 1) * sw - 2 * pw + kw
    decomposable = (N == 1 and kd % sd == 0 and kh % sh == 0 and kw % sw == 0
                    and dD % sd == 0 and dH % sh == 0 and dW % sw == 0)
    if not decomposable:
        # TODO(synk): batched / non-uniform cases fall back to the
        # dilate-and-conv equivalence (wastes prod(stride)x zero taps).
        w_conv = jnp.flip(w, axis=(2, 3, 4)).transpose(1, 0, 2, 3, 4)
        return conv3d_block(x, w_conv, stride=(1, 1, 1),
                            padding=(kd - 1 - pd, kh - 1 - ph, kw - 1 - pw),
                            lhs_dilation=tuple(stride),
                            norm='instance', gamma=gamma, beta=beta)

    _, nD, qD, phD = _phase_params(kd, sd, pd, Din)
    _, nH, qH, phH = _phase_params(kh, sh, ph, Hin)
    _, nW, qW, phW = _phase_params(kw, sw, pw, Win)

    def _common_pad(phs, q, n, din):
        lo = max(max(0, -off) for _, off in phs)
        hi = max(max(0, off + q + n - 2 - (din - 1)) for _, off in phs)
        return lo, hi

    PLd, PRd = _common_pad(phD, qD, nD, Din)
    PLh, PRh = _common_pad(phH, qH, nH, Hin)
    PLw, PRw = _common_pad(phW, qW, nW, Win)

    x_b = x if x.dtype == jnp.bfloat16 else x.astype(jnp.bfloat16)
    if PLd or PRd or PLh or PRh or PLw or PRw:
        x_b = jnp.pad(x_b, ((0, 0), (0, 0), (PLd, PRd), (PLh, PRh), (PLw, PRw)))

    K = Cin * nD * nH * nW
    Mph = qD * qH * qW
    pat_list, w_list = [], []
    for taps_d, off_d in phD:
        for taps_h, off_h in phH:
            for taps_w, off_w in phW:
                d0 = off_d + PLd
                h0 = off_h + PLh
                w0 = off_w + PLw
                xs = x_b[:, :, d0:d0 + qD + nD - 1,
                               h0:h0 + qH + nH - 1,
                               w0:w0 + qW + nW - 1]
                pr = lax.conv_general_dilated_patches(
                    xs, (nD, nH, nW), (1, 1, 1), [(0, 0)] * 3,
                    dimension_numbers=("NCDHW", "OIDHW", "NCDHW"))
                pat_list.append(pr.reshape(K, Mph))
                ws = jnp.take(w, jnp.asarray(taps_d), axis=2)
                ws = jnp.take(ws, jnp.asarray(taps_h), axis=3)
                ws = jnp.take(ws, jnp.asarray(taps_w), axis=4)
                # [Cin, Cout, nd, nh, nw] -> [Cout, Cin*nd*nh*nw]
                w_list.append(ws.transpose(1, 0, 2, 3, 4).reshape(Cout, K))

    n_phase = len(pat_list)
    Kp = _round_up(K, 128)
    Cp = _round_up(Cout, 16)

    pat_all = jnp.stack(pat_list)                             # [nph, K, Mph] bf16
    if Kp > K:
        pat_all = jnp.pad(pat_all, ((0, 0), (0, Kp - K), (0, 0)))
    w_all = jnp.stack(w_list).astype(jnp.float32)             # [nph, Cout, K]
    if Cp > Cout or Kp > K:
        w_all = jnp.pad(w_all, ((0, 0), (0, Cp - Cout), (0, Kp - K)))
    w_all = w_all.astype(jnp.bfloat16)
    g_col = jnp.pad(gamma.astype(jnp.float32), (0, Cp - Cout)).reshape(Cp, 1)
    b_col = jnp.pad(beta.astype(jnp.float32), (0, Cp - Cout)).reshape(Cp, 1)

    out = pl.pallas_call(
        functools.partial(_convT_norm_kernel, eps=eps),
        out_shape=jax.ShapeDtypeStruct((n_phase, Cp, Mph), jnp.bfloat16),
        grid_spec=pltpu.PrefetchScalarGridSpec(
            num_scalar_prefetch=0,
            grid=(n_phase,),
            in_specs=[pl.BlockSpec((1, Cp, Kp), lambda r: (r, 0, 0)),
                      pl.BlockSpec((1, Kp, Mph), lambda r: (r, 0, 0)),
                      pl.BlockSpec((Cp, 1), lambda r: (0, 0)),
                      pl.BlockSpec((Cp, 1), lambda r: (0, 0))],
            out_specs=pl.BlockSpec((n_phase, Cp, Mph), lambda r: (0, 0, 0)),
            scratch_shapes=[pltpu.VMEM((n_phase, Cp, Mph), jnp.float32),
                            pltpu.VMEM((Cp, 1), jnp.float32),
                            pltpu.VMEM((Cp, 1), jnp.float32)]),
        compiler_params=pltpu.CompilerParams(
            dimension_semantics=("arbitrary",)),
    )(w_all, pat_all, g_col, b_col)

    # Interleave phases back into spatial order (tiny bf16 tensor, one XLA op).
    o = out[:, :Cout, :] if Cp > Cout else out                # [nph, C, Mph]
    o = o.reshape(sd, sh, sw, Cout, qD, qH, qW)
    o = o.transpose(3, 4, 0, 5, 1, 6, 2).reshape(Cout, dD, dH, dW)
    return o[None]


# ---------------------------------------------------------------------------
# STVEN_Generator
# ---------------------------------------------------------------------------
def init_params(key, conv_dim=8, c_dim=4, repeat_num=2):
    keys = iter(jax.random.split(key, 64))

    def w(shape, scale=0.05):
        return scale * jax.random.normal(next(keys), shape, jnp.float32)

    p = {}
    n_in = 3 + c_dim
    p['down0_w'] = w((conv_dim, n_in, 3, 7, 7))
    p['down0_g'] = jnp.ones((conv_dim,), jnp.float32)
    p['down0_b'] = jnp.zeros((conv_dim,), jnp.float32)
    cd = conv_dim
    p['down1_w'] = w((cd * 2, cd, 3, 4, 4))
    p['down1_g'] = jnp.ones((cd * 2,), jnp.float32)
    p['down1_b'] = jnp.zeros((cd * 2,), jnp.float32)
    cd *= 2
    p['down2_w'] = w((cd * 4, cd, 4, 4, 4))
    p['down2_g'] = jnp.ones((cd * 4,), jnp.float32)
    p['down2_b'] = jnp.zeros((cd * 4,), jnp.float32)
    cd *= 4
    stcs = []
    for _ in range(repeat_num):
        inter = int(math.floor(3 * 3 * 3 * cd * cd / (3 * 3 * cd + 3 * cd)))
        stcs.append(dict(
            spatial_w=w((inter, cd, 1, 3, 3)),
            spatial_b=w((inter,), 0.01),
            bn_g=jnp.ones((inter,), jnp.float32),
            bn_b=jnp.zeros((inter,), jnp.float32),
            temporal_w=w((cd, inter, 3, 1, 1)),
            temporal_b=w((cd,), 0.01)))
    p['stc'] = stcs
    p['up0_w'] = w((cd, cd // 4, 4, 4, 4))
    p['up0_g'] = jnp.ones((cd // 4,), jnp.float32)
    p['up0_b'] = jnp.zeros((cd // 4,), jnp.float32)
    cd //= 4
    p['up1_w'] = w((cd, cd // 2, 1, 4, 4))
    p['up1_g'] = jnp.ones((cd // 2,), jnp.float32)
    p['up1_b'] = jnp.zeros((cd // 2,), jnp.float32)
    cd //= 2
    p['out_w'] = w((3, cd, 1, 7, 7))
    return p


def stven_forward(params, x, c):
    # x: [N, 3, D, H, W], c: [N, c_dim]
    N, _, D, H, W = x.shape
    c_exp = jnp.broadcast_to(c.reshape(N, c.shape[1], 1, 1, 1),
                             (N, c.shape[1], D, H, W))
    y = jnp.concatenate([x, c_exp], axis=1)

    # down3Dmain: conv + InstanceNorm + ReLU (fused epilogue)
    y = conv3d_block(y, params['down0_w'], stride=(1, 1, 1), padding=(1, 3, 3),
                     norm='instance', gamma=params['down0_g'], beta=params['down0_b'])
    y = conv3d_block(y, params['down1_w'], stride=(1, 2, 2), padding=(1, 1, 1),
                     norm='instance', gamma=params['down1_g'], beta=params['down1_b'])
    y = conv3d_block(y, params['down2_w'], stride=(2, 2, 2), padding=(1, 1, 1),
                     norm='instance', gamma=params['down2_g'], beta=params['down2_b'])

    # SpatioTemporalConv blocks: spatial conv + BN + ReLU (fused), temporal conv (bias only)
    for stc in params['stc']:
        y = conv3d_block(y, stc['spatial_w'], bias=stc['spatial_b'],
                         stride=(1, 1, 1), padding=(0, 1, 1),
                         norm='batch', gamma=stc['bn_g'], beta=stc['bn_b'])
        y = conv3d_block(y, stc['temporal_w'], bias=stc['temporal_b'],
                         stride=(1, 1, 1), padding=(1, 0, 0))

    # layers2 / layers3: ConvTranspose3d + InstanceNorm + ReLU (stride-phase, fused)
    y = conv_transpose3d_norm_relu(y, params['up0_w'], params['up0_g'], params['up0_b'],
                                   stride=(2, 2, 2), padding=(1, 1, 1))
    y = conv_transpose3d_norm_relu(y, params['up1_w'], params['up1_g'], params['up1_b'],
                                   stride=(1, 2, 2), padding=(0, 1, 1))

    # layers4 + residual: tanh(conv(y)) + x fused into the matmul epilogue
    out = conv3d_block(y, params['out_w'], stride=(1, 1, 1), padding=(0, 3, 3),
                       tanh_residual=x.astype(jnp.float32))
    return out


if __name__ == "__main__":
    key = jax.random.PRNGKey(0)
    kp, kx, kc = jax.random.split(key, 3)
    conv_dim, c_dim, repeat_num = 8, 4, 2
    params = init_params(kp, conv_dim, c_dim, repeat_num)

    x = jax.random.normal(kx, (1, 3, 4, 16, 16), jnp.float32)
    c = jax.random.normal(kc, (1, c_dim), jnp.float32)

    fwd = jax.jit(stven_forward)
    out = fwd(params, x, c)
    jax.block_until_ready(out)
    assert out.shape == x.shape and out.dtype == jnp.float32
    assert bool(jnp.all(jnp.isfinite(out)))
    print("KERNEL_OK")
</pallas_src>

<mosaic_0001>
module attributes {stable_mosaic.version = 11 : i64} {
  func.func @_conv_norm_kernel(%arg0: i32, %arg1: memref<16x1152xbf16, #tpu.memory_space<vmem>>, %arg2: memref<1152x1024xbf16, #tpu.memory_space<vmem>>, %arg3: memref<16x1xf32, #tpu.memory_space<vmem>>, %arg4: memref<16x1xf32, #tpu.memory_space<vmem>>, %arg5: memref<16x1xf32, #tpu.memory_space<vmem>>, %arg6: memref<16x1024xbf16, #tpu.memory_space<vmem>>) attributes {dimension_semantics = [#tpu.dimension_semantics<parallel>], iteration_bounds = array<i64: 1>, scalar_prefetch = 0 : i64, scratch_operands = 0 : i64, tpu.core_type = #tpu.core_type<tc>, window_params = [{transform_indices = @transform_0, window_bounds = array<i64: 16, 1152>}, {pipeline_mode = #tpu.pipeline_mode<synchronous>, transform_indices = @transform_1, window_bounds = array<i64: 1152, 1024>}, {transform_indices = @transform_2, window_bounds = array<i64: 16, 1>}, {transform_indices = @transform_3, window_bounds = array<i64: 16, 1>}, {transform_indices = @transform_4, window_bounds = array<i64: 16, 1>}, {transform_indices = @transform_5, window_bounds = array<i64: 16, 1024>}]} {
    %c0 = arith.constant 0 : index
    %c0_0 = arith.constant 0 : index
    %0 = vector.load %arg1[%c0, %c0_0] : memref<16x1152xbf16, #tpu.memory_space<vmem>>, vector<16x1152xbf16>
    %c0_1 = arith.constant 0 : index
    %c0_2 = arith.constant 0 : index
    %1 = vector.load %arg2[%c0_1, %c0_2] : memref<1152x1024xbf16, #tpu.memory_space<vmem>>, vector<1152x1024xbf16>
    %cst = arith.constant dense<0.000000e+00> : vector<16x1024xf32>
    %2 = tpu.matmul %0, %1, %cst {dimension_numbers = #tpu.dot_dimension_numbers<[1], [0], [0], [1], [0, 0, 1, 1], [], []>} : vector<16x1152xbf16>, vector<1152x1024xbf16>, vector<16x1024xf32> -> vector<16x1024xf32>
    %c0_3 = arith.constant 0 : index
    %c0_4 = arith.constant 0 : index
    %3 = vector.load %arg3[%c0_3, %c0_4] : memref<16x1xf32, #tpu.memory_space<vmem>>, vector<16x1xf32>
    %4 = vector.broadcast %3 : vector<16x1xf32> to vector<16x1024xf32>
    %5 = arith.addf %2, %4 : vector<16x1024xf32>
    %c0_5 = arith.constant 0 : index
    %c0_6 = arith.constant 0 : index
    %6 = vector.load %arg4[%c0_5, %c0_6] : memref<16x1xf32, #tpu.memory_space<vmem>>, vector<16x1xf32>
    %c0_7 = arith.constant 0 : index
    %c0_8 = arith.constant 0 : index
    %7 = vector.load %arg5[%c0_7, %c0_8] : memref<16x1xf32, #tpu.memory_space<vmem>>, vector<16x1xf32>
    %cst_9 = arith.constant dense<0.000000e+00> : vector<16xf32>
    %8 = vector.multi_reduction <add>, %5, %cst_9 [1] : vector<16x1024xf32> to vector<16xf32>
    %9 = vector.shape_cast %8 : vector<16xf32> to vector<16x1xf32>
    %cst_10 = arith.constant 9.765625E-4 : f32
    %10 = vector.broadcast %cst_10 : f32 to vector<16x1xf32>
    %11 = arith.mulf %9, %10 : vector<16x1xf32>
    %12 = arith.mulf %5, %5 : vector<16x1024xf32>
    %cst_11 = arith.constant dense<0.000000e+00> : vector<16xf32>
    %13 = vector.multi_reduction <add>, %12, %cst_11 [1] : vector<16x1024xf32> to vector<16xf32>
    %14 = vector.shape_cast %13 : vector<16xf32> to vector<16x1xf32>
    %cst_12 = arith.constant 9.765625E-4 : f32
    %15 = vector.broadcast %cst_12 : f32 to vector<16x1xf32>
    %16 = arith.mulf %14, %15 : vector<16x1xf32>
    %17 = arith.mulf %11, %11 : vector<16x1xf32>
    %18 = arith.subf %16, %17 : vector<16x1xf32>
    %cst_13 = arith.constant 0.000000e+00 : f32
    %19 = vector.broadcast %cst_13 : f32 to vector<16x1xf32>
    %20 = arith.maximumf %18, %19 : vector<16x1xf32>
    %21 = vector.broadcast %11 : vector<16x1xf32> to vector<16x1024xf32>
    %22 = arith.subf %5, %21 : vector<16x1024xf32>
    %cst_14 = arith.constant 9.99999974E-6 : f32
    %23 = vector.broadcast %cst_14 : f32 to vector<16x1xf32>
    %24 = arith.addf %20, %23 : vector<16x1xf32>
    %25 = math.rsqrt %24 : vector<16x1xf32>
    %26 = vector.broadcast %25 : vector<16x1xf32> to vector<16x1024xf32>
    %27 = arith.mulf %22, %26 : vector<16x1024xf32>
    %28 = vector.broadcast %6 : vector<16x1xf32> to vector<16x1024xf32>
    %29 = arith.mulf %27, %28 : vector<16x1024xf32>
    %30 = vector.broadcast %7 : vector<16x1xf32> to vector<16x1024xf32>
    %31 = arith.addf %29, %30 : vector<16x1024xf32>
    %cst_15 = arith.constant 0.000000e+00 : f32
    %32 = vector.broadcast %cst_15 : f32 to vector<16x1024xf32>
    %33 = arith.maximumf %31, %32 : vector<16x1024xf32>
    %34 = arith.truncf %33 : vector<16x1024xf32> to vector<16x1024xbf16>
    %c0_16 = arith.constant 0 : index
    %c0_17 = arith.constant 0 : index
    %35 = vector.load %arg6[%c0_16, %c0_17] : memref<16x1024xbf16, #tpu.memory_space<vmem>>, vector<16x1024xbf16>
    tpu.vector_store %arg6[%c0_16, %c0_17], %34 {strides = array<i32>} : memref<16x1024xbf16, #tpu.memory_space<vmem>>, vector<16x1024xbf16>,
    return
  }
  func.func @transform_0(%arg0: i32) -> (i32, i32) {
    %c0_i32 = arith.constant 0 : i32
    %c0_i32_0 = arith.constant 0 : i32
    return %arg0, %c0_i32 : i32, i32
  }
  func.func @transform_1(%arg0: i32) -> (i32, i32) {
    %c0_i32 = arith.constant 0 : i32
    %c0_i32_0 = arith.constant 0 : i32
    %c0_i32_1 = arith.constant 0 : i32
    return %c0_i32, %c0_i32_0 : i32, i32
  }
  func.func @transform_2(%arg0: i32) -> (i32, i32) {
    %c0_i32 = arith.constant 0 : i32
    %c0_i32_0 = arith.constant 0 : i32
    return %arg0, %c0_i32 : i32, i32
  }
  func.func @transform_3(%arg0: i32) -> (i32, i32) {
    %c0_i32 = arith.constant 0 : i32
    %c0_i32_0 = arith.constant 0 : i32
    return %arg0, %c0_i32 : i32, i32
  }
  func.func @transform_4(%arg0: i32) -> (i32, i32) {
    %c0_i32 = arith.constant 0 : i32
    %c0_i32_0 = arith.constant 0 : i32
    return %arg0, %c0_i32 : i32, i32
  }
  func.func @transform_5(%arg0: i32) -> (i32, i32) {
    %c0_i32 = arith.constant 0 : i32
    %c0_i32_0 = arith.constant 0 : i32
    return %arg0, %c0_i32 : i32, i32
  }
}

module attributes {stable_mosaic.version = 11 : i64} {
  func.func @_conv_norm_kernel(%arg0: i32, %arg1: memref<16x384xbf16, #tpu.memory_space<vmem>>, %arg2: memref<384x256xbf16, #tpu.memory_space<vmem>>, %arg3: memref<16x1xf32, #tpu.memory_space<vmem>>, %arg4: memref<16x1xf32, #tpu.memory_space<vmem>>, %arg5: memref<16x1xf32, #tpu.memory_space<vmem>>, %arg6: memref<16x256xbf16, #tpu.memory_space<vmem>>) attributes {dimension_semantics = [#tpu.dimension_semantics<parallel>], iteration_bounds = array<i64: 1>, scalar_prefetch = 0 : i64, scratch_operands = 0 : i64, tpu.core_type = #tpu.core_type<tc>, window_params = [{transform_indices = @transform_0, window_bounds = array<i64: 16, 384>}, {pipeline_mode = #tpu.pipeline_mode<synchronous>, transform_indices = @transform_1, window_bounds = array<i64: 384, 256>}, {transform_indices = @transform_2, window_bounds = array<i64: 16, 1>}, {transform_indices = @transform_3, window_bounds = array<i64: 16, 1>}, {transform_indices = @transform_4, window_bounds = array<i64: 16, 1>}, {transform_indices = @transform_5, window_bounds = array<i64: 16, 256>}]} {
    %c0 = arith.constant 0 : index
    %c0_0 = arith.constant 0 : index
    %0 = vector.load %arg1[%c0, %c0_0] : memref<16x384xbf16, #tpu.memory_space<vmem>>, vector<16x384xbf16>
    %c0_1 = arith.constant 0 : index
    %c0_2 = arith.constant 0 : index
    %1 = vector.load %arg2[%c0_1, %c0_2] : memref<384x256xbf16, #tpu.memory_space<vmem>>, vector<384x256xbf16>
    %cst = arith.constant dense<0.000000e+00> : vector<16x256xf32>
    %2 = tpu.matmul %0, %1, %cst {dimension_numbers = #tpu.dot_dimension_numbers<[1], [0], [0], [1], [0, 0, 1, 1], [], []>} : vector<16x384xbf16>, vector<384x256xbf16>, vector<16x256xf32> -> vector<16x256xf32>
    %c0_3 = arith.constant 0 : index
    %c0_4 = arith.constant 0 : index
    %3 = vector.load %arg3[%c0_3, %c0_4] : memref<16x1xf32, #tpu.memory_space<vmem>>, vector<16x1xf32>
    %4 = vector.broadcast %3 : vector<16x1xf32> to vector<16x256xf32>
    %5 = arith.addf %2, %4 : vector<16x256xf32>
    %c0_5 = arith.constant 0 : index
    %c0_6 = arith.constant 0 : index
    %6 = vector.load %arg4[%c0_5, %c0_6] : memref<16x1xf32, #tpu.memory_space<vmem>>, vector<16x1xf32>
    %c0_7 = arith.constant 0 : index
    %c0_8 = arith.constant 0 : index
    %7 = vector.load %arg5[%c0_7, %c0_8] : memref<16x1xf32, #tpu.memory_space<vmem>>, vector<16x1xf32>
    %cst_9 = arith.constant dense<0.000000e+00> : vector<16xf32>
    %8 = vector.multi_reduction <add>, %5, %cst_9 [1] : vector<16x256xf32> to vector<16xf32>
    %9 = vector.shape_cast %8 : vector<16xf32> to vector<16x1xf32>
    %cst_10 = arith.constant 3.906250e-03 : f32
    %10 = vector.broadcast %cst_10 : f32 to vector<16x1xf32>
    %11 = arith.mulf %9, %10 : vector<16x1xf32>
    %12 = arith.mulf %5, %5 : vector<16x256xf32>
    %cst_11 = arith.constant dense<0.000000e+00> : vector<16xf32>
    %13 = vector.multi_reduction <add>, %12, %cst_11 [1] : vector<16x256xf32> to vector<16xf32>
    %14 = vector.shape_cast %13 : vector<16xf32> to vector<16x1xf32>
    %cst_12 = arith.constant 3.906250e-03 : f32
    %15 = vector.broadcast %cst_12 : f32 to vector<16x1xf32>
    %16 = arith.mulf %14, %15 : vector<16x1xf32>
    %17 = arith.mulf %11, %11 : vector<16x1xf32>
    %18 = arith.subf %16, %17 : vector<16x1xf32>
    %cst_13 = arith.constant 0.000000e+00 : f32
    %19 = vector.broadcast %cst_13 : f32 to vector<16x1xf32>
    %20 = arith.maximumf %18, %19 : vector<16x1xf32>
    %21 = vector.broadcast %11 : vector<16x1xf32> to vector<16x256xf32>
    %22 = arith.subf %5, %21 : vector<16x256xf32>
    %cst_14 = arith.constant 9.99999974E-6 : f32
    %23 = vector.broadcast %cst_14 : f32 to vector<16x1xf32>
    %24 = arith.addf %20, %23 : vector<16x1xf32>
    %25 = math.rsqrt %24 : vector<16x1xf32>
    %26 = vector.broadcast %25 : vector<16x1xf32> to vector<16x256xf32>
    %27 = arith.mulf %22, %26 : vector<16x256xf32>
    %28 = vector.broadcast %6 : vector<16x1xf32> to vector<16x256xf32>
    %29 = arith.mulf %27, %28 : vector<16x256xf32>
    %30 = vector.broadcast %7 : vector<16x1xf32> to vector<16x256xf32>
    %31 = arith.addf %29, %30 : vector<16x256xf32>
    %cst_15 = arith.constant 0.000000e+00 : f32
    %32 = vector.broadcast %cst_15 : f32 to vector<16x256xf32>
    %33 = arith.maximumf %31, %32 : vector<16x256xf32>
    %34 = arith.truncf %33 : vector<16x256xf32> to vector<16x256xbf16>
    %c0_16 = arith.constant 0 : index
    %c0_17 = arith.constant 0 : index
    %35 = vector.load %arg6[%c0_16, %c0_17] : memref<16x256xbf16, #tpu.memory_space<vmem>>, vector<16x256xbf16>
    tpu.vector_store %arg6[%c0_16, %c0_17], %34 {strides = array<i32>} : memref<16x256xbf16, #tpu.memory_space<vmem>>, vector<16x256xbf16>,
    return
  }
  func.func @transform_0(%arg0: i32) -> (i32, i32) {
    %c0_i32 = arith.constant 0 : i32
    %c0_i32_0 = arith.constant 0 : i32
    return %arg0, %c0_i32 : i32, i32
  }
  func.func @transform_1(%arg0: i32) -> (i32, i32) {
    %c0_i32 = arith.constant 0 : i32
    %c0_i32_0 = arith.constant 0 : i32
    %c0_i32_1 = arith.constant 0 : i32
    return %c0_i32, %c0_i32_0 : i32, i32
  }
  func.func @transform_2(%arg0: i32) -> (i32, i32) {
    %c0_i32 = arith.constant 0 : i32
    %c0_i32_0 = arith.constant 0 : i32
    return %arg0, %c0_i32 : i32, i32
  }
  func.func @transform_3(%arg0: i32) -> (i32, i32) {
    %c0_i32 = arith.constant 0 : i32
    %c0_i32_0 = arith.constant 0 : i32
    return %arg0, %c0_i32 : i32, i32
  }
  func.func @transform_4(%arg0: i32) -> (i32, i32) {
    %c0_i32 = arith.constant 0 : i32
    %c0_i32_0 = arith.constant 0 : i32
    return %arg0, %c0_i32 : i32, i32
  }
  func.func @transform_5(%arg0: i32) -> (i32, i32) {
    %c0_i32 = arith.constant 0 : i32
    %c0_i32_0 = arith.constant 0 : i32
    return %arg0, %c0_i32 : i32, i32
  }
}

module attributes {stable_mosaic.version = 11 : i64} {
  func.func @_conv_norm_kernel(%arg0: i32, %arg1: memref<32x1024xbf16, #tpu.memory_space<vmem>>, %arg2: memref<1024x32xbf16, #tpu.memory_space<vmem>>, %arg3: memref<32x1xf32, #tpu.memory_space<vmem>>, %arg4: memref<32x1xf32, #tpu.memory_space<vmem>>, %arg5: memref<32x1xf32, #tpu.memory_space<vmem>>, %arg6: memref<32x32xbf16, #tpu.memory_space<vmem>>) attributes {dimension_semantics = [#tpu.dimension_semantics<parallel>], iteration_bounds = array<i64: 2>, scalar_prefetch = 0 : i64, scratch_operands = 0 : i64, tpu.core_type = #tpu.core_type<tc>, window_params = [{transform_indices = @transform_0, window_bounds = array<i64: 32, 1024>}, {pipeline_mode = #tpu.pipeline_mode<synchronous>, transform_indices = @transform_1, window_bounds = array<i64: 1024, 32>}, {transform_indices = @transform_2, window_bounds = array<i64: 32, 1>}, {transform_indices = @transform_3, window_bounds = array<i64: 32, 1>}, {transform_indices = @transform_4, window_bounds = array<i64: 32, 1>}, {transform_indices = @transform_5, window_bounds = array<i64: 32, 32>}]} {
    %c0 = arith.constant 0 : index
    %c0_0 = arith.constant 0 : index
    %0 = vector.load %arg1[%c0, %c0_0] : memref<32x1024xbf16, #tpu.memory_space<vmem>>, vector<32x1024xbf16>
    %c0_1 = arith.constant 0 : index
    %c0_2 = arith.constant 0 : index
    %1 = vector.load %arg2[%c0_1, %c0_2] : memref<1024x32xbf16, #tpu.memory_space<vmem>>, vector<1024x32xbf16>
    %cst = arith.constant dense<0.000000e+00> : vector<32x32xf32>
    %2 = tpu.matmul %0, %1, %cst {dimension_numbers = #tpu.dot_dimension_numbers<[1], [0], [0], [1], [0, 0, 1, 1], [], []>} : vector<32x1024xbf16>, vector<1024x32xbf16>, vector<32x32xf32> -> vector<32x32xf32>
    %c0_3 = arith.constant 0 : index
    %c0_4 = arith.constant 0 : index
    %3 = vector.load %arg3[%c0_3, %c0_4] : memref<32x1xf32, #tpu.memory_space<vmem>>, vector<32x1xf32>
    %4 = vector.broadcast %3 : vector<32x1xf32> to vector<32x32xf32>
    %5 = arith.addf %2, %4 : vector<32x32xf32>
    %c0_5 = arith.constant 0 : index
    %c0_6 = arith.constant 0 : index
    %6 = vector.load %arg4[%c0_5, %c0_6] : memref<32x1xf32, #tpu.memory_space<vmem>>, vector<32x1xf32>
    %c0_7 = arith.constant 0 : index
    %c0_8 = arith.constant 0 : index
    %7 = vector.load %arg5[%c0_7, %c0_8] : memref<32x1xf32, #tpu.memory_space<vmem>>, vector<32x1xf32>
    %cst_9 = arith.constant dense<0.000000e+00> : vector<32xf32>
    %8 = vector.multi_reduction <add>, %5, %cst_9 [1] : vector<32x32xf32> to vector<32xf32>
    %9 = vector.shape_cast %8 : vector<32xf32> to vector<32x1xf32>
    %cst_10 = arith.constant 3.125000e-02 : f32
    %10 = vector.broadcast %cst_10 : f32 to vector<32x1xf32>
    %11 = arith.mulf %9, %10 : vector<32x1xf32>
    %12 = arith.mulf %5, %5 : vector<32x32xf32>
    %cst_11 = arith.constant dense<0.000000e+00> : vector<32xf32>
    %13 = vector.multi_reduction <add>, %12, %cst_11 [1] : vector<32x32xf32> to vector<32xf32>
    %14 = vector.shape_cast %13 : vector<32xf32> to vector<32x1xf32>
    %cst_12 = arith.constant 3.125000e-02 : f32
    %15 = vector.broadcast %cst_12 : f32 to vector<32x1xf32>
    %16 = arith.mulf %14, %15 : vector<32x1xf32>
    %17 = arith.mulf %11, %11 : vector<32x1xf32>
    %18 = arith.subf %16, %17 : vector<32x1xf32>
    %cst_13 = arith.constant 0.000000e+00 : f32
    %19 = vector.broadcast %cst_13 : f32 to vector<32x1xf32>
    %20 = arith.maximumf %18, %19 : vector<32x1xf32>
    %21 = vector.broadcast %11 : vector<32x1xf32> to vector<32x32xf32>
    %22 = arith.subf %5, %21 : vector<32x32xf32>
    %cst_14 = arith.constant 9.99999974E-6 : f32
    %23 = vector.broadcast %cst_14 : f32 to vector<32x1xf32>
    %24 = arith.addf %20, %23 : vector<32x1xf32>
    %25 = math.rsqrt %24 : vector<32x1xf32>
    %26 = vector.broadcast %25 : vector<32x1xf32> to vector<32x32xf32>
    %27 = arith.mulf %22, %26 : vector<32x32xf32>
    %28 = vector.broadcast %6 : vector<32x1xf32> to vector<32x32xf32>
    %29 = arith.mulf %27, %28 : vector<32x32xf32>
    %30 = vector.broadcast %7 : vector<32x1xf32> to vector<32x32xf32>
    %31 = arith.addf %29, %30 : vector<32x32xf32>
    %cst_15 = arith.constant 0.000000e+00 : f32
    %32 = vector.broadcast %cst_15 : f32 to vector<32x32xf32>
    %33 = arith.maximumf %31, %32 : vector<32x32xf32>
    %34 = arith.truncf %33 : vector<32x32xf32> to vector<32x32xbf16>
    %c0_16 = arith.constant 0 : index
    %c0_17 = arith.constant 0 : index
    %35 = vector.load %arg6[%c0_16, %c0_17] : memref<32x32xbf16, #tpu.memory_space<vmem>>, vector<32x32xbf16>
    tpu.vector_store %arg6[%c0_16, %c0_17], %34 {strides = array<i32>} : memref<32x32xbf16, #tpu.memory_space<vmem>>, vector<32x32xbf16>,
    return
  }
  func.func @transform_0(%arg0: i32) -> (i32, i32) {
    %c0_i32 = arith.constant 0 : i32
    %c0_i32_0 = arith.constant 0 : i32
    return %arg0, %c0_i32 : i32, i32
  }
  func.func @transform_1(%arg0: i32) -> (i32, i32) {
    %c0_i32 = arith.constant 0 : i32
    %c0_i32_0 = arith.constant 0 : i32
    %c0_i32_1 = arith.constant 0 : i32
    return %c0_i32, %c0_i32_0 : i32, i32
  }
  func.func @transform_2(%arg0: i32) -> (i32, i32) {
    %c0_i32 = arith.constant 0 : i32
    %c0_i32_0 = arith.constant 0 : i32
    return %arg0, %c0_i32 : i32, i32
  }
  func.func @transform_3(%arg0: i32) -> (i32, i32) {
    %c0_i32 = arith.constant 0 : i32
    %c0_i32_0 = arith.constant 0 : i32
    return %arg0, %c0_i32 : i32, i32
  }
  func.func @transform_4(%arg0: i32) -> (i32, i32) {
    %c0_i32 = arith.constant 0 : i32
    %c0_i32_0 = arith.constant 0 : i32
    return %arg0, %c0_i32 : i32, i32
  }
  func.func @transform_5(%arg0: i32) -> (i32, i32) {
    %c0_i32 = arith.constant 0 : i32
    %c0_i32_0 = arith.constant 0 : i32
    return %arg0, %c0_i32 : i32, i32
  }
}

module attributes {stable_mosaic.version = 11 : i64} {
  func.func @_conv_norm_kernel(%arg0: i32, %arg1: memref<48x640xbf16, #tpu.memory_space<vmem>>, %arg2: memref<640x32xbf16, #tpu.memory_space<vmem>>, %arg3: memref<48x1xf32, #tpu.memory_space<vmem>>, %arg4: memref<48x1xf32, #tpu.memory_space<vmem>>, %arg5: memref<48x1xf32, #tpu.memory_space<vmem>>, %arg6: memref<48x32xbf16, #tpu.memory_space<vmem>>) attributes {dimension_semantics = [#tpu.dimension_semantics<parallel>], iteration_bounds = array<i64: 3>, scalar_prefetch = 0 : i64, scratch_operands = 0 : i64, tpu.core_type = #tpu.core_type<tc>, window_params = [{transform_indices = @transform_0, window_bounds = array<i64: 48, 640>}, {pipeline_mode = #tpu.pipeline_mode<synchronous>, transform_indices = @transform_1, window_bounds = array<i64: 640, 32>}, {transform_indices = @transform_2, window_bounds = array<i64: 48, 1>}, {transform_indices = @transform_3, window_bounds = array<i64: 48, 1>}, {transform_indices = @transform_4, window_bounds = array<i64: 48, 1>}, {transform_indices = @transform_5, window_bounds = array<i64: 48, 32>}]} {
    %c0 = arith.constant 0 : index
    %c0_0 = arith.constant 0 : index
    %0 = vector.load %arg1[%c0, %c0_0] : memref<48x640xbf16, #tpu.memory_space<vmem>>, vector<48x640xbf16>
    %c0_1 = arith.constant 0 : index
    %c0_2 = arith.constant 0 : index
    %1 = vector.load %arg2[%c0_1, %c0_2] : memref<640x32xbf16, #tpu.memory_space<vmem>>, vector<640x32xbf16>
    %cst = arith.constant dense<0.000000e+00> : vector<48x32xf32>
    %2 = tpu.matmul %0, %1, %cst {dimension_numbers = #tpu.dot_dimension_numbers<[1], [0], [0], [1], [0, 0, 1, 1], [], []>} : vector<48x640xbf16>, vector<640x32xbf16>, vector<48x32xf32> -> vector<48x32xf32>
    %c0_3 = arith.constant 0 : index
    %c0_4 = arith.constant 0 : index
    %3 = vector.load %arg3[%c0_3, %c0_4] : memref<48x1xf32, #tpu.memory_space<vmem>>, vector<48x1xf32>
    %4 = vector.broadcast %3 : vector<48x1xf32> to vector<48x32xf32>
    %5 = arith.addf %2, %4 : vector<48x32xf32>
    %c0_5 = arith.constant 0 : index
    %c0_6 = arith.constant 0 : index
    %6 = vector.load %arg4[%c0_5, %c0_6] : memref<48x1xf32, #tpu.memory_space<vmem>>, vector<48x1xf32>
    %c0_7 = arith.constant 0 : index
    %c0_8 = arith.constant 0 : index
    %7 = vector.load %arg5[%c0_7, %c0_8] : memref<48x1xf32, #tpu.memory_space<vmem>>, vector<48x1xf32>
    %cst_9 = arith.constant dense<0.000000e+00> : vector<48xf32>
    %8 = vector.multi_reduction <add>, %5, %cst_9 [1] : vector<48x32xf32> to vector<48xf32>
    %9 = vector.shape_cast %8 : vector<48xf32> to vector<48x1xf32>
    %cst_10 = arith.constant 3.125000e-02 : f32
    %10 = vector.broadcast %cst_10 : f32 to vector<48x1xf32>
    %11 = arith.mulf %9, %10 : vector<48x1xf32>
    %12 = arith.mulf %5, %5 : vector<48x32xf32>
    %cst_11 = arith.constant dense<0.000000e+00> : vector<48xf32>
    %13 = vector.multi_reduction <add>, %12, %cst_11 [1] : vector<48x32xf32> to vector<48xf32>
    %14 = vector.shape_cast %13 : vector<48xf32> to vector<48x1xf32>
    %cst_12 = arith.constant 3.125000e-02 : f32
    %15 = vector.broadcast %cst_12 : f32 to vector<48x1xf32>
    %16 = arith.mulf %14, %15 : vector<48x1xf32>
    %17 = arith.mulf %11, %11 : vector<48x1xf32>
    %18 = arith.subf %16, %17 : vector<48x1xf32>
    %cst_13 = arith.constant 0.000000e+00 : f32
    %19 = vector.broadcast %cst_13 : f32 to vector<48x1xf32>
    %20 = arith.maximumf %18, %19 : vector<48x1xf32>
    %21 = vector.broadcast %11 : vector<48x1xf32> to vector<48x32xf32>
    %22 = arith.subf %5, %21 : vector<48x32xf32>
    %cst_14 = arith.constant 9.99999974E-6 : f32
    %23 = vector.broadcast %cst_14 : f32 to vector<48x1xf32>
    %24 = arith.addf %20, %23 : vector<48x1xf32>
    %25 = math.rsqrt %24 : vector<48x1xf32>
    %26 = vector.broadcast %25 : vector<48x1xf32> to vector<48x32xf32>
    %27 = arith.mulf %22, %26 : vector<48x32xf32>
    %28 = vector.broadcast %6 : vector<48x1xf32> to vector<48x32xf32>
    %29 = arith.mulf %27, %28 : vector<48x32xf32>
    %30 = vector.broadcast %7 : vector<48x1xf32> to vector<48x32xf32>
    %31 = arith.addf %29, %30 : vector<48x32xf32>
    %cst_15 = arith.constant 0.000000e+00 : f32
    %32 = vector.broadcast %cst_15 : f32 to vector<48x32xf32>
    %33 = arith.maximumf %31, %32 : vector<48x32xf32>
    %34 = arith.truncf %33 : vector<48x32xf32> to vector<48x32xbf16>
    %c0_16 = arith.constant 0 : index
    %c0_17 = arith.constant 0 : index
    %35 = vector.load %arg6[%c0_16, %c0_17] : memref<48x32xbf16, #tpu.memory_space<vmem>>, vector<48x32xbf16>
    tpu.vector_store %arg6[%c0_16, %c0_17], %34 {strides = array<i32>} : memref<48x32xbf16, #tpu.memory_space<vmem>>, vector<48x32xbf16>,
    return
  }
  func.func @transform_0(%arg0: i32) -> (i32, i32) {
    %c0_i32 = arith.constant 0 : i32
    %c0_i32_0 = arith.constant 0 : i32
    return %arg0, %c0_i32 : i32, i32
  }
  func.func @transform_1(%arg0: i32) -> (i32, i32) {
    %c0_i32 = arith.constant 0 : i32
    %c0_i32_0 = arith.constant 0 : i32
    %c0_i32_1 = arith.constant 0 : i32
    return %c0_i32, %c0_i32_0 : i32, i32
  }
  func.func @transform_2(%arg0: i32) -> (i32, i32) {
    %c0_i32 = arith.constant 0 : i32
    %c0_i32_0 = arith.constant 0 : i32
    return %arg0, %c0_i32 : i32, i32
  }
  func.func @transform_3(%arg0: i32) -> (i32, i32) {
    %c0_i32 = arith.constant 0 : i32
    %c0_i32_0 = arith.constant 0 : i32
    return %arg0, %c0_i32 : i32, i32
  }
  func.func @transform_4(%arg0: i32) -> (i32, i32) {
    %c0_i32 = arith.constant 0 : i32
    %c0_i32_0 = arith.constant 0 : i32
    return %arg0, %c0_i32 : i32, i32
  }
  func.func @transform_5(%arg0: i32) -> (i32, i32) {
    %c0_i32 = arith.constant 0 : i32
    %c0_i32_0 = arith.constant 0 : i32
    return %arg0, %c0_i32 : i32, i32
  }
}

module attributes {stable_mosaic.version = 11 : i64} {
  func.func @_conv_bias_kernel(%arg0: i32, %arg1: memref<32x512xbf16, #tpu.memory_space<vmem>>, %arg2: memref<512x32xbf16, #tpu.memory_space<vmem>>, %arg3: memref<32x1xf32, #tpu.memory_space<vmem>>, %arg4: memref<32x32xbf16, #tpu.memory_space<vmem>>) attributes {dimension_semantics = [#tpu.dimension_semantics<parallel>], iteration_bounds = array<i64: 2>, scalar_prefetch = 0 : i64, scratch_operands = 0 : i64, tpu.core_type = #tpu.core_type<tc>, window_params = [{transform_indices = @transform_0, window_bounds = array<i64: 32, 512>}, {pipeline_mode = #tpu.pipeline_mode<synchronous>, transform_indices = @transform_1, window_bounds = array<i64: 512, 32>}, {transform_indices = @transform_2, window_bounds = array<i64: 32, 1>}, {transform_indices = @transform_3, window_bounds = array<i64: 32, 32>}]} {
    %c0 = arith.constant 0 : index
    %c0_0 = arith.constant 0 : index
    %0 = vector.load %arg1[%c0, %c0_0] : memref<32x512xbf16, #tpu.memory_space<vmem>>, vector<32x512xbf16>
    %c0_1 = arith.constant 0 : index
    %c0_2 = arith.constant 0 : index
    %1 = vector.load %arg2[%c0_1, %c0_2] : memref<512x32xbf16, #tpu.memory_space<vmem>>, vector<512x32xbf16>
    %cst = arith.constant dense<0.000000e+00> : vector<32x32xf32>
    %2 = tpu.matmul %0, %1, %cst {dimension_numbers = #tpu.dot_dimension_numbers<[1], [0], [0], [1], [0, 0, 1, 1], [], []>} : vector<32x512xbf16>, vector<512x32xbf16>, vector<32x32xf32> -> vector<32x32xf32>
    %c0_3 = arith.constant 0 : index
    %c0_4 = arith.constant 0 : index
    %3 = vector.load %arg3[%c0_3, %c0_4] : memref<32x1xf32, #tpu.memory_space<vmem>>, vector<32x1xf32>
    %4 = vector.broadcast %3 : vector<32x1xf32> to vector<32x32xf32>
    %5 = arith.addf %2, %4 : vector<32x32xf32>
    %6 = arith.truncf %5 : vector<32x32xf32> to vector<32x32xbf16>
    %c0_5 = arith.constant 0 : index
    %c0_6 = arith.constant 0 : index
    %7 = vector.load %arg4[%c0_5, %c0_6] : memref<32x32xbf16, #tpu.memory_space<vmem>>, vector<32x32xbf16>
    tpu.vector_store %arg4[%c0_5, %c0_6], %6 {strides = array<i32>} : memref<32x32xbf16, #tpu.memory_space<vmem>>, vector<32x32xbf16>,
    return
  }
  func.func @transform_0(%arg0: i32) -> (i32, i32) {
    %c0_i32 = arith.constant 0 : i32
    %c0_i32_0 = arith.constant 0 : i32
    return %arg0, %c0_i32 : i32, i32
  }
  func.func @transform_1(%arg0: i32) -> (i32, i32) {
    %c0_i32 = arith.constant 0 : i32
    %c0_i32_0 = arith.constant 0 : i32
    %c0_i32_1 = arith.constant 0 : i32
    return %c0_i32, %c0_i32_0 : i32, i32
  }
  func.func @transform_2(%arg0: i32) -> (i32, i32) {
    %c0_i32 = arith.constant 0 : i32
    %c0_i32_0 = arith.constant 0 : i32
    return %arg0, %c0_i32 : i32, i32
  }
  func.func @transform_3(%arg0: i32) -> (i32, i32) {
    %c0_i32 = arith.constant 0 : i32
    %c0_i32_0 = arith.constant 0 : i32
    return %arg0, %c0_i32 : i32, i32
  }
}

module attributes {stable_mosaic.version = 11 : i64} {
  func.func @_convT_norm_kernel(%arg0: i32, %arg1: memref<1x16x512xbf16, #tpu.memory_space<vmem>>, %arg2: memref<1x512x32xbf16, #tpu.memory_space<vmem>>, %arg3: memref<16x1xf32, #tpu.memory_space<vmem>>, %arg4: memref<16x1xf32, #tpu.memory_space<vmem>>, %arg5: memref<8x16x32xbf16, #tpu.memory_space<vmem>>, %arg6: memref<8x16x32xf32, #tpu.memory_space<vmem>>, %arg7: memref<16x1xf32, #tpu.memory_space<vmem>>, %arg8: memref<16x1xf32, #tpu.memory_space<vmem>>) attributes {dimension_semantics = [#tpu.dimension_semantics<arbitrary>], iteration_bounds = array<i64: 8>, scalar_prefetch = 0 : i64, scratch_operands = 3 : i64, tpu.core_type = #tpu.core_type<tc>, window_params = [{transform_indices = @transform_0, window_bounds = array<i64: 1, 16, 512>}, {transform_indices = @transform_1, window_bounds = array<i64: 1, 512, 32>}, {pipeline_mode = #tpu.pipeline_mode<synchronous>, transform_indices = @transform_2, window_bounds = array<i64: 16, 1>}, {pipeline_mode = #tpu.pipeline_mode<synchronous>, transform_indices = @transform_3, window_bounds = array<i64: 16, 1>}, {pipeline_mode = #tpu.pipeline_mode<synchronous>, transform_indices = @transform_4, window_bounds = array<i64: 8, 16, 32>}]} {
    %c0 = arith.constant 0 : index
    %c0_0 = arith.constant 0 : index
    %c0_1 = arith.constant 0 : index
    %0 = vector.load %arg1[%c0, %c0_0, %c0_1] : memref<1x16x512xbf16, #tpu.memory_space<vmem>>, vector<1x16x512xbf16>
    %1 = vector.shape_cast %0 : vector<1x16x512xbf16> to vector<16x512xbf16>
    %c0_2 = arith.constant 0 : index
    %c0_3 = arith.constant 0 : index
    %c0_4 = arith.constant 0 : index
    %2 = vector.load %arg2[%c0_2, %c0_3, %c0_4] : memref<1x512x32xbf16, #tpu.memory_space<vmem>>, vector<1x512x32xbf16>
    %3 = vector.shape_cast %2 : vector<1x512x32xbf16> to vector<512x32xbf16>
    %cst = arith.constant dense<0.000000e+00> : vector<16x32xf32>
    %4 = tpu.matmul %1, %3, %cst {dimension_numbers = #tpu.dot_dimension_numbers<[1], [0], [0], [1], [0, 0, 1, 1], [], []>} : vector<16x512xbf16>, vector<512x32xbf16>, vector<16x32xf32> -> vector<16x32xf32>
    %5 = arith.index_cast %arg0 : i32 to index
    %c0_5 = arith.constant 0 : index
    %c0_6 = arith.constant 0 : index
    %6 = vector.load %arg6[%5, %c0_5, %c0_6] : memref<8x16x32xf32, #tpu.memory_space<vmem>>, vector<1x16x32xf32>
    %7 = vector.shape_cast %6 : vector<1x16x32xf32> to vector<16x32xf32>
    %8 = vector.shape_cast %4 : vector<16x32xf32> to vector<1x16x32xf32>
    tpu.vector_store %arg6[%5, %c0_5, %c0_6], %8 {strides = array<i32>} : memref<8x16x32xf32, #tpu.memory_space<vmem>>, vector<1x16x32xf32>,
    %c0_i32 = arith.constant 0 : i32
    %9 = arith.cmpi eq, %arg0, %c0_i32 : i32
    %10 = arith.extui %9 : i1 to i32
    %c0_i32_7 = arith.constant 0 : i32
    %11 = arith.cmpi ne, %10, %c0_i32_7 : i32
    scf.if %11 {
      %cst_19 = arith.constant 0.000000e+00 : f32
      %26 = vector.broadcast %cst_19 : f32 to vector<16x1xf32>
      %c0_20 = arith.constant 0 : index
      %c0_21 = arith.constant 0 : index
      %27 = vector.load %arg7[%c0_20, %c0_21] : memref<16x1xf32, #tpu.memory_space<vmem>>, vector<16x1xf32>
      tpu.vector_store %arg7[%c0_20, %c0_21], %26 {strides = array<i32>} : memref<16x1xf32, #tpu.memory_space<vmem>>, vector<16x1xf32>,
      %cst_22 = arith.constant 0.000000e+00 : f32
      %28 = vector.broadcast %cst_22 : f32 to vector<16x1xf32>
      %c0_23 = arith.constant 0 : index
      %c0_24 = arith.constant 0 : index
      %29 = vector.load %arg8[%c0_23, %c0_24] : memref<16x1xf32, #tpu.memory_space<vmem>>, vector<16x1xf32>
      tpu.vector_store %arg8[%c0_23, %c0_24], %28 {strides = array<i32>} : memref<16x1xf32, #tpu.memory_space<vmem>>, vector<16x1xf32>,
    } else {
    }
    %c0_8 = arith.constant 0 : index
    %c0_9 = arith.constant 0 : index
    %12 = vector.load %arg7[%c0_8, %c0_9] : memref<16x1xf32, #tpu.memory_space<vmem>>, vector<16x1xf32>
    %cst_10 = arith.constant dense<0.000000e+00> : vector<16xf32>
    %13 = vector.multi_reduction <add>, %4, %cst_10 [1] : vector<16x32xf32> to vector<16xf32>
    %14 = vector.shape_cast %13 : vector<16xf32> to vector<16x1xf32>
    %15 = arith.addf %12, %14 : vector<16x1xf32>
    %c0_11 = arith.constant 0 : index
    %c0_12 = arith.constant 0 : index
    %16 = vector.load %arg7[%c0_11, %c0_12] : memref<16x1xf32, #tpu.memory_space<vmem>>, vector<16x1xf32>
    tpu.vector_store %arg7[%c0_11, %c0_12], %15 {strides = array<i32>} : memref<16x1xf32, #tpu.memory_space<vmem>>, vector<16x1xf32>,
    %c0_13 = arith.constant 0 : index
    %c0_14 = arith.constant 0 : index
    %17 = vector.load %arg8[%c0_13, %c0_14] : memref<16x1xf32, #tpu.memory_space<vmem>>, vector<16x1xf32>
    %18 = arith.mulf %4, %4 : vector<16x32xf32>
    %cst_15 = arith.constant dense<0.000000e+00> : vector<16xf32>
    %19 = vector.multi_reduction <add>, %18, %cst_15 [1] : vector<16x32xf32> to vector<16xf32>
    %20 = vector.shape_cast %19 : vector<16xf32> to vector<16x1xf32>
    %21 = arith.addf %17, %20 : vector<16x1xf32>
    %c0_16 = arith.constant 0 : index
    %c0_17 = arith.constant 0 : index
    %22 = vector.load %arg8[%c0_16, %c0_17] : memref<16x1xf32, #tpu.memory_space<vmem>>, vector<16x1xf32>
    tpu.vector_store %arg8[%c0_16, %c0_17], %21 {strides = array<i32>} : memref<16x1xf32, #tpu.memory_space<vmem>>, vector<16x1xf32>,
    %c7_i32 = arith.constant 7 : i32
    %23 = arith.cmpi eq, %arg0, %c7_i32 : i32
    %24 = arith.extui %23 : i1 to i32
    %c0_i32_18 = arith.constant 0 : i32
    %25 = arith.cmpi ne, %24, %c0_i32_18 : i32
    scf.if %25 {
      %c0_19 = arith.constant 0 : index
      %c0_20 = arith.constant 0 : index
      %26 = vector.load %arg7[%c0_19, %c0_20] : memref<16x1xf32, #tpu.memory_space<vmem>>, vector<16x1xf32>
      %cst_21 = arith.constant 3.906250e-03 : f32
      %27 = vector.broadcast %cst_21 : f32 to vector<16x1xf32>
      %28 = arith.mulf %26, %27 : vector<16x1xf32>
      %c0_22 = arith.constant 0 : index
      %c0_23 = arith.constant 0 : index
      %29 = vector.load %arg8[%c0_22, %c0_23] : memref<16x1xf32, #tpu.memory_space<vmem>>, vector<16x1xf32>
      %cst_24 = arith.constant 3.906250e-03 : f32
      %30 = vector.broadcast %cst_24 : f32 to vector<16x1xf32>
      %31 = arith.mulf %29, %30 : vector<16x1xf32>
      %32 = arith.mulf %28, %28 : vector<16x1xf32>
      %33 = arith.subf %31, %32 : vector<16x1xf32>
      %cst_25 = arith.constant 0.000000e+00 : f32
      %34 = vector.broadcast %cst_25 : f32 to vector<16x1xf32>
      %35 = arith.maximumf %33, %34 : vector<16x1xf32>
      %cst_26 = arith.constant 9.99999974E-6 : f32
      %36 = vector.broadcast %cst_26 : f32 to vector<16x1xf32>
      %37 = arith.addf %35, %36 : vector<16x1xf32>
      %38 = math.rsqrt %37 : vector<16x1xf32>
      %c0_27 = arith.constant 0 : index
      %c0_28 = arith.constant 0 : index
      %39 = vector.load %arg3[%c0_27, %c0_28] : memref<16x1xf32, #tpu.memory_space<vmem>>, vector<16x1xf32>
      %40 = arith.mulf %38, %39 : vector<16x1xf32>
      %c0_29 = arith.constant 0 : index
      %c0_30 = arith.constant 0 : index
      %41 = vector.load %arg4[%c0_29, %c0_30] : memref<16x1xf32, #tpu.memory_space<vmem>>, vector<16x1xf32>
      %42 = arith.mulf %28, %40 : vector<16x1xf32>
      %43 = arith.subf %41, %42 : vector<16x1xf32>
      %c0_31 = arith.constant 0 : index
      %c0_32 = arith.constant 0 : index
      %c0_33 = arith.constant 0 : index
      %44 = vector.load %arg6[%c0_31, %c0_32, %c0_33] : memref<8x16x32xf32, #tpu.memory_space<vmem>>, vector<8x16x32xf32>
      %45 = vector.shape_cast %40 : vector<16x1xf32> to vector<1x16x1xf32>
      %46 = vector.broadcast %45 : vector<1x16x1xf32> to vector<8x16x32xf32>
      %47 = arith.mulf %44, %46 : vector<8x16x32xf32>
      %48 = vector.shape_cast %43 : vector<16x1xf32> to vector<1x16x1xf32>
      %49 = vector.broadcast %48 : vector<1x16x1xf32> to vector<8x16x32xf32>
      %50 = arith.addf %47, %49 : vector<8x16x32xf32>
      %cst_34 = arith.constant 0.000000e+00 : f32
      %51 = vector.broadcast %cst_34 : f32 to vector<8x16x32xf32>
      %52 = arith.maximumf %50, %51 : vector<8x16x32xf32>
      %53 = arith.truncf %52 : vector<8x16x32xf32> to vector<8x16x32xbf16>
      %c0_35 = arith.constant 0 : index
      %c0_36 = arith.constant 0 : index
      %c0_37 = arith.constant 0 : index
      %54 = vector.load %arg5[%c0_35, %c0_36, %c0_37] : memref<8x16x32xbf16, #tpu.memory_space<vmem>>, vector<8x16x32xbf16>
      tpu.vector_store %arg5[%c0_35, %c0_36, %c0_37], %53 {strides = array<i32>} : memref<8x16x32xbf16, #tpu.memory_space<vmem>>, vector<8x16x32xbf16>,
    } else {
    }
    return
  }
  func.func @transform_0(%arg0: i32) -> (i32, i32, i32) {
    %c0_i32 = arith.constant 0 : i32
    %c0_i32_0 = arith.constant 0 : i32
    %c0_i32_1 = arith.constant 0 : i32
    return %arg0, %c0_i32, %c0_i32_0 : i32, i32, i32
  }
  func.func @transform_1(%arg0: i32) -> (i32, i32, i32) {
    %c0_i32 = arith.constant 0 : i32
    %c0_i32_0 = arith.constant 0 : i32
    %c0_i32_1 = arith.constant 0 : i32
    return %arg0, %c0_i32, %c0_i32_0 : i32, i32, i32
  }
  func.func @transform_2(%arg0: i32) -> (i32, i32) {
    %c0_i32 = arith.constant 0 : i32
    %c0_i32_0 = arith.constant 0 : i32
    %c0_i32_1 = arith.constant 0 : i32
    return %c0_i32, %c0_i32_0 : i32, i32
  }
  func.func @transform_3(%arg0: i32) -> (i32, i32) {
    %c0_i32 = arith.constant 0 : i32
    %c0_i32_0 = arith.constant 0 : i32
    %c0_i32_1 = arith.constant 0 : i32
    return %c0_i32, %c0_i32_0 : i32, i32
  }
  func.func @transform_4(%arg0: i32) -> (i32, i32, i32) {
    %c0_i32 = arith.constant 0 : i32
    %c0_i32_0 = arith.constant 0 : i32
    %c0_i32_1 = arith.constant 0 : i32
    %c0_i32_2 = arith.constant 0 : i32
    return %c0_i32, %c0_i32_0, %c0_i32_1 : i32, i32, i32
  }
}

module attributes {stable_mosaic.version = 11 : i64} {
  func.func @_convT_norm_kernel(%arg0: i32, %arg1: memref<1x16x128xbf16, #tpu.memory_space<vmem>>, %arg2: memref<1x128x256xbf16, #tpu.memory_space<vmem>>, %arg3: memref<16x1xf32, #tpu.memory_space<vmem>>, %arg4: memref<16x1xf32, #tpu.memory_space<vmem>>, %arg5: memref<4x16x256xbf16, #tpu.memory_space<vmem>>, %arg6: memref<4x16x256xf32, #tpu.memory_space<vmem>>, %arg7: memref<16x1xf32, #tpu.memory_space<vmem>>, %arg8: memref<16x1xf32, #tpu.memory_space<vmem>>) attributes {dimension_semantics = [#tpu.dimension_semantics<arbitrary>], iteration_bounds = array<i64: 4>, scalar_prefetch = 0 : i64, scratch_operands = 3 : i64, tpu.core_type = #tpu.core_type<tc>, window_params = [{transform_indices = @transform_0, window_bounds = array<i64: 1, 16, 128>}, {transform_indices = @transform_1, window_bounds = array<i64: 1, 128, 256>}, {pipeline_mode = #tpu.pipeline_mode<synchronous>, transform_indices = @transform_2, window_bounds = array<i64: 16, 1>}, {pipeline_mode = #tpu.pipeline_mode<synchronous>, transform_indices = @transform_3, window_bounds = array<i64: 16, 1>}, {pipeline_mode = #tpu.pipeline_mode<synchronous>, transform_indices = @transform_4, window_bounds = array<i64: 4, 16, 256>}]} {
    %c0 = arith.constant 0 : index
    %c0_0 = arith.constant 0 : index
    %c0_1 = arith.constant 0 : index
    %0 = vector.load %arg1[%c0, %c0_0, %c0_1] : memref<1x16x128xbf16, #tpu.memory_space<vmem>>, vector<1x16x128xbf16>
    %1 = vector.shape_cast %0 : vector<1x16x128xbf16> to vector<16x128xbf16>
    %c0_2 = arith.constant 0 : index
    %c0_3 = arith.constant 0 : index
    %c0_4 = arith.constant 0 : index
    %2 = vector.load %arg2[%c0_2, %c0_3, %c0_4] : memref<1x128x256xbf16, #tpu.memory_space<vmem>>, vector<1x128x256xbf16>
    %3 = vector.shape_cast %2 : vector<1x128x256xbf16> to vector<128x256xbf16>
    %cst = arith.constant dense<0.000000e+00> : vector<16x256xf32>
    %4 = tpu.matmul %1, %3, %cst {dimension_numbers = #tpu.dot_dimension_numbers<[1], [0], [0], [1], [0, 0, 1, 1], [], []>} : vector<16x128xbf16>, vector<128x256xbf16>, vector<16x256xf32> -> vector<16x256xf32>
    %5 = arith.index_cast %arg0 : i32 to index
    %c0_5 = arith.constant 0 : index
    %c0_6 = arith.constant 0 : index
    %6 = vector.load %arg6[%5, %c0_5, %c0_6] : memref<4x16x256xf32, #tpu.memory_space<vmem>>, vector<1x16x256xf32>
    %7 = vector.shape_cast %6 : vector<1x16x256xf32> to vector<16x256xf32>
    %8 = vector.shape_cast %4 : vector<16x256xf32> to vector<1x16x256xf32>
    tpu.vector_store %arg6[%5, %c0_5, %c0_6], %8 {strides = array<i32>} : memref<4x16x256xf32, #tpu.memory_space<vmem>>, vector<1x16x256xf32>,
    %c0_i32 = arith.constant 0 : i32
    %9 = arith.cmpi eq, %arg0, %c0_i32 : i32
    %10 = arith.extui %9 : i1 to i32
    %c0_i32_7 = arith.constant 0 : i32
    %11 = arith.cmpi ne, %10, %c0_i32_7 : i32
    scf.if %11 {
      %cst_19 = arith.constant 0.000000e+00 : f32
      %26 = vector.broadcast %cst_19 : f32 to vector<16x1xf32>
      %c0_20 = arith.constant 0 : index
      %c0_21 = arith.constant 0 : index
      %27 = vector.load %arg7[%c0_20, %c0_21] : memref<16x1xf32, #tpu.memory_space<vmem>>, vector<16x1xf32>
      tpu.vector_store %arg7[%c0_20, %c0_21], %26 {strides = array<i32>} : memref<16x1xf32, #tpu.memory_space<vmem>>, vector<16x1xf32>,
      %cst_22 = arith.constant 0.000000e+00 : f32
      %28 = vector.broadcast %cst_22 : f32 to vector<16x1xf32>
      %c0_23 = arith.constant 0 : index
      %c0_24 = arith.constant 0 : index
      %29 = vector.load %arg8[%c0_23, %c0_24] : memref<16x1xf32, #tpu.memory_space<vmem>>, vector<16x1xf32>
      tpu.vector_store %arg8[%c0_23, %c0_24], %28 {strides = array<i32>} : memref<16x1xf32, #tpu.memory_space<vmem>>, vector<16x1xf32>,
    } else {
    }
    %c0_8 = arith.constant 0 : index
    %c0_9 = arith.constant 0 : index
    %12 = vector.load %arg7[%c0_8, %c0_9] : memref<16x1xf32, #tpu.memory_space<vmem>>, vector<16x1xf32>
    %cst_10 = arith.constant dense<0.000000e+00> : vector<16xf32>
    %13 = vector.multi_reduction <add>, %4, %cst_10 [1] : vector<16x256xf32> to vector<16xf32>
    %14 = vector.shape_cast %13 : vector<16xf32> to vector<16x1xf32>
    %15 = arith.addf %12, %14 : vector<16x1xf32>
    %c0_11 = arith.constant 0 : index
    %c0_12 = arith.constant 0 : index
    %16 = vector.load %arg7[%c0_11, %c0_12] : memref<16x1xf32, #tpu.memory_space<vmem>>, vector<16x1xf32>
    tpu.vector_store %arg7[%c0_11, %c0_12], %15 {strides = array<i32>} : memref<16x1xf32, #tpu.memory_space<vmem>>, vector<16x1xf32>,
    %c0_13 = arith.constant 0 : index
    %c0_14 = arith.constant 0 : index
    %17 = vector.load %arg8[%c0_13, %c0_14] : memref<16x1xf32, #tpu.memory_space<vmem>>, vector<16x1xf32>
    %18 = arith.mulf %4, %4 : vector<16x256xf32>
    %cst_15 = arith.constant dense<0.000000e+00> : vector<16xf32>
    %19 = vector.multi_reduction <add>, %18, %cst_15 [1] : vector<16x256xf32> to vector<16xf32>
    %20 = vector.shape_cast %19 : vector<16xf32> to vector<16x1xf32>
    %21 = arith.addf %17, %20 : vector<16x1xf32>
    %c0_16 = arith.constant 0 : index
    %c0_17 = arith.constant 0 : index
    %22 = vector.load %arg8[%c0_16, %c0_17] : memref<16x1xf32, #tpu.memory_space<vmem>>, vector<16x1xf32>
    tpu.vector_store %arg8[%c0_16, %c0_17], %21 {strides = array<i32>} : memref<16x1xf32, #tpu.memory_space<vmem>>, vector<16x1xf32>,
    %c3_i32 = arith.constant 3 : i32
    %23 = arith.cmpi eq, %arg0, %c3_i32 : i32
    %24 = arith.extui %23 : i1 to i32
    %c0_i32_18 = arith.constant 0 : i32
    %25 = arith.cmpi ne, %24, %c0_i32_18 : i32
    scf.if %25 {
      %c0_19 = arith.constant 0 : index
      %c0_20 = arith.constant 0 : index
      %26 = vector.load %arg7[%c0_19, %c0_20] : memref<16x1xf32, #tpu.memory_space<vmem>>, vector<16x1xf32>
      %cst_21 = arith.constant 9.765625E-4 : f32
      %27 = vector.broadcast %cst_21 : f32 to vector<16x1xf32>
      %28 = arith.mulf %26, %27 : vector<16x1xf32>
      %c0_22 = arith.constant 0 : index
      %c0_23 = arith.constant 0 : index
      %29 = vector.load %arg8[%c0_22, %c0_23] : memref<16x1xf32, #tpu.memory_space<vmem>>, vector<16x1xf32>
      %cst_24 = arith.constant 9.765625E-4 : f32
      %30 = vector.broadcast %cst_24 : f32 to vector<16x1xf32>
      %31 = arith.mulf %29, %30 : vector<16x1xf32>
      %32 = arith.mulf %28, %28 : vector<16x1xf32>
      %33 = arith.subf %31, %32 : vector<16x1xf32>
      %cst_25 = arith.constant 0.000000e+00 : f32
      %34 = vector.broadcast %cst_25 : f32 to vector<16x1xf32>
      %35 = arith.maximumf %33, %34 : vector<16x1xf32>
      %cst_26 = arith.constant 9.99999974E-6 : f32
      %36 = vector.broadcast %cst_26 : f32 to vector<16x1xf32>
      %37 = arith.addf %35, %36 : vector<16x1xf32>
      %38 = math.rsqrt %37 : vector<16x1xf32>
      %c0_27 = arith.constant 0 : index
      %c0_28 = arith.constant 0 : index
      %39 = vector.load %arg3[%c0_27, %c0_28] : memref<16x1xf32, #tpu.memory_space<vmem>>, vector<16x1xf32>
      %40 = arith.mulf %38, %39 : vector<16x1xf32>
      %c0_29 = arith.constant 0 : index
      %c0_30 = arith.constant 0 : index
      %41 = vector.load %arg4[%c0_29, %c0_30] : memref<16x1xf32, #tpu.memory_space<vmem>>, vector<16x1xf32>
      %42 = arith.mulf %28, %40 : vector<16x1xf32>
      %43 = arith.subf %41, %42 : vector<16x1xf32>
      %c0_31 = arith.constant 0 : index
      %c0_32 = arith.constant 0 : index
      %c0_33 = arith.constant 0 : index
      %44 = vector.load %arg6[%c0_31, %c0_32, %c0_33] : memref<4x16x256xf32, #tpu.memory_space<vmem>>, vector<4x16x256xf32>
      %45 = vector.shape_cast %40 : vector<16x1xf32> to vector<1x16x1xf32>
      %46 = vector.broadcast %45 : vector<1x16x1xf32> to vector<4x16x256xf32>
      %47 = arith.mulf %44, %46 : vector<4x16x256xf32>
      %48 = vector.shape_cast %43 : vector<16x1xf32> to vector<1x16x1xf32>
      %49 = vector.broadcast %48 : vector<1x16x1xf32> to vector<4x16x256xf32>
      %50 = arith.addf %47, %49 : vector<4x16x256xf32>
      %cst_34 = arith.constant 0.000000e+00 : f32
      %51 = vector.broadcast %cst_34 : f32 to vector<4x16x256xf32>
      %52 = arith.maximumf %50, %51 : vector<4x16x256xf32>
      %53 = arith.truncf %52 : vector<4x16x256xf32> to vector<4x16x256xbf16>
      %c0_35 = arith.constant 0 : index
      %c0_36 = arith.constant 0 : index
      %c0_37 = arith.constant 0 : index
      %54 = vector.load %arg5[%c0_35, %c0_36, %c0_37] : memref<4x16x256xbf16, #tpu.memory_space<vmem>>, vector<4x16x256xbf16>
      tpu.vector_store %arg5[%c0_35, %c0_36, %c0_37], %53 {strides = array<i32>} : memref<4x16x256xbf16, #tpu.memory_space<vmem>>, vector<4x16x256xbf16>,
    } else {
    }
    return
  }
  func.func @transform_0(%arg0: i32) -> (i32, i32, i32) {
    %c0_i32 = arith.constant 0 : i32
    %c0_i32_0 = arith.constant 0 : i32
    %c0_i32_1 = arith.constant 0 : i32
    return %arg0, %c0_i32, %c0_i32_0 : i32, i32, i32
  }
  func.func @transform_1(%arg0: i32) -> (i32, i32, i32) {
    %c0_i32 = arith.constant 0 : i32
    %c0_i32_0 = arith.constant 0 : i32
    %c0_i32_1 = arith.constant 0 : i32
    return %arg0, %c0_i32, %c0_i32_0 : i32, i32, i32
  }
  func.func @transform_2(%arg0: i32) -> (i32, i32) {
    %c0_i32 = arith.constant 0 : i32
    %c0_i32_0 = arith.constant 0 : i32
    %c0_i32_1 = arith.constant 0 : i32
    return %c0_i32, %c0_i32_0 : i32, i32
  }
  func.func @transform_3(%arg0: i32) -> (i32, i32) {
    %c0_i32 = arith.constant 0 : i32
    %c0_i32_0 = arith.constant 0 : i32
    %c0_i32_1 = arith.constant 0 : i32
    return %c0_i32, %c0_i32_0 : i32, i32
  }
  func.func @transform_4(%arg0: i32) -> (i32, i32, i32) {
    %c0_i32 = arith.constant 0 : i32
    %c0_i32_0 = arith.constant 0 : i32
    %c0_i32_1 = arith.constant 0 : i32
    %c0_i32_2 = arith.constant 0 : i32
    return %c0_i32, %c0_i32_0, %c0_i32_1 : i32, i32, i32
  }
}

module attributes {stable_mosaic.version = 11 : i64} {
  func.func @_conv_tanh_res_kernel(%arg0: i32, %arg1: memref<16x512xbf16, #tpu.memory_space<vmem>>, %arg2: memref<512x1024xbf16, #tpu.memory_space<vmem>>, %arg3: memref<16x1024xf32, #tpu.memory_space<vmem>>, %arg4: memref<16x1024xf32, #tpu.memory_space<vmem>>) attributes {dimension_semantics = [#tpu.dimension_semantics<parallel>], iteration_bounds = array<i64: 1>, scalar_prefetch = 0 : i64, scratch_operands = 0 : i64, tpu.core_type = #tpu.core_type<tc>, window_params = [{transform_indices = @transform_0, window_bounds = array<i64: 16, 512>}, {pipeline_mode = #tpu.pipeline_mode<synchronous>, transform_indices = @transform_1, window_bounds = array<i64: 512, 1024>}, {transform_indices = @transform_2, window_bounds = array<i64: 16, 1024>}, {transform_indices = @transform_3, window_bounds = array<i64: 16, 1024>}]} {
    %c0 = arith.constant 0 : index
    %c0_0 = arith.constant 0 : index
    %0 = vector.load %arg1[%c0, %c0_0] : memref<16x512xbf16, #tpu.memory_space<vmem>>, vector<16x512xbf16>
    %c0_1 = arith.constant 0 : index
    %c0_2 = arith.constant 0 : index
    %1 = vector.load %arg2[%c0_1, %c0_2] : memref<512x1024xbf16, #tpu.memory_space<vmem>>, vector<512x1024xbf16>
    %cst = arith.constant dense<0.000000e+00> : vector<16x1024xf32>
    %2 = tpu.matmul %0, %1, %cst {dimension_numbers = #tpu.dot_dimension_numbers<[1], [0], [0], [1], [0, 0, 1, 1], [], []>} : vector<16x512xbf16>, vector<512x1024xbf16>, vector<16x1024xf32> -> vector<16x1024xf32>
    %3 = math.tanh %2 : vector<16x1024xf32>
    %c0_3 = arith.constant 0 : index
    %c0_4 = arith.constant 0 : index
    %4 = vector.load %arg3[%c0_3, %c0_4] : memref<16x1024xf32, #tpu.memory_space<vmem>>, vector<16x1024xf32>
    %5 = arith.addf %3, %4 : vector<16x1024xf32>
    %c0_5 = arith.constant 0 : index
    %c0_6 = arith.constant 0 : index
    %6 = vector.load %arg4[%c0_5, %c0_6] : memref<16x1024xf32, #tpu.memory_space<vmem>>, vector<16x1024xf32>
    tpu.vector_store %arg4[%c0_5, %c0_6], %5 {strides = array<i32>} : memref<16x1024xf32, #tpu.memory_space<vmem>>, vector<16x1024xf32>,
    return
  }
  func.func @transform_0(%arg0: i32) -> (i32, i32) {
    %c0_i32 = arith.constant 0 : i32
    %c0_i32_0 = arith.constant 0 : i32
    return %arg0, %c0_i32 : i32, i32
  }
  func.func @transform_1(%arg0: i32) -> (i32, i32) {
    %c0_i32 = arith.constant 0 : i32
    %c0_i32_0 = arith.constant 0 : i32
    %c0_i32_1 = arith.constant 0 : i32
    return %c0_i32, %c0_i32_0 : i32, i32
  }
  func.func @transform_2(%arg0: i32) -> (i32, i32) {
    %c0_i32 = arith.constant 0 : i32
    %c0_i32_0 = arith.constant 0 : i32
    return %arg0, %c0_i32 : i32, i32
  }
  func.func @transform_3(%arg0: i32) -> (i32, i32) {
    %c0_i32 = arith.constant 0 : i32
    %c0_i32_0 = arith.constant 0 : i32
    return %arg0, %c0_i32 : i32, i32
  }
}

</mosaic_0001>

<bundles_post_ra>
// kernel: stven_forward.10
= control target key start
LH: loop header
LB: loop body
LE: loop exit
PB: predicated region body
PF: predicated region fallthrough
CT: control target
= control target key end

     0   :  { %s7336_s1 = inlined_call_operand.vmem [shape: bf16[1152,1024], index: 1, kind: input, shape index: {}]   ;;  %s7337_s0 = inlined_call_operand.vmem [shape: bf16[16,1152], index: 0, kind: input, shape index: {}]   ;;  %s7338_s2 = inlined_call_operand.vmem [shape: f32[16,1], index: 2, kind: input, shape index: {}]   ;;  %s7339_s3 = inlined_call_operand.vmem [shape: f32[16,1], index: 3, kind: input, shape index: {}]   ;;  %s7340_s4 = inlined_call_operand.vmem [shape: f32[16,1], index: 4, kind: input, shape index: {}]   ;;  %s7341_s5 = inlined_call_operand.vmem [shape: bf16[16,1024], index: 5, kind: output, shape index: {}]  }
   0x1   :  { %v31_v0 = vld [vmem:[%s7336_s1] sm:$0xff]  ;;  %v32_v2 = vld [vmem:[%s7336_s1 + $0x8] sm:$0xff] }
   0x2   :  { %v35_v1 = vld [vmem:[%s7336_s1 + $0x20] sm:$0xff]  ;;  %v36_v4 = vld [vmem:[%s7336_s1 + $0x28] sm:$0xff] }
   0x3   :  { %v4645_v3 = vcombine.high %v31_v0, %v35_v1  ;;  %v4644_v5 = vcombine.low %v31_v0, %v35_v1  ;;  %v39_v6 = vld [vmem:[%s7336_s1 + $0x40] sm:$0xff]  ;;  %v4647_v8 = vcombine.high %v32_v2, %v36_v4  ;;  %v4646_v9 = vcombine.low %v32_v2, %v36_v4  ;;  %v40_v11 = vld [vmem:[%s7336_s1 + $0x48] sm:$0xff] }
   0x4   :  { %v43_v7 = vld [vmem:[%s7336_s1 + $0x60] sm:$0xff]  ;;  %v44_v12 = vld [vmem:[%s7336_s1 + $0x68] sm:$0xff] }
   0x5   :  { %v4653_v10 = vcombine.high %v39_v6, %v43_v7  ;;  %v47_v13 = vld [vmem:[%s7336_s1 + $0x80] sm:$0xff]  ;;  %3545 = vmatprep.subr.bf16.mxu0 %v4645_v3  ;;  %v4655_v14 = vcombine.high %v40_v11, %v44_v12  ;;  %v48_v16 = vld [vmem:[%s7336_s1 + $0x88] sm:$0xff]  ;;  %3760 = vmatprep.subr.bf16.mxu1 %v4647_v8  ;;  %v4652_v18 = vcombine.low %v39_v6, %v43_v7 }
   0x6   :  { %v51_v15 = vld [vmem:[%s7336_s1 + $0xa0] sm:$0xff]  ;;  %v52_v17 = vld [vmem:[%s7336_s1 + $0xa8] sm:$0xff]  ;;  %3546 = vmatpush1.bf16.msra.mxu0 %v4644_v5  ;;  %3761 = vmatpush1.bf16.msra.mxu1 %v4646_v9  ;;  %v4654_v19 = vcombine.low %v40_v11, %v44_v12 }
   0x7   :  { %3547 = vmatprep.subr.bf16.mxu0 %v4653_v10  ;;  %v4661_v20 = vcombine.high %v47_v13, %v51_v15  ;;  %3762 = vmatprep.subr.bf16.mxu1 %v4655_v14  ;;  %v4663_v21 = vcombine.high %v48_v16, %v52_v17  ;;  %v55_v22 = vld [vmem:[%s7336_s1 + $0xc0] sm:$0xff]  ;;  %v56_v24 = vld [vmem:[%s7336_s1 + $0xc8] sm:$0xff]  ;;  %v4660_v26 = vcombine.low %v47_v13, %v51_v15 }
   0x8   :  { %v59_v23 = vld [vmem:[%s7336_s1 + $0xe0] sm:$0xff]  ;;  %v60_v25 = vld [vmem:[%s7336_s1 + $0xe8] sm:$0xff]  ;;  %v4662_v27 = vcombine.low %v48_v16, %v52_v17 }
   0x9   :  { %v4669_v28 = vcombine.high %v55_v22, %v59_v23  ;;  %v4671_v29 = vcombine.high %v56_v24, %v60_v25  ;;  %v63_v30 = vld [vmem:[%s7336_s1 + $0x100] sm:$0xff]  ;;  %v64_v32 = vld [vmem:[%s7336_s1 + $0x108] sm:$0xff]  ;;  %v4668_v34 = vcombine.low %v55_v22, %v59_v23  ;;  %v4670_v35 = vcombine.low %v56_v24, %v60_v25 }
   0xa   :  { %3548 = vmatpush1.bf16.msra.mxu0 %v4652_v18  ;;  %3763 = vmatpush1.bf16.msra.mxu1 %v4654_v19  ;;  %v67_v31 = vld [vmem:[%s7336_s1 + $0x120] sm:$0xff]  ;;  %v68_v33 = vld [vmem:[%s7336_s1 + $0x128] sm:$0xff] }
   0xb   :  { %3549 = vmatprep.subr.bf16.mxu0 %v4661_v20  ;;  %3764 = vmatprep.subr.bf16.mxu1 %v4663_v21  ;;  %v4677_v36 = vcombine.high %v63_v30, %v67_v31  ;;  %v4679_v37 = vcombine.high %v64_v32, %v68_v33  ;;  %v71_v38 = vld [vmem:[%s7336_s1 + $0x140] sm:$0xff]  ;;  %v72_v40 = vld [vmem:[%s7336_s1 + $0x148] sm:$0xff]  ;;  %v4676_v42 = vcombine.low %v63_v30, %v67_v31 }
   0xc   :  { %v75_v39 = vld [vmem:[%s7336_s1 + $0x160] sm:$0xff]  ;;  %v76_v41 = vld [vmem:[%s7336_s1 + $0x168] sm:$0xff]  ;;  %v4678_v43 = vcombine.low %v64_v32, %v68_v33 }
   0xd   :  { %v4685_v44 = vcombine.high %v71_v38, %v75_v39  ;;  %v4687_v45 = vcombine.high %v72_v40, %v76_v41  ;;  %v79_v46 = vld [vmem:[%s7336_s1 + $0x180] sm:$0xff]  ;;  %v80_v48 = vld [vmem:[%s7336_s1 + $0x188] sm:$0xff]  ;;  %v4684_v50 = vcombine.low %v71_v38, %v75_v39  ;;  %v4686_v51 = vcombine.low %v72_v40, %v76_v41 }
   0xe   :  { %3550 = vmatpush1.bf16.msra.mxu0 %v4660_v26  ;;  %3765 = vmatpush1.bf16.msra.mxu1 %v4662_v27  ;;  %v83_v47 = vld [vmem:[%s7336_s1 + $0x1a0] sm:$0xff]  ;;  %v84_v49 = vld [vmem:[%s7336_s1 + $0x1a8] sm:$0xff] }
   0xf   :  { %3551 = vmatprep.subr.bf16.mxu0 %v4669_v28  ;;  %3766 = vmatprep.subr.bf16.mxu1 %v4671_v29  ;;  %v4693_v52 = vcombine.high %v79_v46, %v83_v47  ;;  %v4695_v53 = vcombine.high %v80_v48, %v84_v49  ;;  %v87_v54 = vld [vmem:[%s7336_s1 + $0x1c0] sm:$0xff]  ;;  %v88_v57 = vld [vmem:[%s7336_s1 + $0x1c8] sm:$0xff]  ;;  %v4692_v59 = vcombine.low %v79_v46, %v83_v47 }
  0x10   :  { %v91_v55 = vld [vmem:[%s7336_s1 + $0x1e0] sm:$0xff]  ;;  %v92_v58 = vld [vmem:[%s7336_s1 + $0x1e8] sm:$0xff]  ;;  %v4694_v60 = vcombine.low %v80_v48, %v84_v49 }
  0x11   :  { %v5319_v56 = vld [vmem:[%s7337_s0 + $0x4] ss:$36 sps:$4 sm:$0xff]   ;;  %v4701_v61 = vcombine.high %v87_v54, %v91_v55  ;;  %v4703_v62 = vcombine.high %v88_v57, %v92_v58  ;;  %v4700_v3 = vcombine.low %v87_v54, %v91_v55  ;;  %v4702_v4 = vcombine.low %v88_v57, %v92_v58 }
  0x12   :  { %3552 = vmatpush1.bf16.msra.mxu0 %v4668_v34  ;;  %3767 = vmatpush1.bf16.msra.mxu1 %v4670_v35  ;;  %v95_v63 = vld [vmem:[%s7336_s1 + $0x200] sm:$0xff]  ;;  %v96_v1 = vld [vmem:[%s7336_s1 + $0x208] sm:$0xff] }
  0x13   :  { %3553 = vmatprep.subr.bf16.mxu0 %v4677_v36  ;;  %3768 = vmatprep.subr.bf16.mxu1 %v4679_v37  ;;  %v99_v0 = vld [vmem:[%s7336_s1 + $0x220] sm:$0xff]  ;;  %v100_v2 = vld [vmem:[%s7336_s1 + $0x228] sm:$0xff] }
  0x14   :  { %3577 = vmatprep.mubr.bf16.mxu0 %v5319_v56  ;;  %3792 = vmatprep.mubr.bf16.mxu1 %v5319_v56  ;;  %v4709_v5 = vcombine.high %v95_v63, %v99_v0  ;;  %v4711_v6 = vcombine.high %v96_v1, %v100_v2  ;;  %v103_v7 = vld [vmem:[%s7336_s1 + $0x240] sm:$0xff]  ;;  %v104_v9 = vld [vmem:[%s7336_s1 + $0x248] sm:$0xff]  ;;  %v4708_v11 = vcombine.low %v95_v63, %v99_v0 }
  0x15   :  { %v107_v8 = vld [vmem:[%s7336_s1 + $0x260] sm:$0xff]  ;;  %v108_v10 = vld [vmem:[%s7336_s1 + $0x268] sm:$0xff]  ;;  %v4710_v12 = vcombine.low %v96_v1, %v100_v2 }
  0x16   :  { %3554 = vmatpush1.bf16.msra.mxu0 %v4676_v42  ;;  %3769 = vmatpush1.bf16.msra.mxu1 %v4678_v43  ;;  %v4717_v13 = vcombine.high %v103_v7, %v107_v8  ;;  %v4719_v14 = vcombine.high %v104_v9, %v108_v10  ;;  %v111_v15 = vld [vmem:[%s7336_s1 + $0x280] sm:$0xff]  ;;  %v112_v17 = vld [vmem:[%s7336_s1 + $0x288] sm:$0xff]  ;;  %v4716_v19 = vcombine.low %v103_v7, %v107_v8 }
  0x17   :  { %3555 = vmatprep.subr.bf16.mxu0 %v4685_v44  ;;  %3770 = vmatprep.subr.bf16.mxu1 %v4687_v45  ;;  %v115_v16 = vld [vmem:[%s7336_s1 + $0x2a0] sm:$0xff]  ;;  %v116_v18 = vld [vmem:[%s7336_s1 + $0x2a8] sm:$0xff]  ;;  %v4718_v20 = vcombine.low %v104_v9, %v108_v10 }
  0x18   :  { %v4725_v21 = vcombine.high %v111_v15, %v115_v16  ;;  %v4727_v22 = vcombine.high %v112_v17, %v116_v18  ;;  %v119_v23 = vld [vmem:[%s7336_s1 + $0x2c0] sm:$0xff]  ;;  %v120_v25 = vld [vmem:[%s7336_s1 + $0x2c8] sm:$0xff]  ;;  %v4724_v27 = vcombine.low %v111_v15, %v115_v16  ;;  %v4726_v28 = vcombine.low %v112_v17, %v116_v18 }
  0x19   :  { %v123_v24 = vld [vmem:[%s7336_s1 + $0x2e0] sm:$0xff]  ;;  %v124_v26 = vld [vmem:[%s7336_s1 + $0x2e8] sm:$0xff] }
  0x1a   :  { %3556 = vmatpush1.bf16.msra.mxu0 %v4684_v50  ;;  %3771 = vmatpush1.bf16.msra.mxu1 %v4686_v51  ;;  %v4733_v29 = vcombine.high %v119_v23, %v123_v24  ;;  %v4735_v30 = vcombine.high %v120_v25, %v124_v26  ;;  %v127_v31 = vld [vmem:[%s7336_s1 + $0x300] sm:$0xff]  ;;  %v128_v33 = vld [vmem:[%s7336_s1 + $0x308] sm:$0xff]  ;;  %v4732_v35 = vcombine.low %v119_v23, %v123_v24 }
  0x1b   :  { %3557 = vmatprep.subr.bf16.mxu0 %v4693_v52  ;;  %3772 = vmatprep.subr.bf16.mxu1 %v4695_v53  ;;  %v131_v32 = vld [vmem:[%s7336_s1 + $0x320] sm:$0xff]  ;;  %v132_v34 = vld [vmem:[%s7336_s1 + $0x328] sm:$0xff]  ;;  %v4734_v36 = vcombine.low %v120_v25, %v124_v26 }
  0x1c   :  { %v4741_v37 = vcombine.high %v127_v31, %v131_v32  ;;  %v4743_v38 = vcombine.high %v128_v33, %v132_v34  ;;  %v135_v39 = vld [vmem:[%s7336_s1 + $0x340] sm:$0xff]  ;;  %v136_v41 = vld [vmem:[%s7336_s1 + $0x348] sm:$0xff]  ;;  %v4740_v43 = vcombine.low %v127_v31, %v131_v32  ;;  %v4742_v44 = vcombine.low %v128_v33, %v132_v34 }
  0x1d   :  { %v139_v40 = vld [vmem:[%s7336_s1 + $0x360] sm:$0xff]  ;;  %v140_v42 = vld [vmem:[%s7336_s1 + $0x368] sm:$0xff] }
  0x1e   :  { %3558 = vmatpush1.bf16.msra.mxu0 %v4692_v59  ;;  %3773 = vmatpush1.bf16.msra.mxu1 %v4694_v60  ;;  %v4749_v45 = vcombine.high %v135_v39, %v139_v40  ;;  %v4751_v46 = vcombine.high %v136_v41, %v140_v42  ;;  %v143_v47 = vld [vmem:[%s7336_s1 + $0x380] sm:$0xff]  ;;  %v144_v49 = vld [vmem:[%s7336_s1 + $0x388] sm:$0xff]  ;;  %v4748_v51 = vcombine.low %v135_v39, %v139_v40 }
  0x1f   :  { %3559 = vmatprep.subr.bf16.mxu0 %v4701_v61  ;;  %3774 = vmatprep.subr.bf16.mxu1 %v4703_v62  ;;  %v147_v48 = vld [vmem:[%s7336_s1 + $0x3a0] sm:$0xff]  ;;  %v148_v50 = vld [vmem:[%s7336_s1 + $0x3a8] sm:$0xff]  ;;  %v4750_v52 = vcombine.low %v136_v41, %v140_v42 }
  0x20   :  { %v4757_v53 = vcombine.high %v143_v47, %v147_v48  ;;  %v4759_v54 = vcombine.high %v144_v49, %v148_v50  ;;  %v151_v55 = vld [vmem:[%s7336_s1 + $0x3c0] sm:$0xff]  ;;  %v152_v57 = vld [vmem:[%s7336_s1 + $0x3c8] sm:$0xff]  ;;  %v4756_v59 = vcombine.low %v143_v47, %v147_v48  ;;  %v4758_v60 = vcombine.low %v144_v49, %v148_v50 }
  0x21   :  { %v155_v56 = vld [vmem:[%s7336_s1 + $0x3e0] sm:$0xff]  ;;  %v156_v58 = vld [vmem:[%s7336_s1 + $0x3e8] sm:$0xff] }
  0x22   :  { %3560 = vmatpush1.bf16.msra.mxu0 %v4700_v3  ;;  %3775 = vmatpush1.bf16.msra.mxu1 %v4702_v4  ;;  %v4765_v61 = vcombine.high %v151_v55, %v155_v56  ;;  %v4767_v62 = vcombine.high %v152_v57, %v156_v58  ;;  %v159_v63 = vld [vmem:[%s7336_s1 + $0x400] sm:$0xff]  ;;  %v160_v1 = vld [vmem:[%s7336_s1 + $0x408] sm:$0xff]  ;;  %v4764_v3 = vcombine.low %v151_v55, %v155_v56 }
  0x23   :  { %3561 = vmatprep.subr.bf16.mxu0 %v4709_v5  ;;  %3776 = vmatprep.subr.bf16.mxu1 %v4711_v6  ;;  %v163_v0 = vld [vmem:[%s7336_s1 + $0x420] sm:$0xff]  ;;  %v164_v2 = vld [vmem:[%s7336_s1 + $0x428] sm:$0xff]  ;;  %v4766_v4 = vcombine.low %v152_v57, %v156_v58 }
  0x24   :  { %v4773_v5 = vcombine.high %v159_v63, %v163_v0  ;;  %v4775_v6 = vcombine.high %v160_v1, %v164_v2  ;;  %v167_v7 = vld [vmem:[%s7336_s1 + $0x440] sm:$0xff]  ;;  %v168_v10 = vld [vmem:[%s7336_s1 + $0x448] sm:$0xff] }
  0x25   :  { %v171_v8 = vld [vmem:[%s7336_s1 + $0x460] sm:$0xff]  ;;  %v5322_v18 = vld [vmem:[%s7337_s0 + $0xc] ss:$36 sps:$4 sm:$0xff]  }
  0x26   :  { %3562 = vmatpush1.bf16.msra.mxu0 %v4708_v11  ;;  %3777 = vmatpush1.bf16.msra.mxu1 %v4710_v12  ;;  %v5321_v9 = vld [vmem:[%s7337_s0] ss:$36 sps:$4 sm:$0xff]   ;;  %v172_v11 = vld [vmem:[%s7336_s1 + $0x468] sm:$0xff]  ;;  %v4772_v12 = vcombine.low %v159_v63, %v163_v0 }
  0x27   :  { %3563 = vmatprep.subr.bf16.mxu0 %v4717_v13  ;;  %3778 = vmatprep.subr.bf16.mxu1 %v4719_v14  ;;  %v4774_v13 = vcombine.low %v160_v1, %v164_v2  ;;  %v4781_v14 = vcombine.high %v167_v7, %v171_v8  ;;  %v175_v15 = vld [vmem:[%s7336_s1 + $0x480] sm:$0xff]  ;;  %v4783_v16 = vcombine.high %v168_v10, %v172_v11 }
  0x28   :  { %v179_v17 = vld [vmem:[%s7336_s1 + $0x4a0] sm:$0xff] }
  0x29   :  { %v4789_v23 = vcombine.high %v175_v15, %v179_v17  ;;  %v183_v24 = vld [vmem:[%s7336_s1 + $0x4c0] sm:$0xff] }
  0x2a   :  { %3564 = vmatpush1.bf16.msra.mxu0 %v4716_v19  ;;  %3779 = vmatpush1.bf16.msra.mxu1 %v4718_v20  ;;  %v176_v19 = vld [vmem:[%s7336_s1 + $0x488] sm:$0xff]  ;;  %v187_v25 = vld [vmem:[%s7336_s1 + $0x4e0] sm:$0xff] }
  0x2b   :  { %3565 = vmatprep.subr.bf16.mxu0 %v4725_v21  ;;  %3780 = vmatprep.subr.bf16.mxu1 %v4727_v22  ;;  %v180_v20 = vld [vmem:[%s7336_s1 + $0x4a8] sm:$0xff]  ;;  %v4780_v21 = vcombine.low %v167_v7, %v171_v8  ;;  %v4782_v22 = vcombine.low %v168_v10, %v172_v11  ;;  %v4797_v31 = vcombine.high %v183_v24, %v187_v25  ;;  %v191_v33 = vld [vmem:[%s7336_s1 + $0x500] sm:$0xff] }
  0x2c   :  { %v4791_v26 = vcombine.high %v176_v19, %v180_v20  ;;  %v195_v34 = vld [vmem:[%s7336_s1 + $0x520] sm:$0xff]  ;;  %v232_v11 = vld [vmem:[%s7336_s1 + $0x648] sm:$0xff] }
  0x2d   :  { %v4805_v39 = vcombine.high %v191_v33, %v195_v34  ;;  %v199_v41 = vld [vmem:[%s7336_s1 + $0x540] sm:$0xff] }
  0x2e   :  { %3566 = vmatpush1.bf16.msra.mxu0 %v4724_v27  ;;  %3781 = vmatpush1.bf16.msra.mxu1 %v4726_v28  ;;  %v184_v27 = vld [vmem:[%s7336_s1 + $0x4c8] sm:$0xff]  ;;  %v203_v42 = vld [vmem:[%s7336_s1 + $0x560] sm:$0xff] }
  0x2f   :  { %3567 = vmatprep.subr.bf16.mxu0 %v4733_v29  ;;  %3782 = vmatprep.subr.bf16.mxu1 %v4735_v30  ;;  %v188_v28 = vld [vmem:[%s7336_s1 + $0x4e8] sm:$0xff]  ;;  %v4788_v29 = vcombine.low %v175_v15, %v179_v17  ;;  %v4790_v30 = vcombine.low %v176_v19, %v180_v20  ;;  %v4813_v47 = vcombine.high %v199_v41, %v203_v42  ;;  %v207_v49 = vld [vmem:[%s7336_s1 + $0x580] sm:$0xff] }
  0x30   :  { %v4799_v32 = vcombine.high %v184_v27, %v188_v28  ;;  %v211_v50 = vld [vmem:[%s7336_s1 + $0x5a0] sm:$0xff]  ;;  %v240_v19 = vld [vmem:[%s7336_s1 + $0x688] sm:$0xff] }
  0x31   :  { %v4821_v55 = vcombine.high %v207_v49, %v211_v50  ;;  %v215_v57 = vld [vmem:[%s7336_s1 + $0x5c0] sm:$0xff]  ;;  %v244_v20 = vld [vmem:[%s7336_s1 + $0x6a8] sm:$0xff] }
  0x32   :  { %3568 = vmatpush1.bf16.msra.mxu0 %v4732_v35  ;;  %3783 = vmatpush1.bf16.msra.mxu1 %v4734_v36  ;;  %v192_v35 = vld [vmem:[%s7336_s1 + $0x508] sm:$0xff]  ;;  %v219_v58 = vld [vmem:[%s7336_s1 + $0x5e0] sm:$0xff] }
  0x33   :  { %3569 = vmatprep.subr.bf16.mxu0 %v4741_v37  ;;  %3784 = vmatprep.subr.bf16.mxu1 %v4743_v38  ;;  %v196_v36 = vld [vmem:[%s7336_s1 + $0x528] sm:$0xff]  ;;  %v4796_v37 = vcombine.low %v183_v24, %v187_v25  ;;  %v4798_v38 = vcombine.low %v184_v27, %v188_v28  ;;  %v4829_v63 = vcombine.high %v215_v57, %v219_v58  ;;  %v223_v1 = vld [vmem:[%s7336_s1 + $0x600] sm:$0xff] }
  0x34   :  { %v4807_v40 = vcombine.high %v192_v35, %v196_v36  ;;  %v227_v2 = vld [vmem:[%s7336_s1 + $0x620] sm:$0xff]  ;;  %v4855_v24 = vcombine.high %v240_v19, %v244_v20  ;;  %v248_v27 = vld [vmem:[%s7336_s1 + $0x6c8] sm:$0xff] }
  0x35   :  { %v4837_v7 = vcombine.high %v223_v1, %v227_v2  ;;  %v235_v10 = vld [vmem:[%s7336_s1 + $0x660] sm:$0xff]  ;;  %v252_v28 = vld [vmem:[%s7336_s1 + $0x6e8] sm:$0xff] }
  0x36   :  { %3570 = vmatpush1.bf16.msra.mxu0 %v4740_v43  ;;  %3785 = vmatpush1.bf16.msra.mxu1 %v4742_v44  ;;  %v200_v43 = vld [vmem:[%s7336_s1 + $0x548] sm:$0xff]  ;;  %v239_v17 = vld [vmem:[%s7336_s1 + $0x680] sm:$0xff] }
  0x37   :  { %3571 = vmatprep.subr.bf16.mxu0 %v4749_v45  ;;  %3786 = vmatprep.subr.bf16.mxu1 %v4751_v46  ;;  %v204_v44 = vld [vmem:[%s7336_s1 + $0x568] sm:$0xff]  ;;  %v4804_v45 = vcombine.low %v191_v33, %v195_v34  ;;  %v4806_v46 = vcombine.low %v192_v35, %v196_v36  ;;  %v247_v25 = vld [vmem:[%s7336_s1 + $0x6c0] sm:$0xff] }
  0x38   :  { %v4815_v48 = vcombine.high %v200_v43, %v204_v44  ;;  %v255_v33 = vld [vmem:[%s7336_s1 + $0x700] sm:$0xff]  ;;  %v256_v35 = vld [vmem:[%s7336_s1 + $0x708] sm:$0xff] }
  0x39   :  { %v259_v34 = vld [vmem:[%s7336_s1 + $0x720] sm:$0xff]  ;;  %v260_v36 = vld [vmem:[%s7336_s1 + $0x728] sm:$0xff] }
  0x3a   :  { %3572 = vmatpush1.bf16.msra.mxu0 %v4748_v51  ;;  %3787 = vmatpush1.bf16.msra.mxu1 %v4750_v52  ;;  %v208_v51 = vld [vmem:[%s7336_s1 + $0x588] sm:$0xff] }
  0x3b   :  { %3573 = vmatprep.subr.bf16.mxu0 %v4757_v53  ;;  %3788 = vmatprep.subr.bf16.mxu1 %v4759_v54  ;;  %v212_v52 = vld [vmem:[%s7336_s1 + $0x5a8] sm:$0xff]  ;;  %v4812_v53 = vcombine.low %v199_v41, %v203_v42  ;;  %v4814_v54 = vcombine.low %v200_v43, %v204_v44  ;;  %v263_v41 = vld [vmem:[%s7336_s1 + $0x740] sm:$0xff] }
  0x3c   :  { %v4823_v56 = vcombine.high %v208_v51, %v212_v52  ;;  %v267_v42 = vld [vmem:[%s7336_s1 + $0x760] sm:$0xff]  ;;  %v264_v43 = vld [vmem:[%s7336_s1 + $0x748] sm:$0xff] }
  0x3d   :  { %v268_v44 = vld [vmem:[%s7336_s1 + $0x768] sm:$0xff] }
  0x3e   :  { %3574 = vmatpush1.bf16.msra.mxu0 %v4756_v59  ;;  %3789 = vmatpush1.bf16.msra.mxu1 %v4758_v60  ;;  %v216_v59 = vld [vmem:[%s7336_s1 + $0x5c8] sm:$0xff] }
  0x3f   :  { %3575 = vmatprep.subr.bf16.mxu0 %v4765_v61  ;;  %3790 = vmatprep.subr.bf16.mxu1 %v4767_v62  ;;  %v220_v60 = vld [vmem:[%s7336_s1 + $0x5e8] sm:$0xff]  ;;  %v4820_v61 = vcombine.low %v207_v49, %v211_v50  ;;  %v4822_v62 = vcombine.low %v208_v51, %v212_v52  ;;  %v271_v49 = vld [vmem:[%s7336_s1 + $0x780] sm:$0xff] }
  0x40   :  { %v4831_v0 = vcombine.high %v216_v59, %v220_v60  ;;  %v275_v50 = vld [vmem:[%s7336_s1 + $0x7a0] sm:$0xff]  ;;  %v272_v51 = vld [vmem:[%s7336_s1 + $0x788] sm:$0xff] }
  0x41   :  { %v276_v52 = vld [vmem:[%s7336_s1 + $0x7a8] sm:$0xff] }
  0x42   :  { %3576 = vmatpush1.bf16.msra.mxu0 %v4764_v3  ;;  %3791 = vmatpush1.bf16.msra.mxu1 %v4766_v4  ;;  %v224_v3 = vld [vmem:[%s7336_s1 + $0x608] sm:$0xff] }
  0x43   :  { %3588 = vmatprep.subr.bf16.mxu0 %v4773_v5  ;;  %3803 = vmatprep.subr.bf16.mxu1 %v4775_v6  ;;  %v228_v4 = vld [vmem:[%s7336_s1 + $0x628] sm:$0xff]  ;;  %v4828_v5 = vcombine.low %v215_v57, %v219_v58  ;;  %v4830_v6 = vcombine.low %v216_v59, %v220_v60  ;;  %v279_v57 = vld [vmem:[%s7336_s1 + $0x7c0] sm:$0xff] }
  0x44   :  { %v4839_v8 = vcombine.high %v224_v3, %v228_v4  ;;  %v283_v58 = vld [vmem:[%s7336_s1 + $0x7e0] sm:$0xff]  ;;  %v280_v59 = vld [vmem:[%s7336_s1 + $0x7c8] sm:$0xff] }
  0x45   :  { %3578 = vmatmul.mubr.bf16.vlgmr.msra.gmra.mrb[0].mxu0 %v5321_v9  ;;  %3793 = vmatmul.mubr.bf16.vlgmr.msra.gmra.mrb[0].mxu1 %v5321_v9  ;;  %v231_v9 = vld [vmem:[%s7336_s1 + $0x640] sm:$0xff]  ;;  %v284_v60 = vld [vmem:[%s7336_s1 + $0x7e8] sm:$0xff] }
  0x46   :  { %3589 = vmatpush1.bf16.msra.mxu0 %v4772_v12  ;;  %3804 = vmatpush1.bf16.msra.mxu1 %v4774_v13  ;;  %v236_v12 = vld [vmem:[%s7336_s1 + $0x668] sm:$0xff]  ;;  %v4836_v13 = vcombine.low %v223_v1, %v227_v2  ;;  %v4845_v15 = vcombine.high %v231_v9, %v235_v10  ;;  %v287_v1 = vld [vmem:[%s7336_s1 + $0x800] sm:$0xff] }
  0x47   :  { %3590 = vmatprep.subr.bf16.mxu0 %v4781_v14  ;;  %3805 = vmatprep.subr.bf16.mxu1 %v4783_v16  ;;  %v4838_v14 = vcombine.low %v224_v3, %v228_v4  ;;  %v4847_v16 = vcombine.high %v232_v11, %v236_v12  ;;  %v291_v2 = vld [vmem:[%s7336_s1 + $0x820] sm:$0xff]  ;;  %v288_v3 = vld [vmem:[%s7336_s1 + $0x808] sm:$0xff] }
  0x48   :  { %3620 = vmatprep.mubr.bf16.mxu0 %v5322_v18  ;;  %3835 = vmatprep.mubr.bf16.mxu1 %v5322_v18  ;;  %v243_v18 = vld [vmem:[%s7336_s1 + $0x6a0] sm:$0xff]  ;;  %v292_v4 = vld [vmem:[%s7336_s1 + $0x828] sm:$0xff] }
  0x4a   :  { %3591 = vmatpush1.bf16.msra.mxu0 %v4780_v21  ;;  %3806 = vmatpush1.bf16.msra.mxu1 %v4782_v22  ;;  %v4844_v21 = vcombine.low %v231_v9, %v235_v10  ;;  %v4846_v22 = vcombine.low %v232_v11, %v236_v12  ;;  %v295_v9 = vld [vmem:[%s7336_s1 + $0x840] sm:$0xff]  ;;  %v5324_v11 = vld [vmem:[%s7337_s0 + $0x8] ss:$36 sps:$4 sm:$0xff]  }
  0x4b   :  { %3592 = vmatprep.subr.bf16.mxu0 %v4789_v23  ;;  %3807 = vmatprep.subr.bf16.mxu1 %v4791_v26  ;;  %v4853_v23 = vcombine.high %v239_v17, %v243_v18  ;;  %v251_v26 = vld [vmem:[%s7336_s1 + $0x6e0] sm:$0xff]  ;;  %v296_v12 = vld [vmem:[%s7336_s1 + $0x848] sm:$0xff] }
  0x4c   :  { %v299_v10 = vld [vmem:[%s7336_s1 + $0x860] sm:$0xff] }
  0x4e   :  { %3593 = vmatpush1.bf16.msra.mxu0 %v4788_v29  ;;  %3808 = vmatpush1.bf16.msra.mxu1 %v4790_v30  ;;  %v4852_v29 = vcombine.low %v239_v17, %v243_v18  ;;  %v4854_v30 = vcombine.low %v240_v19, %v244_v20  ;;  %v303_v18 = vld [vmem:[%s7336_s1 + $0x880] sm:$0xff]  ;;  %v5325_v20 = vld [vmem:[%s7337_s0 + $0x14] ss:$36 sps:$4 sm:$0xff]  }
  0x4f   :  { %3594 = vmatprep.subr.bf16.mxu0 %v4797_v31  ;;  %3809 = vmatprep.subr.bf16.mxu1 %v4799_v32  ;;  %v4861_v31 = vcombine.high %v247_v25, %v251_v26  ;;  %v4863_v32 = vcombine.high %v248_v27, %v252_v28  ;;  %v307_v19 = vld [vmem:[%s7336_s1 + $0x8a0] sm:$0xff] }
  0x52   :  { %3595 = vmatpush1.bf16.msra.mxu0 %v4796_v37  ;;  %3810 = vmatpush1.bf16.msra.mxu1 %v4798_v38  ;;  %v4860_v37 = vcombine.low %v247_v25, %v251_v26  ;;  %v4862_v38 = vcombine.low %v248_v27, %v252_v28  ;;  %v4917_v25 = vcombine.high %v303_v18, %v307_v19  ;;  %v311_v27 = vld [vmem:[%s7336_s1 + $0x8c0] sm:$0xff] }
  0x53   :  { %3596 = vmatprep.subr.bf16.mxu0 %v4805_v39  ;;  %3811 = vmatprep.subr.bf16.mxu1 %v4807_v40  ;;  %v4869_v39 = vcombine.high %v255_v33, %v259_v34  ;;  %v4871_v40 = vcombine.high %v256_v35, %v260_v36  ;;  %v315_v28 = vld [vmem:[%s7336_s1 + $0x8e0] sm:$0xff] }
  0x56   :  { %3597 = vmatpush1.bf16.msra.mxu0 %v4804_v45  ;;  %3812 = vmatpush1.bf16.msra.mxu1 %v4806_v46  ;;  %v4868_v45 = vcombine.low %v255_v33, %v259_v34  ;;  %v4870_v46 = vcombine.low %v256_v35, %v260_v36  ;;  %v4925_v33 = vcombine.high %v311_v27, %v315_v28  ;;  %v319_v35 = vld [vmem:[%s7336_s1 + $0x900] sm:$0xff] }
  0x57   :  { %3598 = vmatprep.subr.bf16.mxu0 %v4813_v47  ;;  %3813 = vmatprep.subr.bf16.mxu1 %v4815_v48  ;;  %v4877_v47 = vcombine.high %v263_v41, %v267_v42  ;;  %v4879_v48 = vcombine.high %v264_v43, %v268_v44  ;;  %v323_v36 = vld [vmem:[%s7336_s1 + $0x920] sm:$0xff] }
  0x5a   :  { %3599 = vmatpush1.bf16.msra.mxu0 %v4812_v53  ;;  %3814 = vmatpush1.bf16.msra.mxu1 %v4814_v54  ;;  %v4876_v53 = vcombine.low %v263_v41, %v267_v42  ;;  %v4878_v54 = vcombine.low %v264_v43, %v268_v44  ;;  %v4933_v41 = vcombine.high %v319_v35, %v323_v36  ;;  %v327_v43 = vld [vmem:[%s7336_s1 + $0x940] sm:$0xff] }
  0x5b   :  { %3600 = vmatprep.subr.bf16.mxu0 %v4821_v55  ;;  %3815 = vmatprep.subr.bf16.mxu1 %v4823_v56  ;;  %v4885_v55 = vcombine.high %v271_v49, %v275_v50  ;;  %v4887_v56 = vcombine.high %v272_v51, %v276_v52  ;;  %v331_v44 = vld [vmem:[%s7336_s1 + $0x960] sm:$0xff] }
  0x5e   :  { %3601 = vmatpush1.bf16.msra.mxu0 %v4820_v61  ;;  %3816 = vmatpush1.bf16.msra.mxu1 %v4822_v62  ;;  %v4884_v61 = vcombine.low %v271_v49, %v275_v50  ;;  %v4886_v62 = vcombine.low %v272_v51, %v276_v52  ;;  %v4941_v49 = vcombine.high %v327_v43, %v331_v44  ;;  %v335_v51 = vld [vmem:[%s7336_s1 + $0x980] sm:$0xff] }
  0x5f   :  { %3602 = vmatprep.subr.bf16.mxu0 %v4829_v63  ;;  %3817 = vmatprep.subr.bf16.mxu1 %v4831_v0  ;;  %v4893_v63 = vcombine.high %v279_v57, %v283_v58  ;;  %v4895_v0 = vcombine.high %v280_v59, %v284_v60  ;;  %v339_v52 = vld [vmem:[%s7336_s1 + $0x9a0] sm:$0xff] }
  0x62   :  { %3603 = vmatpush1.bf16.msra.mxu0 %v4828_v5  ;;  %3818 = vmatpush1.bf16.msra.mxu1 %v4830_v6  ;;  %v4892_v5 = vcombine.low %v279_v57, %v283_v58  ;;  %v4894_v6 = vcombine.low %v280_v59, %v284_v60  ;;  %v4949_v57 = vcombine.high %v335_v51, %v339_v52  ;;  %v343_v59 = vld [vmem:[%s7336_s1 + $0x9c0] sm:$0xff] }
  0x63   :  { %3604 = vmatprep.subr.bf16.mxu0 %v4837_v7  ;;  %3819 = vmatprep.subr.bf16.mxu1 %v4839_v8  ;;  %v4901_v7 = vcombine.high %v287_v1, %v291_v2  ;;  %v4903_v8 = vcombine.high %v288_v3, %v292_v4  ;;  %v347_v60 = vld [vmem:[%s7336_s1 + $0x9e0] sm:$0xff] }
  0x66   :  { %3605 = vmatpush1.bf16.msra.mxu0 %v4836_v13  ;;  %3820 = vmatpush1.bf16.msra.mxu1 %v4838_v14  ;;  %v300_v13 = vld [vmem:[%s7336_s1 + $0x868] sm:$0xff]  ;;  %v4900_v14 = vcombine.low %v287_v1, %v291_v2  ;;  %v4957_v1 = vcombine.high %v343_v59, %v347_v60 }
  0x67   :  { %3606 = vmatprep.subr.bf16.mxu0 %v4845_v15  ;;  %3821 = vmatprep.subr.bf16.mxu1 %v4847_v16  ;;  %v4902_v15 = vcombine.low %v288_v3, %v292_v4  ;;  %v4909_v16 = vcombine.high %v295_v9, %v299_v10  ;;  %v4911_v17 = vcombine.high %v296_v12, %v300_v13  ;;  %v351_v3 = vld [vmem:[%s7336_s1 + $0xa00] sm:$0xff] }
  0x68   :  { %v355_v4 = vld [vmem:[%s7336_s1 + $0xa20] sm:$0xff] }
  0x6a   :  { %3607 = vmatpush1.bf16.msra.mxu0 %v4844_v21  ;;  %3822 = vmatpush1.bf16.msra.mxu1 %v4846_v22  ;;  %v304_v21 = vld [vmem:[%s7336_s1 + $0x888] sm:$0xff] }
  0x6b   :  { %3608 = vmatprep.subr.bf16.mxu0 %v4853_v23  ;;  %3823 = vmatprep.subr.bf16.mxu1 %v4855_v24  ;;  %v308_v22 = vld [vmem:[%s7336_s1 + $0x8a8] sm:$0xff]  ;;  %v4908_v23 = vcombine.low %v295_v9, %v299_v10  ;;  %v4910_v24 = vcombine.low %v296_v12, %v300_v13  ;;  %v4965_v9 = vcombine.high %v351_v3, %v355_v4  ;;  %v363_v12 = vld [vmem:[%s7336_s1 + $0xa60] sm:$0xff] }
  0x6c   :  { %v4919_v26 = vcombine.high %v304_v21, %v308_v22  ;;  %v360_v13 = vld [vmem:[%s7336_s1 + $0xa48] sm:$0xff] }
  0x6e   :  { %3609 = vmatpush1.bf16.msra.mxu0 %v4852_v29  ;;  %3824 = vmatpush1.bf16.msra.mxu1 %v4854_v30  ;;  %v312_v29 = vld [vmem:[%s7336_s1 + $0x8c8] sm:$0xff] }
  0x6f   :  { %3610 = vmatprep.subr.bf16.mxu0 %v4861_v31  ;;  %3825 = vmatprep.subr.bf16.mxu1 %v4863_v32  ;;  %v316_v30 = vld [vmem:[%s7336_s1 + $0x8e8] sm:$0xff]  ;;  %v4916_v31 = vcombine.low %v303_v18, %v307_v19  ;;  %v4918_v32 = vcombine.low %v304_v21, %v308_v22  ;;  %v367_v19 = vld [vmem:[%s7336_s1 + $0xa80] sm:$0xff]  ;;  %v5345_v21 = vmov 0  }
  0x70   :  { %v4927_v34 = vcombine.high %v312_v29, %v316_v30  ;;  %5317 = vset.pattern.permute.xlu0 %v5345_v21  ;;  %v368_v22 = vld [vmem:[%s7336_s1 + $0xa88] sm:$0xff]  ;;  %5318 = vset.pattern.permute.xlu1 %v5345_v21 }
  0x72   :  { %3611 = vmatpush1.bf16.msra.mxu0 %v4860_v37  ;;  %3826 = vmatpush1.bf16.msra.mxu1 %v4862_v38  ;;  %v320_v37 = vld [vmem:[%s7336_s1 + $0x908] sm:$0xff] }
  0x73   :  { %3612 = vmatprep.subr.bf16.mxu0 %v4869_v39  ;;  %3827 = vmatprep.subr.bf16.mxu1 %v4871_v40  ;;  %v324_v38 = vld [vmem:[%s7336_s1 + $0x928] sm:$0xff]  ;;  %v4924_v39 = vcombine.low %v311_v27, %v315_v28  ;;  %v4926_v40 = vcombine.low %v312_v29, %v316_v30  ;;  %v375_v28 = vld [vmem:[%s7336_s1 + $0xac0] sm:$0xff] }
  0x74   :  { %v4935_v42 = vcombine.high %v320_v37, %v324_v38  ;;  %v379_v29 = vld [vmem:[%s7336_s1 + $0xae0] sm:$0xff]  ;;  %v376_v30 = vld [vmem:[%s7336_s1 + $0xac8] sm:$0xff] }
  0x76   :  { %3613 = vmatpush1.bf16.msra.mxu0 %v4868_v45  ;;  %3828 = vmatpush1.bf16.msra.mxu1 %v4870_v46  ;;  %v328_v45 = vld [vmem:[%s7336_s1 + $0x948] sm:$0xff] }
  0x77   :  { %3614 = vmatprep.subr.bf16.mxu0 %v4877_v47  ;;  %3829 = vmatprep.subr.bf16.mxu1 %v4879_v48  ;;  %v332_v46 = vld [vmem:[%s7336_s1 + $0x968] sm:$0xff]  ;;  %v4932_v47 = vcombine.low %v319_v35, %v323_v36  ;;  %v4934_v48 = vcombine.low %v320_v37, %v324_v38  ;;  %v383_v36 = vld [vmem:[%s7336_s1 + $0xb00] sm:$0xff] }
  0x78   :  { %v4943_v50 = vcombine.high %v328_v45, %v332_v46  ;;  %v387_v37 = vld [vmem:[%s7336_s1 + $0xb20] sm:$0xff]  ;;  %v384_v38 = vld [vmem:[%s7336_s1 + $0xb08] sm:$0xff] }
  0x7a   :  { %3615 = vmatpush1.bf16.msra.mxu0 %v4876_v53  ;;  %3830 = vmatpush1.bf16.msra.mxu1 %v4878_v54  ;;  %v336_v53 = vld [vmem:[%s7336_s1 + $0x988] sm:$0xff] }
  0x7b   :  { %3616 = vmatprep.subr.bf16.mxu0 %v4885_v55  ;;  %3831 = vmatprep.subr.bf16.mxu1 %v4887_v56  ;;  %v340_v54 = vld [vmem:[%s7336_s1 + $0x9a8] sm:$0xff]  ;;  %v4940_v55 = vcombine.low %v327_v43, %v331_v44  ;;  %v4942_v56 = vcombine.low %v328_v45, %v332_v46  ;;  %v391_v44 = vld [vmem:[%s7336_s1 + $0xb40] sm:$0xff] }
  0x7c   :  { %v4951_v58 = vcombine.high %v336_v53, %v340_v54  ;;  %v395_v45 = vld [vmem:[%s7336_s1 + $0xb60] sm:$0xff]  ;;  %v392_v46 = vld [vmem:[%s7336_s1 + $0xb48] sm:$0xff] }
  0x7e   :  { %3617 = vmatpush1.bf16.msra.mxu0 %v4884_v61  ;;  %3832 = vmatpush1.bf16.msra.mxu1 %v4886_v62  ;;  %v344_v61 = vld [vmem:[%s7336_s1 + $0x9c8] sm:$0xff] }
  0x7f   :  { %3618 = vmatprep.subr.bf16.mxu0 %v4893_v63  ;;  %3833 = vmatprep.subr.bf16.mxu1 %v4895_v0  ;;  %v348_v62 = vld [vmem:[%s7336_s1 + $0x9e8] sm:$0xff]  ;;  %v4948_v63 = vcombine.low %v335_v51, %v339_v52  ;;  %v4950_v0 = vcombine.low %v336_v53, %v340_v54  ;;  %v399_v52 = vld [vmem:[%s7336_s1 + $0xb80] sm:$0xff] }
  0x80   :  { %v4959_v2 = vcombine.high %v344_v61, %v348_v62  ;;  %v403_v53 = vld [vmem:[%s7336_s1 + $0xba0] sm:$0xff]  ;;  %v400_v54 = vld [vmem:[%s7336_s1 + $0xb88] sm:$0xff] }
  0x82   :  { %3619 = vmatpush1.bf16.msra.mxu0 %v4892_v5  ;;  %3834 = vmatpush1.bf16.msra.mxu1 %v4894_v6  ;;  %v352_v5 = vld [vmem:[%s7336_s1 + $0xa08] sm:$0xff] }
  0x83   :  { %3631 = vmatprep.subr.bf16.mxu0 %v4901_v7  ;;  %3846 = vmatprep.subr.bf16.mxu1 %v4903_v8  ;;  %v356_v6 = vld [vmem:[%s7336_s1 + $0xa28] sm:$0xff]  ;;  %v4956_v7 = vcombine.low %v343_v59, %v347_v60  ;;  %v4958_v8 = vcombine.low %v344_v61, %v348_v62  ;;  %v407_v60 = vld [vmem:[%s7336_s1 + $0xbc0] sm:$0xff] }
  0x84   :  { %v4967_v10 = vcombine.high %v352_v5, %v356_v6  ;;  %v411_v61 = vld [vmem:[%s7336_s1 + $0xbe0] sm:$0xff]  ;;  %v408_v62 = vld [vmem:[%s7336_s1 + $0xbc8] sm:$0xff] }
  0x85   :  { %3621 = vmatmul.mubr.bf16.vlgmr.msra.gmra.mrb[0].mxu0 %v5324_v11  ;;  %3836 = vmatmul.mubr.bf16.vlgmr.msra.gmra.mrb[0].mxu1 %v5324_v11  ;;  %v359_v11 = vld [vmem:[%s7336_s1 + $0xa40] sm:$0xff] }
  0x86   :  { %3632 = vmatpush1.bf16.msra.mxu0 %v4900_v14  ;;  %3847 = vmatpush1.bf16.msra.mxu1 %v4902_v15  ;;  %v364_v14 = vld [vmem:[%s7336_s1 + $0xa68] sm:$0xff]  ;;  %v4964_v15 = vcombine.low %v351_v3, %v355_v4  ;;  %v415_v4 = vld [vmem:[%s7336_s1 + $0xc00] sm:$0xff] }
  0x87   :  { %3633 = vmatprep.subr.bf16.mxu0 %v4909_v16  ;;  %3848 = vmatprep.subr.bf16.mxu1 %v4911_v17  ;;  %v4966_v16 = vcombine.low %v352_v5, %v356_v6  ;;  %v4973_v17 = vcombine.high %v359_v11, %v363_v12  ;;  %v4975_v18 = vcombine.high %v360_v13, %v364_v14  ;;  %v419_v5 = vld [vmem:[%s7336_s1 + $0xc20] sm:$0xff]  ;;  %v416_v6 = vld [vmem:[%s7336_s1 + $0xc08] sm:$0xff] }
  0x88   :  { %3663 = vmatprep.mubr.bf16.mxu0 %v5325_v20  ;;  %3878 = vmatprep.mubr.bf16.mxu1 %v5325_v20  ;;  %v371_v20 = vld [vmem:[%s7336_s1 + $0xaa0] sm:$0xff] }
  0x8a   :  { %3634 = vmatpush1.bf16.msra.mxu0 %v4908_v23  ;;  %3849 = vmatpush1.bf16.msra.mxu1 %v4910_v24  ;;  %v372_v23 = vld [vmem:[%s7336_s1 + $0xaa8] sm:$0xff]  ;;  %v4972_v24 = vcombine.low %v359_v11, %v363_v12  ;;  %v423_v12 = vld [vmem:[%s7336_s1 + $0xc40] sm:$0xff] }
  0x8b   :  { %3635 = vmatprep.subr.bf16.mxu0 %v4917_v25  ;;  %3850 = vmatprep.subr.bf16.mxu1 %v4919_v26  ;;  %v4974_v25 = vcombine.low %v360_v13, %v364_v14  ;;  %v4981_v26 = vcombine.high %v367_v19, %v371_v20  ;;  %v4983_v27 = vcombine.high %v368_v22, %v372_v23  ;;  %v427_v13 = vld [vmem:[%s7336_s1 + $0xc60] sm:$0xff]  ;;  %v5327_v14 = vld [vmem:[%s7337_s0 + $0x10] ss:$36 sps:$4 sm:$0xff]  }
  0x8e   :  { %3636 = vmatpush1.bf16.msra.mxu0 %v4916_v31  ;;  %3851 = vmatpush1.bf16.msra.mxu1 %v4918_v32  ;;  %v380_v31 = vld [vmem:[%s7336_s1 + $0xae8] sm:$0xff]  ;;  %v4980_v32 = vcombine.low %v367_v19, %v371_v20  ;;  %v5037_v19 = vcombine.high %v423_v12, %v427_v13 }
  0x8f   :  { %3637 = vmatprep.subr.bf16.mxu0 %v4925_v33  ;;  %3852 = vmatprep.subr.bf16.mxu1 %v4927_v34  ;;  %v4982_v33 = vcombine.low %v368_v22, %v372_v23  ;;  %v4989_v34 = vcombine.high %v375_v28, %v379_v29  ;;  %v4991_v35 = vcombine.high %v376_v30, %v380_v31  ;;  %v431_v22 = vld [vmem:[%s7336_s1 + $0xc80] sm:$0xff] }
  0x90   :  { %v435_v23 = vld [vmem:[%s7336_s1 + $0xca0] sm:$0xff] }
  0x92   :  { %3638 = vmatpush1.bf16.msra.mxu0 %v4924_v39  ;;  %3853 = vmatpush1.bf16.msra.mxu1 %v4926_v40  ;;  %v388_v39 = vld [vmem:[%s7336_s1 + $0xb28] sm:$0xff]  ;;  %v4988_v40 = vcombine.low %v375_v28, %v379_v29  ;;  %v5045_v29 = vcombine.high %v431_v22, %v435_v23 }
  0x93   :  { %3639 = vmatprep.subr.bf16.mxu0 %v4933_v41  ;;  %3854 = vmatprep.subr.bf16.mxu1 %v4935_v42  ;;  %v4990_v41 = vcombine.low %v376_v30, %v380_v31  ;;  %v4997_v42 = vcombine.high %v383_v36, %v387_v37  ;;  %v4999_v43 = vcombine.high %v384_v38, %v388_v39  ;;  %v439_v31 = vld [vmem:[%s7336_s1 + $0xcc0] sm:$0xff] }
  0x96   :  { %3640 = vmatpush1.bf16.msra.mxu0 %v4932_v47  ;;  %3855 = vmatpush1.bf16.msra.mxu1 %v4934_v48  ;;  %v396_v47 = vld [vmem:[%s7336_s1 + $0xb68] sm:$0xff]  ;;  %v4996_v48 = vcombine.low %v383_v36, %v387_v37 }
  0x97   :  { %3641 = vmatprep.subr.bf16.mxu0 %v4941_v49  ;;  %3856 = vmatprep.subr.bf16.mxu1 %v4943_v50  ;;  %v4998_v49 = vcombine.low %v384_v38, %v388_v39  ;;  %v5005_v50 = vcombine.high %v391_v44, %v395_v45  ;;  %v5007_v51 = vcombine.high %v392_v46, %v396_v47  ;;  %v447_v39 = vld [vmem:[%s7336_s1 + $0xd00] sm:$0xff] }
  0x9a   :  { %3642 = vmatpush1.bf16.msra.mxu0 %v4940_v55  ;;  %3857 = vmatpush1.bf16.msra.mxu1 %v4942_v56  ;;  %v404_v55 = vld [vmem:[%s7336_s1 + $0xba8] sm:$0xff]  ;;  %v5004_v56 = vcombine.low %v391_v44, %v395_v45 }
  0x9b   :  { %3643 = vmatprep.subr.bf16.mxu0 %v4949_v57  ;;  %3858 = vmatprep.subr.bf16.mxu1 %v4951_v58  ;;  %v5006_v57 = vcombine.low %v392_v46, %v396_v47  ;;  %v5013_v58 = vcombine.high %v399_v52, %v403_v53  ;;  %v5015_v59 = vcombine.high %v400_v54, %v404_v55  ;;  %v455_v47 = vld [vmem:[%s7336_s1 + $0xd40] sm:$0xff] }
  0x9e   :  { %3644 = vmatpush1.bf16.msra.mxu0 %v4948_v63  ;;  %3859 = vmatpush1.bf16.msra.mxu1 %v4950_v0  ;;  %v412_v63 = vld [vmem:[%s7336_s1 + $0xbe8] sm:$0xff]  ;;  %v5012_v0 = vcombine.low %v399_v52, %v403_v53 }
  0x9f   :  { %3645 = vmatprep.subr.bf16.mxu0 %v4957_v1  ;;  %3860 = vmatprep.subr.bf16.mxu1 %v4959_v2  ;;  %v5014_v1 = vcombine.low %v400_v54, %v404_v55  ;;  %v5021_v2 = vcombine.high %v407_v60, %v411_v61  ;;  %v5023_v3 = vcombine.high %v408_v62, %v412_v63  ;;  %v463_v55 = vld [vmem:[%s7336_s1 + $0xd80] sm:$0xff] }
  0xa2   :  { %3646 = vmatpush1.bf16.msra.mxu0 %v4956_v7  ;;  %3861 = vmatpush1.bf16.msra.mxu1 %v4958_v8  ;;  %v420_v7 = vld [vmem:[%s7336_s1 + $0xc28] sm:$0xff]  ;;  %v5020_v8 = vcombine.low %v407_v60, %v411_v61 }
  0xa3   :  { %3647 = vmatprep.subr.bf16.mxu0 %v4965_v9  ;;  %3862 = vmatprep.subr.bf16.mxu1 %v4967_v10  ;;  %v5022_v9 = vcombine.low %v408_v62, %v412_v63  ;;  %v5029_v10 = vcombine.high %v415_v4, %v419_v5  ;;  %v5031_v11 = vcombine.high %v416_v6, %v420_v7  ;;  %v471_v63 = vld [vmem:[%s7336_s1 + $0xdc0] sm:$0xff] }
  0xa6   :  { %3648 = vmatpush1.bf16.msra.mxu0 %v4964_v15  ;;  %3863 = vmatpush1.bf16.msra.mxu1 %v4966_v16  ;;  %v424_v15 = vld [vmem:[%s7336_s1 + $0xc48] sm:$0xff] }
  0xa7   :  { %3649 = vmatprep.subr.bf16.mxu0 %v4973_v17  ;;  %3864 = vmatprep.subr.bf16.mxu1 %v4975_v18  ;;  %v428_v16 = vld [vmem:[%s7336_s1 + $0xc68] sm:$0xff]  ;;  %v5028_v17 = vcombine.low %v415_v4, %v419_v5  ;;  %v5030_v18 = vcombine.low %v416_v6, %v420_v7  ;;  %v479_v7 = vld [vmem:[%s7336_s1 + $0xe00] sm:$0xff] }
  0xa8   :  { %v5039_v20 = vcombine.high %v424_v15, %v428_v16  ;;  %v5038_v28 = vcombine.low %v424_v15, %v428_v16  ;;  %v487_v15 = vld [vmem:[%s7336_s1 + $0xe40] sm:$0xff] }
  0xa9   :  { %v491_v16 = vld [vmem:[%s7336_s1 + $0xe60] sm:$0xff] }
  0xaa   :  { %3650 = vmatpush1.bf16.msra.mxu0 %v4972_v24  ;;  %3865 = vmatpush1.bf16.msra.mxu1 %v4974_v25  ;;  %v5328_v24 = vld [vmem:[%s7337_s0 + $0x1c] ss:$36 sps:$4 sm:$0xff]   ;;  %v432_v25 = vld [vmem:[%s7336_s1 + $0xc88] sm:$0xff] }
  0xab   :  { %3651 = vmatprep.subr.bf16.mxu0 %v4981_v26  ;;  %3866 = vmatprep.subr.bf16.mxu1 %v4983_v27  ;;  %v436_v26 = vld [vmem:[%s7336_s1 + $0xca8] sm:$0xff]  ;;  %v5036_v27 = vcombine.low %v423_v12, %v427_v13 }
  0xac   :  { %v5047_v30 = vcombine.high %v432_v25, %v436_v26  ;;  %v5046_v36 = vcombine.low %v432_v25, %v436_v26  ;;  %v499_v25 = vld [vmem:[%s7336_s1 + $0xea0] sm:$0xff]  ;;  %v496_v26 = vld [vmem:[%s7336_s1 + $0xe88] sm:$0xff] }
  0xae   :  { %3652 = vmatpush1.bf16.msra.mxu0 %v4980_v32  ;;  %3867 = vmatpush1.bf16.msra.mxu1 %v4982_v33  ;;  %v443_v32 = vld [vmem:[%s7336_s1 + $0xce0] sm:$0xff]  ;;  %v440_v33 = vld [vmem:[%s7336_s1 + $0xcc8] sm:$0xff] }
  0xaf   :  { %3653 = vmatprep.subr.bf16.mxu0 %v4989_v34  ;;  %3868 = vmatprep.subr.bf16.mxu1 %v4991_v35  ;;  %v444_v34 = vld [vmem:[%s7336_s1 + $0xce8] sm:$0xff]  ;;  %v5044_v35 = vcombine.low %v431_v22, %v435_v23  ;;  %v5053_v37 = vcombine.high %v439_v31, %v443_v32  ;;  %v5101_v22 = vcombine.high %v487_v15, %v491_v16 }
  0xb0   :  { %v5055_v38 = vcombine.high %v440_v33, %v444_v34  ;;  %v5054_v44 = vcombine.low %v440_v33, %v444_v34  ;;  %v507_v33 = vld [vmem:[%s7336_s1 + $0xee0] sm:$0xff]  ;;  %v504_v34 = vld [vmem:[%s7336_s1 + $0xec8] sm:$0xff] }
  0xb2   :  { %3654 = vmatpush1.bf16.msra.mxu0 %v4988_v40  ;;  %3869 = vmatpush1.bf16.msra.mxu1 %v4990_v41  ;;  %v451_v40 = vld [vmem:[%s7336_s1 + $0xd20] sm:$0xff]  ;;  %v448_v41 = vld [vmem:[%s7336_s1 + $0xd08] sm:$0xff] }
  0xb3   :  { %3655 = vmatprep.subr.bf16.mxu0 %v4997_v42  ;;  %3870 = vmatprep.subr.bf16.mxu1 %v4999_v43  ;;  %v452_v42 = vld [vmem:[%s7336_s1 + $0xd28] sm:$0xff]  ;;  %v5052_v43 = vcombine.low %v439_v31, %v443_v32  ;;  %v5061_v45 = vcombine.high %v447_v39, %v451_v40  ;;  %v503_v32 = vld [vmem:[%s7336_s1 + $0xec0] sm:$0xff] }
  0xb4   :  { %v5063_v46 = vcombine.high %v448_v41, %v452_v42  ;;  %v5062_v52 = vcombine.low %v448_v41, %v452_v42  ;;  %v515_v41 = vld [vmem:[%s7336_s1 + $0xf20] sm:$0xff]  ;;  %v512_v42 = vld [vmem:[%s7336_s1 + $0xf08] sm:$0xff] }
  0xb6   :  { %3656 = vmatpush1.bf16.msra.mxu0 %v4996_v48  ;;  %3871 = vmatpush1.bf16.msra.mxu1 %v4998_v49  ;;  %v459_v48 = vld [vmem:[%s7336_s1 + $0xd60] sm:$0xff]  ;;  %v456_v49 = vld [vmem:[%s7336_s1 + $0xd48] sm:$0xff] }
  0xb7   :  { %3657 = vmatprep.subr.bf16.mxu0 %v5005_v50  ;;  %3872 = vmatprep.subr.bf16.mxu1 %v5007_v51  ;;  %v460_v50 = vld [vmem:[%s7336_s1 + $0xd68] sm:$0xff]  ;;  %v5060_v51 = vcombine.low %v447_v39, %v451_v40  ;;  %v5069_v53 = vcombine.high %v455_v47, %v459_v48  ;;  %v511_v40 = vld [vmem:[%s7336_s1 + $0xf00] sm:$0xff] }
  0xb8   :  { %v5071_v54 = vcombine.high %v456_v49, %v460_v50  ;;  %v5070_v60 = vcombine.low %v456_v49, %v460_v50  ;;  %v523_v49 = vld [vmem:[%s7336_s1 + $0xf60] sm:$0xff]  ;;  %v520_v50 = vld [vmem:[%s7336_s1 + $0xf48] sm:$0xff] }
  0xba   :  { %3658 = vmatpush1.bf16.msra.mxu0 %v5004_v56  ;;  %3873 = vmatpush1.bf16.msra.mxu1 %v5006_v57  ;;  %v467_v56 = vld [vmem:[%s7336_s1 + $0xda0] sm:$0xff]  ;;  %v464_v57 = vld [vmem:[%s7336_s1 + $0xd88] sm:$0xff] }
  0xbb   :  { %3659 = vmatprep.subr.bf16.mxu0 %v5013_v58  ;;  %3874 = vmatprep.subr.bf16.mxu1 %v5015_v59  ;;  %v468_v58 = vld [vmem:[%s7336_s1 + $0xda8] sm:$0xff]  ;;  %v5068_v59 = vcombine.low %v455_v47, %v459_v48  ;;  %v5077_v61 = vcombine.high %v463_v55, %v467_v56  ;;  %v519_v48 = vld [vmem:[%s7336_s1 + $0xf40] sm:$0xff] }
  0xbc   :  { %v5079_v62 = vcombine.high %v464_v57, %v468_v58  ;;  %v5078_v4 = vcombine.low %v464_v57, %v468_v58  ;;  %v531_v57 = vld [vmem:[%s7336_s1 + $0xfa0] sm:$0xff]  ;;  %v528_v58 = vld [vmem:[%s7336_s1 + $0xf88] sm:$0xff] }
  0xbe   :  { %3660 = vmatpush1.bf16.msra.mxu0 %v5012_v0  ;;  %3875 = vmatpush1.bf16.msra.mxu1 %v5014_v1  ;;  %v475_v0 = vld [vmem:[%s7336_s1 + $0xde0] sm:$0xff]  ;;  %v472_v1 = vld [vmem:[%s7336_s1 + $0xdc8] sm:$0xff] }
  0xbf   :  { %3661 = vmatprep.subr.bf16.mxu0 %v5021_v2  ;;  %3876 = vmatprep.subr.bf16.mxu1 %v5023_v3  ;;  %v476_v2 = vld [vmem:[%s7336_s1 + $0xde8] sm:$0xff]  ;;  %v5076_v3 = vcombine.low %v463_v55, %v467_v56  ;;  %v5085_v5 = vcombine.high %v471_v63, %v475_v0  ;;  %v527_v56 = vld [vmem:[%s7336_s1 + $0xf80] sm:$0xff] }
  0xc0   :  { %v5087_v6 = vcombine.high %v472_v1, %v476_v2  ;;  %v5086_v12 = vcombine.low %v472_v1, %v476_v2  ;;  %v535_v1 = vld [vmem:[%s7336_s1 + $0xfc0] sm:$0xff] }
  0xc1   :  { %v539_v2 = vld [vmem:[%s7336_s1 + $0xfe0] sm:$0xff] }
  0xc2   :  { %3662 = vmatpush1.bf16.msra.mxu0 %v5020_v8  ;;  %3877 = vmatpush1.bf16.msra.mxu1 %v5022_v9  ;;  %v483_v8 = vld [vmem:[%s7336_s1 + $0xe20] sm:$0xff]  ;;  %v480_v9 = vld [vmem:[%s7336_s1 + $0xe08] sm:$0xff] }
  0xc3   :  { %3674 = vmatprep.subr.bf16.mxu0 %v5029_v10  ;;  %3889 = vmatprep.subr.bf16.mxu1 %v5031_v11  ;;  %v484_v10 = vld [vmem:[%s7336_s1 + $0xe28] sm:$0xff]  ;;  %v5084_v11 = vcombine.low %v471_v63, %v475_v0  ;;  %v5093_v13 = vcombine.high %v479_v7, %v483_v8  ;;  %v607_v63 = vld [vmem:[%s7338_s2] sm:$0xff] }
  0xc4   :  { %611 = vperm.xlu0 %5317, %v607_v63   ;;  %v596_v63 = vld [vmem:[%s7336_s1 + $0x11a8] sm:$0xff] }
  0xc5   :  { %3664 = vmatmul.mubr.bf16.vlgmr.msra.gmra.mrb[0].mxu0 %v5327_v14  ;;  %3879 = vmatmul.mubr.bf16.vlgmr.msra.gmra.mrb[0].mxu1 %v5327_v14  ;;  %v5095_v14 = vcombine.high %v480_v9, %v484_v10 }
  0xc6   :  { %3675 = vmatpush1.bf16.msra.mxu0 %v5028_v17  ;;  %3890 = vmatpush1.bf16.msra.mxu1 %v5030_v18  ;;  %v488_v17 = vld [vmem:[%s7336_s1 + $0xe48] sm:$0xff] }
  0xc7   :  { %3676 = vmatprep.subr.bf16.mxu0 %v5037_v19  ;;  %3891 = vmatprep.subr.bf16.mxu1 %v5039_v20  ;;  %v492_v18 = vld [vmem:[%s7336_s1 + $0xe68] sm:$0xff]  ;;  %v5092_v19 = vcombine.low %v479_v7, %v483_v8  ;;  %v5094_v20 = vcombine.low %v480_v9, %v484_v10  ;;  %v5149_v7 = vcombine.high %v535_v1, %v539_v2  ;;  %v543_v10 = vld [vmem:[%s7336_s1 + $0x1000] sm:$0xff] }
  0xc8   :  { %3706 = vmatprep.mubr.bf16.mxu0 %v5328_v24  ;;  %3921 = vmatprep.mubr.bf16.mxu1 %v5328_v24  ;;  %v5103_v23 = vcombine.high %v488_v17, %v492_v18  ;;  %v495_v24 = vld [vmem:[%s7336_s1 + $0xe80] sm:$0xff]  ;;  %v608_v8 = vld [vmem:[%s7338_s2 + $0x8] sm:$0xff] }
  0xc9   :  { %616 = vperm.xlu0 %5317, %v608_v8  }
  0xca   :  { %3677 = vmatpush1.bf16.msra.mxu0 %v5036_v27  ;;  %3892 = vmatpush1.bf16.msra.mxu1 %v5038_v28  ;;  %v500_v27 = vld [vmem:[%s7336_s1 + $0xea8] sm:$0xff]  ;;  %v5100_v28 = vcombine.low %v487_v15, %v491_v16 }
  0xcb   :  { %3678 = vmatprep.subr.bf16.mxu0 %v5045_v29  ;;  %3893 = vmatprep.subr.bf16.mxu1 %v5047_v30  ;;  %v5102_v29 = vcombine.low %v488_v17, %v492_v18  ;;  %v5109_v30 = vcombine.high %v495_v24, %v499_v25  ;;  %v5111_v31 = vcombine.high %v496_v26, %v500_v27  ;;  %v551_v18 = vld [vmem:[%s7336_s1 + $0x1040] sm:$0xff] }
  0xce   :  { %3679 = vmatpush1.bf16.msra.mxu0 %v5044_v35  ;;  %3894 = vmatpush1.bf16.msra.mxu1 %v5046_v36  ;;  %v508_v35 = vld [vmem:[%s7336_s1 + $0xee8] sm:$0xff]  ;;  %v5108_v36 = vcombine.low %v495_v24, %v499_v25 }
  0xcf   :  { %3680 = vmatprep.subr.bf16.mxu0 %v5053_v37  ;;  %3895 = vmatprep.subr.bf16.mxu1 %v5055_v38  ;;  %v5110_v37 = vcombine.low %v496_v26, %v500_v27  ;;  %v5117_v38 = vcombine.high %v503_v32, %v507_v33  ;;  %v5119_v39 = vcombine.high %v504_v34, %v508_v35 }
  0xd2   :  { %3681 = vmatpush1.bf16.msra.mxu0 %v5052_v43  ;;  %3896 = vmatpush1.bf16.msra.mxu1 %v5054_v44  ;;  %v516_v43 = vld [vmem:[%s7336_s1 + $0xf28] sm:$0xff]  ;;  %v5116_v44 = vcombine.low %v503_v32, %v507_v33 }
  0xd3   :  { %3682 = vmatprep.subr.bf16.mxu0 %v5061_v45  ;;  %3897 = vmatprep.subr.bf16.mxu1 %v5063_v46  ;;  %v5118_v45 = vcombine.low %v504_v34, %v508_v35  ;;  %v5125_v46 = vcombine.high %v511_v40, %v515_v41  ;;  %v5127_v47 = vcombine.high %v512_v42, %v516_v43 }
  0xd6   :  { %3683 = vmatpush1.bf16.msra.mxu0 %v5060_v51  ;;  %3898 = vmatpush1.bf16.msra.mxu1 %v5062_v52  ;;  %v524_v51 = vld [vmem:[%s7336_s1 + $0xf68] sm:$0xff]  ;;  %v5124_v52 = vcombine.low %v511_v40, %v515_v41 }
  0xd7   :  { %3684 = vmatprep.subr.bf16.mxu0 %v5069_v53  ;;  %3899 = vmatprep.subr.bf16.mxu1 %v5071_v54  ;;  %v5126_v53 = vcombine.low %v512_v42, %v516_v43  ;;  %v5133_v54 = vcombine.high %v519_v48, %v523_v49  ;;  %v5135_v55 = vcombine.high %v520_v50, %v524_v51 }
  0xda   :  { %3685 = vmatpush1.bf16.msra.mxu0 %v5068_v59  ;;  %3900 = vmatpush1.bf16.msra.mxu1 %v5070_v60  ;;  %v532_v59 = vld [vmem:[%s7336_s1 + $0xfa8] sm:$0xff]  ;;  %v5132_v60 = vcombine.low %v519_v48, %v523_v49 }
  0xdb   :  { %3686 = vmatprep.subr.bf16.mxu0 %v5077_v61  ;;  %3901 = vmatprep.subr.bf16.mxu1 %v5079_v62  ;;  %v5134_v61 = vcombine.low %v520_v50, %v524_v51  ;;  %v5141_v62 = vcombine.high %v527_v56, %v531_v57  ;;  %v5143_v0 = vcombine.high %v528_v58, %v532_v59 }
  0xde   :  { %3687 = vmatpush1.bf16.msra.mxu0 %v5076_v3  ;;  %3902 = vmatpush1.bf16.msra.mxu1 %v5078_v4  ;;  %v536_v3 = vld [vmem:[%s7336_s1 + $0xfc8] sm:$0xff] }
  0xdf   :  { %3688 = vmatprep.subr.bf16.mxu0 %v5085_v5  ;;  %3903 = vmatprep.subr.bf16.mxu1 %v5087_v6  ;;  %v540_v4 = vld [vmem:[%s7336_s1 + $0xfe8] sm:$0xff]  ;;  %v5140_v5 = vcombine.low %v527_v56, %v531_v57  ;;  %v5142_v6 = vcombine.low %v528_v58, %v532_v59 }
  0xe0   :  { %v5151_v9 = vcombine.high %v536_v3, %v540_v4  ;;  %v5150_v15 = vcombine.low %v536_v3, %v540_v4  ;;  %v599_v4 = vld [vmem:[%s7336_s1 + $0x11c0] sm:$0xff] }
  0xe2   :  { %3689 = vmatpush1.bf16.msra.mxu0 %v5084_v11  ;;  %3904 = vmatpush1.bf16.msra.mxu1 %v5086_v12  ;;  %v547_v11 = vld [vmem:[%s7336_s1 + $0x1020] sm:$0xff]  ;;  %v544_v12 = vld [vmem:[%s7336_s1 + $0x1008] sm:$0xff] }
  0xe3   :  { %3690 = vmatprep.subr.bf16.mxu0 %v5093_v13  ;;  %3905 = vmatprep.subr.bf16.mxu1 %v5095_v14  ;;  %v548_v13 = vld [vmem:[%s7336_s1 + $0x1028] sm:$0xff]  ;;  %v5148_v14 = vcombine.low %v535_v1, %v539_v2  ;;  %v5157_v16 = vcombine.high %v543_v10, %v547_v11  ;;  %v5156_v24 = vcombine.low %v543_v10, %v547_v11 }
  0xe4   :  { %v5159_v17 = vcombine.high %v544_v12, %v548_v13  ;;  %v5158_v25 = vcombine.low %v544_v12, %v548_v13  ;;  %v33_v12 = vld [vmem:[%s7336_s1 + $0x10] sm:$0xff] }
  0xe5   :  { %v37_v13 = vld [vmem:[%s7336_s1 + $0x30] sm:$0xff] }
  0xe6   :  { %3691 = vmatpush1.bf16.msra.mxu0 %v5092_v19  ;;  %3906 = vmatpush1.bf16.msra.mxu1 %v5094_v20  ;;  %v555_v19 = vld [vmem:[%s7336_s1 + $0x1060] sm:$0xff]  ;;  %v5330_v20 = vld [vmem:[%s7337_s0 + $0x18] ss:$36 sps:$4 sm:$0xff]  }
  0xe7   :  { %3692 = vmatprep.subr.bf16.mxu0 %v5101_v22  ;;  %3907 = vmatprep.subr.bf16.mxu1 %v5103_v23  ;;  %v552_v22 = vld [vmem:[%s7336_s1 + $0x1048] sm:$0xff]  ;;  %v5165_v26 = vcombine.high %v551_v18, %v555_v19  ;;  %v5164_v32 = vcombine.low %v551_v18, %v555_v19  ;;  %v4649_v18 = vcombine.high %v33_v12, %v37_v13 }
  0xe8   :  { %v556_v23 = vld [vmem:[%s7336_s1 + $0x1068] sm:$0xff] }
  0xe9   :  { %v5167_v27 = vcombine.high %v552_v22, %v556_v23  ;;  %v5166_v33 = vcombine.low %v552_v22, %v556_v23  ;;  %v45_v22 = vld [vmem:[%s7336_s1 + $0x70] sm:$0xff]  ;;  %v5331_v23 = vld [vmem:[%s7337_s0 + $0x20] ss:$36 sps:$4 sm:$0xff]  }
  0xea   :  { %3693 = vmatpush1.bf16.msra.mxu0 %v5100_v28  ;;  %3908 = vmatpush1.bf16.msra.mxu1 %v5102_v29  ;;  %v559_v28 = vld [vmem:[%s7336_s1 + $0x1080] sm:$0xff] }
  0xeb   :  { %3694 = vmatprep.subr.bf16.mxu0 %v5109_v30  ;;  %3909 = vmatprep.subr.bf16.mxu1 %v5111_v31  ;;  %v563_v29 = vld [vmem:[%s7336_s1 + $0x10a0] sm:$0xff]  ;;  %v560_v30 = vld [vmem:[%s7336_s1 + $0x1088] sm:$0xff] }
  0xec   :  { %v564_v31 = vld [vmem:[%s7336_s1 + $0x10a8] sm:$0xff]  ;;  %v5173_v34 = vcombine.high %v559_v28, %v563_v29  ;;  %v5172_v40 = vcombine.low %v559_v28, %v563_v29 }
  0xed   :  { %v5175_v35 = vcombine.high %v560_v30, %v564_v31  ;;  %v5174_v41 = vcombine.low %v560_v30, %v564_v31  ;;  %v49_v30 = vld [vmem:[%s7336_s1 + $0x90] sm:$0xff] }
  0xee   :  { %3695 = vmatpush1.bf16.msra.mxu0 %v5108_v36  ;;  %3910 = vmatpush1.bf16.msra.mxu1 %v5110_v37  ;;  %v567_v36 = vld [vmem:[%s7336_s1 + $0x10c0] sm:$0xff]  ;;  %v53_v31 = vld [vmem:[%s7336_s1 + $0xb0] sm:$0xff] }
  0xef   :  { %3696 = vmatprep.subr.bf16.mxu0 %v5117_v38  ;;  %3911 = vmatprep.subr.bf16.mxu1 %v5119_v39  ;;  %v571_v37 = vld [vmem:[%s7336_s1 + $0x10e0] sm:$0xff]  ;;  %v568_v38 = vld [vmem:[%s7336_s1 + $0x10c8] sm:$0xff] }
  0xf0   :  { %v572_v39 = vld [vmem:[%s7336_s1 + $0x10e8] sm:$0xff]  ;;  %v5181_v42 = vcombine.high %v567_v36, %v571_v37  ;;  %v5180_v48 = vcombine.low %v567_v36, %v571_v37  ;;  %v4665_v36 = vcombine.high %v49_v30, %v53_v31 }
  0xf1   :  { %v5183_v43 = vcombine.high %v568_v38, %v572_v39  ;;  %v5182_v49 = vcombine.low %v568_v38, %v572_v39  ;;  %v57_v38 = vld [vmem:[%s7336_s1 + $0xd0] sm:$0xff] }
  0xf2   :  { %3697 = vmatpush1.bf16.msra.mxu0 %v5116_v44  ;;  %3912 = vmatpush1.bf16.msra.mxu1 %v5118_v45  ;;  %v575_v44 = vld [vmem:[%s7336_s1 + $0x1100] sm:$0xff]  ;;  %v61_v39 = vld [vmem:[%s7336_s1 + $0xf0] sm:$0xff] }
  0xf3   :  { %3698 = vmatprep.subr.bf16.mxu0 %v5125_v46  ;;  %3913 = vmatprep.subr.bf16.mxu1 %v5127_v47  ;;  %v579_v45 = vld [vmem:[%s7336_s1 + $0x1120] sm:$0xff]  ;;  %v576_v46 = vld [vmem:[%s7336_s1 + $0x1108] sm:$0xff] }
  0xf4   :  { %v580_v47 = vld [vmem:[%s7336_s1 + $0x1128] sm:$0xff]  ;;  %v5189_v50 = vcombine.high %v575_v44, %v579_v45  ;;  %v5188_v56 = vcombine.low %v575_v44, %v579_v45  ;;  %v4673_v45 = vcombine.high %v57_v38, %v61_v39 }
  0xf5   :  { %v5191_v51 = vcombine.high %v576_v46, %v580_v47  ;;  %v5190_v57 = vcombine.low %v576_v46, %v580_v47  ;;  %v65_v47 = vld [vmem:[%s7336_s1 + $0x110] sm:$0xff] }
  0xf6   :  { %3699 = vmatpush1.bf16.msra.mxu0 %v5124_v52  ;;  %3914 = vmatpush1.bf16.msra.mxu1 %v5126_v53  ;;  %v583_v52 = vld [vmem:[%s7336_s1 + $0x1140] sm:$0xff] }
  0xf7   :  { %3700 = vmatprep.subr.bf16.mxu0 %v5133_v54  ;;  %3915 = vmatprep.subr.bf16.mxu1 %v5135_v55  ;;  %v587_v53 = vld [vmem:[%s7336_s1 + $0x1160] sm:$0xff]  ;;  %v584_v54 = vld [vmem:[%s7336_s1 + $0x1148] sm:$0xff] }
  0xf8   :  { %v588_v55 = vld [vmem:[%s7336_s1 + $0x1168] sm:$0xff]  ;;  %v5197_v58 = vcombine.high %v583_v52, %v587_v53 }
  0xf9   :  { %v5199_v59 = vcombine.high %v584_v54, %v588_v55  ;;  %v5198_v1 = vcombine.low %v584_v54, %v588_v55  ;;  %v73_v55 = vld [vmem:[%s7336_s1 + $0x150] sm:$0xff] }
  0xfa   :  { %3701 = vmatpush1.bf16.msra.mxu0 %v5132_v60  ;;  %3916 = vmatpush1.bf16.msra.mxu1 %v5134_v61  ;;  %v591_v60 = vld [vmem:[%s7336_s1 + $0x1180] sm:$0xff] }
  0xfb   :  { %3702 = vmatprep.subr.bf16.mxu0 %v5141_v62  ;;  %3917 = vmatprep.subr.bf16.mxu1 %v5143_v0  ;;  %v595_v61 = vld [vmem:[%s7336_s1 + $0x11a0] sm:$0xff]  ;;  %v592_v62 = vld [vmem:[%s7336_s1 + $0x1188] sm:$0xff]  ;;  %v5196_v0 = vcombine.low %v583_v52, %v587_v53 }
  0xfc   :  { %v5205_v2 = vcombine.high %v591_v60, %v595_v61  ;;  %v5207_v3 = vcombine.high %v592_v62, %v596_v63  ;;  %v5204_v8 = vcombine.low %v591_v60, %v595_v61 }
  0xfe   :  { %3703 = vmatpush1.bf16.msra.mxu0 %v5140_v5  ;;  %3918 = vmatpush1.bf16.msra.mxu1 %v5142_v6  ;;  %v603_v5 = vld [vmem:[%s7336_s1 + $0x11e0] sm:$0xff]  ;;  %v600_v6 = vld [vmem:[%s7336_s1 + $0x11c8] sm:$0xff] }
  0xff   :  { %3704 = vmatprep.subr.bf16.mxu0 %v5149_v7  ;;  %3919 = vmatprep.subr.bf16.mxu1 %v5151_v9  ;;  %v604_v7 = vld [vmem:[%s7336_s1 + $0x11e8] sm:$0xff]  ;;  %v5206_v9 = vcombine.low %v592_v62, %v596_v63  ;;  %v5213_v10 = vcombine.high %v599_v4, %v603_v5  ;;  %v81_v63 = vld [vmem:[%s7336_s1 + $0x190] sm:$0xff] }
 0x100   :  { %v5215_v11 = vcombine.high %v600_v6, %v604_v7 }
 0x102   :  { %3705 = vmatpush1.bf16.msra.mxu0 %v5148_v14  ;;  %3920 = vmatpush1.bf16.msra.mxu1 %v5150_v15  ;;  %v34_v14 = vld [vmem:[%s7336_s1 + $0x18] sm:$0xff] }
 0x103   :  { %3717 = vmatprep.subr.bf16.mxu0 %v5157_v16  ;;  %3932 = vmatprep.subr.bf16.mxu1 %v5159_v17  ;;  %v38_v15 = vld [vmem:[%s7336_s1 + $0x38] sm:$0xff]  ;;  %v5212_v16 = vcombine.low %v599_v4, %v603_v5  ;;  %v5214_v17 = vcombine.low %v600_v6, %v604_v7  ;;  %v89_v7 = vld [vmem:[%s7336_s1 + $0x1d0] sm:$0xff] }
 0x104   :  { %v4651_v19 = vcombine.high %v34_v14, %v38_v15 }
 0x105   :  { %3707 = vmatmul.mubr.bf16.vlgmr.msra.gmra.mrb[0].mxu0 %v5330_v20  ;;  %3922 = vmatmul.mubr.bf16.vlgmr.msra.gmra.mrb[0].mxu1 %v5330_v20  ;;  %v41_v20 = vld [vmem:[%s7336_s1 + $0x50] sm:$0xff] }
 0x106   :  { %3718 = vmatpush1.bf16.msra.mxu0 %v5156_v24  ;;  %3933 = vmatpush1.bf16.msra.mxu1 %v5158_v25  ;;  %v42_v24 = vld [vmem:[%s7336_s1 + $0x58] sm:$0xff]  ;;  %v4657_v28 = vcombine.high %v41_v20, %v45_v22 }
 0x107   :  { %3719 = vmatprep.subr.bf16.mxu0 %v5165_v26  ;;  %3934 = vmatprep.subr.bf16.mxu1 %v5167_v27  ;;  %v46_v25 = vld [vmem:[%s7336_s1 + $0x78] sm:$0xff]  ;;  %v4648_v26 = vcombine.low %v33_v12, %v37_v13  ;;  %v4650_v27 = vcombine.low %v34_v14, %v38_v15  ;;  %v97_v15 = vld [vmem:[%s7336_s1 + $0x210] sm:$0xff] }
 0x108   :  { %3749 = vmatprep.mubr.bf16.mxu0 %v5345_v21  ;;  %3964 = vmatprep.mubr.bf16.mxu1 %v5345_v21  ;;  %v4659_v29 = vcombine.high %v42_v24, %v46_v25 }
 0x10a   :  { %3720 = vmatpush1.bf16.msra.mxu0 %v5164_v32  ;;  %3935 = vmatpush1.bf16.msra.mxu1 %v5166_v33  ;;  %v50_v32 = vld [vmem:[%s7336_s1 + $0x98] sm:$0xff] }
 0x10b   :  { %3721 = vmatprep.subr.bf16.mxu0 %v5173_v34  ;;  %3936 = vmatprep.subr.bf16.mxu1 %v5175_v35  ;;  %v54_v33 = vld [vmem:[%s7336_s1 + $0xb8] sm:$0xff]  ;;  %v4656_v34 = vcombine.low %v41_v20, %v45_v22  ;;  %v4658_v35 = vcombine.low %v42_v24, %v46_v25  ;;  %v105_v24 = vld [vmem:[%s7336_s1 + $0x250] sm:$0xff] }
 0x10c   :  { %v4667_v37 = vcombine.high %v50_v32, %v54_v33  ;;  %v4666_v44 = vcombine.low %v50_v32, %v54_v33  ;;  %v109_v25 = vld [vmem:[%s7336_s1 + $0x270] sm:$0xff] }
 0x10d   :  { %v113_v32 = vld [vmem:[%s7336_s1 + $0x290] sm:$0xff] }
 0x10e   :  { %3722 = vmatpush1.bf16.msra.mxu0 %v5172_v40  ;;  %3937 = vmatpush1.bf16.msra.mxu1 %v5174_v41  ;;  %v5336_v40 = vld [vmem:[%s7337_s0 + $0x4] ss:$36 sps:$4 sm:$0xff]   ;;  %v58_v41 = vld [vmem:[%s7336_s1 + $0xd8] sm:$0xff]  ;;  %v117_v33 = vld [vmem:[%s7336_s1 + $0x2b0] sm:$0xff] }
 0x10f   :  { %3723 = vmatprep.subr.bf16.mxu0 %v5181_v42  ;;  %3938 = vmatprep.subr.bf16.mxu1 %v5183_v43  ;;  %v62_v42 = vld [vmem:[%s7336_s1 + $0xf8] sm:$0xff]  ;;  %v4664_v43 = vcombine.low %v49_v30, %v53_v31  ;;  %v4721_v30 = vcombine.high %v105_v24, %v109_v25 }
 0x110   :  { %v4675_v46 = vcombine.high %v58_v41, %v62_v42  ;;  %v4674_v52 = vcombine.low %v58_v41, %v62_v42  ;;  %v125_v41 = vld [vmem:[%s7336_s1 + $0x2f0] sm:$0xff]  ;;  %v122_v42 = vld [vmem:[%s7336_s1 + $0x2d8] sm:$0xff] }
 0x112   :  { %3724 = vmatpush1.bf16.msra.mxu0 %v5180_v48  ;;  %3939 = vmatpush1.bf16.msra.mxu1 %v5182_v49  ;;  %v69_v48 = vld [vmem:[%s7336_s1 + $0x130] sm:$0xff]  ;;  %v66_v49 = vld [vmem:[%s7336_s1 + $0x118] sm:$0xff] }
 0x113   :  { %3725 = vmatprep.subr.bf16.mxu0 %v5189_v50  ;;  %3940 = vmatprep.subr.bf16.mxu1 %v5191_v51  ;;  %v70_v50 = vld [vmem:[%s7336_s1 + $0x138] sm:$0xff]  ;;  %v4672_v51 = vcombine.low %v57_v38, %v61_v39  ;;  %v4681_v53 = vcombine.high %v65_v47, %v69_v48  ;;  %v4729_v38 = vcombine.high %v113_v32, %v117_v33 }
 0x114   :  { %v4683_v54 = vcombine.high %v66_v49, %v70_v50  ;;  %v4682_v60 = vcombine.low %v66_v49, %v70_v50  ;;  %v133_v49 = vld [vmem:[%s7336_s1 + $0x330] sm:$0xff]  ;;  %v130_v50 = vld [vmem:[%s7336_s1 + $0x318] sm:$0xff] }
 0x116   :  { %3726 = vmatpush1.bf16.msra.mxu0 %v5188_v56  ;;  %3941 = vmatpush1.bf16.msra.mxu1 %v5190_v57  ;;  %v77_v56 = vld [vmem:[%s7336_s1 + $0x170] sm:$0xff]  ;;  %v74_v57 = vld [vmem:[%s7336_s1 + $0x158] sm:$0xff] }
 0x117   :  { %3727 = vmatprep.subr.bf16.mxu0 %v5197_v58  ;;  %3942 = vmatprep.subr.bf16.mxu1 %v5199_v59  ;;  %v78_v58 = vld [vmem:[%s7336_s1 + $0x178] sm:$0xff]  ;;  %v4680_v59 = vcombine.low %v65_v47, %v69_v48  ;;  %v4689_v61 = vcombine.high %v73_v55, %v77_v56  ;;  %v129_v48 = vld [vmem:[%s7336_s1 + $0x310] sm:$0xff] }
 0x118   :  { %v4691_v62 = vcombine.high %v74_v57, %v78_v58  ;;  %v4690_v4 = vcombine.low %v74_v57, %v78_v58  ;;  %v141_v57 = vld [vmem:[%s7336_s1 + $0x370] sm:$0xff]  ;;  %v138_v58 = vld [vmem:[%s7336_s1 + $0x358] sm:$0xff] }
 0x11a   :  { %3728 = vmatpush1.bf16.msra.mxu0 %v5196_v0  ;;  %3943 = vmatpush1.bf16.msra.mxu1 %v5198_v1  ;;  %v85_v0 = vld [vmem:[%s7336_s1 + $0x1b0] sm:$0xff]  ;;  %v82_v1 = vld [vmem:[%s7336_s1 + $0x198] sm:$0xff] }
 0x11b   :  { %3729 = vmatprep.subr.bf16.mxu0 %v5205_v2  ;;  %3944 = vmatprep.subr.bf16.mxu1 %v5207_v3  ;;  %v86_v2 = vld [vmem:[%s7336_s1 + $0x1b8] sm:$0xff]  ;;  %v4688_v3 = vcombine.low %v73_v55, %v77_v56  ;;  %v4697_v5 = vcombine.high %v81_v63, %v85_v0  ;;  %v137_v56 = vld [vmem:[%s7336_s1 + $0x350] sm:$0xff] }
 0x11c   :  { %v4699_v6 = vcombine.high %v82_v1, %v86_v2  ;;  %v4698_v12 = vcombine.low %v82_v1, %v86_v2  ;;  %v149_v1 = vld [vmem:[%s7336_s1 + $0x3b0] sm:$0xff]  ;;  %v146_v2 = vld [vmem:[%s7336_s1 + $0x398] sm:$0xff] }
 0x11e   :  { %3730 = vmatpush1.bf16.msra.mxu0 %v5204_v8  ;;  %3945 = vmatpush1.bf16.msra.mxu1 %v5206_v9  ;;  %v93_v8 = vld [vmem:[%s7336_s1 + $0x1f0] sm:$0xff]  ;;  %v90_v9 = vld [vmem:[%s7336_s1 + $0x1d8] sm:$0xff] }
 0x11f   :  { %3731 = vmatprep.subr.bf16.mxu0 %v5213_v10  ;;  %3946 = vmatprep.subr.bf16.mxu1 %v5215_v11  ;;  %v94_v10 = vld [vmem:[%s7336_s1 + $0x1f8] sm:$0xff]  ;;  %v4696_v11 = vcombine.low %v81_v63, %v85_v0  ;;  %v4705_v13 = vcombine.high %v89_v7, %v93_v8  ;;  %v145_v0 = vld [vmem:[%s7336_s1 + $0x390] sm:$0xff] }
 0x120   :  { %v4707_v14 = vcombine.high %v90_v9, %v94_v10  ;;  %v4706_v20 = vcombine.low %v90_v9, %v94_v10  ;;  %v157_v9 = vld [vmem:[%s7336_s1 + $0x3f0] sm:$0xff]  ;;  %v154_v10 = vld [vmem:[%s7336_s1 + $0x3d8] sm:$0xff] }
 0x122   :  { %3732 = vmatpush1.bf16.msra.mxu0 %v5212_v16  ;;  %3947 = vmatpush1.bf16.msra.mxu1 %v5214_v17  ;;  %v101_v16 = vld [vmem:[%s7336_s1 + $0x230] sm:$0xff]  ;;  %v98_v17 = vld [vmem:[%s7336_s1 + $0x218] sm:$0xff] }
 0x123   :  { %3975 = vmatprep.subr.bf16.mxu0 %v4649_v18  ;;  %4190 = vmatprep.subr.bf16.mxu1 %v4651_v19  ;;  %v102_v18 = vld [vmem:[%s7336_s1 + $0x238] sm:$0xff]  ;;  %v4704_v19 = vcombine.low %v89_v7, %v93_v8  ;;  %v4713_v22 = vcombine.high %v97_v15, %v101_v16  ;;  %v153_v8 = vld [vmem:[%s7336_s1 + $0x3d0] sm:$0xff] }
 0x125   :  { %3750 = vmatmul.mubr.bf16.vlgmr.msra.gmra.mrb[0].mxu0 %v5331_v23  ;;  %3965 = vmatmul.mubr.bf16.vlgmr.msra.gmra.mrb[0].mxu1 %v5331_v23  ;;  %v4715_v23 = vcombine.high %v98_v17, %v102_v18 }
 0x126   :  { %3976 = vmatpush1.bf16.msra.mxu0 %v4648_v26  ;;  %4191 = vmatpush1.bf16.msra.mxu1 %v4650_v27  ;;  %v106_v26 = vld [vmem:[%s7336_s1 + $0x258] sm:$0xff] }
 0x127   :  { %3977 = vmatprep.subr.bf16.mxu0 %v4657_v28  ;;  %4192 = vmatprep.subr.bf16.mxu1 %v4659_v29  ;;  %v110_v27 = vld [vmem:[%s7336_s1 + $0x278] sm:$0xff]  ;;  %v4712_v28 = vcombine.low %v97_v15, %v101_v16  ;;  %v4714_v29 = vcombine.low %v98_v17, %v102_v18  ;;  %v161_v16 = vld [vmem:[%s7336_s1 + $0x410] sm:$0xff] }
 0x128   :  { %4007 = vmatprep.mubr.bf16.mxu0 %v5336_v40  ;;  %4222 = vmatprep.mubr.bf16.mxu1 %v5336_v40  ;;  %v4723_v31 = vcombine.high %v106_v26, %v110_v27  ;;  %v121_v40 = vld [vmem:[%s7336_s1 + $0x2d0] sm:$0xff]  ;;  %v162_v18 = vld [vmem:[%s7336_s1 + $0x418] sm:$0xff] }
 0x129   :  { %v165_v17 = vld [vmem:[%s7336_s1 + $0x430] sm:$0xff] }
 0x12a   :  { %3978 = vmatpush1.bf16.msra.mxu0 %v4656_v34  ;;  %4193 = vmatpush1.bf16.msra.mxu1 %v4658_v35  ;;  %v114_v34 = vld [vmem:[%s7336_s1 + $0x298] sm:$0xff] }
 0x12b   :  { %3979 = vmatprep.subr.bf16.mxu0 %v4665_v36  ;;  %4194 = vmatprep.subr.bf16.mxu1 %v4667_v37  ;;  %v118_v35 = vld [vmem:[%s7336_s1 + $0x2b8] sm:$0xff]  ;;  %v4720_v36 = vcombine.low %v105_v24, %v109_v25  ;;  %v4722_v37 = vcombine.low %v106_v26, %v110_v27  ;;  %v169_v25 = vld [vmem:[%s7336_s1 + $0x450] sm:$0xff] }
 0x12c   :  { %v4731_v39 = vcombine.high %v114_v34, %v118_v35  ;;  %v173_v26 = vld [vmem:[%s7336_s1 + $0x470] sm:$0xff]  ;;  %v170_v27 = vld [vmem:[%s7336_s1 + $0x458] sm:$0xff] }
 0x12e   :  { %3980 = vmatpush1.bf16.msra.mxu0 %v4664_v43  ;;  %4195 = vmatpush1.bf16.msra.mxu1 %v4666_v44  ;;  %v126_v43 = vld [vmem:[%s7336_s1 + $0x2f8] sm:$0xff]  ;;  %v4728_v44 = vcombine.low %v113_v32, %v117_v33  ;;  %v177_v33 = vld [vmem:[%s7336_s1 + $0x490] sm:$0xff] }
 0x12f   :  { %3981 = vmatprep.subr.bf16.mxu0 %v4673_v45  ;;  %4196 = vmatprep.subr.bf16.mxu1 %v4675_v46  ;;  %v4730_v45 = vcombine.low %v114_v34, %v118_v35  ;;  %v4737_v46 = vcombine.high %v121_v40, %v125_v41  ;;  %v4739_v47 = vcombine.high %v122_v42, %v126_v43  ;;  %v181_v34 = vld [vmem:[%s7336_s1 + $0x4b0] sm:$0xff]  ;;  %v5337_v35 = vld [vmem:[%s7337_s0] ss:$36 sps:$4 sm:$0xff]  }
 0x132   :  { %3982 = vmatpush1.bf16.msra.mxu0 %v4672_v51  ;;  %4197 = vmatpush1.bf16.msra.mxu1 %v4674_v52  ;;  %v134_v51 = vld [vmem:[%s7336_s1 + $0x338] sm:$0xff]  ;;  %v4736_v52 = vcombine.low %v121_v40, %v125_v41  ;;  %v4793_v40 = vcombine.high %v177_v33, %v181_v34 }
 0x133   :  { %3983 = vmatprep.subr.bf16.mxu0 %v4681_v53  ;;  %4198 = vmatprep.subr.bf16.mxu1 %v4683_v54  ;;  %v4738_v53 = vcombine.low %v122_v42, %v126_v43  ;;  %v4745_v54 = vcombine.high %v129_v48, %v133_v49  ;;  %v4747_v55 = vcombine.high %v130_v50, %v134_v51  ;;  %v185_v42 = vld [vmem:[%s7336_s1 + $0x4d0] sm:$0xff] }
 0x134   :  { %v189_v43 = vld [vmem:[%s7336_s1 + $0x4f0] sm:$0xff] }
 0x136   :  { %3984 = vmatpush1.bf16.msra.mxu0 %v4680_v59  ;;  %4199 = vmatpush1.bf16.msra.mxu1 %v4682_v60  ;;  %v142_v59 = vld [vmem:[%s7336_s1 + $0x378] sm:$0xff]  ;;  %v4744_v60 = vcombine.low %v129_v48, %v133_v49  ;;  %v4801_v49 = vcombine.high %v185_v42, %v189_v43 }
 0x137   :  { %3985 = vmatprep.subr.bf16.mxu0 %v4689_v61  ;;  %4200 = vmatprep.subr.bf16.mxu1 %v4691_v62  ;;  %v4746_v61 = vcombine.low %v130_v50, %v134_v51  ;;  %v4753_v62 = vcombine.high %v137_v56, %v141_v57  ;;  %v4755_v63 = vcombine.high %v138_v58, %v142_v59  ;;  %v193_v51 = vld [vmem:[%s7336_s1 + $0x510] sm:$0xff] }
 0x13a   :  { %3986 = vmatpush1.bf16.msra.mxu0 %v4688_v3  ;;  %4201 = vmatpush1.bf16.msra.mxu1 %v4690_v4  ;;  %v150_v3 = vld [vmem:[%s7336_s1 + $0x3b8] sm:$0xff]  ;;  %v4752_v4 = vcombine.low %v137_v56, %v141_v57 }
 0x13b   :  { %3987 = vmatprep.subr.bf16.mxu0 %v4697_v5  ;;  %4202 = vmatprep.subr.bf16.mxu1 %v4699_v6  ;;  %v4754_v5 = vcombine.low %v138_v58, %v142_v59  ;;  %v4761_v6 = vcombine.high %v145_v0, %v149_v1  ;;  %v4763_v7 = vcombine.high %v146_v2, %v150_v3  ;;  %v201_v59 = vld [vmem:[%s7336_s1 + $0x550] sm:$0xff] }
 0x13e   :  { %3988 = vmatpush1.bf16.msra.mxu0 %v4696_v11  ;;  %4203 = vmatpush1.bf16.msra.mxu1 %v4698_v12  ;;  %v158_v11 = vld [vmem:[%s7336_s1 + $0x3f8] sm:$0xff]  ;;  %v4760_v12 = vcombine.low %v145_v0, %v149_v1 }
 0x13f   :  { %3989 = vmatprep.subr.bf16.mxu0 %v4705_v13  ;;  %4204 = vmatprep.subr.bf16.mxu1 %v4707_v14  ;;  %v4762_v13 = vcombine.low %v146_v2, %v150_v3  ;;  %v4769_v14 = vcombine.high %v153_v8, %v157_v9  ;;  %v4771_v15 = vcombine.high %v154_v10, %v158_v11  ;;  %v209_v3 = vld [vmem:[%s7336_s1 + $0x590] sm:$0xff] }
 0x142   :  { %3990 = vmatpush1.bf16.msra.mxu0 %v4704_v19  ;;  %4205 = vmatpush1.bf16.msra.mxu1 %v4706_v20  ;;  %v166_v19 = vld [vmem:[%s7336_s1 + $0x438] sm:$0xff]  ;;  %v4768_v20 = vcombine.low %v153_v8, %v157_v9 }
 0x143   :  { %3991 = vmatprep.subr.bf16.mxu0 %v4713_v22  ;;  %4206 = vmatprep.subr.bf16.mxu1 %v4715_v23  ;;  %v4770_v22 = vcombine.low %v154_v10, %v158_v11  ;;  %v4777_v23 = vcombine.high %v161_v16, %v165_v17  ;;  %v4779_v24 = vcombine.high %v162_v18, %v166_v19  ;;  %v217_v11 = vld [vmem:[%s7336_s1 + $0x5d0] sm:$0xff] }
 0x146   :  { %3992 = vmatpush1.bf16.msra.mxu0 %v4712_v28  ;;  %4207 = vmatpush1.bf16.msra.mxu1 %v4714_v29  ;;  %v174_v28 = vld [vmem:[%s7336_s1 + $0x478] sm:$0xff]  ;;  %v4776_v29 = vcombine.low %v161_v16, %v165_v17 }
 0x147   :  { %3993 = vmatprep.subr.bf16.mxu0 %v4721_v30  ;;  %4208 = vmatprep.subr.bf16.mxu1 %v4723_v31  ;;  %v4778_v30 = vcombine.low %v162_v18, %v166_v19  ;;  %v4785_v31 = vcombine.high %v169_v25, %v173_v26  ;;  %v4787_v32 = vcombine.high %v170_v27, %v174_v28  ;;  %v225_v19 = vld [vmem:[%s7336_s1 + $0x610] sm:$0xff] }
 0x14a   :  { %3994 = vmatpush1.bf16.msra.mxu0 %v4720_v36  ;;  %4209 = vmatpush1.bf16.msra.mxu1 %v4722_v37  ;;  %v178_v36 = vld [vmem:[%s7336_s1 + $0x498] sm:$0xff] }
 0x14b   :  { %3995 = vmatprep.subr.bf16.mxu0 %v4729_v38  ;;  %4210 = vmatprep.subr.bf16.mxu1 %v4731_v39  ;;  %v182_v37 = vld [vmem:[%s7336_s1 + $0x4b8] sm:$0xff]  ;;  %v4784_v38 = vcombine.low %v169_v25, %v173_v26  ;;  %v4786_v39 = vcombine.low %v170_v27, %v174_v28  ;;  %v233_v28 = vld [vmem:[%s7336_s1 + $0x650] sm:$0xff] }
 0x14c   :  { %v4795_v41 = vcombine.high %v178_v36, %v182_v37  ;;  %v4794_v48 = vcombine.low %v178_v36, %v182_v37  ;;  %v241_v36 = vld [vmem:[%s7336_s1 + $0x690] sm:$0xff] }
 0x14d   :  { %v245_v37 = vld [vmem:[%s7336_s1 + $0x6b0] sm:$0xff] }
 0x14e   :  { %3996 = vmatpush1.bf16.msra.mxu0 %v4728_v44  ;;  %4211 = vmatpush1.bf16.msra.mxu1 %v4730_v45  ;;  %v5338_v44 = vld [vmem:[%s7337_s0 + $0xc] ss:$36 sps:$4 sm:$0xff]   ;;  %v186_v45 = vld [vmem:[%s7336_s1 + $0x4d8] sm:$0xff] }
 0x14f   :  { %3997 = vmatprep.subr.bf16.mxu0 %v4737_v46  ;;  %4212 = vmatprep.subr.bf16.mxu1 %v4739_v47  ;;  %v190_v46 = vld [vmem:[%s7336_s1 + $0x4f8] sm:$0xff]  ;;  %v4792_v47 = vcombine.low %v177_v33, %v181_v34 }
 0x150   :  { %v4803_v50 = vcombine.high %v186_v45, %v190_v46  ;;  %v4802_v56 = vcombine.low %v186_v45, %v190_v46  ;;  %v253_v45 = vld [vmem:[%s7336_s1 + $0x6f0] sm:$0xff]  ;;  %v250_v46 = vld [vmem:[%s7336_s1 + $0x6d8] sm:$0xff] }
 0x152   :  { %3998 = vmatpush1.bf16.msra.mxu0 %v4736_v52  ;;  %4213 = vmatpush1.bf16.msra.mxu1 %v4738_v53  ;;  %v197_v52 = vld [vmem:[%s7336_s1 + $0x530] sm:$0xff]  ;;  %v194_v53 = vld [vmem:[%s7336_s1 + $0x518] sm:$0xff] }
 0x153   :  { %3999 = vmatprep.subr.bf16.mxu0 %v4745_v54  ;;  %4214 = vmatprep.subr.bf16.mxu1 %v4747_v55  ;;  %v198_v54 = vld [vmem:[%s7336_s1 + $0x538] sm:$0xff]  ;;  %v4800_v55 = vcombine.low %v185_v42, %v189_v43  ;;  %v4809_v57 = vcombine.high %v193_v51, %v197_v52  ;;  %v4857_v42 = vcombine.high %v241_v36, %v245_v37 }
 0x154   :  { %v4811_v58 = vcombine.high %v194_v53, %v198_v54  ;;  %v4810_v0 = vcombine.low %v194_v53, %v198_v54  ;;  %v261_v53 = vld [vmem:[%s7336_s1 + $0x730] sm:$0xff]  ;;  %v258_v54 = vld [vmem:[%s7336_s1 + $0x718] sm:$0xff] }
 0x156   :  { %4000 = vmatpush1.bf16.msra.mxu0 %v4744_v60  ;;  %4215 = vmatpush1.bf16.msra.mxu1 %v4746_v61  ;;  %v205_v60 = vld [vmem:[%s7336_s1 + $0x570] sm:$0xff]  ;;  %v202_v61 = vld [vmem:[%s7336_s1 + $0x558] sm:$0xff] }
 0x157   :  { %4001 = vmatprep.subr.bf16.mxu0 %v4753_v62  ;;  %4216 = vmatprep.subr.bf16.mxu1 %v4755_v63  ;;  %v206_v62 = vld [vmem:[%s7336_s1 + $0x578] sm:$0xff]  ;;  %v4808_v63 = vcombine.low %v193_v51, %v197_v52  ;;  %v4817_v1 = vcombine.high %v201_v59, %v205_v60  ;;  %v257_v52 = vld [vmem:[%s7336_s1 + $0x710] sm:$0xff] }
 0x158   :  { %v4819_v2 = vcombine.high %v202_v61, %v206_v62  ;;  %v4818_v8 = vcombine.low %v202_v61, %v206_v62  ;;  %v269_v61 = vld [vmem:[%s7336_s1 + $0x770] sm:$0xff]  ;;  %v266_v62 = vld [vmem:[%s7336_s1 + $0x758] sm:$0xff] }
 0x15a   :  { %4002 = vmatpush1.bf16.msra.mxu0 %v4752_v4  ;;  %4217 = vmatpush1.bf16.msra.mxu1 %v4754_v5  ;;  %v213_v4 = vld [vmem:[%s7336_s1 + $0x5b0] sm:$0xff]  ;;  %v210_v5 = vld [vmem:[%s7336_s1 + $0x598] sm:$0xff] }
 0x15b   :  { %4003 = vmatprep.subr.bf16.mxu0 %v4761_v6  ;;  %4218 = vmatprep.subr.bf16.mxu1 %v4763_v7  ;;  %v214_v6 = vld [vmem:[%s7336_s1 + $0x5b8] sm:$0xff]  ;;  %v4816_v7 = vcombine.low %v201_v59, %v205_v60  ;;  %v4825_v9 = vcombine.high %v209_v3, %v213_v4  ;;  %v265_v60 = vld [vmem:[%s7336_s1 + $0x750] sm:$0xff] }
 0x15c   :  { %v4827_v10 = vcombine.high %v210_v5, %v214_v6  ;;  %v4826_v16 = vcombine.low %v210_v5, %v214_v6  ;;  %v277_v5 = vld [vmem:[%s7336_s1 + $0x7b0] sm:$0xff]  ;;  %v274_v6 = vld [vmem:[%s7336_s1 + $0x798] sm:$0xff] }
 0x15e   :  { %4004 = vmatpush1.bf16.msra.mxu0 %v4760_v12  ;;  %4219 = vmatpush1.bf16.msra.mxu1 %v4762_v13  ;;  %v221_v12 = vld [vmem:[%s7336_s1 + $0x5f0] sm:$0xff]  ;;  %v218_v13 = vld [vmem:[%s7336_s1 + $0x5d8] sm:$0xff] }
 0x15f   :  { %4005 = vmatprep.subr.bf16.mxu0 %v4769_v14  ;;  %4220 = vmatprep.subr.bf16.mxu1 %v4771_v15  ;;  %v222_v14 = vld [vmem:[%s7336_s1 + $0x5f8] sm:$0xff]  ;;  %v4824_v15 = vcombine.low %v209_v3, %v213_v4  ;;  %v4833_v17 = vcombine.high %v217_v11, %v221_v12  ;;  %v273_v4 = vld [vmem:[%s7336_s1 + $0x790] sm:$0xff] }
 0x160   :  { %v4835_v18 = vcombine.high %v218_v13, %v222_v14  ;;  %v4834_v25 = vcombine.low %v218_v13, %v222_v14  ;;  %v285_v13 = vld [vmem:[%s7336_s1 + $0x7f0] sm:$0xff]  ;;  %v282_v14 = vld [vmem:[%s7336_s1 + $0x7d8] sm:$0xff] }
 0x162   :  { %4006 = vmatpush1.bf16.msra.mxu0 %v4768_v20  ;;  %4221 = vmatpush1.bf16.msra.mxu1 %v4770_v22  ;;  %v229_v20 = vld [vmem:[%s7336_s1 + $0x630] sm:$0xff]  ;;  %v226_v22 = vld [vmem:[%s7336_s1 + $0x618] sm:$0xff] }
 0x163   :  { %4018 = vmatprep.subr.bf16.mxu0 %v4777_v23  ;;  %4233 = vmatprep.subr.bf16.mxu1 %v4779_v24  ;;  %v230_v23 = vld [vmem:[%s7336_s1 + $0x638] sm:$0xff]  ;;  %v4832_v24 = vcombine.low %v217_v11, %v221_v12  ;;  %v4841_v26 = vcombine.high %v225_v19, %v229_v20  ;;  %v281_v12 = vld [vmem:[%s7336_s1 + $0x7d0] sm:$0xff] }
 0x164   :  { %v4843_v27 = vcombine.high %v226_v22, %v230_v23  ;;  %v4842_v33 = vcombine.low %v226_v22, %v230_v23  ;;  %v293_v22 = vld [vmem:[%s7336_s1 + $0x830] sm:$0xff]  ;;  %v290_v23 = vld [vmem:[%s7336_s1 + $0x818] sm:$0xff] }
 0x165   :  { %4008 = vmatmul.mubr.bf16.vlgmr.msra.gmra.mrb[4].mxu0 %v5337_v35  ;;  %4223 = vmatmul.mubr.bf16.vlgmr.msra.gmra.mrb[4].mxu1 %v5337_v35 }
 0x166   :  { %4019 = vmatpush1.bf16.msra.mxu0 %v4776_v29  ;;  %4234 = vmatpush1.bf16.msra.mxu1 %v4778_v30  ;;  %v237_v29 = vld [vmem:[%s7336_s1 + $0x670] sm:$0xff]  ;;  %v234_v30 = vld [vmem:[%s7336_s1 + $0x658] sm:$0xff] }
 0x167   :  { %4020 = vmatprep.subr.bf16.mxu0 %v4785_v31  ;;  %4235 = vmatprep.subr.bf16.mxu1 %v4787_v32  ;;  %v238_v31 = vld [vmem:[%s7336_s1 + $0x678] sm:$0xff]  ;;  %v4840_v32 = vcombine.low %v225_v19, %v229_v20  ;;  %v4849_v34 = vcombine.high %v233_v28, %v237_v29  ;;  %v289_v20 = vld [vmem:[%s7336_s1 + $0x810] sm:$0xff] }
 0x168   :  { %4050 = vmatprep.mubr.bf16.mxu0 %v5338_v44  ;;  %4265 = vmatprep.mubr.bf16.mxu1 %v5338_v44  ;;  %v4851_v35 = vcombine.high %v234_v30, %v238_v31  ;;  %v249_v44 = vld [vmem:[%s7336_s1 + $0x6d0] sm:$0xff] }
 0x16a   :  { %4021 = vmatpush1.bf16.msra.mxu0 %v4784_v38  ;;  %4236 = vmatpush1.bf16.msra.mxu1 %v4786_v39  ;;  %v242_v38 = vld [vmem:[%s7336_s1 + $0x698] sm:$0xff] }
 0x16b   :  { %4022 = vmatprep.subr.bf16.mxu0 %v4793_v40  ;;  %4237 = vmatprep.subr.bf16.mxu1 %v4795_v41  ;;  %v246_v39 = vld [vmem:[%s7336_s1 + $0x6b8] sm:$0xff]  ;;  %v4848_v40 = vcombine.low %v233_v28, %v237_v29  ;;  %v4850_v41 = vcombine.low %v234_v30, %v238_v31  ;;  %v297_v29 = vld [vmem:[%s7336_s1 + $0x850] sm:$0xff] }
 0x16c   :  { %v4859_v43 = vcombine.high %v242_v38, %v246_v39  ;;  %v301_v30 = vld [vmem:[%s7336_s1 + $0x870] sm:$0xff]  ;;  %v298_v31 = vld [vmem:[%s7336_s1 + $0x858] sm:$0xff] }
 0x16e   :  { %4023 = vmatpush1.bf16.msra.mxu0 %v4792_v47  ;;  %4238 = vmatpush1.bf16.msra.mxu1 %v4794_v48  ;;  %v254_v47 = vld [vmem:[%s7336_s1 + $0x6f8] sm:$0xff]  ;;  %v4856_v48 = vcombine.low %v241_v36, %v245_v37  ;;  %v305_v37 = vld [vmem:[%s7336_s1 + $0x890] sm:$0xff] }
 0x16f   :  { %4024 = vmatprep.subr.bf16.mxu0 %v4801_v49  ;;  %4239 = vmatprep.subr.bf16.mxu1 %v4803_v50  ;;  %v4858_v49 = vcombine.low %v242_v38, %v246_v39  ;;  %v4865_v50 = vcombine.high %v249_v44, %v253_v45  ;;  %v4867_v51 = vcombine.high %v250_v46, %v254_v47  ;;  %v309_v38 = vld [vmem:[%s7336_s1 + $0x8b0] sm:$0xff]  ;;  %v5339_v39 = vld [vmem:[%s7337_s0 + $0x8] ss:$36 sps:$4 sm:$0xff]  }
 0x172   :  { %4025 = vmatpush1.bf16.msra.mxu0 %v4800_v55  ;;  %4240 = vmatpush1.bf16.msra.mxu1 %v4802_v56  ;;  %v262_v55 = vld [vmem:[%s7336_s1 + $0x738] sm:$0xff]  ;;  %v4864_v56 = vcombine.low %v249_v44, %v253_v45  ;;  %v4921_v44 = vcombine.high %v305_v37, %v309_v38 }
 0x173   :  { %4026 = vmatprep.subr.bf16.mxu0 %v4809_v57  ;;  %4241 = vmatprep.subr.bf16.mxu1 %v4811_v58  ;;  %v4866_v57 = vcombine.low %v250_v46, %v254_v47  ;;  %v4873_v58 = vcombine.high %v257_v52, %v261_v53  ;;  %v4875_v59 = vcombine.high %v258_v54, %v262_v55  ;;  %v313_v46 = vld [vmem:[%s7336_s1 + $0x8d0] sm:$0xff] }
 0x174   :  { %v317_v47 = vld [vmem:[%s7336_s1 + $0x8f0] sm:$0xff] }
 0x176   :  { %4027 = vmatpush1.bf16.msra.mxu0 %v4808_v63  ;;  %4242 = vmatpush1.bf16.msra.mxu1 %v4810_v0  ;;  %v270_v63 = vld [vmem:[%s7336_s1 + $0x778] sm:$0xff]  ;;  %v4872_v0 = vcombine.low %v257_v52, %v261_v53  ;;  %v4929_v53 = vcombine.high %v313_v46, %v317_v47 }
 0x177   :  { %4028 = vmatprep.subr.bf16.mxu0 %v4817_v1  ;;  %4243 = vmatprep.subr.bf16.mxu1 %v4819_v2  ;;  %v4874_v1 = vcombine.low %v258_v54, %v262_v55  ;;  %v4881_v2 = vcombine.high %v265_v60, %v269_v61  ;;  %v4883_v3 = vcombine.high %v266_v62, %v270_v63  ;;  %v321_v55 = vld [vmem:[%s7336_s1 + $0x910] sm:$0xff] }
 0x17a   :  { %4029 = vmatpush1.bf16.msra.mxu0 %v4816_v7  ;;  %4244 = vmatpush1.bf16.msra.mxu1 %v4818_v8  ;;  %v278_v7 = vld [vmem:[%s7336_s1 + $0x7b8] sm:$0xff]  ;;  %v4880_v8 = vcombine.low %v265_v60, %v269_v61 }
 0x17b   :  { %4030 = vmatprep.subr.bf16.mxu0 %v4825_v9  ;;  %4245 = vmatprep.subr.bf16.mxu1 %v4827_v10  ;;  %v4882_v9 = vcombine.low %v266_v62, %v270_v63  ;;  %v4889_v10 = vcombine.high %v273_v4, %v277_v5  ;;  %v4891_v11 = vcombine.high %v274_v6, %v278_v7  ;;  %v329_v63 = vld [vmem:[%s7336_s1 + $0x950] sm:$0xff] }
 0x17e   :  { %4031 = vmatpush1.bf16.msra.mxu0 %v4824_v15  ;;  %4246 = vmatpush1.bf16.msra.mxu1 %v4826_v16  ;;  %v286_v15 = vld [vmem:[%s7336_s1 + $0x7f8] sm:$0xff]  ;;  %v4888_v16 = vcombine.low %v273_v4, %v277_v5 }
 0x17f   :  { %4032 = vmatprep.subr.bf16.mxu0 %v4833_v17  ;;  %4247 = vmatprep.subr.bf16.mxu1 %v4835_v18  ;;  %v4890_v17 = vcombine.low %v274_v6, %v278_v7  ;;  %v4897_v18 = vcombine.high %v281_v12, %v285_v13  ;;  %v4899_v19 = vcombine.high %v282_v14, %v286_v15  ;;  %v337_v7 = vld [vmem:[%s7336_s1 + $0x990] sm:$0xff] }
 0x182   :  { %4033 = vmatpush1.bf16.msra.mxu0 %v4832_v24  ;;  %4248 = vmatpush1.bf16.msra.mxu1 %v4834_v25  ;;  %v294_v24 = vld [vmem:[%s7336_s1 + $0x838] sm:$0xff]  ;;  %v4896_v25 = vcombine.low %v281_v12, %v285_v13 }
 0x183   :  { %4034 = vmatprep.subr.bf16.mxu0 %v4841_v26  ;;  %4249 = vmatprep.subr.bf16.mxu1 %v4843_v27  ;;  %v4898_v26 = vcombine.low %v282_v14, %v286_v15  ;;  %v4905_v27 = vcombine.high %v289_v20, %v293_v22  ;;  %v4907_v28 = vcombine.high %v290_v23, %v294_v24  ;;  %v345_v15 = vld [vmem:[%s7336_s1 + $0x9d0] sm:$0xff] }
 0x186   :  { %4035 = vmatpush1.bf16.msra.mxu0 %v4840_v32  ;;  %4250 = vmatpush1.bf16.msra.mxu1 %v4842_v33  ;;  %v302_v32 = vld [vmem:[%s7336_s1 + $0x878] sm:$0xff]  ;;  %v4904_v33 = vcombine.low %v289_v20, %v293_v22 }
 0x187   :  { %4036 = vmatprep.subr.bf16.mxu0 %v4849_v34  ;;  %4251 = vmatprep.subr.bf16.mxu1 %v4851_v35  ;;  %v4906_v34 = vcombine.low %v290_v23, %v294_v24  ;;  %v4913_v35 = vcombine.high %v297_v29, %v301_v30  ;;  %v4915_v36 = vcombine.high %v298_v31, %v302_v32  ;;  %v353_v24 = vld [vmem:[%s7336_s1 + $0xa10] sm:$0xff] }
 0x18a   :  { %4037 = vmatpush1.bf16.msra.mxu0 %v4848_v40  ;;  %4252 = vmatpush1.bf16.msra.mxu1 %v4850_v41  ;;  %v306_v40 = vld [vmem:[%s7336_s1 + $0x898] sm:$0xff] }
 0x18b   :  { %4038 = vmatprep.subr.bf16.mxu0 %v4857_v42  ;;  %4253 = vmatprep.subr.bf16.mxu1 %v4859_v43  ;;  %v310_v41 = vld [vmem:[%s7336_s1 + $0x8b8] sm:$0xff]  ;;  %v4912_v42 = vcombine.low %v297_v29, %v301_v30  ;;  %v4914_v43 = vcombine.low %v298_v31, %v302_v32  ;;  %v361_v32 = vld [vmem:[%s7336_s1 + $0xa50] sm:$0xff] }
 0x18c   :  { %v4923_v45 = vcombine.high %v306_v40, %v310_v41  ;;  %v4922_v52 = vcombine.low %v306_v40, %v310_v41  ;;  %v369_v40 = vld [vmem:[%s7336_s1 + $0xa90] sm:$0xff] }
 0x18d   :  { %v373_v41 = vld [vmem:[%s7336_s1 + $0xab0] sm:$0xff] }
 0x18e   :  { %4039 = vmatpush1.bf16.msra.mxu0 %v4856_v48  ;;  %4254 = vmatpush1.bf16.msra.mxu1 %v4858_v49  ;;  %v5340_v48 = vld [vmem:[%s7337_s0 + $0x14] ss:$36 sps:$4 sm:$0xff]  }
 0x18f   :  { %4040 = vmatprep.subr.bf16.mxu0 %v4865_v50  ;;  %4255 = vmatprep.subr.bf16.mxu1 %v4867_v51  ;;  %v314_v49 = vld [vmem:[%s7336_s1 + $0x8d8] sm:$0xff]  ;;  %v4920_v51 = vcombine.low %v305_v37, %v309_v38 }
 0x190   :  { %v318_v50 = vld [vmem:[%s7336_s1 + $0x8f8] sm:$0xff] }
 0x191   :  { %v4931_v54 = vcombine.high %v314_v49, %v318_v50  ;;  %v4930_v60 = vcombine.low %v314_v49, %v318_v50  ;;  %v381_v49 = vld [vmem:[%s7336_s1 + $0xaf0] sm:$0xff]  ;;  %v378_v50 = vld [vmem:[%s7336_s1 + $0xad8] sm:$0xff] }
 0x192   :  { %4041 = vmatpush1.bf16.msra.mxu0 %v4864_v56  ;;  %4256 = vmatpush1.bf16.msra.mxu1 %v4866_v57  ;;  %v325_v56 = vld [vmem:[%s7336_s1 + $0x930] sm:$0xff]  ;;  %v322_v57 = vld [vmem:[%s7336_s1 + $0x918] sm:$0xff] }
 0x193   :  { %4042 = vmatprep.subr.bf16.mxu0 %v4873_v58  ;;  %4257 = vmatprep.subr.bf16.mxu1 %v4875_v59  ;;  %v326_v58 = vld [vmem:[%s7336_s1 + $0x938] sm:$0xff]  ;;  %v4928_v59 = vcombine.low %v313_v46, %v317_v47  ;;  %v4937_v61 = vcombine.high %v321_v55, %v325_v56  ;;  %v4985_v46 = vcombine.high %v369_v40, %v373_v41 }
 0x194   :  { %v4939_v62 = vcombine.high %v322_v57, %v326_v58  ;;  %v4938_v4 = vcombine.low %v322_v57, %v326_v58  ;;  %v389_v57 = vld [vmem:[%s7336_s1 + $0xb30] sm:$0xff]  ;;  %v386_v58 = vld [vmem:[%s7336_s1 + $0xb18] sm:$0xff] }
 0x196   :  { %4043 = vmatpush1.bf16.msra.mxu0 %v4872_v0  ;;  %4258 = vmatpush1.bf16.msra.mxu1 %v4874_v1  ;;  %v333_v0 = vld [vmem:[%s7336_s1 + $0x970] sm:$0xff]  ;;  %v330_v1 = vld [vmem:[%s7336_s1 + $0x958] sm:$0xff] }
 0x197   :  { %4044 = vmatprep.subr.bf16.mxu0 %v4881_v2  ;;  %4259 = vmatprep.subr.bf16.mxu1 %v4883_v3  ;;  %v334_v2 = vld [vmem:[%s7336_s1 + $0x978] sm:$0xff]  ;;  %v4936_v3 = vcombine.low %v321_v55, %v325_v56  ;;  %v4945_v5 = vcombine.high %v329_v63, %v333_v0  ;;  %v385_v56 = vld [vmem:[%s7336_s1 + $0xb10] sm:$0xff] }
 0x198   :  { %v4947_v6 = vcombine.high %v330_v1, %v334_v2  ;;  %v4946_v12 = vcombine.low %v330_v1, %v334_v2  ;;  %v397_v1 = vld [vmem:[%s7336_s1 + $0xb70] sm:$0xff]  ;;  %v394_v2 = vld [vmem:[%s7336_s1 + $0xb58] sm:$0xff] }
 0x19a   :  { %4045 = vmatpush1.bf16.msra.mxu0 %v4880_v8  ;;  %4260 = vmatpush1.bf16.msra.mxu1 %v4882_v9  ;;  %v341_v8 = vld [vmem:[%s7336_s1 + $0x9b0] sm:$0xff]  ;;  %v338_v9 = vld [vmem:[%s7336_s1 + $0x998] sm:$0xff] }
 0x19b   :  { %4046 = vmatprep.subr.bf16.mxu0 %v4889_v10  ;;  %4261 = vmatprep.subr.bf16.mxu1 %v4891_v11  ;;  %v342_v10 = vld [vmem:[%s7336_s1 + $0x9b8] sm:$0xff]  ;;  %v4944_v11 = vcombine.low %v329_v63, %v333_v0  ;;  %v4953_v13 = vcombine.high %v337_v7, %v341_v8  ;;  %v393_v0 = vld [vmem:[%s7336_s1 + $0xb50] sm:$0xff] }
 0x19c   :  { %v4955_v14 = vcombine.high %v338_v9, %v342_v10  ;;  %v4954_v20 = vcombine.low %v338_v9, %v342_v10  ;;  %v405_v9 = vld [vmem:[%s7336_s1 + $0xbb0] sm:$0xff]  ;;  %v402_v10 = vld [vmem:[%s7336_s1 + $0xb98] sm:$0xff] }
 0x19e   :  { %4047 = vmatpush1.bf16.msra.mxu0 %v4888_v16  ;;  %4262 = vmatpush1.bf16.msra.mxu1 %v4890_v17  ;;  %v349_v16 = vld [vmem:[%s7336_s1 + $0x9f0] sm:$0xff]  ;;  %v346_v17 = vld [vmem:[%s7336_s1 + $0x9d8] sm:$0xff] }
 0x19f   :  { %4048 = vmatprep.subr.bf16.mxu0 %v4897_v18  ;;  %4263 = vmatprep.subr.bf16.mxu1 %v4899_v19  ;;  %v350_v18 = vld [vmem:[%s7336_s1 + $0x9f8] sm:$0xff]  ;;  %v4952_v19 = vcombine.low %v337_v7, %v341_v8  ;;  %v4961_v22 = vcombine.high %v345_v15, %v349_v16  ;;  %v401_v8 = vld [vmem:[%s7336_s1 + $0xb90] sm:$0xff] }
 0x1a0   :  { %v4963_v23 = vcombine.high %v346_v17, %v350_v18  ;;  %v4962_v29 = vcombine.low %v346_v17, %v350_v18  ;;  %v413_v17 = vld [vmem:[%s7336_s1 + $0xbf0] sm:$0xff]  ;;  %v410_v18 = vld [vmem:[%s7336_s1 + $0xbd8] sm:$0xff] }
 0x1a2   :  { %4049 = vmatpush1.bf16.msra.mxu0 %v4896_v25  ;;  %4264 = vmatpush1.bf16.msra.mxu1 %v4898_v26  ;;  %v357_v25 = vld [vmem:[%s7336_s1 + $0xa30] sm:$0xff]  ;;  %v354_v26 = vld [vmem:[%s7336_s1 + $0xa18] sm:$0xff] }
 0x1a3   :  { %4061 = vmatprep.subr.bf16.mxu0 %v4905_v27  ;;  %4276 = vmatprep.subr.bf16.mxu1 %v4907_v28  ;;  %v358_v27 = vld [vmem:[%s7336_s1 + $0xa38] sm:$0xff]  ;;  %v4960_v28 = vcombine.low %v345_v15, %v349_v16  ;;  %v4969_v30 = vcombine.high %v353_v24, %v357_v25  ;;  %v409_v16 = vld [vmem:[%s7336_s1 + $0xbd0] sm:$0xff] }
 0x1a4   :  { %v4971_v31 = vcombine.high %v354_v26, %v358_v27  ;;  %v4970_v37 = vcombine.low %v354_v26, %v358_v27  ;;  %v421_v26 = vld [vmem:[%s7336_s1 + $0xc30] sm:$0xff]  ;;  %v418_v27 = vld [vmem:[%s7336_s1 + $0xc18] sm:$0xff] }
 0x1a5   :  { %4051 = vmatmul.mubr.bf16.vlgmr.msra.gmra.mrb[4].mxu0 %v5339_v39  ;;  %4266 = vmatmul.mubr.bf16.vlgmr.msra.gmra.mrb[4].mxu1 %v5339_v39 }
 0x1a6   :  { %4062 = vmatpush1.bf16.msra.mxu0 %v4904_v33  ;;  %4277 = vmatpush1.bf16.msra.mxu1 %v4906_v34  ;;  %v365_v33 = vld [vmem:[%s7336_s1 + $0xa70] sm:$0xff]  ;;  %v362_v34 = vld [vmem:[%s7336_s1 + $0xa58] sm:$0xff] }
 0x1a7   :  { %4063 = vmatprep.subr.bf16.mxu0 %v4913_v35  ;;  %4278 = vmatprep.subr.bf16.mxu1 %v4915_v36  ;;  %v366_v35 = vld [vmem:[%s7336_s1 + $0xa78] sm:$0xff]  ;;  %v4968_v36 = vcombine.low %v353_v24, %v357_v25  ;;  %v4977_v38 = vcombine.high %v361_v32, %v365_v33  ;;  %v417_v25 = vld [vmem:[%s7336_s1 + $0xc10] sm:$0xff] }
 0x1a8   :  { %4093 = vmatprep.mubr.bf16.mxu0 %v5340_v48  ;;  %4308 = vmatprep.mubr.bf16.mxu1 %v5340_v48  ;;  %v4979_v39 = vcombine.high %v362_v34, %v366_v35  ;;  %v377_v48 = vld [vmem:[%s7336_s1 + $0xad0] sm:$0xff] }
 0x1aa   :  { %4064 = vmatpush1.bf16.msra.mxu0 %v4912_v42  ;;  %4279 = vmatpush1.bf16.msra.mxu1 %v4914_v43  ;;  %v370_v42 = vld [vmem:[%s7336_s1 + $0xa98] sm:$0xff] }
 0x1ab   :  { %4065 = vmatprep.subr.bf16.mxu0 %v4921_v44  ;;  %4280 = vmatprep.subr.bf16.mxu1 %v4923_v45  ;;  %v374_v43 = vld [vmem:[%s7336_s1 + $0xab8] sm:$0xff]  ;;  %v4976_v44 = vcombine.low %v361_v32, %v365_v33  ;;  %v4978_v45 = vcombine.low %v362_v34, %v366_v35  ;;  %v425_v33 = vld [vmem:[%s7336_s1 + $0xc50] sm:$0xff] }
 0x1ac   :  { %v4987_v47 = vcombine.high %v370_v42, %v374_v43  ;;  %v429_v34 = vld [vmem:[%s7336_s1 + $0xc70] sm:$0xff]  ;;  %v426_v35 = vld [vmem:[%s7336_s1 + $0xc58] sm:$0xff] }
 0x1ae   :  { %4066 = vmatpush1.bf16.msra.mxu0 %v4920_v51  ;;  %4281 = vmatpush1.bf16.msra.mxu1 %v4922_v52  ;;  %v382_v51 = vld [vmem:[%s7336_s1 + $0xaf8] sm:$0xff]  ;;  %v4984_v52 = vcombine.low %v369_v40, %v373_v41  ;;  %v433_v41 = vld [vmem:[%s7336_s1 + $0xc90] sm:$0xff] }
 0x1af   :  { %4067 = vmatprep.subr.bf16.mxu0 %v4929_v53  ;;  %4282 = vmatprep.subr.bf16.mxu1 %v4931_v54  ;;  %v4986_v53 = vcombine.low %v370_v42, %v374_v43  ;;  %v4993_v54 = vcombine.high %v377_v48, %v381_v49  ;;  %v4995_v55 = vcombine.high %v378_v50, %v382_v51  ;;  %v437_v42 = vld [vmem:[%s7336_s1 + $0xcb0] sm:$0xff] }
 0x1b0   :  { %v5341_v43 = vld [vmem:[%s7337_s0 + $0x10] ss:$36 sps:$4 sm:$0xff]  }
 0x1b2   :  { %4068 = vmatpush1.bf16.msra.mxu0 %v4928_v59  ;;  %4283 = vmatpush1.bf16.msra.mxu1 %v4930_v60  ;;  %v390_v59 = vld [vmem:[%s7336_s1 + $0xb38] sm:$0xff]  ;;  %v4992_v60 = vcombine.low %v377_v48, %v381_v49  ;;  %v5049_v48 = vcombine.high %v433_v41, %v437_v42 }
 0x1b3   :  { %4069 = vmatprep.subr.bf16.mxu0 %v4937_v61  ;;  %4284 = vmatprep.subr.bf16.mxu1 %v4939_v62  ;;  %v4994_v61 = vcombine.low %v378_v50, %v382_v51  ;;  %v5001_v62 = vcombine.high %v385_v56, %v389_v57  ;;  %v5003_v63 = vcombine.high %v386_v58, %v390_v59  ;;  %v441_v50 = vld [vmem:[%s7336_s1 + $0xcd0] sm:$0xff] }
 0x1b4   :  { %v445_v51 = vld [vmem:[%s7336_s1 + $0xcf0] sm:$0xff] }
 0x1b6   :  { %4070 = vmatpush1.bf16.msra.mxu0 %v4936_v3  ;;  %4285 = vmatpush1.bf16.msra.mxu1 %v4938_v4  ;;  %v398_v3 = vld [vmem:[%s7336_s1 + $0xb78] sm:$0xff]  ;;  %v5000_v4 = vcombine.low %v385_v56, %v389_v57  ;;  %v5057_v57 = vcombine.high %v441_v50, %v445_v51 }
 0x1b7   :  { %4071 = vmatprep.subr.bf16.mxu0 %v4945_v5  ;;  %4286 = vmatprep.subr.bf16.mxu1 %v4947_v6  ;;  %v5002_v5 = vcombine.low %v386_v58, %v390_v59  ;;  %v5009_v6 = vcombine.high %v393_v0, %v397_v1  ;;  %v5011_v7 = vcombine.high %v394_v2, %v398_v3  ;;  %v449_v59 = vld [vmem:[%s7336_s1 + $0xd10] sm:$0xff] }
 0x1ba   :  { %4072 = vmatpush1.bf16.msra.mxu0 %v4944_v11  ;;  %4287 = vmatpush1.bf16.msra.mxu1 %v4946_v12  ;;  %v406_v11 = vld [vmem:[%s7336_s1 + $0xbb8] sm:$0xff]  ;;  %v5008_v12 = vcombine.low %v393_v0, %v397_v1 }
 0x1bb   :  { %4073 = vmatprep.subr.bf16.mxu0 %v4953_v13  ;;  %4288 = vmatprep.subr.bf16.mxu1 %v4955_v14  ;;  %v5010_v13 = vcombine.low %v394_v2, %v398_v3  ;;  %v5017_v14 = vcombine.high %v401_v8, %v405_v9  ;;  %v5019_v15 = vcombine.high %v402_v10, %v406_v11  ;;  %v457_v3 = vld [vmem:[%s7336_s1 + $0xd50] sm:$0xff] }
 0x1be   :  { %4074 = vmatpush1.bf16.msra.mxu0 %v4952_v19  ;;  %4289 = vmatpush1.bf16.msra.mxu1 %v4954_v20  ;;  %v414_v19 = vld [vmem:[%s7336_s1 + $0xbf8] sm:$0xff]  ;;  %v5016_v20 = vcombine.low %v401_v8, %v405_v9 }
 0x1bf   :  { %4075 = vmatprep.subr.bf16.mxu0 %v4961_v22  ;;  %4290 = vmatprep.subr.bf16.mxu1 %v4963_v23  ;;  %v5018_v22 = vcombine.low %v402_v10, %v406_v11  ;;  %v5025_v23 = vcombine.high %v409_v16, %v413_v17  ;;  %v5027_v24 = vcombine.high %v410_v18, %v414_v19  ;;  %v465_v11 = vld [vmem:[%s7336_s1 + $0xd90] sm:$0xff] }
 0x1c2   :  { %4076 = vmatpush1.bf16.msra.mxu0 %v4960_v28  ;;  %4291 = vmatpush1.bf16.msra.mxu1 %v4962_v29  ;;  %v422_v28 = vld [vmem:[%s7336_s1 + $0xc38] sm:$0xff]  ;;  %v5024_v29 = vcombine.low %v409_v16, %v413_v17 }
 0x1c3   :  { %4077 = vmatprep.subr.bf16.mxu0 %v4969_v30  ;;  %4292 = vmatprep.subr.bf16.mxu1 %v4971_v31  ;;  %v5026_v30 = vcombine.low %v410_v18, %v414_v19  ;;  %v5033_v31 = vcombine.high %v417_v25, %v421_v26  ;;  %v5035_v32 = vcombine.high %v418_v27, %v422_v28 }
 0x1c6   :  { %4078 = vmatpush1.bf16.msra.mxu0 %v4968_v36  ;;  %4293 = vmatpush1.bf16.msra.mxu1 %v4970_v37  ;;  %v430_v36 = vld [vmem:[%s7336_s1 + $0xc78] sm:$0xff]  ;;  %v5032_v37 = vcombine.low %v417_v25, %v421_v26 }
 0x1c7   :  { %4079 = vmatprep.subr.bf16.mxu0 %v4977_v38  ;;  %4294 = vmatprep.subr.bf16.mxu1 %v4979_v39  ;;  %v5034_v38 = vcombine.low %v418_v27, %v422_v28  ;;  %v5041_v39 = vcombine.high %v425_v33, %v429_v34  ;;  %v5043_v40 = vcombine.high %v426_v35, %v430_v36  ;;  %v474_v25 = vld [vmem:[%s7336_s1 + $0xdd8] sm:$0xff] }
 0x1c8   :  { %v478_v26 = vld [vmem:[%s7336_s1 + $0xdf8] sm:$0xff] }
 0x1ca   :  { %4080 = vmatpush1.bf16.msra.mxu0 %v4976_v44  ;;  %4295 = vmatpush1.bf16.msra.mxu1 %v4978_v45  ;;  %v434_v44 = vld [vmem:[%s7336_s1 + $0xc98] sm:$0xff] }
 0x1cb   :  { %4081 = vmatprep.subr.bf16.mxu0 %v4985_v46  ;;  %4296 = vmatprep.subr.bf16.mxu1 %v4987_v47  ;;  %v438_v45 = vld [vmem:[%s7336_s1 + $0xcb8] sm:$0xff]  ;;  %v5040_v46 = vcombine.low %v425_v33, %v429_v34  ;;  %v5042_v47 = vcombine.low %v426_v35, %v430_v36  ;;  %v5091_v35 = vcombine.high %v474_v25, %v478_v26  ;;  %v481_v36 = vld [vmem:[%s7336_s1 + $0xe10] sm:$0xff] }
 0x1cc   :  { %v5051_v49 = vcombine.high %v434_v44, %v438_v45  ;;  %v5050_v56 = vcombine.low %v434_v44, %v438_v45  ;;  %v489_v44 = vld [vmem:[%s7336_s1 + $0xe50] sm:$0xff] }
 0x1cd   :  { %v493_v45 = vld [vmem:[%s7336_s1 + $0xe70] sm:$0xff] }
 0x1ce   :  { %4082 = vmatpush1.bf16.msra.mxu0 %v4984_v52  ;;  %4297 = vmatpush1.bf16.msra.mxu1 %v4986_v53  ;;  %v5342_v52 = vld [vmem:[%s7337_s0 + $0x1c] ss:$36 sps:$4 sm:$0xff]  }
 0x1cf   :  { %4083 = vmatprep.subr.bf16.mxu0 %v4993_v54  ;;  %4298 = vmatprep.subr.bf16.mxu1 %v4995_v55  ;;  %v442_v53 = vld [vmem:[%s7336_s1 + $0xcd8] sm:$0xff]  ;;  %v5048_v55 = vcombine.low %v433_v41, %v437_v42  ;;  %v5090_v41 = vcombine.low %v474_v25, %v478_v26  ;;  %v533_v25 = vld [vmem:[%s7336_s1 + $0xfb0] sm:$0xff] }
 0x1d0   :  { %v446_v54 = vld [vmem:[%s7336_s1 + $0xcf8] sm:$0xff] }
 0x1d1   :  { %v5059_v58 = vcombine.high %v442_v53, %v446_v54  ;;  %v5058_v0 = vcombine.low %v442_v53, %v446_v54  ;;  %v501_v53 = vld [vmem:[%s7336_s1 + $0xeb0] sm:$0xff]  ;;  %v498_v54 = vld [vmem:[%s7336_s1 + $0xe98] sm:$0xff] }
 0x1d2   :  { %4084 = vmatpush1.bf16.msra.mxu0 %v4992_v60  ;;  %4299 = vmatpush1.bf16.msra.mxu1 %v4994_v61  ;;  %v453_v60 = vld [vmem:[%s7336_s1 + $0xd30] sm:$0xff]  ;;  %v450_v61 = vld [vmem:[%s7336_s1 + $0xd18] sm:$0xff] }
 0x1d3   :  { %4085 = vmatprep.subr.bf16.mxu0 %v5001_v62  ;;  %4300 = vmatprep.subr.bf16.mxu1 %v5003_v63  ;;  %v454_v62 = vld [vmem:[%s7336_s1 + $0xd38] sm:$0xff]  ;;  %v5056_v63 = vcombine.low %v441_v50, %v445_v51  ;;  %v5065_v1 = vcombine.high %v449_v59, %v453_v60  ;;  %v5105_v50 = vcombine.high %v489_v44, %v493_v45 }
 0x1d4   :  { %v5067_v2 = vcombine.high %v450_v61, %v454_v62  ;;  %v5066_v8 = vcombine.low %v450_v61, %v454_v62  ;;  %v509_v61 = vld [vmem:[%s7336_s1 + $0xef0] sm:$0xff]  ;;  %v506_v62 = vld [vmem:[%s7336_s1 + $0xed8] sm:$0xff] }
 0x1d5   :  { %v530_v26 = vld [vmem:[%s7336_s1 + $0xf98] sm:$0xff] }
 0x1d6   :  { %4086 = vmatpush1.bf16.msra.mxu0 %v5000_v4  ;;  %4301 = vmatpush1.bf16.msra.mxu1 %v5002_v5  ;;  %v461_v4 = vld [vmem:[%s7336_s1 + $0xd70] sm:$0xff]  ;;  %v458_v5 = vld [vmem:[%s7336_s1 + $0xd58] sm:$0xff] }
 0x1d7   :  { %4087 = vmatprep.subr.bf16.mxu0 %v5009_v6  ;;  %4302 = vmatprep.subr.bf16.mxu1 %v5011_v7  ;;  %v462_v6 = vld [vmem:[%s7336_s1 + $0xd78] sm:$0xff]  ;;  %v5064_v7 = vcombine.low %v449_v59, %v453_v60  ;;  %v5073_v9 = vcombine.high %v457_v3, %v461_v4  ;;  %v505_v60 = vld [vmem:[%s7336_s1 + $0xed0] sm:$0xff] }
 0x1d8   :  { %v5075_v10 = vcombine.high %v458_v5, %v462_v6  ;;  %v5074_v16 = vcombine.low %v458_v5, %v462_v6  ;;  %v517_v5 = vld [vmem:[%s7336_s1 + $0xf30] sm:$0xff]  ;;  %v514_v6 = vld [vmem:[%s7336_s1 + $0xf18] sm:$0xff] }
 0x1da   :  { %4088 = vmatpush1.bf16.msra.mxu0 %v5008_v12  ;;  %4303 = vmatpush1.bf16.msra.mxu1 %v5010_v13  ;;  %v469_v12 = vld [vmem:[%s7336_s1 + $0xdb0] sm:$0xff]  ;;  %v466_v13 = vld [vmem:[%s7336_s1 + $0xd98] sm:$0xff] }
 0x1db   :  { %4089 = vmatprep.subr.bf16.mxu0 %v5017_v14  ;;  %4304 = vmatprep.subr.bf16.mxu1 %v5019_v15  ;;  %v470_v14 = vld [vmem:[%s7336_s1 + $0xdb8] sm:$0xff]  ;;  %v5072_v15 = vcombine.low %v457_v3, %v461_v4  ;;  %v5081_v17 = vcombine.high %v465_v11, %v469_v12  ;;  %v513_v4 = vld [vmem:[%s7336_s1 + $0xf10] sm:$0xff] }
 0x1dc   :  { %v5083_v19 = vcombine.high %v466_v13, %v470_v14 }
 0x1de   :  { %4090 = vmatpush1.bf16.msra.mxu0 %v5016_v20  ;;  %4305 = vmatpush1.bf16.msra.mxu1 %v5018_v22  ;;  %v473_v20 = vld [vmem:[%s7336_s1 + $0xdd0] sm:$0xff] }
 0x1df   :  { %4091 = vmatprep.subr.bf16.mxu0 %v5025_v23  ;;  %4306 = vmatprep.subr.bf16.mxu1 %v5027_v24  ;;  %v477_v22 = vld [vmem:[%s7336_s1 + $0xdf0] sm:$0xff] }
 0x1e0   :  { %v5089_v33 = vcombine.high %v473_v20, %v477_v22 }
 0x1e2   :  { %4092 = vmatpush1.bf16.msra.mxu0 %v5024_v29  ;;  %4307 = vmatpush1.bf16.msra.mxu1 %v5026_v30  ;;  %v5080_v29 = vcombine.low %v465_v11, %v469_v12  ;;  %v521_v12 = vld [vmem:[%s7336_s1 + $0xf50] sm:$0xff] }
 0x1e3   :  { %4104 = vmatprep.subr.bf16.mxu0 %v5033_v31  ;;  %4319 = vmatprep.subr.bf16.mxu1 %v5035_v32  ;;  %v5082_v32 = vcombine.low %v466_v13, %v470_v14  ;;  %v525_v13 = vld [vmem:[%s7336_s1 + $0xf70] sm:$0xff]  ;;  %v522_v14 = vld [vmem:[%s7336_s1 + $0xf58] sm:$0xff] }
 0x1e5   :  { %4094 = vmatmul.mubr.bf16.vlgmr.msra.gmra.mrb[4].mxu0 %v5341_v43  ;;  %4309 = vmatmul.mubr.bf16.vlgmr.msra.gmra.mrb[4].mxu1 %v5341_v43 }
 0x1e6   :  { %4105 = vmatpush1.bf16.msra.mxu0 %v5032_v37  ;;  %4320 = vmatpush1.bf16.msra.mxu1 %v5034_v38  ;;  %v485_v37 = vld [vmem:[%s7336_s1 + $0xe30] sm:$0xff]  ;;  %v482_v38 = vld [vmem:[%s7336_s1 + $0xe18] sm:$0xff] }
 0x1e7   :  { %4106 = vmatprep.subr.bf16.mxu0 %v5041_v39  ;;  %4321 = vmatprep.subr.bf16.mxu1 %v5043_v40  ;;  %v486_v39 = vld [vmem:[%s7336_s1 + $0xe38] sm:$0xff]  ;;  %v5088_v40 = vcombine.low %v473_v20, %v477_v22  ;;  %v5097_v42 = vcombine.high %v481_v36, %v485_v37  ;;  %v529_v22 = vld [vmem:[%s7336_s1 + $0xf90] sm:$0xff] }
 0x1e8   :  { %4136 = vmatprep.mubr.bf16.mxu0 %v5342_v52  ;;  %4351 = vmatprep.mubr.bf16.mxu1 %v5342_v52  ;;  %v5099_v43 = vcombine.high %v482_v38, %v486_v39  ;;  %v497_v52 = vld [vmem:[%s7336_s1 + $0xe90] sm:$0xff] }
 0x1ea   :  { %4107 = vmatpush1.bf16.msra.mxu0 %v5040_v46  ;;  %4322 = vmatpush1.bf16.msra.mxu1 %v5042_v47  ;;  %v490_v46 = vld [vmem:[%s7336_s1 + $0xe58] sm:$0xff] }
 0x1eb   :  { %4108 = vmatprep.subr.bf16.mxu0 %v5049_v48  ;;  %4323 = vmatprep.subr.bf16.mxu1 %v5051_v49  ;;  %v494_v47 = vld [vmem:[%s7336_s1 + $0xe78] sm:$0xff]  ;;  %v5096_v48 = vcombine.low %v481_v36, %v485_v37  ;;  %v5098_v49 = vcombine.low %v482_v38, %v486_v39  ;;  %v537_v37 = vld [vmem:[%s7336_s1 + $0xfd0] sm:$0xff] }
 0x1ec   :  { %v5107_v51 = vcombine.high %v490_v46, %v494_v47  ;;  %v541_v38 = vld [vmem:[%s7336_s1 + $0xff0] sm:$0xff]  ;;  %v538_v39 = vld [vmem:[%s7336_s1 + $0xfd8] sm:$0xff] }
 0x1ee   :  { %4109 = vmatpush1.bf16.msra.mxu0 %v5048_v55  ;;  %4324 = vmatpush1.bf16.msra.mxu1 %v5050_v56  ;;  %v502_v55 = vld [vmem:[%s7336_s1 + $0xeb8] sm:$0xff]  ;;  %v5104_v56 = vcombine.low %v489_v44, %v493_v45  ;;  %v545_v45 = vld [vmem:[%s7336_s1 + $0x1010] sm:$0xff] }
 0x1ef   :  { %4110 = vmatprep.subr.bf16.mxu0 %v5057_v57  ;;  %4325 = vmatprep.subr.bf16.mxu1 %v5059_v58  ;;  %v5106_v57 = vcombine.low %v490_v46, %v494_v47  ;;  %v5113_v58 = vcombine.high %v497_v52, %v501_v53  ;;  %v5115_v59 = vcombine.high %v498_v54, %v502_v55  ;;  %v549_v46 = vld [vmem:[%s7336_s1 + $0x1030] sm:$0xff]  ;;  %v546_v47 = vld [vmem:[%s7336_s1 + $0x1018] sm:$0xff] }
 0x1f2   :  { %4111 = vmatpush1.bf16.msra.mxu0 %v5056_v63  ;;  %4326 = vmatpush1.bf16.msra.mxu1 %v5058_v0  ;;  %v510_v63 = vld [vmem:[%s7336_s1 + $0xef8] sm:$0xff]  ;;  %v5112_v0 = vcombine.low %v497_v52, %v501_v53  ;;  %v553_v53 = vld [vmem:[%s7336_s1 + $0x1050] sm:$0xff] }
 0x1f3   :  { %4112 = vmatprep.subr.bf16.mxu0 %v5065_v1  ;;  %4327 = vmatprep.subr.bf16.mxu1 %v5067_v2  ;;  %v5114_v1 = vcombine.low %v498_v54, %v502_v55  ;;  %v5121_v2 = vcombine.high %v505_v60, %v509_v61  ;;  %v5123_v3 = vcombine.high %v506_v62, %v510_v63  ;;  %v557_v54 = vld [vmem:[%s7336_s1 + $0x1070] sm:$0xff]  ;;  %v554_v55 = vld [vmem:[%s7336_s1 + $0x1058] sm:$0xff] }
 0x1f6   :  { %4113 = vmatpush1.bf16.msra.mxu0 %v5064_v7  ;;  %4328 = vmatpush1.bf16.msra.mxu1 %v5066_v8  ;;  %v518_v7 = vld [vmem:[%s7336_s1 + $0xf38] sm:$0xff]  ;;  %v5120_v8 = vcombine.low %v505_v60, %v509_v61  ;;  %v561_v61 = vld [vmem:[%s7336_s1 + $0x1090] sm:$0xff] }
 0x1f7   :  { %4114 = vmatprep.subr.bf16.mxu0 %v5073_v9  ;;  %4329 = vmatprep.subr.bf16.mxu1 %v5075_v10  ;;  %v5122_v9 = vcombine.low %v506_v62, %v510_v63  ;;  %v5129_v10 = vcombine.high %v513_v4, %v517_v5  ;;  %v5131_v11 = vcombine.high %v514_v6, %v518_v7  ;;  %v565_v62 = vld [vmem:[%s7336_s1 + $0x10b0] sm:$0xff]  ;;  %v5343_v63 = vld [vmem:[%s7337_s0 + $0x18] ss:$36 sps:$4 sm:$0xff]  }
 0x1f8   :  { %v6958_v18 = vpop.f32.mrb[0].mxu0  ;;  %v6966_v23 = vpop.f32.mrb[0].mxu1 }
 0x1f9   :  { %v6968_v24 = vpop.f32.mrb[1].mxu0  ;;  %v6976_v27 = vpop.f32.mrb[1].mxu1 }
 0x1fa   :  { %v6978_v28 = vpop.f32.mrb[2].mxu0  ;;  %4115 = vmatpush1.bf16.msra.mxu0 %v5072_v15  ;;  %v6980_v30 = vpop.f32.mrb[2].mxu1  ;;  %4330 = vmatpush1.bf16.msra.mxu1 %v5074_v16  ;;  %v526_v15 = vld [vmem:[%s7336_s1 + $0xf78] sm:$0xff]  ;;  %v5128_v16 = vcombine.low %v513_v4, %v517_v5  ;;  %v5177_v4 = vcombine.high %v561_v61, %v565_v62 }
 0x1fb   :  { %v6982_v31 = vpop.f32.mrb[3].mxu0  ;;  %4116 = vmatprep.subr.bf16.mxu0 %v5081_v17  ;;  %v6984_v34 = vpop.f32.mrb[3].mxu1  ;;  %4331 = vmatprep.subr.bf16.mxu1 %v5083_v19  ;;  %v5130_v17 = vcombine.low %v514_v6, %v518_v7  ;;  %v5137_v19 = vcombine.high %v521_v12, %v525_v13  ;;  %v5139_v20 = vcombine.high %v522_v14, %v526_v15  ;;  %v569_v6 = vld [vmem:[%s7336_s1 + $0x10d0] sm:$0xff] }
 0x1fc   :  { %v573_v7 = vld [vmem:[%s7336_s1 + $0x10f0] sm:$0xff] }
 0x1fe   :  { %4117 = vmatpush1.bf16.msra.mxu0 %v5080_v29  ;;  %4332 = vmatpush1.bf16.msra.mxu1 %v5082_v32  ;;  %v534_v29 = vld [vmem:[%s7336_s1 + $0xfb8] sm:$0xff]  ;;  %v5136_v32 = vcombine.low %v521_v12, %v525_v13  ;;  %v5185_v12 = vcombine.high %v569_v6, %v573_v7 }
 0x1ff   :  { %4118 = vmatprep.subr.bf16.mxu0 %v5089_v33  ;;  %4333 = vmatprep.subr.bf16.mxu1 %v5091_v35  ;;  %v5138_v33 = vcombine.low %v522_v14, %v526_v15  ;;  %v5145_v35 = vcombine.high %v529_v22, %v533_v25  ;;  %v5147_v36 = vcombine.high %v530_v26, %v534_v29  ;;  %v577_v14 = vld [vmem:[%s7336_s1 + $0x1110] sm:$0xff] }
 0x200   :  { %v581_v15 = vld [vmem:[%s7336_s1 + $0x1130] sm:$0xff] }
 0x202   :  { %4119 = vmatpush1.bf16.msra.mxu0 %v5088_v40  ;;  %4334 = vmatpush1.bf16.msra.mxu1 %v5090_v41  ;;  %v542_v40 = vld [vmem:[%s7336_s1 + $0xff8] sm:$0xff]  ;;  %v5144_v41 = vcombine.low %v529_v22, %v533_v25  ;;  %v585_v25 = vld [vmem:[%s7336_s1 + $0x1150] sm:$0xff] }
 0x203   :  { %4120 = vmatprep.subr.bf16.mxu0 %v5097_v42  ;;  %4335 = vmatprep.subr.bf16.mxu1 %v5099_v43  ;;  %v5146_v42 = vcombine.low %v530_v26, %v534_v29  ;;  %v5153_v43 = vcombine.high %v537_v37, %v541_v38  ;;  %v5155_v44 = vcombine.high %v538_v39, %v542_v40  ;;  %v589_v26 = vld [vmem:[%s7336_s1 + $0x1170] sm:$0xff]  ;;  %v586_v29 = vld [vmem:[%s7336_s1 + $0x1158] sm:$0xff] }
 0x206   :  { %4121 = vmatpush1.bf16.msra.mxu0 %v5096_v48  ;;  %4336 = vmatpush1.bf16.msra.mxu1 %v5098_v49  ;;  %v550_v48 = vld [vmem:[%s7336_s1 + $0x1038] sm:$0xff]  ;;  %v5152_v49 = vcombine.low %v537_v37, %v541_v38  ;;  %v593_v38 = vld [vmem:[%s7336_s1 + $0x1190] sm:$0xff] }
 0x207   :  { %4122 = vmatprep.subr.bf16.mxu0 %v5105_v50  ;;  %4337 = vmatprep.subr.bf16.mxu1 %v5107_v51  ;;  %v5154_v50 = vcombine.low %v538_v39, %v542_v40  ;;  %v5161_v51 = vcombine.high %v545_v45, %v549_v46  ;;  %v5163_v52 = vcombine.high %v546_v47, %v550_v48  ;;  %v597_v39 = vld [vmem:[%s7336_s1 + $0x11b0] sm:$0xff]  ;;  %v594_v40 = vld [vmem:[%s7336_s1 + $0x1198] sm:$0xff] }
 0x20a   :  { %4123 = vmatpush1.bf16.msra.mxu0 %v5104_v56  ;;  %4338 = vmatpush1.bf16.msra.mxu1 %v5106_v57  ;;  %v558_v56 = vld [vmem:[%s7336_s1 + $0x1078] sm:$0xff]  ;;  %v5160_v57 = vcombine.low %v545_v45, %v549_v46  ;;  %v601_v46 = vld [vmem:[%s7336_s1 + $0x11d0] sm:$0xff] }
 0x20b   :  { %4124 = vmatprep.subr.bf16.mxu0 %v5113_v58  ;;  %4339 = vmatprep.subr.bf16.mxu1 %v5115_v59  ;;  %v5162_v58 = vcombine.low %v546_v47, %v550_v48  ;;  %v5169_v59 = vcombine.high %v553_v53, %v557_v54  ;;  %v5171_v60 = vcombine.high %v554_v55, %v558_v56  ;;  %v605_v47 = vld [vmem:[%s7336_s1 + $0x11f0] sm:$0xff]  ;;  %v602_v48 = vld [vmem:[%s7336_s1 + $0x11d8] sm:$0xff] }
 0x20e   :  { %4125 = vmatpush1.bf16.msra.mxu0 %v5112_v0  ;;  %4340 = vmatpush1.bf16.msra.mxu1 %v5114_v1  ;;  %v562_v0 = vld [vmem:[%s7336_s1 + $0x1098] sm:$0xff] }
 0x20f   :  { %4126 = vmatprep.subr.bf16.mxu0 %v5121_v2  ;;  %4341 = vmatprep.subr.bf16.mxu1 %v5123_v3  ;;  %v566_v1 = vld [vmem:[%s7336_s1 + $0x10b8] sm:$0xff]  ;;  %v5168_v2 = vcombine.low %v553_v53, %v557_v54  ;;  %v5170_v3 = vcombine.low %v554_v55, %v558_v56  ;;  %v5216_v54 = vcombine.low %v601_v46, %v605_v47  ;;  %v5344_v56 = vld [vmem:[%s7337_s0 + $0x20] ss:$36 sps:$4 sm:$0xff]  }
 0x210   :  { %v5179_v5 = vcombine.high %v562_v0, %v566_v1 }
 0x212   :  { %4127 = vmatpush1.bf16.msra.mxu0 %v5120_v8  ;;  %4342 = vmatpush1.bf16.msra.mxu1 %v5122_v9  ;;  %v570_v8 = vld [vmem:[%s7336_s1 + $0x10d8] sm:$0xff] }
 0x213   :  { %4128 = vmatprep.subr.bf16.mxu0 %v5129_v10  ;;  %4343 = vmatprep.subr.bf16.mxu1 %v5131_v11  ;;  %v574_v9 = vld [vmem:[%s7336_s1 + $0x10f8] sm:$0xff]  ;;  %v5176_v10 = vcombine.low %v561_v61, %v565_v62  ;;  %v5178_v11 = vcombine.low %v562_v0, %v566_v1 }
 0x214   :  { %v5187_v13 = vcombine.high %v570_v8, %v574_v9 }
 0x216   :  { %4129 = vmatpush1.bf16.msra.mxu0 %v5128_v16  ;;  %4344 = vmatpush1.bf16.msra.mxu1 %v5130_v17  ;;  %v582_v16 = vld [vmem:[%s7336_s1 + $0x1138] sm:$0xff]  ;;  %v5184_v17 = vcombine.low %v569_v6, %v573_v7 }
 0x217   :  { %4130 = vmatprep.subr.bf16.mxu0 %v5137_v19  ;;  %4345 = vmatprep.subr.bf16.mxu1 %v5139_v20  ;;  %v5186_v19 = vcombine.low %v570_v8, %v574_v9  ;;  %v5193_v20 = vcombine.high %v577_v14, %v581_v15 }
 0x21a   :  { %4131 = vmatpush1.bf16.msra.mxu0 %v5136_v32  ;;  %4346 = vmatpush1.bf16.msra.mxu1 %v5138_v33  ;;  %v590_v32 = vld [vmem:[%s7336_s1 + $0x1178] sm:$0xff]  ;;  %v5192_v33 = vcombine.low %v577_v14, %v581_v15 }
 0x21b   :  { %4132 = vmatprep.subr.bf16.mxu0 %v5145_v35  ;;  %4347 = vmatprep.subr.bf16.mxu1 %v5147_v36  ;;  %v5201_v36 = vcombine.high %v585_v25, %v589_v26  ;;  %v5203_v37 = vcombine.high %v586_v29, %v590_v32 }
 0x21e   :  { %4133 = vmatpush1.bf16.msra.mxu0 %v5144_v41  ;;  %4348 = vmatpush1.bf16.msra.mxu1 %v5146_v42  ;;  %v598_v41 = vld [vmem:[%s7336_s1 + $0x11b8] sm:$0xff]  ;;  %v5200_v42 = vcombine.low %v585_v25, %v589_v26 }
 0x21f   :  { %4134 = vmatprep.subr.bf16.mxu0 %v5153_v43  ;;  %4349 = vmatprep.subr.bf16.mxu1 %v5155_v44  ;;  %v5202_v43 = vcombine.low %v586_v29, %v590_v32  ;;  %v5209_v44 = vcombine.high %v593_v38, %v597_v39  ;;  %v5211_v45 = vcombine.high %v594_v40, %v598_v41 }
 0x222   :  { %4135 = vmatpush1.bf16.msra.mxu0 %v5152_v49  ;;  %4350 = vmatpush1.bf16.msra.mxu1 %v5154_v50  ;;  %v606_v49 = vld [vmem:[%s7336_s1 + $0x11f8] sm:$0xff]  ;;  %v5208_v50 = vcombine.low %v593_v38, %v597_v39 }
 0x223   :  { %4147 = vmatprep.subr.bf16.mxu0 %v5161_v51  ;;  %4362 = vmatprep.subr.bf16.mxu1 %v5163_v52  ;;  %v5210_v51 = vcombine.low %v594_v40, %v598_v41  ;;  %v5217_v52 = vcombine.high %v601_v46, %v605_v47  ;;  %v5219_v53 = vcombine.high %v602_v48, %v606_v49 }
 0x224   :  { %v5218_v55 = vcombine.low %v602_v48, %v606_v49  ;;  %v4405_v48 = vld [vmem:[%s7339_s3] sm:$0xff]  ;;  %v4406_v49 = vld [vmem:[%s7339_s3 + $0x8] sm:$0xff] }
 0x225   :  { %4137 = vmatmul.mubr.bf16.vlgmr.msra.gmra.mrb[4].mxu0 %v5343_v63  ;;  %4352 = vmatmul.mubr.bf16.vlgmr.msra.gmra.mrb[4].mxu1 %v5343_v63 }
 0x226   :  { %4148 = vmatpush1.bf16.msra.mxu0 %v5160_v57  ;;  %4363 = vmatpush1.bf16.msra.mxu1 %v5162_v58  ;;  %v612_v57 = vpop.permute.xlu0 %611 }
 0x227   :  { %4149 = vmatprep.subr.bf16.mxu0 %v5169_v59  ;;  %4364 = vmatprep.subr.bf16.mxu1 %v5171_v60  ;;  %v7187_v58 = vadd.f32 %v6958_v18, %v612_v57  ;;  %v7190_v59 = vadd.f32 %v6968_v24, %v612_v57  ;;  %v7203_v1 = vadd.f32 %v6966_v23, %v612_v57 }
 0x228   :  { %4179 = vmatprep.mubr.bf16.mxu0 %v5345_v21  ;;  %4394 = vmatprep.mubr.bf16.mxu1 %v5345_v21  ;;  %v578_v21 = vld [vmem:[%s7336_s1 + $0x1118] sm:$0xff] }
 0x229   :  { %v5195_v22 = vcombine.high %v578_v21, %v582_v16  ;;  %v5194_v35 = vcombine.low %v578_v21, %v582_v16  ;;  %v4429_v61 = vmul.f32 %v7187_v58, %v7187_v58  ;;  %v4430_v62 = vmul.f32 %v7190_v59, %v7190_v59 }
 0x22a   :  { %4150 = vmatpush1.bf16.msra.mxu0 %v5168_v2  ;;  %4365 = vmatpush1.bf16.msra.mxu1 %v5170_v3  ;;  %v617_v60 = vpop.permute.xlu0 %616  ;;  %v4409_v18 = vadd.f32 %v7190_v59, %v7187_v58  ;;  %v4431_v3 = vmul.f32 %v7203_v1, %v7203_v1 }
 0x22b   :  { %4151 = vmatprep.subr.bf16.mxu0 %v5177_v4  ;;  %4366 = vmatprep.subr.bf16.mxu1 %v5179_v5  ;;  %v7197_v63 = vadd.f32 %v6978_v28, %v617_v60  ;;  %v7200_v0 = vadd.f32 %v6982_v31, %v617_v60  ;;  %v4445_v24 = vadd.f32 %v4430_v62, %v4429_v61 }
 0x22c   :  { %v7212_v4 = vadd.f32 %v6976_v27, %v612_v57  ;;  %v7215_v28 = vadd.f32 %v6980_v30, %v617_v60  ;;  %v4410_v31 = vadd.f32 %v7203_v1, %v4409_v18  ;;  %v7222_v7 = vadd.f32 %v6984_v34, %v617_v60 }
 0x22d   :  { %v4418_v2 = vadd.f32 %v7200_v0, %v7197_v63  ;;  %v4446_v23 = vadd.f32 %v4445_v24, %v4431_v3 }
 0x22e   :  { %4152 = vmatpush1.bf16.msra.mxu0 %v5176_v10  ;;  %4367 = vmatpush1.bf16.msra.mxu1 %v5178_v11  ;;  %v4432_v6 = vmul.f32 %v7212_v4, %v7212_v4  ;;  %v4411_v9 = vadd.f32 %v7212_v4, %v4410_v31 }
 0x22f   :  { %4153 = vmatprep.subr.bf16.mxu0 %v5185_v12  ;;  %4368 = vmatprep.subr.bf16.mxu1 %v5187_v13  ;;  %v4419_v5 = vadd.f32 %v7215_v28, %v4418_v2 }
 0x230   :  { %v4447_v30 = vadd.f32 %v4446_v23, %v4432_v6  ;;  %v4408_v23 = vld [vmem:[%s7340_s4 + $0x8] sm:$0xff] }
 0x231   :  { %v4420_v12 = vadd.f32 %v7222_v7, %v4419_v5 }
 0x232   :  { %4154 = vmatpush1.bf16.msra.mxu0 %v5184_v17  ;;  %4369 = vmatpush1.bf16.msra.mxu1 %v5186_v19 }
 0x233   :  { %4155 = vmatprep.subr.bf16.mxu0 %v5193_v20  ;;  %4370 = vmatprep.subr.bf16.mxu1 %v5195_v22 }
 0x236   :  { %4156 = vmatpush1.bf16.msra.mxu0 %v5192_v33  ;;  %4371 = vmatpush1.bf16.msra.mxu1 %v5194_v35 }
 0x237   :  { %4157 = vmatprep.subr.bf16.mxu0 %v5201_v36  ;;  %4372 = vmatprep.subr.bf16.mxu1 %v5203_v37 }
 0x23a   :  { %4158 = vmatpush1.bf16.msra.mxu0 %v5200_v42  ;;  %4373 = vmatpush1.bf16.msra.mxu1 %v5202_v43 }
 0x23b   :  { %4159 = vmatprep.subr.bf16.mxu0 %v5209_v44  ;;  %4374 = vmatprep.subr.bf16.mxu1 %v5211_v45 }
 0x23e   :  { %4160 = vmatpush1.bf16.msra.mxu0 %v5208_v50  ;;  %4375 = vmatpush1.bf16.msra.mxu1 %v5210_v51  ;;  %v4407_v50 = vld [vmem:[%s7340_s4] sm:$0xff]  ;;  %v4437_v51 = vmul.f32 %v7197_v63, %v7197_v63 }
 0x23f   :  { %4161 = vmatprep.subr.bf16.mxu0 %v5217_v52  ;;  %4376 = vmatprep.subr.bf16.mxu1 %v5219_v53  ;;  %v4438_v52 = vmul.f32 %v7200_v0, %v7200_v0 }
 0x241   :  { %v4454_v53 = vadd.f32 %v4438_v52, %v4437_v51 }
 0x242   :  { %4162 = vmatpush1.bf16.msra.mxu0 %v5216_v54  ;;  %4377 = vmatpush1.bf16.msra.mxu1 %v5218_v55  ;;  %v4439_v54 = vmul.f32 %v7215_v28, %v7215_v28 }
 0x244   :  { %v4455_v55 = vadd.f32 %v4454_v53, %v4439_v54 }
 0x245   :  { %4180 = vmatmul.mubr.bf16.vlgmr.msra.gmra.mrb[4].mxu0 %v5344_v56  ;;  %4395 = vmatmul.mubr.bf16.vlgmr.msra.gmra.mrb[4].mxu1 %v5344_v56  ;;  %v4440_v56 = vmul.f32 %v7222_v7, %v7222_v7 }
 0x318   :  { %v4181_v8 = vpop.f32.mrb[4].mxu0  ;;  %v4396_v27 = vpop.f32.mrb[4].mxu1 }
 0x319   :  { %v7225_v10 = vadd.f32 %v4181_v8, %v612_v57  ;;  %v4183_v11 = vpop.f32.mrb[5].mxu0  ;;  %v4398_v14 = vpop.f32.mrb[5].mxu1  ;;  %v7233_v16 = vadd.f32 %v4396_v27, %v612_v57 }
 0x31a   :  { %v7228_v13 = vadd.f32 %v4183_v11, %v612_v57  ;;  %v4185_v15 = vpop.f32.mrb[6].mxu0  ;;  %v4400_v19 = vpop.f32.mrb[6].mxu1  ;;  %v7241_v32 = vadd.f32 %v4398_v14, %v612_v57 }
 0x31b   :  { %v4412_v21 = vadd.f32 %v7225_v10, %v4411_v9  ;;  %v4433_v34 = vmul.f32 %v7225_v10, %v7225_v10  ;;  %v7235_v17 = vadd.f32 %v4185_v15, %v617_v60  ;;  %v4187_v20 = vpop.f32.mrb[7].mxu0  ;;  %v4402_v26 = vpop.f32.mrb[7].mxu1  ;;  %v4435_v36 = vmul.f32 %v7233_v16, %v7233_v16 }
 0x31c   :  { %v4434_v22 = vmul.f32 %v7228_v13, %v7228_v13  ;;  %v7239_v25 = vadd.f32 %v4187_v20, %v617_v60  ;;  %v7248_v39 = vadd.f32 %v4400_v19, %v617_v60  ;;  %v4436_v41 = vmul.f32 %v7241_v32, %v7241_v32 }
 0x31d   :  { %v4448_v29 = vadd.f32 %v4447_v30, %v4433_v34  ;;  %v4421_v33 = vadd.f32 %v7235_v17, %v4420_v12  ;;  %v4413_v35 = vadd.f32 %v7228_v13, %v4412_v21  ;;  %v7255_v46 = vadd.f32 %v4402_v26, %v617_v60 }
 0x31e   :  { %v4441_v57 = vmul.f32 %v7235_v17, %v7235_v17  ;;  %v4456_v60 = vadd.f32 %v4455_v55, %v4440_v56  ;;  %v4442_v62 = vmul.f32 %v7239_v25, %v7239_v25  ;;  %v4443_v24 = vmul.f32 %v7248_v39, %v7248_v39 }
 0x31f   :  { %v4422_v37 = vadd.f32 %v7239_v25, %v4421_v33  ;;  %v4449_v38 = vadd.f32 %v4448_v29, %v4434_v22  ;;  %v4414_v40 = vadd.f32 %v7233_v16, %v4413_v35  ;;  %v4444_v3 = vmul.f32 %v7255_v46, %v7255_v46 }
 0x320   :  { %v4457_v61 = vadd.f32 %v4456_v60, %v4441_v57 }
 0x321   :  { %v4450_v42 = vadd.f32 %v4449_v38, %v4435_v36  ;;  %v4415_v43 = vadd.f32 %v7241_v32, %v4414_v40  ;;  %v4423_v44 = vadd.f32 %v7248_v39, %v4422_v37 }
 0x322   :  { %v4458_v18 = vadd.f32 %v4457_v61, %v4442_v62 }
 0x323   :  { %v4451_v45 = vadd.f32 %v4450_v42, %v4436_v41  ;;  %4416 = vadd.xlane.f32.xlu1 %v4415_v43  ;;  %v4424_v47 = vadd.f32 %v7255_v46, %v4423_v44 }
 0x324   :  { %v4459_v2 = vadd.f32 %v4458_v18, %v4443_v24 }
 0x325   :  { %4452 = vadd.xlane.f32.xlu0 %v4451_v45 }
 0x326   :  { %v4460_v31 = vadd.f32 %v4459_v2, %v4444_v3 }
 0x327   :  { %4425 = vadd.xlane.f32.xlu1 %v4424_v47 }
 0x338   :  { %4509 = vperm.xlu1 %5318, %v4405_v48  }
 0x33c   :  { %4514 = vperm.xlu1 %5318, %v4406_v49  }
 0x340   :  { %4535 = vperm.xlu1 %5318, %v4407_v50  }
 0x364   :  { %4461 = vadd.xlane.f32.xlu1 %v4460_v31 }
 0x375   :  { %4540 = vperm.xlu1 %5318, %v4408_v23  }
 0x3b0   :  { %v4417_v5 = vpop.xlane.xlu1 %4416 }
 0x3b1   :  { %v4427_v6 = vmul.f32 0.0009765625, %v4417_v5 }
 0x3b2   :  { %v4453_v8 = vpop.xlane.xlu0 %4452 }
 0x3b3   :  { %v4463_v9 = vmul.f32 0.0009765625, %v4453_v8  ;;  %v4465_v27 = vmul.f32 %v4427_v6, %v4427_v6  ;;  %v4471_v34 = vsub.f32 %v7187_v58, %v4427_v6  ;;  %v4472_v19 = vsub.f32 %v7190_v59, %v4427_v6 }
 0x3b4   :  { %v4426_v12 = vpop.xlane.xlu1 %4425  ;;  %v4473_v20 = vsub.f32 %v7203_v1, %v4427_v6  ;;  %v4474_v22 = vsub.f32 %v7212_v4, %v4427_v6  ;;  %v4475_v29 = vsub.f32 %v7225_v10, %v4427_v6  ;;  %v4476_v33 = vsub.f32 %v7228_v13, %v4427_v6 }
 0x3b5   :  { %v4467_v11 = vsub.f32 %v4463_v9, %v4465_v27  ;;  %v4477_v35 = vsub.f32 %v7233_v16, %v4427_v6  ;;  %v4478_v36 = vsub.f32 %v7241_v32, %v4427_v6  ;;  %v4428_v6 = vmul.f32 0.0009765625, %v4426_v12 }
 0x3b7   :  { %v4469_v30 = vmax.f32 %v4467_v11, 0.0  ;;  %v4466_v9 = vmul.f32 %v4428_v6, %v4428_v6  ;;  %v4484_v12 = vsub.f32 %v7239_v25, %v4428_v6 }
 0x3b8   :  { %v4510_v15 = vpop.permute.xlu1 %4509 }
 0x3b9   :  { %v4487_v14 = vadd.f32 1e-05, %v4469_v30 }
 0x3bb   :  { %5332 = vrsqrt.f32 %v4487_v14 }
 0x3bc   :  { %v7286_v21 = vpop.permute.xlu1 %4514 }
 0x3c0   :  { %v4536_v49 = vpop.permute.xlu1 %4535 }
 0x3c5   :  { %v5333_v26 = vpop.eup %5332 }
 0x3c6   :  { %v4491_v37 = vmul.f32 %v5333_v26, %v4471_v34  ;;  %v4492_v38 = vmul.f32 %v5333_v26, %v4472_v19  ;;  %v4493_v40 = vmul.f32 %v5333_v26, %v4473_v20  ;;  %v4494_v41 = vmul.f32 %v5333_v26, %v4474_v22 }
 0x3c7   :  { %v4495_v58 = vmul.f32 %v5333_v26, %v4475_v29  ;;  %v4496_v42 = vmul.f32 %v5333_v26, %v4476_v33  ;;  %v4497_v59 = vmul.f32 %v5333_v26, %v4477_v35  ;;  %v4498_v43 = vmul.f32 %v5333_v26, %v4478_v36 }
 0x3c8   :  { %v4517_v1 = vmul.f32 %v4510_v15, %v4491_v37  ;;  %v4518_v44 = vmul.f32 %v4510_v15, %v4492_v38  ;;  %v4519_v4 = vmul.f32 %v4510_v15, %v4493_v40  ;;  %v4520_v45 = vmul.f32 %v4510_v15, %v4494_v41 }
 0x3c9   :  { %v4521_v47 = vmul.f32 %v4510_v15, %v4495_v58  ;;  %v4522_v10 = vmul.f32 %v4510_v15, %v4496_v42  ;;  %v4523_v48 = vmul.f32 %v4510_v15, %v4497_v59  ;;  %v4524_v13 = vmul.f32 %v4510_v15, %v4498_v43 }
 0x3ca   :  { %v4543_v16 = vadd.f32 %v4536_v49, %v4517_v1  ;;  %v4544_v50 = vadd.f32 %v4536_v49, %v4518_v44  ;;  %v4545_v32 = vadd.f32 %v4536_v49, %v4519_v4  ;;  %v4546_v51 = vadd.f32 %v4536_v49, %v4520_v45 }
 0x3cb   :  { %v4547_v52 = vadd.f32 %v4536_v49, %v4521_v47  ;;  %v4548_v53 = vadd.f32 %v4536_v49, %v4522_v10  ;;  %v4549_v54 = vadd.f32 %v4536_v49, %v4523_v48  ;;  %v4550_v55 = vadd.f32 %v4536_v49, %v4524_v13 }
 0x3cc   :  { %v4559_v56 = vmax.f32 %v4543_v16, 0.0  ;;  %v4560_v57 = vmax.f32 %v4544_v50, 0.0  ;;  %v4561_v60 = vmax.f32 %v4545_v32, 0.0  ;;  %v4562_v61 = vmax.f32 %v4546_v51, 0.0 }
 0x3cd   :  { %v4563_v62 = vmax.f32 %v4547_v52, 0.0  ;;  %v4564_v18 = vmax.f32 %v4548_v53, 0.0  ;;  %v4565_v24 = vmax.f32 %v4549_v54, 0.0  ;;  %v4566_v2 = vmax.f32 %v4550_v55, 0.0 }
 0x3ce   :  { %v5228_v3 = vpack.c.bf16 %v4560_v57, %v4559_v56  ;;  %v5229_v31 = vpack.c.bf16 %v4562_v61, %v4561_v60  ;;  %v4479_v15 = vsub.f32 %v7197_v63, %v4428_v6  ;;  %v4480_v34 = vsub.f32 %v7200_v0, %v4428_v6 }
 0x3cf   :  { %v5230_v23 = vpack.c.bf16 %v4564_v18, %v4563_v62  ;;  %v5231_v5 = vpack.c.bf16 %v4566_v2, %v4565_v24  ;;  %v4481_v19 = vsub.f32 %v7215_v28, %v4428_v6  ;;  %v4482_v20 = vsub.f32 %v7222_v7, %v4428_v6 }
 0x3d0   :  { %4623 = vst [vmem:[%s7341_s5] sm:$0xff] %v5228_v3  ;;  %4624 = vst [vmem:[%s7341_s5 + $0x8] sm:$0xff] %v5229_v31  ;;  %v4483_v26 = vsub.f32 %v7235_v17, %v4428_v6  ;;  %v4485_v29 = vsub.f32 %v7248_v39, %v4428_v6  ;;  %v4486_v33 = vsub.f32 %v7255_v46, %v4428_v6 }
 0x3d1   :  { %4625 = vst [vmem:[%s7341_s5 + $0x10] sm:$0xff] %v5230_v23  ;;  %4626 = vst [vmem:[%s7341_s5 + $0x18] sm:$0xff] %v5231_v5 }
 0x3f1   :  { %v4462_v8 = vpop.xlane.xlu1 %4461 }
 0x3f2   :  { %v4464_v27 = vmul.f32 0.0009765625, %v4462_v8 }
 0x3f4   :  { %v4468_v11 = vsub.f32 %v4464_v27, %v4466_v9 }
 0x3f5   :  { %v4541_v59 = vpop.permute.xlu1 %4540 }
 0x3f6   :  { %v4470_v30 = vmax.f32 %v4468_v11, 0.0 }
 0x3f8   :  { %v4488_v14 = vadd.f32 1e-05, %v4470_v30 }
 0x3fa   :  { %5334 = vrsqrt.f32 %v4488_v14 }
 0x404   :  { %v5335_v22 = vpop.eup %5334 }
 0x405   :  { %v4499_v35 = vmul.f32 %v5335_v22, %v4479_v15  ;;  %v4500_v36 = vmul.f32 %v5335_v22, %v4480_v34  ;;  %v4501_v37 = vmul.f32 %v5335_v22, %v4481_v19  ;;  %v4502_v38 = vmul.f32 %v5335_v22, %v4482_v20 }
 0x406   :  { %v4503_v63 = vmul.f32 %v5335_v22, %v4483_v26  ;;  %v4504_v40 = vmul.f32 %v5335_v22, %v4484_v12  ;;  %v4505_v0 = vmul.f32 %v5335_v22, %v4485_v29  ;;  %v4506_v41 = vmul.f32 %v5335_v22, %v4486_v33 }
 0x407   :  { %v4525_v28 = vmul.f32 %v7286_v21, %v4499_v35  ;;  %v4526_v7 = vmul.f32 %v7286_v21, %v4500_v36  ;;  %v4527_v17 = vmul.f32 %v7286_v21, %v4501_v37  ;;  %v4528_v25 = vmul.f32 %v7286_v21, %v4502_v38 }
 0x408   :  { %v4529_v39 = vmul.f32 %v7286_v21, %v4503_v63  ;;  %v4530_v46 = vmul.f32 %v7286_v21, %v4504_v40  ;;  %v4531_v58 = vmul.f32 %v7286_v21, %v4505_v0  ;;  %v4532_v42 = vmul.f32 %v7286_v21, %v4506_v41 }
 0x409   :  { %v4551_v43 = vadd.f32 %v4541_v59, %v4525_v28  ;;  %v4552_v1 = vadd.f32 %v4541_v59, %v4526_v7  ;;  %v4553_v44 = vadd.f32 %v4541_v59, %v4527_v17  ;;  %v4554_v4 = vadd.f32 %v4541_v59, %v4528_v25 }
 0x40a   :  { %v4555_v45 = vadd.f32 %v4541_v59, %v4529_v39  ;;  %v4556_v47 = vadd.f32 %v4541_v59, %v4530_v46  ;;  %v4557_v10 = vadd.f32 %v4541_v59, %v4531_v58  ;;  %v4558_v48 = vadd.f32 %v4541_v59, %v4532_v42 }
 0x40b   :  { %v4567_v13 = vmax.f32 %v4551_v43, 0.0  ;;  %v4568_v49 = vmax.f32 %v4552_v1, 0.0  ;;  %v4569_v16 = vmax.f32 %v4553_v44, 0.0  ;;  %v4570_v50 = vmax.f32 %v4554_v4, 0.0 }
 0x40c   :  { %v4571_v32 = vmax.f32 %v4555_v45, 0.0  ;;  %v4572_v51 = vmax.f32 %v4556_v47, 0.0  ;;  %v4573_v52 = vmax.f32 %v4557_v10, 0.0  ;;  %v4574_v53 = vmax.f32 %v4558_v48, 0.0 }
 0x40d   :  { %v5232_v54 = vpack.c.bf16 %v4568_v49, %v4567_v13  ;;  %v5233_v55 = vpack.c.bf16 %v4570_v50, %v4569_v16 }
 0x40e   :  { %v5234_v21 = vpack.c.bf16 %v4572_v51, %v4571_v32  ;;  %v5235_v56 = vpack.c.bf16 %v4574_v53, %v4573_v52 }
 0x40f   :  { %4627 = vst [vmem:[%s7341_s5 + $0x20] sm:$0xff] %v5232_v54  ;;  %4628 = vst [vmem:[%s7341_s5 + $0x28] sm:$0xff] %v5233_v55 }
 0x410   :  { %4629 = vst [vmem:[%s7341_s5 + $0x30] sm:$0xff] %v5234_v21  ;;  %4630 = vst [vmem:[%s7341_s5 + $0x38] sm:$0xff] %v5235_v56 }

// kernel: stven_forward.11
= control target key start
LH: loop header
LB: loop body
LE: loop exit
PB: predicated region body
PF: predicated region fallthrough
CT: control target
= control target key end

     0   :  { %v665_v1 = vmov 0   ;;  %s879_s1 = inlined_call_operand.vmem [shape: bf16[384,256], index: 1, kind: input, shape index: {}]   ;;  %s880_s0 = inlined_call_operand.vmem [shape: bf16[16,384], index: 0, kind: input, shape index: {}]   ;;  %s881_s2 = inlined_call_operand.vmem [shape: f32[16,1], index: 2, kind: input, shape index: {}]   ;;  %s882_s3 = inlined_call_operand.vmem [shape: f32[16,1], index: 3, kind: input, shape index: {}]   ;;  %s883_s4 = inlined_call_operand.vmem [shape: f32[16,1], index: 4, kind: input, shape index: {}]   ;;  %s884_s5 = inlined_call_operand.vmem [shape: bf16[16,256], index: 5, kind: output, shape index: {}]  }
   0x1   :  { %v585_v0 = vld [vmem:[%s879_s1 + $0x4] ss:$8 sps:$4 sm:$0xff]   ;;  %416 = vmatprep.mubr.bf16.mxu0 %v665_v1  ;;  %583 = vset.pattern.permute.xlu0 %v665_v1  ;;  %v587_v2 = vld [vmem:[%s879_s1] ss:$8 sps:$4 sm:$0xff]   ;;  %v588_v3 = vld [vmem:[%s879_s1 + $0x14] ss:$8 sps:$4 sm:$0xff]  }
   0x2   :  { %584 = vset.pattern.permute.xlu1 %v665_v1  ;;  %341 = vmatprep.subr.bf16.mxu1 %v585_v0  ;;  %v590_v4 = vld [vmem:[%s879_s1 + $0x10] ss:$8 sps:$4 sm:$0xff]   ;;  %v591_v5 = vld [vmem:[%s879_s1 + $0x24] ss:$8 sps:$4 sm:$0xff]   ;;  %v593_v6 = vld [vmem:[%s879_s1 + $0x20] ss:$8 sps:$4 sm:$0xff]  }
   0x3   :  { %342 = vmatpush1.bf16.msra.mxu1 %v587_v2  ;;  %v594_v7 = vld [vmem:[%s879_s1 + $0x34] ss:$8 sps:$4 sm:$0xff]   ;;  %v596_v8 = vld [vmem:[%s879_s1 + $0x30] ss:$8 sps:$4 sm:$0xff]   ;;  %v609_v9 = vld [vmem:[%s879_s1 + $0x104] ss:$8 sps:$4 sm:$0xff]  }
   0x4   :  { %343 = vmatprep.subr.bf16.mxu1 %v588_v3  ;;  %v597_v10 = vld [vmem:[%s879_s1 + $0x44] ss:$8 sps:$4 sm:$0xff]   ;;  %v613_v11 = vld [vmem:[%s879_s1 + $0x100] ss:$8 sps:$4 sm:$0xff]   ;;  %384 = vmatprep.subr.bf16.mxu0 %v609_v9  ;;  %v615_v12 = vld [vmem:[%s879_s1 + $0x114] ss:$8 sps:$4 sm:$0xff]  }
   0x5   :  { %385 = vmatpush1.bf16.msra.mxu0 %v613_v11  ;;  %v599_v13 = vld [vmem:[%s879_s1 + $0x40] ss:$8 sps:$4 sm:$0xff]   ;;  %v600_v14 = vld [vmem:[%s879_s1 + $0x54] ss:$8 sps:$4 sm:$0xff]   ;;  %v619_v15 = vld [vmem:[%s879_s1 + $0x110] ss:$8 sps:$4 sm:$0xff]  }
   0x6   :  { %386 = vmatprep.subr.bf16.mxu0 %v615_v12  ;;  %v621_v16 = vld [vmem:[%s879_s1 + $0x124] ss:$8 sps:$4 sm:$0xff]   ;;  %v602_v17 = vld [vmem:[%s879_s1 + $0x50] ss:$8 sps:$4 sm:$0xff]   ;;  %v625_v18 = vld [vmem:[%s879_s1 + $0x120] ss:$8 sps:$4 sm:$0xff]  }
   0x7   :  { %344 = vmatpush1.bf16.msra.mxu1 %v590_v4  ;;  %v627_v19 = vld [vmem:[%s879_s1 + $0x134] ss:$8 sps:$4 sm:$0xff]   ;;  %v603_v20 = vld [vmem:[%s879_s1 + $0x64] ss:$8 sps:$4 sm:$0xff]   ;;  %v631_v21 = vld [vmem:[%s879_s1 + $0x130] ss:$8 sps:$4 sm:$0xff]  }
   0x8   :  { %345 = vmatprep.subr.bf16.mxu1 %v591_v5  ;;  %v605_v22 = vld [vmem:[%s879_s1 + $0x60] ss:$8 sps:$4 sm:$0xff]   ;;  %v633_v23 = vld [vmem:[%s879_s1 + $0x144] ss:$8 sps:$4 sm:$0xff]   ;;  %v606_v24 = vld [vmem:[%s879_s1 + $0x74] ss:$8 sps:$4 sm:$0xff]  }
   0x9   :  { %387 = vmatpush1.bf16.msra.mxu0 %v619_v15  ;;  %v608_v25 = vld [vmem:[%s879_s1 + $0x70] ss:$8 sps:$4 sm:$0xff]   ;;  %v637_v26 = vld [vmem:[%s879_s1 + $0x140] ss:$8 sps:$4 sm:$0xff]   ;;  %v639_v27 = vld [vmem:[%s879_s1 + $0x154] ss:$8 sps:$4 sm:$0xff]  }
   0xa   :  { %388 = vmatprep.subr.bf16.mxu0 %v621_v16  ;;  %v611_v28 = vld [vmem:[%s879_s1 + $0x84] ss:$8 sps:$4 sm:$0xff]   ;;  %v643_v29 = vld [vmem:[%s879_s1 + $0x150] ss:$8 sps:$4 sm:$0xff]   ;;  %v614_v30 = vld [vmem:[%s879_s1 + $0x80] ss:$8 sps:$4 sm:$0xff]  }
   0xb   :  { %346 = vmatpush1.bf16.msra.mxu1 %v593_v6  ;;  %v645_v31 = vld [vmem:[%s879_s1 + $0x164] ss:$8 sps:$4 sm:$0xff]   ;;  %v617_v32 = vld [vmem:[%s879_s1 + $0x94] ss:$8 sps:$4 sm:$0xff]   ;;  %v649_v34 = vld [vmem:[%s879_s1 + $0x160] ss:$8 sps:$4 sm:$0xff]  }
   0xc   :  { %347 = vmatprep.subr.bf16.mxu1 %v594_v7  ;;  %v659_v33 = vld [vmem:[%s880_s0 + $0x4] ss:$12 sps:$4 sm:$0xff]   ;;  %v651_v37 = vld [vmem:[%s879_s1 + $0x174] ss:$8 sps:$4 sm:$0xff]   ;;  %v74_v40 = vld [vmem:[%s881_s2 + $0x8] sm:$0xff] }
   0xd   :  { %389 = vmatpush1.bf16.msra.mxu0 %v625_v18  ;;  %v73_v35 = vld [vmem:[%s881_s2] sm:$0xff]  ;;  %v620_v36 = vld [vmem:[%s879_s1 + $0x90] ss:$8 sps:$4 sm:$0xff]   ;;  %373 = vmatprep.mubr.bf16.mxu1 %v659_v33  ;;  %v629_v42 = vld [vmem:[%s879_s1 + $0xb4] ss:$8 sps:$4 sm:$0xff]  }
   0xe   :  { %390 = vmatprep.subr.bf16.mxu0 %v627_v19  ;;  %v623_v38 = vld [vmem:[%s879_s1 + $0xa4] ss:$8 sps:$4 sm:$0xff]   ;;  %77 = vperm.xlu0 %583, %v73_v35   ;;  %v655_v39 = vld [vmem:[%s879_s1 + $0x170] ss:$8 sps:$4 sm:$0xff]   ;;  %v626_v41 = vld [vmem:[%s879_s1 + $0xa0] ss:$8 sps:$4 sm:$0xff]  }
   0xf   :  { %348 = vmatpush1.bf16.msra.mxu1 %v596_v8  ;;  %v660_v43 = vld [vmem:[%s880_s0 + $0x8] ss:$12 sps:$4 sm:$0xff]   ;;  %v632_v44 = vld [vmem:[%s879_s1 + $0xb0] ss:$8 sps:$4 sm:$0xff]   ;;  %v635_v45 = vld [vmem:[%s879_s1 + $0xc4] ss:$8 sps:$4 sm:$0xff]  }
  0x10   :  { %349 = vmatprep.subr.bf16.mxu1 %v597_v10  ;;  %v638_v46 = vld [vmem:[%s879_s1 + $0xc0] ss:$8 sps:$4 sm:$0xff]   ;;  %v641_v47 = vld [vmem:[%s879_s1 + $0xd4] ss:$8 sps:$4 sm:$0xff]   ;;  %v644_v48 = vld [vmem:[%s879_s1 + $0xd0] ss:$8 sps:$4 sm:$0xff]  }
  0x11   :  { %391 = vmatpush1.bf16.msra.mxu0 %v631_v21  ;;  %v647_v49 = vld [vmem:[%s879_s1 + $0xe4] ss:$8 sps:$4 sm:$0xff]   ;;  %v650_v50 = vld [vmem:[%s879_s1 + $0xe0] ss:$8 sps:$4 sm:$0xff]   ;;  %v653_v51 = vld [vmem:[%s879_s1 + $0xf4] ss:$8 sps:$4 sm:$0xff]  }
  0x12   :  { %392 = vmatprep.subr.bf16.mxu0 %v633_v23  ;;  %82 = vperm.xlu0 %583, %v74_v40   ;;  %v656_v52 = vld [vmem:[%s879_s1 + $0xf0] ss:$8 sps:$4 sm:$0xff]   ;;  %v657_v53 = vld [vmem:[%s880_s0] ss:$12 sps:$4 sm:$0xff]  }
  0x13   :  { %350 = vmatpush1.bf16.msra.mxu1 %v599_v13  ;;  %v427_v13 = vld [vmem:[%s882_s3] sm:$0xff]  ;;  %v430_v19 = vld [vmem:[%s883_s4 + $0x8] sm:$0xff] }
  0x14   :  { %351 = vmatprep.subr.bf16.mxu1 %v600_v14  ;;  %v428_v14 = vld [vmem:[%s882_s3 + $0x8] sm:$0xff]  ;;  %v429_v15 = vld [vmem:[%s883_s4] sm:$0xff] }
  0x15   :  { %393 = vmatpush1.bf16.msra.mxu0 %v637_v26 }
  0x16   :  { %394 = vmatprep.subr.bf16.mxu0 %v639_v27 }
  0x17   :  { %352 = vmatpush1.bf16.msra.mxu1 %v602_v17 }
  0x18   :  { %353 = vmatprep.subr.bf16.mxu1 %v603_v20 }
  0x19   :  { %395 = vmatpush1.bf16.msra.mxu0 %v643_v29 }
  0x1a   :  { %396 = vmatprep.subr.bf16.mxu0 %v645_v31 }
  0x1b   :  { %354 = vmatpush1.bf16.msra.mxu1 %v605_v22 }
  0x1c   :  { %355 = vmatprep.subr.bf16.mxu1 %v606_v24 }
  0x1d   :  { %397 = vmatpush1.bf16.msra.mxu0 %v649_v34 }
  0x1e   :  { %398 = vmatprep.subr.bf16.mxu0 %v651_v37 }
  0x1f   :  { %356 = vmatpush1.bf16.msra.mxu1 %v608_v25 }
  0x20   :  { %357 = vmatprep.subr.bf16.mxu1 %v611_v28 }
  0x21   :  { %399 = vmatpush1.bf16.msra.mxu0 %v655_v39 }
  0x23   :  { %358 = vmatpush1.bf16.msra.mxu1 %v614_v30 }
  0x24   :  { %359 = vmatprep.subr.bf16.mxu1 %v617_v32  ;;  %417 = vmatmul.mubr.bf16.vlgmr.msra.gmra.mrb[0].mxu0 %v660_v43 }
  0x27   :  { %360 = vmatpush1.bf16.msra.mxu1 %v620_v36 }
  0x28   :  { %361 = vmatprep.subr.bf16.mxu1 %v623_v38 }
  0x2b   :  { %362 = vmatpush1.bf16.msra.mxu1 %v626_v41 }
  0x2c   :  { %363 = vmatprep.subr.bf16.mxu1 %v629_v42 }
  0x2f   :  { %364 = vmatpush1.bf16.msra.mxu1 %v632_v44 }
  0x30   :  { %365 = vmatprep.subr.bf16.mxu1 %v635_v45 }
  0x33   :  { %366 = vmatpush1.bf16.msra.mxu1 %v638_v46 }
  0x34   :  { %367 = vmatprep.subr.bf16.mxu1 %v641_v47 }
  0x37   :  { %368 = vmatpush1.bf16.msra.mxu1 %v644_v48 }
  0x38   :  { %369 = vmatprep.subr.bf16.mxu1 %v647_v49 }
  0x3b   :  { %370 = vmatpush1.bf16.msra.mxu1 %v650_v50 }
  0x3c   :  { %371 = vmatprep.subr.bf16.mxu1 %v653_v51 }
  0x3f   :  { %372 = vmatpush1.bf16.msra.mxu1 %v656_v52 }
  0x42   :  { %374 = vmatmul.mubr.bf16.vlgmr.msra.gmra.mrb[0].mxu1 %v657_v53 }
  0x8d   :  { %v78_v58 = vpop.permute.xlu0 %77 }
  0x91   :  { %v83_v60 = vpop.permute.xlu0 %82 }
  0xf7   :  { %v418_v54 = vpop.f32.mrb[0].mxu0 }
  0xf8   :  { %v420_v55 = vpop.f32.mrb[1].mxu0 }
  0xf9   :  { %v422_v56 = vpop.f32.mrb[2].mxu0 }
  0xfa   :  { %v424_v57 = vpop.f32.mrb[3].mxu0 }
 0x115   :  { %v375_v59 = vpop.f32.mrb[0].mxu1 }
 0x116   :  { %v376_v61 = vadd.f32 %v375_v59, %v78_v58  ;;  %v377_v62 = vpop.f32.mrb[1].mxu1 }
 0x117   :  { %v378_v63 = vadd.f32 %v377_v62, %v78_v58  ;;  %v379_v0 = vpop.f32.mrb[2].mxu1 }
 0x118   :  { %v419_v1 = vadd.f32 %v418_v54, %v376_v61  ;;  %v380_v2 = vadd.f32 %v379_v0, %v83_v60  ;;  %v381_v3 = vpop.f32.mrb[3].mxu1 }
 0x119   :  { %v421_v4 = vadd.f32 %v420_v55, %v378_v63  ;;  %v382_v5 = vadd.f32 %v381_v3, %v83_v60 }
 0x11a   :  { %v855_v6 = vadd.f32 %v422_v56, %v380_v2  ;;  %v439_v7 = vmul.f32 %v419_v1, %v419_v1 }
 0x11b   :  { %v425_v8 = vadd.f32 %v424_v57, %v382_v5  ;;  %v431_v9 = vadd.f32 %v421_v4, %v419_v1  ;;  %v440_v10 = vmul.f32 %v421_v4, %v421_v4 }
 0x11c   :  { %v441_v16 = vmul.f32 %v855_v6, %v855_v6 }
 0x11d   :  { %432 = vadd.xlane.f32.xlu1 %v431_v9  ;;  %v443_v11 = vadd.f32 %v440_v10, %v439_v7  ;;  %v434_v12 = vadd.f32 %v425_v8, %v855_v6  ;;  %v442_v17 = vmul.f32 %v425_v8, %v425_v8 }
 0x11f   :  { %444 = vadd.xlane.f32.xlu0 %v443_v11  ;;  %v446_v18 = vadd.f32 %v442_v17, %v441_v16 }
 0x121   :  { %435 = vadd.xlane.f32.xlu1 %v434_v12 }
 0x132   :  { %471 = vperm.xlu1 %584, %v427_v13  }
 0x136   :  { %476 = vperm.xlu1 %584, %v428_v14  }
 0x13a   :  { %485 = vperm.xlu1 %584, %v429_v15  }
 0x15e   :  { %447 = vadd.xlane.f32.xlu1 %v446_v18 }
 0x16f   :  { %490 = vperm.xlu1 %584, %v430_v19  }
 0x1aa   :  { %v433_v20 = vpop.xlane.xlu1 %432 }
 0x1ab   :  { %v437_v21 = vmul.f32 0.00390625, %v433_v20 }
 0x1ac   :  { %v445_v22 = vpop.xlane.xlu0 %444 }
 0x1ad   :  { %v449_v23 = vmul.f32 0.00390625, %v445_v22  ;;  %v451_v24 = vmul.f32 %v437_v21, %v437_v21  ;;  %v457_v31 = vsub.f32 %v419_v1, %v437_v21  ;;  %v458_v32 = vsub.f32 %v421_v4, %v437_v21 }
 0x1ae   :  { %v436_v27 = vpop.xlane.xlu1 %435 }
 0x1af   :  { %v453_v25 = vsub.f32 %v449_v23, %v451_v24  ;;  %v438_v44 = vmul.f32 0.00390625, %v436_v27 }
 0x1b1   :  { %v455_v26 = vmax.f32 %v453_v25, 0.0  ;;  %v452_v46 = vmul.f32 %v438_v44, %v438_v44  ;;  %v459_v51 = vsub.f32 %v855_v6, %v438_v44  ;;  %v460_v52 = vsub.f32 %v425_v8, %v438_v44 }
 0x1b2   :  { %v472_v29 = vpop.permute.xlu1 %471 }
 0x1b3   :  { %v461_v28 = vadd.f32 1e-05, %v455_v26 }
 0x1b5   :  { %661 = vrsqrt.f32 %v461_v28 }
 0x1b6   :  { %v477_v30 = vpop.permute.xlu1 %476 }
 0x1ba   :  { %v486_v38 = vpop.permute.xlu1 %485 }
 0x1bf   :  { %v662_v33 = vpop.eup %661 }
 0x1c0   :  { %v465_v34 = vmul.f32 %v662_v33, %v457_v31  ;;  %v466_v35 = vmul.f32 %v662_v33, %v458_v32 }
 0x1c2   :  { %v479_v36 = vmul.f32 %v472_v29, %v465_v34  ;;  %v480_v37 = vmul.f32 %v472_v29, %v466_v35 }
 0x1c4   :  { %v493_v39 = vadd.f32 %v486_v38, %v479_v36  ;;  %v494_v40 = vadd.f32 %v486_v38, %v480_v37 }
 0x1c6   :  { %v497_v41 = vmax.f32 %v493_v39, 0.0  ;;  %v498_v42 = vmax.f32 %v494_v40, 0.0 }
 0x1c8   :  { %v572_v43 = vpack.c.bf16 %v498_v42, %v497_v41 }
 0x1ca   :  { %513 = vst [vmem:[%s884_s5] sm:$0xff] %v572_v43 }
 0x1eb   :  { %v448_v45 = vpop.xlane.xlu1 %447 }
 0x1ec   :  { %v450_v47 = vmul.f32 0.00390625, %v448_v45 }
 0x1ee   :  { %v454_v48 = vsub.f32 %v450_v47, %v452_v46 }
 0x1ef   :  { %v491_v58 = vpop.permute.xlu1 %490 }
 0x1f0   :  { %v456_v49 = vmax.f32 %v454_v48, 0.0 }
 0x1f2   :  { %v462_v50 = vadd.f32 1e-05, %v456_v49 }
 0x1f4   :  { %663 = vrsqrt.f32 %v462_v50 }
 0x1fe   :  { %v664_v53 = vpop.eup %663 }
 0x1ff   :  { %v467_v54 = vmul.f32 %v664_v53, %v459_v51  ;;  %v468_v55 = vmul.f32 %v664_v53, %v460_v52 }
 0x201   :  { %v481_v56 = vmul.f32 %v477_v30, %v467_v54  ;;  %v482_v57 = vmul.f32 %v477_v30, %v468_v55 }
 0x203   :  { %v495_v59 = vadd.f32 %v491_v58, %v481_v56  ;;  %v496_v60 = vadd.f32 %v491_v58, %v482_v57 }
 0x205   :  { %v499_v61 = vmax.f32 %v495_v59, 0.0  ;;  %v500_v62 = vmax.f32 %v496_v60, 0.0 }
 0x207   :  { %v573_v63 = vpack.c.bf16 %v500_v62, %v499_v61 }
 0x209   :  { %514 = vst [vmem:[%s884_s5 + $0x8] sm:$0xff] %v573_v63 }

// kernel: stven_forward.12
= control target key start
LH: loop header
LB: loop body
LE: loop exit
PB: predicated region body
PF: predicated region fallthrough
CT: control target
= control target key end

     0   :  { %s1705_s18 = smov 0   ;;  %s2001_s0 = inlined_call_operand.vmem [shape: bf16[64,1024], index: 0, kind: input, shape index: {}]   ;;  %s2002_s1 = inlined_call_operand.vmem [shape: bf16[1024,32], index: 1, kind: input, shape index: {}]   ;;  %s2003_s2 = inlined_call_operand.vmem [shape: f32[64,1], index: 2, kind: input, shape index: {}]   ;;  %s2004_s3 = inlined_call_operand.vmem [shape: f32[64,1], index: 3, kind: input, shape index: {}]   ;;  %s2005_s4 = inlined_call_operand.vmem [shape: f32[64,1], index: 4, kind: input, shape index: {}]   ;;  %s2006_s5 = inlined_call_operand.vmem [shape: bf16[64,32], index: 5, kind: output, shape index: {}]  }
   0x1 LB: > { %s1364_s19 = sadd.s32 4294967295, %s1672_s18   ;;  %p1368_p0 = scmp.ge.s32.totalorder %s1672_s18, 1  ;;  %s1672_s18 = sphi %s1705_s18, %s15_s18  }
   0x2   : > { %p222_p1 = scmp.lt.s32.totalorder %s1672_s18, 3 }
   0x4   : > { %p223_p2 = pnand %p1368_p0, %p222_p1 }
   0x5   : > { %v1594_v0 = vld [vmem:[%s2002_s1 + $0x40] sm:$0xff] (!%p223_p2)   ;;  %v1674_v4 = vmov (!%p223_p2), 0   ;;  %v1598_v5 = vld [vmem:[%s2002_s1 + $0x48] sm:$0xff] (!%p223_p2)   ;;  %v1602_v9 = vld [vmem:[%s2002_s1 + $0x50] sm:$0xff] (!%p223_p2)   ;;  %s1369_s29 = sshll.u32 (!%p223_p2), %s1364_s19, 2  ;;  %vm1134_vm0 = vcmask (!%p223_p2), 261120  }
   0x6   : > { %226 = sbr.rel (%p223_p2) target bundleno = 479 (0x1df), region = 40  ;;  %v1595_v1 = vld [vmem:[%s2002_s1 + $0xc0] sm:$0xff] (!%p223_p2)   ;;  %1471 = vmatprep.subr.bf16.mxu0 (!%p223_p2), %v1594_v0  ;;  %1592 = vset.pattern.permute.xlu0 (!%p223_p2), %v1674_v4  ;;  %v1599_v6 = vld [vmem:[%s2002_s1 + $0xc8] sm:$0xff] (!%p223_p2)   ;;  %v1603_v10 = vld [vmem:[%s2002_s1 + $0xd0] sm:$0xff] (!%p223_p2)   ;;  %p267_p3 = scmp.lt.s32.totalorder (!%p223_p2), %s1369_s29, 7  ;;  %vm1267_vm1 = vcmask (!%p223_p2), 257024  }
   0x7   : > { %v1596_v2 = vld [vmem:[%s2002_s1] sm:$0xff] (!%p223_p2)   ;;  %1499 = vmatprep.subr.bf16.mxu1 (!%p223_p2), %v1595_v1  ;;  %1593 = vset.pattern.permute.xlu1 (!%p223_p2), %v1674_v4  ;;  %v1600_v7 = vld [vmem:[%s2002_s1 + $0x8] sm:$0xff] (!%p223_p2)   ;;  %v1604_v11 = vld [vmem:[%s2002_s1 + $0x10] sm:$0xff] (!%p223_p2)  }
   0x8   : > { %v1597_v3 = vld [vmem:[%s2002_s1 + $0x80] sm:$0xff] (!%p223_p2)   ;;  %1472 = vmatpush3.bf16.msra.mxu0 (!%p223_p2), %v1596_v2  ;;  %v1601_v8 = vld [vmem:[%s2002_s1 + $0x88] sm:$0xff] (!%p223_p2)   ;;  %v1605_v12 = vld [vmem:[%s2002_s1 + $0x90] sm:$0xff] (!%p223_p2)  }
   0x9   : > { %1500 = vmatpush3.bf16.msra.mxu1 (!%p223_p2), %v1597_v3  ;;  %1473 = vmatprep.subr.bf16.mxu0 (!%p223_p2), %v1598_v5  ;;  %v1606_v13 = vld [vmem:[%s2002_s1 + $0x58] sm:$0xff] (!%p223_p2)   ;;  %v1610_v17 = vld [vmem:[%s2002_s1 + $0x60] sm:$0xff] (!%p223_p2)   ;;  %v1614_v21 = vld [vmem:[%s2002_s1 + $0x68] sm:$0xff] (!%p223_p2)  }
   0xa   : > { %1501 = vmatprep.subr.bf16.mxu1 (!%p223_p2), %v1599_v6  ;;  %v1607_v14 = vld [vmem:[%s2002_s1 + $0xd8] sm:$0xff] (!%p223_p2)   ;;  %v1611_v18 = vld [vmem:[%s2002_s1 + $0xe0] sm:$0xff] (!%p223_p2)   ;;  %v1615_v22 = vld [vmem:[%s2002_s1 + $0xe8] sm:$0xff] (!%p223_p2)  }
   0xb   : > { %v1608_v15 = vld [vmem:[%s2002_s1 + $0x18] sm:$0xff] (!%p223_p2)   ;;  %v1612_v19 = vld [vmem:[%s2002_s1 + $0x20] sm:$0xff] (!%p223_p2)   ;;  %v1616_v23 = vld [vmem:[%s2002_s1 + $0x28] sm:$0xff] (!%p223_p2)  }
   0xc   : > { %1474 = vmatpush3.bf16.msra.mxu0 (!%p223_p2), %v1600_v7  ;;  %v1609_v16 = vld [vmem:[%s2002_s1 + $0x98] sm:$0xff] (!%p223_p2)   ;;  %v1613_v20 = vld [vmem:[%s2002_s1 + $0xa0] sm:$0xff] (!%p223_p2)   ;;  %v1617_v24 = vld [vmem:[%s2002_s1 + $0xa8] sm:$0xff] (!%p223_p2)  }
   0xd   : > { %1502 = vmatpush3.bf16.msra.mxu1 %v1601_v8  ;;  %1475 = vmatprep.subr.bf16.mxu0 %v1602_v9  ;;  %s2008_s29 = smov (!%p267_p3, %s1369_s29), 7  ;;  %v1618_v25 = vld [vmem:[%s2002_s1 + $0x70] sm:$0xff]   ;;  %v1622_v29 = vld [vmem:[%s2002_s1 + $0x78] sm:$0xff]   ;;  %v1626_v41 = vld [vmem:[%s2002_s1 + $0x140] sm:$0xff]  }
   0xe   : > { %1503 = vmatprep.subr.bf16.mxu1 %v1603_v10  ;;  %v1619_v26 = vld [vmem:[%s2002_s1 + $0xf0] sm:$0xff]   ;;  %s1466_s28 = sshll.u32 %s2008_s29, 5  ;;  %v1623_v30 = vld [vmem:[%s2002_s1 + $0xf8] sm:$0xff]   ;;  %v1627_v42 = vld [vmem:[%s2002_s1 + $0x1c0] sm:$0xff]   ;;  %s1918_s11 = sshll.u32 %s2008_s29, 3 }
   0xf   : > { %v1620_v27 = vld [vmem:[%s2002_s1 + $0x30] sm:$0xff]   ;;  %s1811_s19 = scalar_lea.vmem %s2001_s0, %s1466_s28  ;;  %v1624_v31 = vld [vmem:[%s2002_s1 + $0x38] sm:$0xff]   ;;  %v1628_v43 = vld [vmem:[%s2002_s1 + $0x100] sm:$0xff]   ;;  %s277_s20 = scalar_lea.vmem %s2003_s2, %s1918_s11 }
  0x10   : > { %1476 = vmatpush3.bf16.msra.mxu0 %v1604_v11  ;;  %v1621_v28 = vld [vmem:[%s2002_s1 + $0xb0] sm:$0xff]   ;;  %v1625_v32 = vld [vmem:[%s2002_s1 + $0xb8] sm:$0xff]   ;;  %v298_v33 = vld [vmem:[%s1811_s19] sm:$0xff]  ;;  %s1946_s25 = scalar_lea.vmem %s2005_s4, %s1918_s11  ;;  %s1379_s26 = sshll.u32 %s2008_s29, 2 }
  0x11   : > { %1504 = vmatpush3.bf16.msra.mxu1 %v1605_v12  ;;  %1477 = vmatprep.subr.bf16.mxu0 %v1606_v13  ;;  %v302_v34 = vld [vmem:[%s1811_s19 + $0x20] sm:$0xff]  ;;  %v299_v35 = vld [vmem:[%s1811_s19 + $0x8] sm:$0xff]  ;;  %v1634_v49 = vld [vmem:[%s2002_s1 + $0x150] sm:$0xff]   ;;  %s295_s30 = scalar_lea.vmem %s2006_s5, %s1379_s26 }
  0x12   : > { %1505 = vmatprep.subr.bf16.mxu1 %v1607_v14  ;;  %v1380_v36 = vcombine.low %v298_v33, %v302_v34  ;;  %v1381_v37 = vcombine.high %v298_v33, %v302_v34  ;;  %v303_v38 = vld [vmem:[%s1811_s19 + $0x28] sm:$0xff]  ;;  %v1629_v44 = vld [vmem:[%s2002_s1 + $0x180] sm:$0xff]   ;;  %v1635_v50 = vld [vmem:[%s2002_s1 + $0x1d0] sm:$0xff]  }
  0x13   : > { %v1382_v39 = vcombine.low %v299_v35, %v303_v38  ;;  %v1383_v40 = vcombine.high %v299_v35, %v303_v38  ;;  %v1630_v45 = vld [vmem:[%s2002_s1 + $0x148] sm:$0xff]   ;;  %v1636_v51 = vld [vmem:[%s2002_s1 + $0x110] sm:$0xff]   ;;  %v1638_v53 = vld [vmem:[%s2002_s1 + $0x158] sm:$0xff]  }
  0x14   : > { %1478 = vmatpush3.bf16.msra.mxu0 %v1608_v15  ;;  %962 = vmatprep.mubr.bf16.mxu0 %v1381_v37  ;;  %v1631_v46 = vld [vmem:[%s2002_s1 + $0x1c8] sm:$0xff]   ;;  %v1637_v52 = vld [vmem:[%s2002_s1 + $0x190] sm:$0xff]   ;;  %v1639_v54 = vld [vmem:[%s2002_s1 + $0x1d8] sm:$0xff]  }
  0x15   : > { %1506 = vmatpush3.bf16.msra.mxu1 %v1609_v16  ;;  %1479 = vmatprep.subr.bf16.mxu0 %v1610_v17  ;;  %v1632_v47 = vld [vmem:[%s2002_s1 + $0x108] sm:$0xff]   ;;  %v1640_v55 = vld [vmem:[%s2002_s1 + $0x118] sm:$0xff]   ;;  %v1642_v57 = vld [vmem:[%s2002_s1 + $0x160] sm:$0xff]  }
  0x16   : > { %1507 = vmatprep.subr.bf16.mxu1 %v1611_v18  ;;  %1011 = vmatprep.mubr.bf16.mxu1 %v1383_v40  ;;  %v1633_v48 = vld [vmem:[%s2002_s1 + $0x188] sm:$0xff]   ;;  %v1641_v56 = vld [vmem:[%s2002_s1 + $0x198] sm:$0xff]   ;;  %v1643_v58 = vld [vmem:[%s2002_s1 + $0x1e0] sm:$0xff]  }
  0x17   : > { %v1644_v59 = vld [vmem:[%s2002_s1 + $0x120] sm:$0xff]   ;;  %v1646_v0 = vld [vmem:[%s2002_s1 + $0x168] sm:$0xff]   ;;  %v1650_v9 = vld [vmem:[%s2002_s1 + $0x170] sm:$0xff]  }
  0x18   : > { %1480 = vmatpush3.bf16.msra.mxu0 %v1612_v19  ;;  %v1645_v60 = vld [vmem:[%s2002_s1 + $0x1a0] sm:$0xff]   ;;  %v1647_v2 = vld [vmem:[%s2002_s1 + $0x1e8] sm:$0xff]   ;;  %v1651_v10 = vld [vmem:[%s2002_s1 + $0x1f0] sm:$0xff]  }
  0x19   : > { %1508 = vmatpush3.bf16.msra.mxu1 %v1613_v20  ;;  %1481 = vmatprep.subr.bf16.mxu0 %v1614_v21  ;;  %v306_v61 = vld [vmem:[%s1811_s19 + $0x40] sm:$0xff]  ;;  %v1648_v3 = vld [vmem:[%s2002_s1 + $0x128] sm:$0xff]   ;;  %v1652_v11 = vld [vmem:[%s2002_s1 + $0x130] sm:$0xff]  }
  0x1a   : > { %1509 = vmatprep.subr.bf16.mxu1 %v1615_v22  ;;  %v310_v62 = vld [vmem:[%s1811_s19 + $0x60] sm:$0xff]  ;;  %v1649_v4 = vld [vmem:[%s2002_s1 + $0x1a8] sm:$0xff]   ;;  %v1653_v12 = vld [vmem:[%s2002_s1 + $0x1b0] sm:$0xff]  }
  0x1b   : > { %v1389_v63 = vcombine.high %v306_v61, %v310_v62  ;;  %v1388_v1 = vcombine.low %v306_v61, %v310_v62  ;;  %v307_v5 = vld [vmem:[%s1811_s19 + $0x48] sm:$0xff]  ;;  %v1654_v13 = vld [vmem:[%s2002_s1 + $0x178] sm:$0xff]   ;;  %v300_v17 = vld [vmem:[%s1811_s19 + $0x10] sm:$0xff] }
  0x1c   : > { %1482 = vmatpush3.bf16.msra.mxu0 %v1616_v23  ;;  %v311_v6 = vld [vmem:[%s1811_s19 + $0x68] sm:$0xff]  ;;  %v1655_v14 = vld [vmem:[%s2002_s1 + $0x1f8] sm:$0xff]   ;;  %v304_v18 = vld [vmem:[%s1811_s19 + $0x30] sm:$0xff] }
  0x1d   : > { %1510 = vmatpush3.bf16.msra.mxu1 %v1617_v24  ;;  %1483 = vmatprep.subr.bf16.mxu0 %v1618_v25  ;;  %v1391_v7 = vcombine.high %v307_v5, %v311_v6  ;;  %v1390_v8 = vcombine.low %v307_v5, %v311_v6  ;;  %v1656_v15 = vld [vmem:[%s2002_s1 + $0x138] sm:$0xff]   ;;  %v1384_v21 = vcombine.low %v300_v17, %v304_v18  ;;  %v308_v25 = vld [vmem:[%s1811_s19 + $0x50] sm:$0xff]  ;;  %v443_v33 = vld [vmem:[%s277_s20 + $0x8] sm:$0xff] }
  0x1e   : > { %1511 = vmatprep.subr.bf16.mxu1 %v1619_v26  ;;  %v1657_v16 = vld [vmem:[%s2002_s1 + $0x1b8] sm:$0xff]   ;;  %v1385_v22 = vcombine.high %v300_v17, %v304_v18  ;;  %v312_v26 = vld [vmem:[%s1811_s19 + $0x70] sm:$0xff] }
  0x1f   : > { %v301_v19 = vld [vmem:[%s1811_s19 + $0x18] sm:$0xff]  ;;  %v1392_v35 = vcombine.low %v308_v25, %v312_v26 }
  0x20   : > { %1484 = vmatpush3.bf16.msra.mxu0 %v1620_v27  ;;  %v305_v20 = vld [vmem:[%s1811_s19 + $0x38] sm:$0xff] }
  0x21   : > { %1512 = vmatpush3.bf16.msra.mxu1 %v1621_v28  ;;  %1485 = vmatprep.subr.bf16.mxu0 %v1622_v29  ;;  %v1386_v23 = vcombine.low %v301_v19, %v305_v20  ;;  %v1387_v24 = vcombine.high %v301_v19, %v305_v20  ;;  %v309_v27 = vld [vmem:[%s1811_s19 + $0x58] sm:$0xff]  ;;  %v1393_v28 = vcombine.high %v308_v25, %v312_v26 }
  0x22   : > { %1513 = vmatprep.subr.bf16.mxu1 %v1623_v30  ;;  %v313_v29 = vld [vmem:[%s1811_s19 + $0x78] sm:$0xff]  ;;  %s283_s19 = scalar_lea.vmem %s2004_s3, %s1918_s11 }
  0x23   : > { %v1395_v30 = vcombine.high %v309_v27, %v313_v29  ;;  %v445_v34 = vld [vmem:[%s277_s20 + $0x18] sm:$0xff]  ;;  %v1126_v37 = vld [vmem:[%s283_s19] sm:$0xff]  ;;  %v1127_v38 = vld [vmem:[%s283_s19 + $0x8] sm:$0xff] }
  0x24   : > { %1486 = vmatpush3.bf16.msra.mxu0 %v1624_v31  ;;  %v442_v31 = vld [vmem:[%s277_s20] sm:$0xff]  ;;  %v1129_v40 = vld [vmem:[%s283_s19 + $0x18] sm:$0xff] }
  0x25   : > { %1514 = vmatpush3.bf16.msra.mxu1 %v1625_v32  ;;  %1527 = vmatprep.subr.bf16.mxu0 %v1626_v41  ;;  %v444_v32 = vld [vmem:[%s277_s20 + $0x10] sm:$0xff]  ;;  %v1130_v41 = vld [vmem:[%s1946_s25] sm:$0xff] }
  0x26   : > { %1555 = vmatprep.subr.bf16.mxu1 %v1627_v42  ;;  %448 = vperm.xlu0 %1592, %v442_v31   ;;  %v1131_v42 = vld [vmem:[%s1946_s25 + $0x8] sm:$0xff] }
  0x27   : > { %963 = vmatmul.mubr.bf16.vlgmr.msra.gmra.mrb[0].mxu0 %v1380_v36  ;;  %458 = vperm.xlu1 %1593, %v444_v32   ;;  %v1394_v36 = vcombine.low %v309_v27, %v313_v29 }
  0x28   : > { %1012 = vmatmul.mubr.bf16.vlgmr.msra.gmra.mrb[0].mxu1 %v1382_v39  ;;  %1528 = vmatpush3.bf16.msra.mxu0 %v1628_v43  ;;  %v1128_v39 = vld [vmem:[%s283_s19 + $0x10] sm:$0xff] }
  0x29   : > { %1556 = vmatpush3.bf16.msra.mxu1 %v1629_v44  ;;  %1529 = vmatprep.subr.bf16.mxu0 %v1630_v45 }
  0x2a   : > { %1557 = vmatprep.subr.bf16.mxu1 %v1631_v46  ;;  %970 = vmatprep.mubr.bf16.mxu0 %v1389_v63 }
  0x2b   : > { %1019 = vmatprep.mubr.bf16.mxu1 %v1391_v7  ;;  %453 = vperm.xlu0 %1592, %v443_v33  }
  0x2c   : > { %1530 = vmatpush3.bf16.msra.mxu0 %v1632_v47  ;;  %463 = vperm.xlu1 %1593, %v445_v34  }
  0x2d   : > { %1558 = vmatpush3.bf16.msra.mxu1 %v1633_v48  ;;  %1531 = vmatprep.subr.bf16.mxu0 %v1634_v49 }
  0x2e   : > { %1559 = vmatprep.subr.bf16.mxu1 %v1635_v50 }
  0x2f   : > { %971 = vmatmul.mubr.bf16.gmra.mrb[4].mxu0 %v1388_v1  ;;  %1206 = vperm.xlu0 %1592, %v1127_v38  }
  0x30   : > { %1532 = vmatpush3.bf16.msra.mxu0 %v1636_v51  ;;  %1020 = vmatmul.mubr.bf16.gmra.mrb[4].mxu1 %v1390_v8 }
  0x31   : > { %1560 = vmatpush3.bf16.msra.mxu1 %v1637_v52  ;;  %1533 = vmatprep.subr.bf16.mxu0 %v1638_v53 }
  0x32   : > { %1561 = vmatprep.subr.bf16.mxu1 %v1639_v54  ;;  %1060 = vmatprep.mubr.bf16.mxu0 %v1385_v22 }
  0x33   : > { %1109 = vmatprep.mubr.bf16.mxu1 %v1387_v24  ;;  %1201 = vperm.xlu1 %1593, %v1126_v37  }
  0x34   : > { %1534 = vmatpush3.bf16.msra.mxu0 %v1640_v55  ;;  %1216 = vperm.xlu0 %1592, %v1129_v40  }
  0x35   : > { %1562 = vmatpush3.bf16.msra.mxu1 %v1641_v56  ;;  %1535 = vmatprep.subr.bf16.mxu0 %v1642_v57 }
  0x36   : > { %1563 = vmatprep.subr.bf16.mxu1 %v1643_v58 }
  0x37   : > { %1211 = vperm.xlu1 %1593, %v1128_v39  }
  0x38   : > { %1536 = vmatpush3.bf16.msra.mxu0 %v1644_v59 }
  0x39   : > { %1564 = vmatpush3.bf16.msra.mxu1 %v1645_v60  ;;  %1537 = vmatprep.subr.bf16.mxu0 %v1646_v0 }
  0x3a   : > { %1565 = vmatprep.subr.bf16.mxu1 %v1647_v2 }
  0x3b   : > { %1225 = vperm.xlu1 %1593, %v1130_v41  }
  0x3c   : > { %1538 = vmatpush3.bf16.msra.mxu0 %v1648_v3 }
  0x3d   : > { %1566 = vmatpush3.bf16.msra.mxu1 %v1649_v4  ;;  %1539 = vmatprep.subr.bf16.mxu0 %v1650_v9 }
  0x3e   : > { %1567 = vmatprep.subr.bf16.mxu1 %v1651_v10 }
  0x3f   : > { %1230 = vperm.xlu1 %1593, %v1131_v42  }
  0x40   : > { %1540 = vmatpush3.bf16.msra.mxu0 %v1652_v11 }
  0x41   : > { %1568 = vmatpush3.bf16.msra.mxu1 %v1653_v12  ;;  %1541 = vmatprep.subr.bf16.mxu0 %v1654_v13 }
  0x42   : > { %1569 = vmatprep.subr.bf16.mxu1 %v1655_v14 }
  0x44   : > { %1542 = vmatpush3.bf16.msra.mxu0 %v1656_v15 }
  0x45   : > { %1570 = vmatpush3.bf16.msra.mxu1 %v1657_v16 }
  0x47   : > { %1061 = vmatmul.mubr.bf16.vlgmr.msra.gmra.mrb[8].mxu0 %v1384_v21 }
  0x48   : > { %1110 = vmatmul.mubr.bf16.vlgmr.msra.gmra.mrb[8].mxu1 %v1386_v23  ;;  %1068 = vmatprep.mubr.bf16.mxu0 %v1393_v28 }
  0x49   : > { %1117 = vmatprep.mubr.bf16.mxu1 %v1395_v30 }
  0x4f   : > { %1069 = vmatmul.mubr.bf16.gmra.mrb[12].mxu0 %v1392_v35 }
  0x50   : > { %1118 = vmatmul.mubr.bf16.gmra.mrb[12].mxu1 %v1394_v36 }
  0xa5   : > { %v449_v43 = vpop.permute.xlu0 %448 }
  0xa6   : > { %v459_v61 = vpop.permute.xlu1 %458 }
  0xaa   : > { %v454_v45 = vpop.permute.xlu0 %453 }
  0xab   : > { %v464_v6 = vpop.permute.xlu1 %463 }
  0xfa   : > { %v1487_v44 = vpop.f32.mrb[0].mxu0 }
  0xfb   : > { %v1515_v46 = vpop.f32.mrb[0].mxu1  ;;  %v1488_v47 = vpop.f32.mrb[1].mxu0 }
  0xfc   : > { %v1489_v48 = vadd.f32 %v1488_v47, %v1487_v44  ;;  %v1516_v49 = vpop.f32.mrb[1].mxu1  ;;  %v1490_v50 = vpop.f32.mrb[2].mxu0 }
  0xfd   : > { %v1517_v51 = vadd.f32 %v1516_v49, %v1515_v46  ;;  %v1518_v52 = vpop.f32.mrb[2].mxu1  ;;  %v1491_v53 = vpop.f32.mrb[3].mxu0 }
  0xfe   : > { %v965_v54 = vadd.f32 %v1489_v48, %v449_v43  ;;  %v1492_v55 = vadd.f32 %v1491_v53, %v1490_v50  ;;  %v1519_v56 = vpop.f32.mrb[3].mxu1 }
  0xff   : > { %v1520_v57 = vadd.f32 %v1519_v56, %v1518_v52 }
 0x100   : > { %v1014_v58 = vadd.f32 %v1517_v51, %v965_v54  ;;  %v968_v59 = vadd.f32 %v1492_v55, %v454_v45 }
 0x102   : > { %v1017_v60 = vadd.f32 %v1520_v57, %v968_v59  ;;  %v1493_v62 = vpop.f32.mrb[4].mxu0  ;;  %v1133_v59 = vld [vmem:[%s1946_s25 + $0x18] sm:$0xff] }
 0x103   : > { %v1494_v63 = vpop.f32.mrb[5].mxu0  ;;  %v1521_v5 = vpop.f32.mrb[4].mxu1 }
 0x104   : > { %v1495_v0 = vadd.f32 %v1494_v63, %v1493_v62  ;;  %v1496_v1 = vpop.f32.mrb[6].mxu0  ;;  %v1522_v7 = vpop.f32.mrb[5].mxu1 }
 0x105   : > { %v1497_v2 = vpop.f32.mrb[7].mxu0  ;;  %v1523_v9 = vadd.f32 %v1522_v7, %v1521_v5  ;;  %v1524_v10 = vpop.f32.mrb[6].mxu1 }
 0x106   : > { %v1498_v3 = vadd.f32 %v1497_v2, %v1496_v1  ;;  %v973_v4 = vadd.f32 %v1495_v0, %v459_v61  ;;  %v1525_v11 = vpop.f32.mrb[7].mxu1  ;;  %v1202_v61 = vpop.permute.xlu1 %1201 }
 0x107   : > { %v1526_v13 = vadd.f32 %v1525_v11, %v1524_v10  ;;  %v1207_v63 = vpop.permute.xlu0 %1206 }
 0x108   : > { %v976_v8 = vadd.f32 %v1498_v3, %v464_v6  ;;  %v1022_v12 = vadd.f32 %v1523_v9, %v973_v4 }
 0x10a   : > { %v1025_v14 = vadd.f32 %v1526_v13, %v976_v8  ;;  %v1980_v62 = vpop.permute.xlu1 %1211 }
 0x10b   : > { %v1982_v1 = vpop.permute.xlu0 %1216 }
 0x10e   : > { %v1226_v0 = vpop.permute.xlu1 %1225 }
 0x112   : > { %v1231_v2 = vpop.permute.xlu1 %1230 }
 0x11a   : > { %v1543_v15 = vpop.f32.mrb[8].mxu0 }
 0x11b   : > { %v1571_v16 = vpop.f32.mrb[8].mxu1  ;;  %v1544_v17 = vpop.f32.mrb[9].mxu0 }
 0x11c   : > { %v1572_v18 = vpop.f32.mrb[9].mxu1  ;;  %v1545_v19 = vadd.f32 %v1544_v17, %v1543_v15  ;;  %v1546_v21 = vpop.f32.mrb[10].mxu0 }
 0x11d   : > { %v1573_v20 = vadd.f32 %v1572_v18, %v1571_v16  ;;  %v1574_v22 = vpop.f32.mrb[10].mxu1  ;;  %v1547_v23 = vpop.f32.mrb[11].mxu0 }
 0x11e   : > { %v1575_v24 = vpop.f32.mrb[11].mxu1  ;;  %v1063_v25 = vadd.f32 %v1545_v19, %v1014_v58  ;;  %v1548_v26 = vadd.f32 %v1547_v23, %v1546_v21 }
 0x11f   : > { %v1576_v27 = vadd.f32 %v1575_v24, %v1574_v22 }
 0x120   : > { %v1950_v28 = vadd.f32 %v1573_v20, %v1063_v25  ;;  %v1066_v29 = vadd.f32 %v1548_v26, %v1017_v60  ;;  %v1132_v60 = vld [vmem:[%s1946_s25 + $0x10] sm:$0xff] }
 0x122   : > { %v1952_v30 = vadd.f32 %v1576_v27, %v1066_v29  ;;  %v1549_v31 = vpop.f32.mrb[12].mxu0  ;;  %v1135_v33 = vsel %vm1134_vm0, %v1950_v28, 0.0  ;;  %v1151_v34 = vmul.f32 %v1950_v28, %v1950_v28 }
 0x123   : > { %v1577_v32 = vpop.f32.mrb[12].mxu1  ;;  %v1550_v35 = vpop.f32.mrb[13].mxu0  ;;  %1136 = vadd.xlane.f32.xlu0 %v1135_v33 }
 0x124   : > { %v1578_v36 = vpop.f32.mrb[13].mxu1  ;;  %v1551_v37 = vadd.f32 %v1550_v35, %v1549_v31  ;;  %v1552_v39 = vpop.f32.mrb[14].mxu0  ;;  %v1138_v41 = vsel %vm1134_vm0, %v1952_v30, 0.0  ;;  %v1155_v44 = vsel %vm1134_vm0, %v1151_v34, 0.0  ;;  %v1152_v48 = vmul.f32 %v1952_v30, %v1952_v30 }
 0x125   : > { %v1579_v38 = vadd.f32 %v1578_v36, %v1577_v32  ;;  %v1580_v40 = vpop.f32.mrb[14].mxu1  ;;  %v1553_v42 = vpop.f32.mrb[15].mxu0  ;;  %1139 = vadd.xlane.f32.xlu1 %v1138_v41 }
 0x126   : > { %v1581_v43 = vpop.f32.mrb[15].mxu1  ;;  %v1071_v45 = vadd.f32 %v1551_v37, %v1022_v12  ;;  %v1554_v46 = vadd.f32 %v1553_v42, %v1552_v39  ;;  %v1158_v52 = vsel %vm1134_vm0, %v1152_v48, 0.0 }
 0x127   : > { %v1582_v47 = vadd.f32 %v1581_v43, %v1580_v40  ;;  %1156 = vadd.xlane.f32.xlu0 %v1155_v44 }
 0x128   : > { %v1963_v49 = vadd.f32 %v1579_v38, %v1071_v45  ;;  %v1074_v50 = vadd.f32 %v1554_v46, %v1025_v14 }
 0x12a   : > { %v1965_v51 = vadd.f32 %v1582_v47, %v1074_v50  ;;  %v1153_v54 = vmul.f32 %v1963_v49, %v1963_v49  ;;  %v1141_v55 = vsel %vm1134_vm0, %v1963_v49, 0.0 }
 0x12b   : > { %1159 = vadd.xlane.f32.xlu0 %v1158_v52 }
 0x12c   : > { %v1144_v53 = vsel %vm1134_vm0, %v1965_v51, 0.0  ;;  %v1154_v56 = vmul.f32 %v1965_v51, %v1965_v51  ;;  %v1161_v57 = vsel %vm1134_vm0, %v1153_v54, 0.0 }
 0x12d   : > { %1145 = vadd.xlane.f32.xlu1 %v1144_v53 }
 0x12e   : > { %v1164_v58 = vsel %vm1134_vm0, %v1154_v56, 0.0 }
 0x12f   : > { %1142 = vadd.xlane.f32.xlu0 %v1141_v55 }
 0x131   : > { %1162 = vadd.xlane.f32.xlu1 %v1161_v57 }
 0x133   : > { %1165 = vadd.xlane.f32.xlu0 %v1164_v58 }
 0x142   : > { %1240 = vperm.xlu1 %1593, %v1133_v59  }
 0x149   : > { %1235 = vperm.xlu0 %1592, %v1132_v60  }
 0x1b0   : > { %v1137_v3 = vpop.xlane.xlu0 %1136 }
 0x1b1   : > { %v1147_v4 = vmul.f32 0.03125, %v1137_v3 }
 0x1b2   : > { %v1140_v5 = vpop.xlane.xlu1 %1139 }
 0x1b3   : > { %v1171_v7 = vmul.f32 %v1147_v4, %v1147_v4  ;;  %v1148_v8 = vmul.f32 0.03125, %v1140_v5  ;;  %v1183_v35 = vsub.f32 %v1950_v28, %v1147_v4 }
 0x1b4   : > { %v1157_v6 = vpop.xlane.xlu0 %1156 }
 0x1b5   : > { %v1167_v9 = vmul.f32 0.03125, %v1157_v6  ;;  %v1172_v12 = vmul.f32 %v1148_v8, %v1148_v8  ;;  %v1184_v40 = vsub.f32 %v1952_v30, %v1148_v8 }
 0x1b7   : > { %v1175_v10 = vsub.f32 %v1167_v9, %v1171_v7 }
 0x1b8   : > { %v1160_v11 = vpop.xlane.xlu0 %1159 }
 0x1b9   : > { %v1179_v13 = vmax.f32 %v1175_v10, 0.0  ;;  %v1168_v14 = vmul.f32 0.03125, %v1160_v11 }
 0x1ba   : > { %v1146_v15 = vpop.xlane.xlu1 %1145 }
 0x1bb   : > { %v1187_v16 = vadd.f32 1e-05, %v1179_v13  ;;  %v1176_v17 = vsub.f32 %v1168_v14, %v1172_v12  ;;  %v1150_v20 = vmul.f32 0.03125, %v1146_v15 }
 0x1bc   : > { %v1143_v18 = vpop.xlane.xlu0 %1142 }
 0x1bd   : > { %1658 = vrsqrt.f32 %v1187_v16  ;;  %v1180_v19 = vmax.f32 %v1176_v17, 0.0  ;;  %v1149_v21 = vmul.f32 0.03125, %v1143_v18  ;;  %v1174_v27 = vmul.f32 %v1150_v20, %v1150_v20 }
 0x1be   : > { %v1163_v22 = vpop.xlane.xlu1 %1162  ;;  %v1186_v30 = vsub.f32 %v1965_v51, %v1150_v20 }
 0x1bf   : > { %v1188_v23 = vadd.f32 1e-05, %v1180_v19  ;;  %v1169_v24 = vmul.f32 0.03125, %v1163_v22  ;;  %v1173_v25 = vmul.f32 %v1149_v21, %v1149_v21  ;;  %v1185_v48 = vsub.f32 %v1963_v49, %v1149_v21 }
 0x1c0   : > { %v1166_v26 = vpop.xlane.xlu0 %1165 }
 0x1c1   : > { %1660 = vrsqrt.f32 %v1188_v23  ;;  %v1170_v29 = vmul.f32 0.03125, %v1166_v26  ;;  %v1177_v31 = vsub.f32 %v1169_v24, %v1173_v25 }
 0x1c2   : > { %v1241_v60 = vpop.permute.xlu1 %1240 }
 0x1c3   : > { %v1178_v32 = vsub.f32 %v1170_v29, %v1174_v27  ;;  %v1181_v33 = vmax.f32 %v1177_v31, 0.0 }
 0x1c5   : > { %v1182_v34 = vmax.f32 %v1178_v32, 0.0  ;;  %v1189_v36 = vadd.f32 1e-05, %v1181_v33 }
 0x1c7   : > { %v1659_v37 = vpop.eup %1658  ;;  %v1190_v38 = vadd.f32 1e-05, %v1182_v34  ;;  %1662 = vrsqrt.f32 %v1189_v36 }
 0x1c8   : > { %v1195_v39 = vmul.f32 %v1659_v37, %v1183_v35  ;;  %v1236_v59 = vpop.permute.xlu0 %1235 }
 0x1c9   : > { %1664 = vrsqrt.f32 %v1190_v38 }
 0x1ca   : > { %v1219_v41 = vmul.f32 %v1202_v61, %v1195_v39 }
 0x1cb   : > { %v1661_v42 = vpop.eup %1660 }
 0x1cc   : > { %v1243_v43 = vadd.f32 %v1226_v0, %v1219_v41  ;;  %v1196_v44 = vmul.f32 %v1661_v42, %v1184_v40 }
 0x1ce   : > { %v1247_v45 = vmax.f32 %v1243_v43, 0.0  ;;  %v1220_v46 = vmul.f32 %v1207_v63, %v1196_v44 }
 0x1d0   : > { %v1467_v28 = vpack.c.bf16 %v1247_v45, %v1247_v45  ;;  %v1244_v47 = vadd.f32 %v1231_v2, %v1220_v46 }
 0x1d1   : > { %v1663_v50 = vpop.eup %1662 }
 0x1d2   : > { %v1248_v52 = vmax.f32 %v1244_v47, 0.0  ;;  %1268 = vst.msk [vmem:[%s295_s30] sm:$0xf] %vm1267_vm1, %v1467_v28  ;;  %v1197_v54 = vmul.f32 %v1663_v50, %v1185_v48 }
 0x1d3   : > { %v1665_v53 = vpop.eup %1664 }
 0x1d4   : > { %v1468_v55 = vpack.c.bf16 %v1248_v52, %v1248_v52  ;;  %v1198_v56 = vmul.f32 %v1665_v53, %v1186_v30  ;;  %v1221_v57 = vmul.f32 %v1980_v62, %v1197_v54 }
 0x1d6   : > { %v1222_v58 = vmul.f32 %v1982_v1, %v1198_v56  ;;  %1269 = vst.msk [vmem:[%s295_s30 + $0x4] sm:$0xf] %vm1267_vm1, %v1468_v55  ;;  %v1245_v61 = vadd.f32 %v1236_v59, %v1221_v57 }
 0x1d8   : > { %v1246_v49 = vadd.f32 %v1241_v60, %v1222_v58  ;;  %v1249_v63 = vmax.f32 %v1245_v61, 0.0 }
 0x1da   : > { %v1250_v0 = vmax.f32 %v1246_v49, 0.0  ;;  %v1469_v2 = vpack.c.bf16 %v1249_v63, %v1249_v63 }
 0x1dc   : > { %v1470_v51 = vpack.c.bf16 %v1250_v0, %v1250_v0  ;;  %1270 = vst.msk [vmem:[%s295_s30 + $0x8] sm:$0xf] %vm1267_vm1, %v1469_v2 }
 0x1de   : > { %1271 = vst.msk [vmem:[%s295_s30 + $0xc] sm:$0xf] %vm1267_vm1, %v1470_v51 }
 0x1df PF: > { %s15_s18 = sadd.s32 1, %s1672_s18  }
 0x1e0   : > { %p12_p4 = scmp.ge.s32.totalorder %s15_s18, 4  }
 0x1e2   :  { %14 = sbr.rel (!%p12_p4) target bundleno = 1 (0x1), region = 79 }

// kernel: stven_forward.13
= control target key start
LH: loop header
LB: loop body
LE: loop exit
PB: predicated region body
PF: predicated region fallthrough
CT: control target
= control target key end

     0   :  { %s1561_s18 = smov 0   ;;  %s1874_s0 = inlined_call_operand.vmem [shape: bf16[144,640], index: 0, kind: input, shape index: {}]   ;;  %s1875_s1 = inlined_call_operand.vmem [shape: bf16[640,32], index: 1, kind: input, shape index: {}]   ;;  %s1876_s2 = inlined_call_operand.vmem [shape: f32[144,1], index: 2, kind: input, shape index: {}]   ;;  %s1877_s3 = inlined_call_operand.vmem [shape: f32[144,1], index: 3, kind: input, shape index: {}]   ;;  %s1878_s4 = inlined_call_operand.vmem [shape: f32[144,1], index: 4, kind: input, shape index: {}]   ;;  %s1879_s5 = inlined_call_operand.vmem [shape: bf16[144,32], index: 5, kind: output, shape index: {}]  }
   0x1 LB: > { %s1231_s19 = sadd.s32 4294967295, %s1526_s18   ;;  %p1235_p0 = scmp.ge.s32.totalorder %s1526_s18, 1  ;;  %s1526_s18 = sphi %s1561_s18, %s15_s18  }
   0x2   : > { %p222_p1 = scmp.lt.s32.totalorder %s1526_s18, 4 }
   0x4   : > { %p223_p2 = pnand %p1235_p0, %p222_p1 }
   0x5   : > { %v1447_v0 = vld [vmem:[%s1875_s1 + $0x40] sm:$0xff] (!%p223_p2)   ;;  %v1451_v4 = vld [vmem:[%s1875_s1 + $0x48] sm:$0xff] (!%p223_p2)   ;;  %v1528_v7 = vmov (!%p223_p2), 0   ;;  %v1455_v9 = vld [vmem:[%s1875_s1 + $0x50] sm:$0xff] (!%p223_p2)   ;;  %s266_s25 = smul.u32 (!%p223_p2), 6, %s1231_s19  ;;  %v1529_v35 = vmov (!%p223_p2), 0.0  }
   0x6   : > { %226 = sbr.rel (%p223_p2) target bundleno = 482 (0x1e2), region = 40  ;;  %v1448_v1 = vld [vmem:[%s1875_s1 + $0xc0] sm:$0xff] (!%p223_p2)   ;;  %1310 = vmatprep.subr.bf16.mxu0 (!%p223_p2), %v1447_v0  ;;  %v1452_v5 = vld [vmem:[%s1875_s1 + $0xc8] sm:$0xff] (!%p223_p2)   ;;  %1446 = vset.pattern.permute.xlu1 (!%p223_p2), %v1528_v7  ;;  %v1456_v10 = vld [vmem:[%s1875_s1 + $0xd0] sm:$0xff] (!%p223_p2)   ;;  %vm1530_vm0 = vmmov (!%p223_p2), 0   ;;  %vm933_vm1 = vcmask (!%p223_p2), 261120  }
   0x7   : > { %v1449_v2 = vld [vmem:[%s1875_s1] sm:$0xff] (!%p223_p2)   ;;  %1344 = vmatprep.subr.bf16.mxu1 (!%p223_p2), %v1448_v1  ;;  %v1453_v6 = vld [vmem:[%s1875_s1 + $0x8] sm:$0xff] (!%p223_p2)   ;;  %1445 = vset.pattern.permute.xlu0 (!%p223_p2), %v1528_v7  ;;  %v1457_v11 = vld [vmem:[%s1875_s1 + $0x10] sm:$0xff] (!%p223_p2)   ;;  %p267_p3 = scmp.lt.s32.totalorder (!%p223_p2), %s266_s25, 17  ;;  %vm1132_vm2 = vcmask (!%p223_p2), 257024  }
   0x8   : > { %v1450_v3 = vld [vmem:[%s1875_s1 + $0x80] sm:$0xff] (!%p223_p2)   ;;  %1311 = vmatpush3.bf16.msra.mxu0 (!%p223_p2), %v1449_v2  ;;  %v1454_v8 = vld [vmem:[%s1875_s1 + $0x88] sm:$0xff] (!%p223_p2)   ;;  %v1458_v12 = vld [vmem:[%s1875_s1 + $0x90] sm:$0xff] (!%p223_p2)  }
   0x9   : > { %1345 = vmatpush3.bf16.msra.mxu1 (!%p223_p2), %v1450_v3  ;;  %1312 = vmatprep.subr.bf16.mxu0 (!%p223_p2), %v1451_v4  ;;  %v1459_v13 = vld [vmem:[%s1875_s1 + $0x58] sm:$0xff] (!%p223_p2)   ;;  %v1463_v17 = vld [vmem:[%s1875_s1 + $0x60] sm:$0xff] (!%p223_p2)   ;;  %v1467_v21 = vld [vmem:[%s1875_s1 + $0x68] sm:$0xff] (!%p223_p2)  }
   0xa   : > { %1346 = vmatprep.subr.bf16.mxu1 (!%p223_p2), %v1452_v5  ;;  %v1460_v14 = vld [vmem:[%s1875_s1 + $0xd8] sm:$0xff] (!%p223_p2)   ;;  %v1464_v18 = vld [vmem:[%s1875_s1 + $0xe0] sm:$0xff] (!%p223_p2)   ;;  %v1468_v22 = vld [vmem:[%s1875_s1 + $0xe8] sm:$0xff] (!%p223_p2)  }
   0xb   : > { %v1461_v15 = vld [vmem:[%s1875_s1 + $0x18] sm:$0xff] (!%p223_p2)   ;;  %v1465_v19 = vld [vmem:[%s1875_s1 + $0x20] sm:$0xff] (!%p223_p2)   ;;  %v1469_v23 = vld [vmem:[%s1875_s1 + $0x28] sm:$0xff] (!%p223_p2)  }
   0xc   : > { %1313 = vmatpush3.bf16.msra.mxu0 (!%p223_p2), %v1453_v6  ;;  %v1462_v16 = vld [vmem:[%s1875_s1 + $0x98] sm:$0xff] (!%p223_p2)   ;;  %v1466_v20 = vld [vmem:[%s1875_s1 + $0xa0] sm:$0xff] (!%p223_p2)   ;;  %v1470_v24 = vld [vmem:[%s1875_s1 + $0xa8] sm:$0xff] (!%p223_p2)  }
   0xd   : > { %1347 = vmatpush3.bf16.msra.mxu1 %v1454_v8  ;;  %1314 = vmatprep.subr.bf16.mxu0 %v1455_v9  ;;  %s1881_s25 = smov (!%p267_p3, %s266_s25), 17  ;;  %v1471_v25 = vld [vmem:[%s1875_s1 + $0x70] sm:$0xff]   ;;  %v1475_v29 = vld [vmem:[%s1875_s1 + $0x78] sm:$0xff]   ;;  %v1485_v38 = vld [vmem:[%s1875_s1 + $0x100] sm:$0xff]  }
   0xe   : > { %1348 = vmatprep.subr.bf16.mxu1 %v1456_v10  ;;  %v1472_v26 = vld [vmem:[%s1875_s1 + $0xf0] sm:$0xff]   ;;  %s1433_s27 = smul.u32 20, %s1881_s25  ;;  %v1476_v30 = vld [vmem:[%s1875_s1 + $0xf8] sm:$0xff]   ;;  %v1486_v39 = vld [vmem:[%s1875_s1 + $0x108] sm:$0xff]   ;;  %s1704_s28 = sshll.u32 %s1881_s25, 3 }
   0xf   : > { %v1473_v27 = vld [vmem:[%s1875_s1 + $0x30] sm:$0xff]   ;;  %v1477_v31 = vld [vmem:[%s1875_s1 + $0x38] sm:$0xff]   ;;  %v1495_v48 = vld [vmem:[%s1875_s1 + $0x120] sm:$0xff]   ;;  %s1716_s8 = scalar_lea.vmem %s1876_s2, %s1704_s28  ;;  %s1744_s15 = scalar_lea.vmem %s1877_s3, %s1704_s28 }
  0x10   : > { %1315 = vmatpush3.bf16.msra.mxu0 %v1457_v11  ;;  %v1474_v28 = vld [vmem:[%s1875_s1 + $0xb0] sm:$0xff]   ;;  %s1667_s12 = scalar_lea.vmem %s1874_s0, %s1433_s27  ;;  %v1478_v32 = vld [vmem:[%s1875_s1 + $0xb8] sm:$0xff]   ;;  %v1499_v52 = vld [vmem:[%s1875_s1 + $0x128] sm:$0xff]   ;;  %s1765_s22 = scalar_lea.vmem %s1878_s4, %s1704_s28 }
  0x11   : > { %1349 = vmatpush3.bf16.msra.mxu1 %v1458_v12  ;;  %1316 = vmatprep.subr.bf16.mxu0 %v1459_v13  ;;  %v1479_v33 = vld [vmem:[%s1667_s12] ss:$20 sps:$4 sm:$0xff]   ;;  %v1481_v34 = vld [vmem:[%s1667_s12 + $0x4] ss:$20 sps:$4 sm:$0xff]   ;;  %v1482_v36 = vld [vmem:[%s1667_s12 + $0x8] ss:$20 sps:$4 sm:$0xff]  }
  0x12   : > { %1350 = vmatprep.subr.bf16.mxu1 %v1460_v14  ;;  %v1484_v37 = vld [vmem:[%s1667_s12 + $0xc] ss:$20 sps:$4 sm:$0xff]   ;;  %782 = vmatprep.mubr.bf16.mxu0 %v1481_v34  ;;  %v1487_v41 = vld [vmem:[%s1875_s1 + $0x110] sm:$0xff]   ;;  %v1490_v42 = vld [vmem:[%s1667_s12 + $0x28] ss:$20 sps:$4 sm:$0xff]  }
  0x13   : > { %839 = vmatprep.mubr.bf16.mxu1 %v1484_v37  ;;  %v1488_v40 = vld [vmem:[%s1667_s12 + $0x2c] ss:$20 sps:$4 sm:$0xff]   ;;  %v1492_v43 = vld [vmem:[%s1667_s12 + $0x34] ss:$20 sps:$4 sm:$0xff]   ;;  %v1494_v44 = vld [vmem:[%s1667_s12 + $0x30] ss:$20 sps:$4 sm:$0xff]  }
  0x14   : > { %1317 = vmatpush3.bf16.msra.mxu0 %v1461_v15  ;;  %v1496_v45 = vld [vmem:[%s1667_s12 + $0x54] ss:$20 sps:$4 sm:$0xff]   ;;  %v1491_v46 = vld [vmem:[%s1875_s1 + $0x118] sm:$0xff]   ;;  %v1498_v49 = vld [vmem:[%s1667_s12 + $0x50] ss:$20 sps:$4 sm:$0xff]  }
  0x15   : > { %1351 = vmatpush3.bf16.msra.mxu1 %v1462_v16  ;;  %1318 = vmatprep.subr.bf16.mxu0 %v1463_v17  ;;  %v1500_v47 = vld [vmem:[%s1667_s12 + $0x5c] ss:$20 sps:$4 sm:$0xff]   ;;  %v1502_v50 = vld [vmem:[%s1667_s12 + $0x58] ss:$20 sps:$4 sm:$0xff]   ;;  %v396_v53 = vld [vmem:[%s1716_s8] sm:$0xff] }
  0x16   : > { %1352 = vmatprep.subr.bf16.mxu1 %v1464_v18  ;;  %v398_v51 = vld [vmem:[%s1716_s8 + $0x10] sm:$0xff]  ;;  %v399_v54 = vld [vmem:[%s1716_s8 + $0x18] sm:$0xff]  ;;  %404 = vperm.xlu0 %1445, %v396_v53   ;;  %v397_v56 = vld [vmem:[%s1716_s8 + $0x8] sm:$0xff] }
  0x17   : > { %414 = vperm.xlu1 %1446, %v398_v51   ;;  %v1503_v55 = vld [vmem:[%s1875_s1 + $0x130] sm:$0xff]   ;;  %v401_v57 = vld [vmem:[%s1716_s8 + $0x28] sm:$0xff]  ;;  %v1504_v58 = vld [vmem:[%s1875_s1 + $0x138] sm:$0xff]  }
  0x18   : > { %1319 = vmatpush3.bf16.msra.mxu0 %v1465_v19  ;;  %v400_v59 = vld [vmem:[%s1716_s8 + $0x20] sm:$0xff]  ;;  %v1506_v62 = vld [vmem:[%s1667_s12 + $0x38] ss:$20 sps:$4 sm:$0xff]   ;;  %v923_v0 = vld [vmem:[%s1744_s15 + $0x10] sm:$0xff] }
  0x19   : > { %1353 = vmatpush3.bf16.msra.mxu1 %v1466_v20  ;;  %1320 = vmatprep.subr.bf16.mxu0 %v1467_v21  ;;  %v921_v60 = vld [vmem:[%s1744_s15] sm:$0xff]  ;;  %v922_v63 = vld [vmem:[%s1744_s15 + $0x8] sm:$0xff]  ;;  %v924_v2 = vld [vmem:[%s1744_s15 + $0x18] sm:$0xff] }
  0x1a   : > { %1354 = vmatprep.subr.bf16.mxu1 %v1468_v22  ;;  %409 = vperm.xlu0 %1445, %v397_v56   ;;  %v1505_v61 = vld [vmem:[%s1667_s12 + $0x10] ss:$20 sps:$4 sm:$0xff]   ;;  %v1507_v3 = vld [vmem:[%s1667_s12 + $0x60] ss:$20 sps:$4 sm:$0xff]   ;;  %v926_v5 = vld [vmem:[%s1744_s15 + $0x28] sm:$0xff]  ;;  %s1240_s12 = sshll.u32 %s1881_s25, 2 }
  0x1b   : > { %419 = vperm.xlu1 %1446, %v399_v54   ;;  %v925_v1 = vld [vmem:[%s1744_s15 + $0x20] sm:$0xff]  ;;  %v929_v6 = vld [vmem:[%s1765_s22 + $0x10] sm:$0xff]  ;;  %v928_v7 = vld [vmem:[%s1765_s22 + $0x8] sm:$0xff]  ;;  %s1847_s26 = scalar_lea.vmem %s1879_s5, %s1240_s12 }
  0x1c   : > { %1321 = vmatpush3.bf16.msra.mxu0 %v1469_v23  ;;  %v927_v4 = vld [vmem:[%s1765_s22] sm:$0xff]  ;;  %v930_v8 = vld [vmem:[%s1765_s22 + $0x18] sm:$0xff] }
  0x1d   : > { %1355 = vmatpush3.bf16.msra.mxu1 %v1470_v24  ;;  %1322 = vmatprep.subr.bf16.mxu0 %v1471_v25 }
  0x1e   : > { %1356 = vmatprep.subr.bf16.mxu1 %v1472_v26  ;;  %424 = vperm.xlu0 %1445, %v400_v59  }
  0x1f   : > { %429 = vperm.xlu1 %1446, %v401_v57  }
  0x20   : > { %1323 = vmatpush3.bf16.msra.mxu0 %v1473_v27 }
  0x21   : > { %1357 = vmatpush3.bf16.msra.mxu1 %v1474_v28  ;;  %1324 = vmatprep.subr.bf16.mxu0 %v1475_v29 }
  0x22   : > { %1358 = vmatprep.subr.bf16.mxu1 %v1476_v30  ;;  %1037 = vperm.xlu0 %1445, %v922_v63  }
  0x23   : > { %1032 = vperm.xlu1 %1446, %v921_v60  }
  0x24   : > { %1325 = vmatpush3.bf16.msra.mxu0 %v1477_v31 }
  0x25   : > { %1359 = vmatpush3.bf16.msra.mxu1 %v1478_v32  ;;  %1389 = vmatprep.subr.bf16.mxu0 %v1529_v35 }
  0x26   : > { %1417 = vmatprep.subr.bf16.mxu1 %v1529_v35  ;;  %1052 = vperm.xlu0 %1445, %v925_v1  }
  0x27   : > { %783 = vmatmul.mubr.bf16.vlgmr.msra.gmra.mrb[0].mxu0 %v1479_v33  ;;  %1042 = vperm.xlu1 %1446, %v923_v0  }
  0x28   : > { %840 = vmatmul.mubr.bf16.vlgmr.msra.gmra.mrb[0].mxu1 %v1482_v36  ;;  %1390 = vmatpush3.bf16.msra.mxu0 %v1485_v38 }
  0x29   : > { %1425 = vmatpush3.bf16.msra.mxu1 %v1485_v38  ;;  %1391 = vmatprep.subr.bf16.mxu0 %v1529_v35 }
  0x2a   : > { %1418 = vmatprep.subr.bf16.mxu1 %v1529_v35  ;;  %790 = vmatprep.mubr.bf16.mxu0 %v1488_v40 }
  0x2b   : > { %847 = vmatprep.mubr.bf16.mxu1 %v1492_v43  ;;  %1047 = vperm.xlu1 %1446, %v924_v2  }
  0x2c   : > { %1392 = vmatpush3.bf16.msra.mxu0 %v1486_v39  ;;  %1068 = vperm.xlu0 %1445, %v927_v4  }
  0x2d   : > { %1426 = vmatpush3.bf16.msra.mxu1 %v1486_v39  ;;  %1393 = vmatprep.subr.bf16.mxu0 %v1529_v35 }
  0x2e   : > { %1419 = vmatprep.subr.bf16.mxu1 %v1529_v35 }
  0x2f   : > { %791 = vmatmul.mubr.bf16.gmra.mrb[4].mxu0 %v1490_v42  ;;  %1057 = vperm.xlu1 %1446, %v926_v5  }
  0x30   : > { %1394 = vmatpush3.bf16.msra.mxu0 %v1487_v41  ;;  %848 = vmatmul.mubr.bf16.gmra.mrb[4].mxu1 %v1494_v44 }
  0x31   : > { %1427 = vmatpush3.bf16.msra.mxu1 %v1487_v41  ;;  %1395 = vmatprep.subr.bf16.mxu0 %v1529_v35 }
  0x32   : > { %1420 = vmatprep.subr.bf16.mxu1 %v1529_v35  ;;  %798 = vmatprep.mubr.bf16.mxu0 %v1496_v45 }
  0x33   : > { %855 = vmatprep.mubr.bf16.mxu1 %v1500_v47  ;;  %1078 = vperm.xlu0 %1445, %v929_v6  }
  0x34   : > { %1396 = vmatpush3.bf16.msra.mxu0 %v1491_v46  ;;  %1073 = vperm.xlu1 %1446, %v928_v7  }
  0x35   : > { %1428 = vmatpush3.bf16.msra.mxu1 %v1491_v46  ;;  %1397 = vmatprep.subr.bf16.mxu0 %v1529_v35 }
  0x36   : > { %1421 = vmatprep.subr.bf16.mxu1 %v1529_v35 }
  0x37   : > { %799 = vmatmul.mubr.bf16.gmra.mrb[8].mxu0 %v1498_v49 }
  0x38   : > { %1398 = vmatpush3.bf16.msra.mxu0 %v1495_v48  ;;  %856 = vmatmul.mubr.bf16.gmra.mrb[8].mxu1 %v1502_v50 }
  0x39   : > { %1429 = vmatpush3.bf16.msra.mxu1 %v1495_v48  ;;  %1399 = vmatprep.subr.bf16.mxu0 %v1529_v35 }
  0x3a   : > { %1422 = vmatprep.subr.bf16.mxu1 %v1529_v35  ;;  %1405 = vmatprep.mubr.msk.bf16.mxu0 %vm1530_vm0, %v1529_v35 }
  0x3b   : > { %1409 = vmatprep.mubr.msk.bf16.mxu1 %vm1530_vm0, %v1529_v35  ;;  %1083 = vperm.xlu1 %1446, %v930_v8  }
  0x3c   : > { %1400 = vmatpush3.bf16.msra.mxu0 %v1499_v52 }
  0x3d   : > { %1430 = vmatpush3.bf16.msra.mxu1 %v1499_v52  ;;  %1401 = vmatprep.subr.bf16.mxu0 %v1529_v35 }
  0x3e   : > { %1423 = vmatprep.subr.bf16.mxu1 %v1529_v35 }
  0x40   : > { %1402 = vmatpush3.bf16.msra.mxu0 %v1503_v55 }
  0x41   : > { %1431 = vmatpush3.bf16.msra.mxu1 %v1503_v55  ;;  %1403 = vmatprep.subr.bf16.mxu0 %v1529_v35 }
  0x42   : > { %1424 = vmatprep.subr.bf16.mxu1 %v1529_v35 }
  0x44   : > { %1404 = vmatpush3.bf16.msra.mxu0 %v1504_v58 }
  0x45   : > { %1432 = vmatpush3.bf16.msra.mxu1 %v1504_v58 }
  0x47   : > { %1406 = vmatmul.mubr.bf16.vlgmr.msra.gmra.mrb[12].mxu0 %v1505_v61 }
  0x48   : > { %1410 = vmatmul.mubr.bf16.vlgmr.msra.gmra.mrb[12].mxu1 %v1506_v62 }
  0x49   : > { %1413 = vmatprep.mubr.msk.bf16.mxu1 %vm1530_vm0, %v1529_v35 }
  0x50   : > { %1414 = vmatmul.mubr.bf16.gmra.mrb[16].mxu1 %v1507_v3 }
  0x95   : > { %v405_v9 = vpop.permute.xlu0 %404 }
  0x96   : > { %v415_v26 = vpop.permute.xlu1 %414 }
  0x99   : > { %v410_v11 = vpop.permute.xlu0 %409 }
  0x9a   : > { %v420_v40 = vpop.permute.xlu1 %419 }
  0x9d   : > { %v425_v44 = vpop.permute.xlu0 %424 }
  0x9e   : > { %v430_v58 = vpop.permute.xlu1 %429 }
  0xfa   : > { %v1326_v10 = vpop.f32.mrb[0].mxu0 }
  0xfb   : > { %v1327_v12 = vpop.f32.mrb[1].mxu0  ;;  %v1360_v13 = vpop.f32.mrb[0].mxu1 }
  0xfc   : > { %v1328_v14 = vadd.f32 %v1327_v12, %v1326_v10  ;;  %v1329_v15 = vpop.f32.mrb[2].mxu0  ;;  %v1361_v16 = vpop.f32.mrb[1].mxu1 }
  0xfd   : > { %v1330_v17 = vpop.f32.mrb[3].mxu0  ;;  %v1362_v18 = vadd.f32 %v1361_v16, %v1360_v13  ;;  %v1363_v19 = vpop.f32.mrb[2].mxu1 }
  0xfe   : > { %v785_v20 = vadd.f32 %v1328_v14, %v405_v9  ;;  %v1331_v21 = vadd.f32 %v1330_v17, %v1329_v15  ;;  %v1364_v22 = vpop.f32.mrb[3].mxu1 }
  0xff   : > { %v1365_v23 = vadd.f32 %v1364_v22, %v1363_v19 }
 0x100   : > { %v788_v24 = vadd.f32 %v1331_v21, %v410_v11  ;;  %v842_v25 = vadd.f32 %v1362_v18, %v785_v20 }
 0x102   : > { %v1332_v27 = vpop.f32.mrb[4].mxu0  ;;  %v845_v28 = vadd.f32 %v1365_v23, %v788_v24 }
 0x103   : > { %v1333_v29 = vpop.f32.mrb[5].mxu0  ;;  %v1366_v30 = vpop.f32.mrb[4].mxu1 }
 0x104   : > { %v1334_v31 = vadd.f32 %v1333_v29, %v1332_v27  ;;  %v1335_v32 = vpop.f32.mrb[6].mxu0  ;;  %v1367_v33 = vpop.f32.mrb[5].mxu1 }
 0x105   : > { %v1336_v34 = vpop.f32.mrb[7].mxu0  ;;  %v1368_v35 = vadd.f32 %v1367_v33, %v1366_v30  ;;  %v1369_v36 = vpop.f32.mrb[6].mxu1 }
 0x106   : > { %v793_v37 = vadd.f32 %v1334_v31, %v415_v26  ;;  %v1337_v38 = vadd.f32 %v1336_v34, %v1335_v32  ;;  %v1370_v39 = vpop.f32.mrb[7].mxu1 }
 0x107   : > { %v1371_v41 = vadd.f32 %v1370_v39, %v1369_v36  ;;  %v931_v36 = vld [vmem:[%s1765_s22 + $0x20] sm:$0xff]  ;;  %v1821_v39 = vpop.permute.xlu0 %1037 }
 0x108   : > { %v796_v42 = vadd.f32 %v1337_v38, %v420_v40  ;;  %v850_v43 = vadd.f32 %v1368_v35, %v793_v37  ;;  %v932_v35 = vld [vmem:[%s1765_s22 + $0x28] sm:$0xff]  ;;  %v1817_v37 = vpop.permute.xlu1 %1032 }
 0x10a   : > { %v1338_v45 = vpop.f32.mrb[8].mxu0  ;;  %v853_v46 = vadd.f32 %v1371_v41, %v796_v42 }
 0x10b   : > { %v1339_v47 = vpop.f32.mrb[9].mxu0  ;;  %v1372_v48 = vpop.f32.mrb[8].mxu1 }
 0x10c   : > { %v1340_v49 = vadd.f32 %v1339_v47, %v1338_v45  ;;  %v1341_v50 = vpop.f32.mrb[10].mxu0  ;;  %v1373_v51 = vpop.f32.mrb[9].mxu1 }
 0x10d   : > { %v1342_v52 = vpop.f32.mrb[11].mxu0  ;;  %v1374_v53 = vadd.f32 %v1373_v51, %v1372_v48  ;;  %v1375_v54 = vpop.f32.mrb[10].mxu1 }
 0x10e   : > { %v801_v55 = vadd.f32 %v1340_v49, %v425_v44  ;;  %v1343_v56 = vadd.f32 %v1342_v52, %v1341_v50  ;;  %v1376_v57 = vpop.f32.mrb[11].mxu1  ;;  %v1819_v38 = vpop.permute.xlu1 %1042 }
 0x10f   : > { %v1377_v59 = vadd.f32 %v1376_v57, %v1375_v54  ;;  %v1825_v41 = vpop.permute.xlu0 %1052 }
 0x110   : > { %v804_v60 = vadd.f32 %v1343_v56, %v430_v58  ;;  %v858_v61 = vadd.f32 %v1374_v53, %v801_v55 }
 0x112   : > { %v861_v62 = vadd.f32 %v1377_v59, %v804_v60  ;;  %v1823_v40 = vpop.permute.xlu1 %1047 }
 0x116   : > { %v1827_v42 = vpop.permute.xlu1 %1057 }
 0x11a   : > { %v898_v63 = vpop.f32.mrb[12].mxu0  ;;  %v1831_v44 = vpop.permute.xlu1 %1073 }
 0x11b   : > { %v1773_v0 = vadd.f32 %v898_v63, %v842_v25  ;;  %v906_v1 = vpop.f32.mrb[12].mxu1  ;;  %v1407_v2 = vpop.f32.mrb[13].mxu0 }
 0x11c   : > { %v1775_v3 = vadd.f32 %v906_v1, %v850_v43  ;;  %v1411_v4 = vpop.f32.mrb[13].mxu1  ;;  %v901_v5 = vpop.f32.mrb[14].mxu0 }
 0x11d   : > { %v1777_v6 = vadd.f32 %v901_v5, %v845_v28  ;;  %v909_v7 = vpop.f32.mrb[14].mxu1  ;;  %v1408_v8 = vpop.f32.mrb[15].mxu0  ;;  %v934_v9 = vsel %vm933_vm1, %v1773_v0, 0.0  ;;  %v958_v13 = vmul.f32 %v1773_v0, %v1773_v0 }
 0x11e   : > { %v1781_v10 = vadd.f32 %v909_v7, %v853_v46  ;;  %v1412_v11 = vpop.f32.mrb[15].mxu1  ;;  %935 = vadd.xlane.f32.xlu0 %v934_v9  ;;  %v940_v14 = vsel %vm933_vm1, %v1775_v3, 0.0  ;;  %v960_v17 = vmul.f32 %v1775_v3, %v1775_v3  ;;  %v1829_v43 = vpop.permute.xlu0 %1068 }
 0x11f   : > { %v937_v12 = vsel %vm933_vm1, %v1777_v6, 0.0  ;;  %v964_v16 = vsel %vm933_vm1, %v958_v13, 0.0  ;;  %v959_v22 = vmul.f32 %v1777_v6, %v1777_v6  ;;  %v1835_v46 = vpop.permute.xlu1 %1083 }
 0x120   : > { %938 = vadd.xlane.f32.xlu1 %v937_v12  ;;  %v943_v21 = vsel %vm933_vm1, %v1781_v10, 0.0  ;;  %v970_v25 = vsel %vm933_vm1, %v960_v17, 0.0  ;;  %v961_v27 = vmul.f32 %v1781_v10, %v1781_v10 }
 0x121   : > { %v967_v26 = vsel %vm933_vm1, %v959_v22, 0.0 }
 0x122   : > { %941 = vadd.xlane.f32.xlu0 %v940_v14  ;;  %v973_v30 = vsel %vm933_vm1, %v961_v27, 0.0  ;;  %v1833_v45 = vpop.permute.xlu0 %1078 }
 0x123   : > { %v914_v15 = vpop.f32.mrb[16].mxu1 }
 0x124   : > { %v1792_v18 = vadd.f32 %v914_v15, %v858_v61  ;;  %v1415_v19 = vpop.f32.mrb[17].mxu1  ;;  %965 = vadd.xlane.f32.xlu1 %v964_v16 }
 0x125   : > { %v917_v20 = vpop.f32.mrb[18].mxu1 }
 0x126   : > { %v1798_v23 = vadd.f32 %v917_v20, %v861_v62  ;;  %944 = vadd.xlane.f32.xlu0 %v943_v21  ;;  %v1416_v24 = vpop.f32.mrb[19].mxu1  ;;  %v946_v28 = vsel %vm933_vm1, %v1792_v18, 0.0  ;;  %v962_v29 = vmul.f32 %v1792_v18, %v1792_v18 }
 0x128   : > { %971 = vadd.xlane.f32.xlu1 %v970_v25  ;;  %v976_v31 = vsel %vm933_vm1, %v962_v29, 0.0  ;;  %v949_v32 = vsel %vm933_vm1, %v1798_v23, 0.0  ;;  %v963_v33 = vmul.f32 %v1798_v23, %v1798_v23 }
 0x12a   : > { %968 = vadd.xlane.f32.xlu0 %v967_v26  ;;  %v979_v34 = vsel %vm933_vm1, %v963_v33, 0.0 }
 0x12c   : > { %947 = vadd.xlane.f32.xlu1 %v946_v28 }
 0x12e   : > { %974 = vadd.xlane.f32.xlu0 %v973_v30 }
 0x130   : > { %977 = vadd.xlane.f32.xlu1 %v976_v31 }
 0x132   : > { %950 = vadd.xlane.f32.xlu0 %v949_v32 }
 0x136   : > { %980 = vadd.xlane.f32.xlu0 %v979_v34 }
 0x141   : > { %1093 = vperm.xlu1 %1446, %v932_v35  }
 0x14c   : > { %1088 = vperm.xlu0 %1445, %v931_v36  }
 0x1ab   : > { %v936_v47 = vpop.xlane.xlu0 %935 }
 0x1ac   : > { %v952_v49 = vmul.f32 0.03125, %v936_v47 }
 0x1ad   : > { %v939_v48 = vpop.xlane.xlu1 %938 }
 0x1ae   : > { %v988_v52 = vmul.f32 %v952_v49, %v952_v49  ;;  %v953_v56 = vmul.f32 0.03125, %v939_v48  ;;  %v1006_v29 = vsub.f32 %v1773_v0, %v952_v49 }
 0x1af   : > { %v942_v50 = vpop.xlane.xlu0 %941 }
 0x1b0   : > { %v954_v53 = vmul.f32 0.03125, %v942_v50  ;;  %v989_v63 = vmul.f32 %v953_v56, %v953_v56 }
 0x1b1   : > { %v966_v51 = vpop.xlane.xlu1 %965 }
 0x1b2   : > { %v982_v54 = vmul.f32 0.03125, %v966_v51  ;;  %v990_v59 = vmul.f32 %v954_v53, %v954_v53  ;;  %v1008_v48 = vsub.f32 %v1775_v3, %v954_v53 }
 0x1b3   : > { %v945_v55 = vpop.xlane.xlu0 %944 }
 0x1b4   : > { %v994_v57 = vsub.f32 %v982_v54, %v988_v52  ;;  %v955_v5 = vmul.f32 0.03125, %v945_v55  ;;  %v1007_v54 = vsub.f32 %v1777_v6, %v953_v56 }
 0x1b5   : > { %v972_v58 = vpop.xlane.xlu1 %971 }
 0x1b6   : > { %v1000_v60 = vmax.f32 %v994_v57, 0.0  ;;  %v984_v61 = vmul.f32 0.03125, %v972_v58  ;;  %v991_v15 = vmul.f32 %v955_v5, %v955_v5 }
 0x1b7   : > { %v969_v62 = vpop.xlane.xlu0 %968 }
 0x1b8   : > { %v1012_v1 = vadd.f32 1e-05, %v1000_v60  ;;  %v996_v2 = vsub.f32 %v984_v61, %v990_v59  ;;  %v983_v4 = vmul.f32 0.03125, %v969_v62 }
 0x1b9   : > { %v948_v7 = vpop.xlane.xlu1 %947 }
 0x1ba   : > { %1508 = vrsqrt.f32 %v1012_v1  ;;  %v1002_v8 = vmax.f32 %v996_v2, 0.0  ;;  %v995_v9 = vsub.f32 %v983_v4, %v989_v63  ;;  %v956_v11 = vmul.f32 0.03125, %v948_v7 }
 0x1bb   : > { %v975_v12 = vpop.xlane.xlu0 %974 }
 0x1bc   : > { %v1014_v13 = vadd.f32 1e-05, %v1002_v8  ;;  %v1001_v14 = vmax.f32 %v995_v9, 0.0  ;;  %v985_v16 = vmul.f32 0.03125, %v975_v12  ;;  %v992_v20 = vmul.f32 %v956_v11, %v956_v11 }
 0x1bd   : > { %v978_v17 = vpop.xlane.xlu1 %977  ;;  %v1010_v61 = vsub.f32 %v1792_v18, %v956_v11 }
 0x1be   : > { %1510 = vrsqrt.f32 %v1014_v13  ;;  %v1013_v19 = vadd.f32 1e-05, %v1001_v14  ;;  %v986_v21 = vmul.f32 0.03125, %v978_v17  ;;  %v997_v22 = vsub.f32 %v985_v16, %v991_v15 }
 0x1bf   : > { %v951_v24 = vpop.xlane.xlu0 %950 }
 0x1c0   : > { %1512 = vrsqrt.f32 %v1013_v19  ;;  %v998_v25 = vsub.f32 %v986_v21, %v992_v20  ;;  %v957_v26 = vmul.f32 0.03125, %v951_v24  ;;  %v1003_v27 = vmax.f32 %v997_v22, 0.0 }
 0x1c1   : > { %v1094_v14 = vpop.permute.xlu1 %1093 }
 0x1c2   : > { %v1004_v28 = vmax.f32 %v998_v25, 0.0  ;;  %v1015_v30 = vadd.f32 1e-05, %v1003_v27  ;;  %v993_v34 = vmul.f32 %v957_v26, %v957_v26  ;;  %v1011_v18 = vsub.f32 %v1798_v23, %v957_v26 }
 0x1c3   : > { %v981_v31 = vpop.xlane.xlu0 %980 }
 0x1c4   : > { %v1509_v32 = vpop.eup %1508  ;;  %v1016_v33 = vadd.f32 1e-05, %v1004_v28  ;;  %v987_v35 = vmul.f32 0.03125, %v981_v31  ;;  %1514 = vrsqrt.f32 %v1015_v30 }
 0x1c5   : > { %v1024_v36 = vmul.f32 %v1509_v32, %v1006_v29 }
 0x1c6   : > { %1516 = vrsqrt.f32 %v1016_v33  ;;  %v999_v47 = vsub.f32 %v987_v35, %v993_v34 }
 0x1c7   : > { %v1060_v50 = vmul.f32 %v1817_v37, %v1024_v36 }
 0x1c8   : > { %v1511_v51 = vpop.eup %1510  ;;  %v1005_v52 = vmax.f32 %v999_v47, 0.0 }
 0x1c9   : > { %v1096_v0 = vadd.f32 %v1829_v43, %v1060_v50  ;;  %v1026_v49 = vmul.f32 %v1511_v51, %v1008_v48  ;;  %v1009_v43 = vsub.f32 %v1781_v10, %v955_v5 }
 0x1ca   : > { %v1513_v55 = vpop.eup %1512  ;;  %v1017_v57 = vadd.f32 1e-05, %v1005_v52 }
 0x1cb   : > { %v1102_v58 = vmax.f32 %v1096_v0, 0.0  ;;  %v1062_v59 = vmul.f32 %v1819_v38, %v1026_v49  ;;  %v1025_v60 = vmul.f32 %v1513_v55, %v1007_v54 }
 0x1cc   : > { %1518 = vrsqrt.f32 %v1017_v57 }
 0x1cd   : > { %v1304_v3 = vpack.c.bf16 %v1102_v58, %v1102_v58  ;;  %v1098_v6 = vadd.f32 %v1833_v45, %v1062_v59  ;;  %v1061_v37 = vmul.f32 %v1821_v39, %v1025_v60 }
 0x1ce   : > { %v1515_v53 = vpop.eup %1514 }
 0x1cf   : > { %v1104_v56 = vmax.f32 %v1098_v6, 0.0  ;;  %v1097_v38 = vadd.f32 %v1831_v44, %v1061_v37  ;;  %1133 = vst.msk [vmem:[%s1847_s26] sm:$0xf] %vm1132_vm2, %v1304_v3  ;;  %v1027_v63 = vmul.f32 %v1515_v53, %v1009_v43  ;;  %v1089_v44 = vpop.permute.xlu0 %1088 }
 0x1d0   : > { %v1517_v62 = vpop.eup %1516 }
 0x1d1   : > { %v1306_v1 = vpack.c.bf16 %v1104_v56, %v1104_v56  ;;  %v1103_v2 = vmax.f32 %v1097_v38, 0.0  ;;  %v1028_v4 = vmul.f32 %v1517_v62, %v1010_v61  ;;  %v1063_v45 = vmul.f32 %v1823_v40, %v1027_v63 }
 0x1d3   : > { %v1305_v7 = vpack.c.bf16 %v1103_v2, %v1103_v2  ;;  %v1064_v10 = vmul.f32 %v1825_v41, %v1028_v4  ;;  %1135 = vst.msk [vmem:[%s1847_s26 + $0x8] sm:$0xf] %vm1132_vm2, %v1306_v1  ;;  %v1099_v39 = vadd.f32 %v1835_v46, %v1063_v45 }
 0x1d5   : > { %1134 = vst.msk [vmem:[%s1847_s26 + $0x4] sm:$0xf] %vm1132_vm2, %v1305_v7  ;;  %v1100_v5 = vadd.f32 %v1089_v44, %v1064_v10  ;;  %v1105_v9 = vmax.f32 %v1099_v39, 0.0 }
 0x1d6   : > { %v1519_v8 = vpop.eup %1518 }
 0x1d7   : > { %v1029_v11 = vmul.f32 %v1519_v8, %v1011_v18  ;;  %v1106_v40 = vmax.f32 %v1100_v5, 0.0  ;;  %v1307_v12 = vpack.c.bf16 %v1105_v9, %v1105_v9 }
 0x1d9   : > { %v1065_v13 = vmul.f32 %v1827_v42, %v1029_v11  ;;  %v1308_v41 = vpack.c.bf16 %v1106_v40, %v1106_v40  ;;  %1136 = vst.msk [vmem:[%s1847_s26 + $0xc] sm:$0xf] %vm1132_vm2, %v1307_v12 }
 0x1db   : > { %v1101_v15 = vadd.f32 %v1094_v14, %v1065_v13  ;;  %1137 = vst.msk [vmem:[%s1847_s26 + $0x10] sm:$0xf] %vm1132_vm2, %v1308_v41 }
 0x1dd   : > { %v1107_v46 = vmax.f32 %v1101_v15, 0.0 }
 0x1df   : > { %v1309_v23 = vpack.c.bf16 %v1107_v46, %v1107_v46 }
 0x1e1   : > { %1138 = vst.msk [vmem:[%s1847_s26 + $0x14] sm:$0xf] %vm1132_vm2, %v1309_v23 }
 0x1e2 PF: > { %s15_s18 = sadd.s32 1, %s1526_s18  }
 0x1e3   : > { %p12_p4 = scmp.ge.s32.totalorder %s15_s18, 5  }
 0x1e5   :  { %14 = sbr.rel (!%p12_p4) target bundleno = 1 (0x1), region = 79 }

// kernel: stven_forward.14
= control target key start
LH: loop header
LB: loop body
LE: loop exit
PB: predicated region body
PF: predicated region fallthrough
CT: control target
= control target key end

     0   :  { %s918_s12 = smov 0   ;;  %s1045_s0 = inlined_call_operand.vmem [shape: bf16[64,512], index: 0, kind: input, shape index: {}]   ;;  %s1046_s1 = inlined_call_operand.vmem [shape: bf16[512,32], index: 1, kind: input, shape index: {}]   ;;  %s1047_s2 = inlined_call_operand.vmem [shape: f32[64,1], index: 2, kind: input, shape index: {}]   ;;  %s1048_s3 = inlined_call_operand.vmem [shape: bf16[64,32], index: 3, kind: output, shape index: {}]  }
   0x1 LB: > { %s715_s13 = sadd.s32 4294967295, %s895_s12   ;;  %p719_p0 = scmp.ge.s32.totalorder %s895_s12, 1  ;;  %s895_s12 = sphi %s918_s12, %s13_s12  }
   0x2   : > { %p150_p1 = scmp.lt.s32.totalorder %s895_s12, 3 }
   0x4   : > { %p151_p2 = pnand %p719_p0, %p150_p1 }
   0x5   : > { %v845_v0 = vld [vmem:[%s1046_s1 + $0x40] sm:$0xff] (!%p151_p2)   ;;  %v897_v4 = vmov (!%p151_p2), 0   ;;  %v849_v5 = vld [vmem:[%s1046_s1 + $0x48] sm:$0xff] (!%p151_p2)   ;;  %v853_v9 = vld [vmem:[%s1046_s1 + $0x50] sm:$0xff] (!%p151_p2)   ;;  %s720_s21 = sshll.u32 (!%p151_p2), %s715_s13, 2  ;;  %vm642_vm0 = vcmask (!%p151_p2), 257024  }
   0x6   : > { %154 = sbr.rel (%p151_p2) target bundleno = 271 (0x10f), region = 32  ;;  %v846_v1 = vld [vmem:[%s1046_s1 + $0xc0] sm:$0xff] (!%p151_p2)   ;;  %778 = vmatprep.subr.bf16.mxu0 (!%p151_p2), %v845_v0  ;;  %843 = vset.pattern.permute.xlu0 (!%p151_p2), %v897_v4  ;;  %v850_v6 = vld [vmem:[%s1046_s1 + $0xc8] sm:$0xff] (!%p151_p2)   ;;  %v854_v10 = vld [vmem:[%s1046_s1 + $0xd0] sm:$0xff] (!%p151_p2)   ;;  %p181_p3 = scmp.lt.s32.totalorder (!%p151_p2), %s720_s21, 7 }
   0x7   : > { %v847_v2 = vld [vmem:[%s1046_s1] sm:$0xff] (!%p151_p2)   ;;  %806 = vmatprep.subr.bf16.mxu1 (!%p151_p2), %v846_v1  ;;  %844 = vset.pattern.permute.xlu1 (!%p151_p2), %v897_v4  ;;  %v851_v7 = vld [vmem:[%s1046_s1 + $0x8] sm:$0xff] (!%p151_p2)   ;;  %v855_v11 = vld [vmem:[%s1046_s1 + $0x10] sm:$0xff] (!%p151_p2)  }
   0x8   : > { %v848_v3 = vld [vmem:[%s1046_s1 + $0x80] sm:$0xff] (!%p151_p2)   ;;  %779 = vmatpush3.bf16.msra.mxu0 (!%p151_p2), %v847_v2  ;;  %v852_v8 = vld [vmem:[%s1046_s1 + $0x88] sm:$0xff] (!%p151_p2)   ;;  %v856_v12 = vld [vmem:[%s1046_s1 + $0x90] sm:$0xff] (!%p151_p2)  }
   0x9   : > { %807 = vmatpush3.bf16.msra.mxu1 (!%p151_p2), %v848_v3  ;;  %780 = vmatprep.subr.bf16.mxu0 (!%p151_p2), %v849_v5  ;;  %v857_v13 = vld [vmem:[%s1046_s1 + $0x58] sm:$0xff] (!%p151_p2)   ;;  %v861_v17 = vld [vmem:[%s1046_s1 + $0x60] sm:$0xff] (!%p151_p2)   ;;  %v865_v21 = vld [vmem:[%s1046_s1 + $0x68] sm:$0xff] (!%p151_p2)  }
   0xa   : > { %808 = vmatprep.subr.bf16.mxu1 (!%p151_p2), %v850_v6  ;;  %v858_v14 = vld [vmem:[%s1046_s1 + $0xd8] sm:$0xff] (!%p151_p2)   ;;  %v862_v18 = vld [vmem:[%s1046_s1 + $0xe0] sm:$0xff] (!%p151_p2)   ;;  %v866_v22 = vld [vmem:[%s1046_s1 + $0xe8] sm:$0xff] (!%p151_p2)  }
   0xb   : > { %v859_v15 = vld [vmem:[%s1046_s1 + $0x18] sm:$0xff] (!%p151_p2)   ;;  %v863_v19 = vld [vmem:[%s1046_s1 + $0x20] sm:$0xff] (!%p151_p2)   ;;  %v867_v23 = vld [vmem:[%s1046_s1 + $0x28] sm:$0xff] (!%p151_p2)  }
   0xc   : > { %781 = vmatpush3.bf16.msra.mxu0 (!%p151_p2), %v851_v7  ;;  %v860_v16 = vld [vmem:[%s1046_s1 + $0x98] sm:$0xff] (!%p151_p2)   ;;  %v864_v20 = vld [vmem:[%s1046_s1 + $0xa0] sm:$0xff] (!%p151_p2)   ;;  %v868_v24 = vld [vmem:[%s1046_s1 + $0xa8] sm:$0xff] (!%p151_p2)  }
   0xd   : > { %809 = vmatpush3.bf16.msra.mxu1 %v852_v8  ;;  %782 = vmatprep.subr.bf16.mxu0 %v853_v9  ;;  %s1050_s21 = smov (!%p181_p3, %s720_s21), 7  ;;  %v869_v25 = vld [vmem:[%s1046_s1 + $0x70] sm:$0xff]   ;;  %v873_v29 = vld [vmem:[%s1046_s1 + $0x78] sm:$0xff]  }
   0xe   : > { %810 = vmatprep.subr.bf16.mxu1 %v854_v10  ;;  %v870_v26 = vld [vmem:[%s1046_s1 + $0xf0] sm:$0xff]   ;;  %s773_s18 = sshll.u32 %s1050_s21, 4  ;;  %v874_v30 = vld [vmem:[%s1046_s1 + $0xf8] sm:$0xff]   ;;  %s724_s5 = sshll.u32 %s1050_s21, 3 }
   0xf   : > { %v871_v27 = vld [vmem:[%s1046_s1 + $0x30] sm:$0xff]   ;;  %s185_s28 = scalar_lea.vmem %s1045_s0, %s773_s18  ;;  %v875_v31 = vld [vmem:[%s1046_s1 + $0x38] sm:$0xff]   ;;  %s191_s8 = scalar_lea.vmem %s1047_s2, %s724_s5 }
  0x10   : > { %783 = vmatpush3.bf16.msra.mxu0 %v855_v11  ;;  %v872_v28 = vld [vmem:[%s1046_s1 + $0xb0] sm:$0xff]   ;;  %v876_v32 = vld [vmem:[%s1046_s1 + $0xb8] sm:$0xff]   ;;  %v272_v39 = vld [vmem:[%s191_s8] sm:$0xff]  ;;  %s726_s9 = sshll.u32 %s1050_s21, 2 }
  0x11   : > { %811 = vmatpush3.bf16.msra.mxu1 %v856_v12  ;;  %784 = vmatprep.subr.bf16.mxu0 %v857_v13  ;;  %v877_v33 = vld [vmem:[%s185_s28] ss:$16 sps:$4 sm:$0xff]   ;;  %v879_v34 = vld [vmem:[%s185_s28 + $0x4] ss:$16 sps:$4 sm:$0xff]   ;;  %v880_v35 = vld [vmem:[%s185_s28 + $0x8] ss:$16 sps:$4 sm:$0xff]   ;;  %s197_s14 = scalar_lea.vmem %s1048_s3, %s726_s9 }
  0x12   : > { %812 = vmatprep.subr.bf16.mxu1 %v858_v14  ;;  %v882_v36 = vld [vmem:[%s185_s28 + $0xc] ss:$16 sps:$4 sm:$0xff]   ;;  %560 = vmatprep.mubr.bf16.mxu0 %v879_v34  ;;  %v883_v37 = vld [vmem:[%s185_s28 + $0x24] ss:$16 sps:$4 sm:$0xff]   ;;  %v887_v42 = vld [vmem:[%s185_s28 + $0x20] ss:$16 sps:$4 sm:$0xff]  }
  0x13   : > { %609 = vmatprep.mubr.bf16.mxu1 %v882_v36  ;;  %v885_v38 = vld [vmem:[%s185_s28 + $0x2c] ss:$16 sps:$4 sm:$0xff]   ;;  %v274_v40 = vld [vmem:[%s191_s8 + $0x10] sm:$0xff]  ;;  %278 = vperm.xlu0 %843, %v272_v39   ;;  %v888_v44 = vld [vmem:[%s185_s28 + $0x28] ss:$16 sps:$4 sm:$0xff]  }
  0x14   : > { %785 = vmatpush3.bf16.msra.mxu0 %v859_v15  ;;  %288 = vperm.xlu1 %844, %v274_v40   ;;  %v273_v41 = vld [vmem:[%s191_s8 + $0x8] sm:$0xff]  ;;  %v275_v43 = vld [vmem:[%s191_s8 + $0x18] sm:$0xff] }
  0x15   : > { %813 = vmatpush3.bf16.msra.mxu1 %v860_v16  ;;  %786 = vmatprep.subr.bf16.mxu0 %v861_v17 }
  0x16   : > { %814 = vmatprep.subr.bf16.mxu1 %v862_v18 }
  0x17   : > { %283 = vperm.xlu0 %843, %v273_v41  }
  0x18   : > { %787 = vmatpush3.bf16.msra.mxu0 %v863_v19  ;;  %293 = vperm.xlu1 %844, %v275_v43  }
  0x19   : > { %815 = vmatpush3.bf16.msra.mxu1 %v864_v20  ;;  %788 = vmatprep.subr.bf16.mxu0 %v865_v21 }
  0x1a   : > { %816 = vmatprep.subr.bf16.mxu1 %v866_v22 }
  0x1c   : > { %789 = vmatpush3.bf16.msra.mxu0 %v867_v23 }
  0x1d   : > { %817 = vmatpush3.bf16.msra.mxu1 %v868_v24  ;;  %790 = vmatprep.subr.bf16.mxu0 %v869_v25 }
  0x1e   : > { %818 = vmatprep.subr.bf16.mxu1 %v870_v26 }
  0x20   : > { %791 = vmatpush3.bf16.msra.mxu0 %v871_v27 }
  0x21   : > { %819 = vmatpush3.bf16.msra.mxu1 %v872_v28  ;;  %792 = vmatprep.subr.bf16.mxu0 %v873_v29 }
  0x22   : > { %820 = vmatprep.subr.bf16.mxu1 %v874_v30 }
  0x24   : > { %793 = vmatpush3.bf16.msra.mxu0 %v875_v31 }
  0x25   : > { %821 = vmatpush3.bf16.msra.mxu1 %v876_v32 }
  0x27   : > { %561 = vmatmul.mubr.bf16.vlgmr.msra.gmra.mrb[0].mxu0 %v877_v33 }
  0x28   : > { %610 = vmatmul.mubr.bf16.vlgmr.msra.gmra.mrb[0].mxu1 %v880_v35  ;;  %568 = vmatprep.mubr.bf16.mxu0 %v883_v37 }
  0x29   : > { %617 = vmatprep.mubr.bf16.mxu1 %v885_v38 }
  0x2f   : > { %569 = vmatmul.mubr.bf16.gmra.mrb[4].mxu0 %v887_v42 }
  0x30   : > { %618 = vmatmul.mubr.bf16.gmra.mrb[4].mxu1 %v888_v44 }
  0x92   : > { %v279_v45 = vpop.permute.xlu0 %278 }
  0x93   : > { %v289_v62 = vpop.permute.xlu1 %288 }
  0x96   : > { %v284_v47 = vpop.permute.xlu0 %283 }
  0x97   : > { %v294_v14 = vpop.permute.xlu1 %293 }
  0xfa   : > { %v794_v46 = vpop.f32.mrb[0].mxu0 }
  0xfb   : > { %v822_v48 = vpop.f32.mrb[0].mxu1  ;;  %v795_v49 = vpop.f32.mrb[1].mxu0 }
  0xfc   : > { %v796_v50 = vadd.f32 %v795_v49, %v794_v46  ;;  %v823_v51 = vpop.f32.mrb[1].mxu1  ;;  %v797_v52 = vpop.f32.mrb[2].mxu0 }
  0xfd   : > { %v824_v53 = vadd.f32 %v823_v51, %v822_v48  ;;  %v825_v54 = vpop.f32.mrb[2].mxu1  ;;  %v798_v55 = vpop.f32.mrb[3].mxu0 }
  0xfe   : > { %v563_v56 = vadd.f32 %v796_v50, %v279_v45  ;;  %v799_v57 = vadd.f32 %v798_v55, %v797_v52  ;;  %v826_v58 = vpop.f32.mrb[3].mxu1 }
  0xff   : > { %v827_v59 = vadd.f32 %v826_v58, %v825_v54 }
 0x100   : > { %v612_v60 = vadd.f32 %v824_v53, %v563_v56  ;;  %v566_v61 = vadd.f32 %v799_v57, %v284_v47 }
 0x102   : > { %v774_v63 = vpack.c.bf16 %v612_v60, %v612_v60  ;;  %v615_v0 = vadd.f32 %v827_v59, %v566_v61  ;;  %v800_v1 = vpop.f32.mrb[4].mxu0 }
 0x103   : > { %v828_v2 = vpop.f32.mrb[4].mxu1  ;;  %v801_v3 = vpop.f32.mrb[5].mxu0 }
 0x104   : > { %643 = vst.msk [vmem:[%s197_s14] sm:$0xf] %vm642_vm0, %v774_v63  ;;  %v775_v4 = vpack.c.bf16 %v615_v0, %v615_v0  ;;  %v802_v5 = vadd.f32 %v801_v3, %v800_v1  ;;  %v829_v6 = vpop.f32.mrb[5].mxu1  ;;  %v803_v7 = vpop.f32.mrb[6].mxu0 }
 0x105   : > { %v830_v8 = vadd.f32 %v829_v6, %v828_v2  ;;  %v831_v9 = vpop.f32.mrb[6].mxu1  ;;  %v804_v10 = vpop.f32.mrb[7].mxu0 }
 0x106   : > { %644 = vst.msk [vmem:[%s197_s14 + $0x4] sm:$0xf] %vm642_vm0, %v775_v4  ;;  %v571_v11 = vadd.f32 %v802_v5, %v289_v62  ;;  %v805_v12 = vadd.f32 %v804_v10, %v803_v7  ;;  %v832_v13 = vpop.f32.mrb[7].mxu1 }
 0x107   : > { %v833_v15 = vadd.f32 %v832_v13, %v831_v9 }
 0x108   : > { %v620_v16 = vadd.f32 %v830_v8, %v571_v11  ;;  %v574_v17 = vadd.f32 %v805_v12, %v294_v14 }
 0x10a   : > { %v776_v18 = vpack.c.bf16 %v620_v16, %v620_v16  ;;  %v623_v19 = vadd.f32 %v833_v15, %v574_v17 }
 0x10c   : > { %645 = vst.msk [vmem:[%s197_s14 + $0x8] sm:$0xf] %vm642_vm0, %v776_v18  ;;  %v777_v20 = vpack.c.bf16 %v623_v19, %v623_v19 }
 0x10e   : > { %646 = vst.msk [vmem:[%s197_s14 + $0xc] sm:$0xf] %vm642_vm0, %v777_v20 }
 0x10f PF: > { %s13_s12 = sadd.s32 1, %s895_s12  }
 0x110   : > { %p10_p4 = scmp.ge.s32.totalorder %s13_s12, 4  }
 0x112   :  { %12 = sbr.rel (!%p10_p4) target bundleno = 1 (0x1), region = 65 }

// kernel: stven_forward.17
= control target key start
LH: loop header
LB: loop body
LE: loop exit
PB: predicated region body
PF: predicated region fallthrough
CT: control target
= control target key end

     0   :  { %s1062_s15 = smov 0   ;;  %s1206_s0 = inlined_call_operand.vmem [shape: bf16[8,16,512], index: 0, kind: input, shape index: {}]   ;;  %s1207_s1 = inlined_call_operand.vmem [shape: bf16[8,512,32], index: 1, kind: input, shape index: {}]   ;;  %s1208_s2 = inlined_call_operand.vmem [shape: f32[16,1], index: 2, kind: input, shape index: {}]   ;;  %s1209_s3 = inlined_call_operand.vmem [shape: f32[16,1], index: 3, kind: input, shape index: {}]   ;;  %s1210_s4 = inlined_call_operand.vmem [shape: bf16[8,16,32], index: 4, kind: output, shape index: {}]  }
   0x1 LB: > { %s1068_s16 = sadd.s32 4294967295, %s1033_s15   ;;  %p849_p0 = scmp.ge.s32.totalorder %s1033_s15, 1  ;;  %s1033_s15 = sphi %s1062_s15, %s14_s15  }
   0x2   : > { %p167_p1 = scmp.lt.s32.totalorder %s1033_s15, 9 }
   0x4   : > { %p168_p2 = pnand %p849_p0, %p167_p1 }
   0x5   : > { %p193_p3 = scmp.lt.s32.totalorder (!%p168_p2), %s1068_s16, 7  ;;  %s890_s26 = sshll.u32 (!%p168_p2), %s1068_s16, 4  ;;  %vm568_vm0 = vcmask (!%p168_p2), 261120  }
   0x6   : > { %171 = sbr.rel (%p168_p2) target bundleno = 599 (0x257), region = 36  ;;  %s567_s27 = scalar_lea.vmem (!%p168_p2), [#allocation2], %s890_s26 }
   0x7   : > { %p891_p4 = scmp.ne.s32.totalorder (!%p168_p2), %s1068_s16, 0 }
   0xd   : > { %s1074_s17 = scalar_select %p193_p3, %s1068_s16, 7 }
   0xe   : > { %vm575_vm1 = vcmask (!%p891_p4), 7168   ;;  %v1035_v50 = vmov (!%p891_p4), 0.0  }
   0xf   : > { %s912_s18 = sshll.u32 %s1074_s17, 8  ;;  %s911_s22 = sshll.u32 %s1074_s17, 5  ;;  %576 = vst.msk [vmem:[#allocation3] sm:$0xff] (!%p891_p4), %vm575_vm1, %v1035_v50  ;;  %577 = vst.msk [vmem:[#allocation3 + $0x8] sm:$0xff] (!%p891_p4), %vm575_vm1, %v1035_v50 }
  0x10   : > { %s1080_s21 = scalar_lea.vmem %s1207_s1, %s912_s18  ;;  %s197_s25 = scalar_lea.vmem %s1206_s0, %s911_s22  ;;  %578 = vst.msk [vmem:[#allocation4] sm:$0xff] (!%p891_p4), %vm575_vm1, %v1035_v50  ;;  %579 = vst.msk [vmem:[#allocation4 + $0x8] sm:$0xff] (!%p891_p4), %vm575_vm1, %v1035_v50 }
  0x11   : > { %v983_v0 = vld [vmem:[%s1080_s21 + $0x40] sm:$0xff]   ;;  %v987_v4 = vld [vmem:[%s1080_s21 + $0x48] sm:$0xff]   ;;  %v991_v8 = vld [vmem:[%s1080_s21 + $0x50] sm:$0xff]  }
  0x12   : > { %v984_v1 = vld [vmem:[%s1080_s21 + $0xc0] sm:$0xff]   ;;  %929 = vmatprep.subr.bf16.mxu0 %v983_v0  ;;  %v988_v5 = vld [vmem:[%s1080_s21 + $0xc8] sm:$0xff]   ;;  %v992_v9 = vld [vmem:[%s1080_s21 + $0xd0] sm:$0xff]  }
  0x13   : > { %v985_v2 = vld [vmem:[%s1080_s21] sm:$0xff]   ;;  %951 = vmatprep.subr.bf16.mxu1 %v984_v1  ;;  %v989_v6 = vld [vmem:[%s1080_s21 + $0x8] sm:$0xff]   ;;  %v993_v10 = vld [vmem:[%s1080_s21 + $0x10] sm:$0xff]  }
  0x14   : > { %v986_v3 = vld [vmem:[%s1080_s21 + $0x80] sm:$0xff]   ;;  %930 = vmatpush3.bf16.msra.mxu0 %v985_v2  ;;  %v990_v7 = vld [vmem:[%s1080_s21 + $0x88] sm:$0xff]   ;;  %v994_v11 = vld [vmem:[%s1080_s21 + $0x90] sm:$0xff]  }
  0x15   : > { %952 = vmatpush3.bf16.msra.mxu1 %v986_v3  ;;  %931 = vmatprep.subr.bf16.mxu0 %v987_v4  ;;  %v995_v12 = vld [vmem:[%s1080_s21 + $0x58] sm:$0xff]   ;;  %v999_v16 = vld [vmem:[%s1080_s21 + $0x60] sm:$0xff]   ;;  %v1003_v20 = vld [vmem:[%s1080_s21 + $0x68] sm:$0xff]  }
  0x16   : > { %953 = vmatprep.subr.bf16.mxu1 %v988_v5  ;;  %v996_v13 = vld [vmem:[%s1080_s21 + $0xd8] sm:$0xff]   ;;  %v1000_v17 = vld [vmem:[%s1080_s21 + $0xe0] sm:$0xff]   ;;  %v1004_v21 = vld [vmem:[%s1080_s21 + $0xe8] sm:$0xff]  }
  0x17   : > { %v997_v14 = vld [vmem:[%s1080_s21 + $0x18] sm:$0xff]   ;;  %v1001_v18 = vld [vmem:[%s1080_s21 + $0x20] sm:$0xff]   ;;  %v1005_v22 = vld [vmem:[%s1080_s21 + $0x28] sm:$0xff]  }
  0x18   : > { %932 = vmatpush3.bf16.msra.mxu0 %v989_v6  ;;  %v998_v15 = vld [vmem:[%s1080_s21 + $0x98] sm:$0xff]   ;;  %v1002_v19 = vld [vmem:[%s1080_s21 + $0xa0] sm:$0xff]   ;;  %v1006_v23 = vld [vmem:[%s1080_s21 + $0xa8] sm:$0xff]  }
  0x19   : > { %954 = vmatpush3.bf16.msra.mxu1 %v990_v7  ;;  %933 = vmatprep.subr.bf16.mxu0 %v991_v8  ;;  %v1007_v24 = vld [vmem:[%s1080_s21 + $0x70] sm:$0xff]   ;;  %v1011_v28 = vld [vmem:[%s1080_s21 + $0x78] sm:$0xff]  }
  0x1a   : > { %955 = vmatprep.subr.bf16.mxu1 %v992_v9  ;;  %v1008_v25 = vld [vmem:[%s1080_s21 + $0xf0] sm:$0xff]   ;;  %v1012_v29 = vld [vmem:[%s1080_s21 + $0xf8] sm:$0xff]  }
  0x1b   : > { %v1009_v26 = vld [vmem:[%s1080_s21 + $0x30] sm:$0xff]   ;;  %v1013_v30 = vld [vmem:[%s1080_s21 + $0x38] sm:$0xff]  }
  0x1c   : > { %934 = vmatpush3.bf16.msra.mxu0 %v993_v10  ;;  %v1010_v27 = vld [vmem:[%s1080_s21 + $0xb0] sm:$0xff]   ;;  %v1014_v31 = vld [vmem:[%s1080_s21 + $0xb8] sm:$0xff]  }
  0x1d   : > { %956 = vmatpush3.bf16.msra.mxu1 %v994_v11  ;;  %935 = vmatprep.subr.bf16.mxu0 %v995_v12  ;;  %v1015_v32 = vld [vmem:[%s197_s25] ss:$16 sps:$4 sm:$0xff]   ;;  %v1017_v33 = vld [vmem:[%s197_s25 + $0x4] ss:$16 sps:$4 sm:$0xff]   ;;  %v1018_v34 = vld [vmem:[%s197_s25 + $0x8] ss:$16 sps:$4 sm:$0xff]  }
  0x1e   : > { %957 = vmatprep.subr.bf16.mxu1 %v996_v13  ;;  %v1020_v35 = vld [vmem:[%s197_s25 + $0xc] ss:$16 sps:$4 sm:$0xff]   ;;  %516 = vmatprep.mubr.bf16.mxu0 %v1017_v33 }
  0x1f   : > { %557 = vmatprep.mubr.bf16.mxu1 %v1020_v35 }
  0x20   : > { %936 = vmatpush3.bf16.msra.mxu0 %v997_v14 }
  0x21   : > { %958 = vmatpush3.bf16.msra.mxu1 %v998_v15  ;;  %937 = vmatprep.subr.bf16.mxu0 %v999_v16 }
  0x22   : > { %959 = vmatprep.subr.bf16.mxu1 %v1000_v17 }
  0x24   : > { %938 = vmatpush3.bf16.msra.mxu0 %v1001_v18 }
  0x25   : > { %960 = vmatpush3.bf16.msra.mxu1 %v1002_v19  ;;  %939 = vmatprep.subr.bf16.mxu0 %v1003_v20 }
  0x26   : > { %961 = vmatprep.subr.bf16.mxu1 %v1004_v21 }
  0x28   : > { %940 = vmatpush3.bf16.msra.mxu0 %v1005_v22 }
  0x29   : > { %962 = vmatpush3.bf16.msra.mxu1 %v1006_v23  ;;  %941 = vmatprep.subr.bf16.mxu0 %v1007_v24 }
  0x2a   : > { %963 = vmatprep.subr.bf16.mxu1 %v1008_v25 }
  0x2c   : > { %942 = vmatpush3.bf16.msra.mxu0 %v1009_v26 }
  0x2d   : > { %964 = vmatpush3.bf16.msra.mxu1 %v1010_v27  ;;  %943 = vmatprep.subr.bf16.mxu0 %v1011_v28 }
  0x2e   : > { %965 = vmatprep.subr.bf16.mxu1 %v1012_v29 }
  0x30   : > { %944 = vmatpush3.bf16.msra.mxu0 %v1013_v30 }
  0x31   : > { %966 = vmatpush3.bf16.msra.mxu1 %v1014_v31 }
  0x33   : > { %517 = vmatmul.mubr.bf16.vlgmr.msra.gmra.mrb[0].mxu0 %v1015_v32 }
  0x34   : > { %558 = vmatmul.mubr.bf16.vlgmr.msra.gmra.mrb[0].mxu1 %v1018_v34 }
 0x106   : > { %v945_v36 = vpop.f32.mrb[0].mxu0 }
 0x107   : > { %v967_v37 = vpop.f32.mrb[0].mxu1  ;;  %v946_v38 = vpop.f32.mrb[1].mxu0 }
 0x108   : > { %v947_v39 = vadd.f32 %v946_v38, %v945_v36  ;;  %v968_v40 = vpop.f32.mrb[1].mxu1  ;;  %v948_v41 = vpop.f32.mrb[2].mxu0 }
 0x109   : > { %v969_v42 = vadd.f32 %v968_v40, %v967_v37  ;;  %v970_v43 = vpop.f32.mrb[2].mxu1  ;;  %v949_v44 = vpop.f32.mrb[3].mxu0  ;;  %574 = sbr.rel (%p891_p4) target bundleno = 272 (0x110), region = 40 }
 0x10a   : > { %v950_v45 = vadd.f32 %v949_v44, %v948_v41  ;;  %v971_v46 = vpop.f32.mrb[3].mxu1 }
 0x10b   : > { %v560_v47 = vadd.f32 %v969_v42, %v947_v39  ;;  %v972_v48 = vadd.f32 %v971_v46, %v970_v43 }
 0x10d   : > { %569 = vst.msk [vmem:[%s567_s27] sm:$0xff] %vm568_vm0, %v560_v47  ;;  %v563_v49 = vadd.f32 %v972_v48, %v950_v45 }
 0x10f   : > { %570 = vst.msk [vmem:[%s567_s27 + $0x8] sm:$0xff] %vm568_vm0, %v563_v49 }
 0x110 PF: > { %v595_v51 = vmul.f32 %v560_v47, %v560_v47  ;;  %v582_v52 = vsel %vm568_vm0, %v560_v47, 0.0  ;;  %v596_v53 = vmul.f32 %v563_v49, %v563_v49  ;;  %v585_v55 = vsel %vm568_vm0, %v563_v49, 0.0  ;;  %v580_v57 = vld [vmem:[#allocation3] sm:$0xff]  ;;  %v593_v58 = vld [vmem:[#allocation4] sm:$0xff]  ;;  %v581_v62 = vld [vmem:[#allocation3 + $0x8] sm:$0xff]  ;;  %p892_p5 = scmp.ne.s32.totalorder %s1068_s16, 7 }
 0x111   : > { %583 = vadd.xlane.f32.xlu0 %v582_v52  ;;  %vm590_vm2 = vcmask 7168   ;;  %v594_v0 = vld [vmem:[#allocation4 + $0x8] sm:$0xff]  ;;  %v1036_v7 = vmov (!%p892_p5), 0   ;;  %v629_v22 = vld [vmem:[%s1208_s2] sm:$0xff] (!%p892_p5)  ;;  %v630_v23 = vld [vmem:[%s1208_s2 + $0x8] sm:$0xff] (!%p892_p5)  ;;  %vm787_vm3 = vcmask (!%p892_p5), 257024  }
 0x112   : > { %v597_v54 = vsel %vm568_vm0, %v595_v51, 0.0  ;;  %v600_v56 = vsel %vm568_vm0, %v596_v53, 0.0  ;;  %1021 = vset.pattern.permute.xlu0 (!%p892_p5), %v1036_v7  ;;  %1022 = vset.pattern.permute.xlu1 (!%p892_p5), %v1036_v7  ;;  %v633_v28 = vld [vmem:[%s1209_s3] sm:$0xff] (!%p892_p5)  ;;  %v634_v30 = vld [vmem:[%s1209_s3 + $0x8] sm:$0xff] (!%p892_p5) }
 0x113   : > { %598 = vadd.xlane.f32.xlu1 %v597_v54 }
 0x115   : > { %586 = vadd.xlane.f32.xlu0 %v585_v55 }
 0x116   : > { %v639_v34 = vld [vmem:[#allocation2] sm:$0xff] (!%p892_p5)  ;;  %v641_v35 = vld [vmem:[#allocation2 + $0x10] sm:$0xff] (!%p892_p5)  ;;  %v640_v43 = vld [vmem:[#allocation2 + $0x8] sm:$0xff] (!%p892_p5) }
 0x117   : > { %601 = vadd.xlane.f32.xlu1 %v600_v56  ;;  %v643_v36 = vld [vmem:[#allocation2 + $0x20] sm:$0xff] (!%p892_p5)  ;;  %v645_v37 = vld [vmem:[#allocation2 + $0x30] sm:$0xff] (!%p892_p5)  ;;  %v642_v44 = vld [vmem:[#allocation2 + $0x18] sm:$0xff] (!%p892_p5) }
 0x118   : > { %v647_v38 = vld [vmem:[#allocation2 + $0x40] sm:$0xff] (!%p892_p5)  ;;  %v649_v39 = vld [vmem:[#allocation2 + $0x50] sm:$0xff] (!%p892_p5)  ;;  %v644_v45 = vld [vmem:[#allocation2 + $0x28] sm:$0xff] (!%p892_p5) }
 0x119   : > { %v651_v40 = vld [vmem:[#allocation2 + $0x60] sm:$0xff] (!%p892_p5)  ;;  %v653_v42 = vld [vmem:[#allocation2 + $0x70] sm:$0xff] (!%p892_p5)  ;;  %v646_v46 = vld [vmem:[#allocation2 + $0x38] sm:$0xff] (!%p892_p5) }
 0x11a   : > { %v648_v47 = vld [vmem:[#allocation2 + $0x48] sm:$0xff] (!%p892_p5)  ;;  %v650_v52 = vld [vmem:[#allocation2 + $0x58] sm:$0xff] (!%p892_p5) }
 0x11b   : > { %v652_v53 = vld [vmem:[#allocation2 + $0x68] sm:$0xff] (!%p892_p5)  ;;  %v654_v54 = vld [vmem:[#allocation2 + $0x78] sm:$0xff] (!%p892_p5) }
 0x19e   : > { %v584_v59 = vpop.xlane.xlu0 %583 }
 0x19f   : > { %v588_v60 = vadd.f32 %v584_v59, %v580_v57 }
 0x1a0   : > { %v599_v61 = vpop.xlane.xlu1 %598 }
 0x1a1   : > { %v603_v63 = vadd.f32 %v599_v61, %v593_v58  ;;  %591 = vst.msk [vmem:[#allocation3] sm:$0xff] %vm590_vm2, %v588_v60  ;;  %610 = sbr.rel (%p892_p5) target bundleno = 599 (0x257), region = 44 }
 0x1a2   : > { %v587_v1 = vpop.xlane.xlu0 %586 }
 0x1a3   : > { %605 = vst.msk [vmem:[#allocation4] sm:$0xff] %vm590_vm2, %v603_v63  ;;  %v589_v2 = vadd.f32 %v587_v1, %v581_v62 }
 0x1a4   : > { %v602_v3 = vpop.xlane.xlu1 %601 }
 0x1a5   : > { %v604_v4 = vadd.f32 %v602_v3, %v594_v0  ;;  %592 = vst.msk [vmem:[#allocation3 + $0x8] sm:$0xff] %vm590_vm2, %v589_v2 }
 0x1a7   : > { %606 = vst.msk [vmem:[#allocation4 + $0x8] sm:$0xff] %vm590_vm2, %v604_v4 }
 0x1a8   : > { %v611_v5 = vld [vmem:[#allocation3] sm:$0xff] }
 0x1a9   : > { %v613_v8 = vmul.f32 0.00390625, %v611_v5 }
 0x1aa   : > { %v615_v6 = vld [vmem:[#allocation4] sm:$0xff] }
 0x1ab   : > { %v617_v9 = vmul.f32 0.00390625, %v615_v6  ;;  %v619_v14 = vmul.f32 %v613_v8, %v613_v8 }
 0x1ac   : > { %v612_v10 = vld [vmem:[#allocation3 + $0x8] sm:$0xff] }
 0x1ad   : > { %v614_v12 = vmul.f32 0.00390625, %v612_v10  ;;  %v621_v16 = vsub.f32 %v617_v9, %v619_v14 }
 0x1ae   : > { %v616_v11 = vld [vmem:[#allocation4 + $0x8] sm:$0xff] }
 0x1af   : > { %v618_v13 = vmul.f32 0.00390625, %v616_v11  ;;  %v620_v15 = vmul.f32 %v614_v12, %v614_v12  ;;  %v623_v18 = vmax.f32 %v621_v16, 0.0 }
 0x1b1   : > { %v622_v17 = vsub.f32 %v618_v13, %v620_v15  ;;  %v625_v20 = vadd.f32 1e-05, %v623_v18 }
 0x1b3   : > { %v624_v19 = vmax.f32 %v622_v17, 0.0  ;;  %1023 = vrsqrt.f32 %v625_v20 }
 0x1b5   : > { %v626_v21 = vadd.f32 1e-05, %v624_v19 }
 0x1b7   : > { %1025 = vrsqrt.f32 %v626_v21 }
 0x1bd   : > { %v1024_v24 = vpop.eup %1023 }
 0x1be   : > { %v631_v26 = vmul.f32 %v1024_v24, %v629_v22 }
 0x1c0   : > { %657 = vperm.xlu0 %1021, %v631_v26   ;;  %v635_v29 = vmul.f32 %v631_v26, %v613_v8 }
 0x1c1   : > { %v1026_v25 = vpop.eup %1025 }
 0x1c2   : > { %v632_v27 = vmul.f32 %v1026_v25, %v630_v23  ;;  %v637_v32 = vsub.f32 %v633_v28, %v635_v29 }
 0x1c4   : > { %v636_v31 = vmul.f32 %v632_v27, %v614_v12  ;;  %662 = vperm.xlu0 %1021, %v632_v27   ;;  %683 = vperm.xlu1 %1022, %v637_v32  }
 0x1c6   : > { %v638_v33 = vsub.f32 %v634_v30, %v636_v31 }
 0x1c8   : > { %688 = vperm.xlu1 %1022, %v638_v33  }
 0x23f   : > { %v658_v41 = vpop.permute.xlu0 %657 }
 0x240   : > { %v665_v48 = vmul.f32 %v658_v41, %v639_v34  ;;  %v667_v49 = vmul.f32 %v658_v41, %v641_v35  ;;  %v669_v50 = vmul.f32 %v658_v41, %v643_v36  ;;  %v671_v51 = vmul.f32 %v658_v41, %v645_v37 }
 0x241   : > { %v673_v55 = vmul.f32 %v658_v41, %v647_v38  ;;  %v675_v56 = vmul.f32 %v658_v41, %v649_v39  ;;  %v677_v57 = vmul.f32 %v658_v41, %v651_v40  ;;  %v679_v58 = vmul.f32 %v658_v41, %v653_v42 }
 0x243   : > { %v663_v59 = vpop.permute.xlu0 %662  ;;  %v684_v60 = vpop.permute.xlu1 %683 }
 0x244   : > { %v666_v61 = vmul.f32 %v663_v59, %v640_v43  ;;  %v668_v62 = vmul.f32 %v663_v59, %v642_v44  ;;  %v670_v63 = vmul.f32 %v663_v59, %v644_v45  ;;  %v672_v0 = vmul.f32 %v663_v59, %v646_v46 }
 0x245   : > { %v674_v1 = vmul.f32 %v663_v59, %v648_v47  ;;  %v676_v2 = vmul.f32 %v663_v59, %v650_v52  ;;  %v678_v3 = vmul.f32 %v663_v59, %v652_v53  ;;  %v680_v4 = vmul.f32 %v663_v59, %v654_v54 }
 0x246   : > { %v691_v5 = vadd.f32 %v684_v60, %v665_v48  ;;  %v693_v6 = vadd.f32 %v684_v60, %v667_v49  ;;  %v695_v7 = vadd.f32 %v684_v60, %v669_v50  ;;  %v697_v8 = vadd.f32 %v684_v60, %v671_v51 }
 0x247   : > { %v699_v9 = vadd.f32 %v684_v60, %v673_v55  ;;  %v701_v10 = vadd.f32 %v684_v60, %v675_v56  ;;  %v703_v11 = vadd.f32 %v684_v60, %v677_v57  ;;  %v705_v12 = vadd.f32 %v684_v60, %v679_v58  ;;  %v689_v21 = vpop.permute.xlu1 %688 }
 0x248   : > { %v707_v13 = vmax.f32 %v691_v5, 0.0  ;;  %v709_v14 = vmax.f32 %v693_v6, 0.0  ;;  %v711_v15 = vmax.f32 %v695_v7, 0.0  ;;  %v713_v16 = vmax.f32 %v697_v8, 0.0 }
 0x249   : > { %v715_v17 = vmax.f32 %v699_v9, 0.0  ;;  %v717_v18 = vmax.f32 %v701_v10, 0.0  ;;  %v719_v19 = vmax.f32 %v703_v11, 0.0  ;;  %v721_v20 = vmax.f32 %v705_v12, 0.0 }
 0x24a   : > { %v913_v22 = vpack.c.bf16 %v707_v13, %v707_v13  ;;  %v915_v23 = vpack.c.bf16 %v709_v14, %v709_v14  ;;  %v917_v24 = vpack.c.bf16 %v711_v15, %v711_v15  ;;  %v919_v25 = vpack.c.bf16 %v713_v16, %v713_v16 }
 0x24b   : > { %v921_v26 = vpack.c.bf16 %v715_v17, %v715_v17  ;;  %v923_v27 = vpack.c.bf16 %v717_v18, %v717_v18  ;;  %v925_v28 = vpack.c.bf16 %v719_v19, %v719_v19  ;;  %v927_v29 = vpack.c.bf16 %v721_v20, %v721_v20 }
 0x24c   : > { %788 = vst.msk [vmem:[%s1210_s4] sm:$0xf] %vm787_vm3, %v913_v22  ;;  %790 = vst.msk [vmem:[%s1210_s4 + $0x8] sm:$0xf] %vm787_vm3, %v915_v23  ;;  %v692_v30 = vadd.f32 %v689_v21, %v666_v61  ;;  %v694_v31 = vadd.f32 %v689_v21, %v668_v62  ;;  %v696_v32 = vadd.f32 %v689_v21, %v670_v63 }
 0x24d   : > { %792 = vst.msk [vmem:[%s1210_s4 + $0x10] sm:$0xf] %vm787_vm3, %v917_v24  ;;  %794 = vst.msk [vmem:[%s1210_s4 + $0x18] sm:$0xf] %vm787_vm3, %v919_v25  ;;  %v698_v33 = vadd.f32 %v689_v21, %v672_v0  ;;  %v700_v34 = vadd.f32 %v689_v21, %v674_v1  ;;  %v702_v35 = vadd.f32 %v689_v21, %v676_v2 }
 0x24e   : > { %796 = vst.msk [vmem:[%s1210_s4 + $0x20] sm:$0xf] %vm787_vm3, %v921_v26  ;;  %798 = vst.msk [vmem:[%s1210_s4 + $0x28] sm:$0xf] %vm787_vm3, %v923_v27  ;;  %v704_v36 = vadd.f32 %v689_v21, %v678_v3  ;;  %v706_v37 = vadd.f32 %v689_v21, %v680_v4  ;;  %v708_v38 = vmax.f32 %v692_v30, 0.0  ;;  %v710_v39 = vmax.f32 %v694_v31, 0.0 }
 0x24f   : > { %800 = vst.msk [vmem:[%s1210_s4 + $0x30] sm:$0xf] %vm787_vm3, %v925_v28  ;;  %802 = vst.msk [vmem:[%s1210_s4 + $0x38] sm:$0xf] %vm787_vm3, %v927_v29  ;;  %v712_v40 = vmax.f32 %v696_v32, 0.0  ;;  %v714_v41 = vmax.f32 %v698_v33, 0.0 }
 0x250   : > { %v716_v42 = vmax.f32 %v700_v34, 0.0  ;;  %v718_v43 = vmax.f32 %v702_v35, 0.0  ;;  %v720_v44 = vmax.f32 %v704_v36, 0.0  ;;  %v722_v45 = vmax.f32 %v706_v37, 0.0 }
 0x251   : > { %v914_v46 = vpack.c.bf16 %v708_v38, %v708_v38  ;;  %v916_v47 = vpack.c.bf16 %v710_v39, %v710_v39  ;;  %v918_v48 = vpack.c.bf16 %v712_v40, %v712_v40  ;;  %v920_v49 = vpack.c.bf16 %v714_v41, %v714_v41 }
 0x252   : > { %v922_v50 = vpack.c.bf16 %v716_v42, %v716_v42  ;;  %v924_v51 = vpack.c.bf16 %v718_v43, %v718_v43  ;;  %v926_v52 = vpack.c.bf16 %v720_v44, %v720_v44  ;;  %v928_v53 = vpack.c.bf16 %v722_v45, %v722_v45 }
 0x253   : > { %789 = vst.msk [vmem:[%s1210_s4 + $0x4] sm:$0xf] %vm787_vm3, %v914_v46  ;;  %791 = vst.msk [vmem:[%s1210_s4 + $0xc] sm:$0xf] %vm787_vm3, %v916_v47 }
 0x254   : > { %793 = vst.msk [vmem:[%s1210_s4 + $0x14] sm:$0xf] %vm787_vm3, %v918_v48  ;;  %795 = vst.msk [vmem:[%s1210_s4 + $0x1c] sm:$0xf] %vm787_vm3, %v920_v49 }
 0x255   : > { %797 = vst.msk [vmem:[%s1210_s4 + $0x24] sm:$0xf] %vm787_vm3, %v922_v50  ;;  %799 = vst.msk [vmem:[%s1210_s4 + $0x2c] sm:$0xf] %vm787_vm3, %v924_v51 }
 0x256   : > { %801 = vst.msk [vmem:[%s1210_s4 + $0x34] sm:$0xf] %vm787_vm3, %v926_v52  ;;  %803 = vst.msk [vmem:[%s1210_s4 + $0x3c] sm:$0xf] %vm787_vm3, %v928_v53 }
 0x257 PF: > { %s14_s15 = sadd.s32 1, %s1033_s15  }
 0x258   : > { %p11_p6 = scmp.ge.s32.totalorder %s14_s15, 10  }
 0x25a   :  { %13 = sbr.rel (!%p11_p6) target bundleno = 1 (0x1), region = 74 }

// kernel: stven_forward.18
= control target key start
LH: loop header
LB: loop body
LE: loop exit
PB: predicated region body
PF: predicated region fallthrough
CT: control target
= control target key end

     0   :  { %s738_s15 = smov 0   ;;  %s816_s0 = inlined_call_operand.vmem [shape: bf16[4,16,128], index: 0, kind: input, shape index: {}]   ;;  %s817_s1 = inlined_call_operand.vmem [shape: bf16[4,128,256], index: 1, kind: input, shape index: {}]   ;;  %s818_s2 = inlined_call_operand.vmem [shape: f32[16,1], index: 2, kind: input, shape index: {}]   ;;  %s819_s3 = inlined_call_operand.vmem [shape: f32[16,1], index: 3, kind: input, shape index: {}]   ;;  %s820_s4 = inlined_call_operand.vmem [shape: bf16[4,16,256], index: 4, kind: output, shape index: {}]  }
   0x1 LB: > { %s744_s16 = sadd.s32 4294967295, %s708_s15   ;;  %p613_p0 = scmp.ge.s32.totalorder %s708_s15, 1  ;;  %s708_s15 = sphi %s738_s15, %s14_s15  }
   0x2   : > { %p167_p1 = scmp.lt.s32.totalorder %s708_s15, 5 }
   0x4   : > { %p168_p2 = pnand %p613_p0, %p167_p1 }
   0x5   : > { %p193_p3 = scmp.lt.s32.totalorder (!%p168_p2), %s744_s16, 3  ;;  %v710_v0 = vmov (!%p168_p2), 0   ;;  %s651_s26 = sshll.u32 (!%p168_p2), %s744_s16, 5 }
   0x6   : > { %171 = sbr.rel (%p168_p2) target bundleno = 591 (0x24f), region = 36  ;;  %340 = vmatprep.mubr.bf16.mxu0 (!%p168_p2), %v710_v0  ;;  %s353_s27 = scalar_lea.vmem (!%p168_p2), [#allocation2], %s651_s26 }
   0x7   : > { %p637_p4 = scmp.ne.s32.totalorder (!%p168_p2), %s744_s16, 0 }
   0xd   : > { %s194_s17 = scalar_select %p193_p3, %s744_s16, 3 }
   0xe   : > { %vm362_vm0 = vcmask (!%p637_p4), 7168   ;;  %v711_v22 = vmov (!%p637_p4), 0.0  }
   0xf   : > { %s650_s18 = sshll.u32 %s194_s17, 7  ;;  %s649_s22 = sshll.u32 %s194_s17, 3  ;;  %363 = vst.msk [vmem:[#allocation3] sm:$0xff] (!%p637_p4), %vm362_vm0, %v711_v22  ;;  %364 = vst.msk [vmem:[#allocation3 + $0x8] sm:$0xff] (!%p637_p4), %vm362_vm0, %v711_v22 }
  0x10   : > { %s753_s21 = scalar_lea.vmem %s817_s1, %s650_s18  ;;  %s197_s25 = scalar_lea.vmem %s816_s0, %s649_s22  ;;  %365 = vst.msk [vmem:[#allocation4] sm:$0xff] (!%p637_p4), %vm362_vm0, %v711_v22  ;;  %366 = vst.msk [vmem:[#allocation4 + $0x8] sm:$0xff] (!%p637_p4), %vm362_vm0, %v711_v22 }
  0x11   : > { %v671_v1 = vld [vmem:[%s753_s21 + $0x4] ss:$8 sps:$4 sm:$0xff]   ;;  %v673_v2 = vld [vmem:[%s753_s21] ss:$8 sps:$4 sm:$0xff]   ;;  %v674_v3 = vld [vmem:[%s753_s21 + $0x14] ss:$8 sps:$4 sm:$0xff]  }
  0x12   : > { %308 = vmatprep.subr.bf16.mxu0 %v671_v1  ;;  %v676_v4 = vld [vmem:[%s753_s21 + $0x10] ss:$8 sps:$4 sm:$0xff]   ;;  %v677_v5 = vld [vmem:[%s753_s21 + $0x24] ss:$8 sps:$4 sm:$0xff]   ;;  %v679_v6 = vld [vmem:[%s753_s21 + $0x20] ss:$8 sps:$4 sm:$0xff]  }
  0x13   : > { %309 = vmatpush1.bf16.msra.mxu0 %v673_v2  ;;  %v680_v7 = vld [vmem:[%s753_s21 + $0x34] ss:$8 sps:$4 sm:$0xff]   ;;  %v682_v8 = vld [vmem:[%s753_s21 + $0x30] ss:$8 sps:$4 sm:$0xff]   ;;  %v683_v9 = vld [vmem:[%s753_s21 + $0x44] ss:$8 sps:$4 sm:$0xff]  }
  0x14   : > { %310 = vmatprep.subr.bf16.mxu0 %v674_v3  ;;  %v685_v10 = vld [vmem:[%s753_s21 + $0x40] ss:$8 sps:$4 sm:$0xff]   ;;  %v686_v11 = vld [vmem:[%s753_s21 + $0x54] ss:$8 sps:$4 sm:$0xff]   ;;  %v688_v12 = vld [vmem:[%s753_s21 + $0x50] ss:$8 sps:$4 sm:$0xff]  }
  0x15   : > { %v689_v13 = vld [vmem:[%s753_s21 + $0x64] ss:$8 sps:$4 sm:$0xff]   ;;  %v691_v14 = vld [vmem:[%s753_s21 + $0x60] ss:$8 sps:$4 sm:$0xff]   ;;  %v692_v15 = vld [vmem:[%s753_s21 + $0x74] ss:$8 sps:$4 sm:$0xff]  }
  0x16   : > { %v694_v16 = vld [vmem:[%s753_s21 + $0x70] ss:$8 sps:$4 sm:$0xff]   ;;  %v695_v17 = vld [vmem:[%s197_s25] sm:$0xff]  }
  0x17   : > { %311 = vmatpush1.bf16.msra.mxu0 %v676_v4 }
  0x18   : > { %312 = vmatprep.subr.bf16.mxu0 %v677_v5 }
  0x1b   : > { %313 = vmatpush1.bf16.msra.mxu0 %v679_v6 }
  0x1c   : > { %314 = vmatprep.subr.bf16.mxu0 %v680_v7 }
  0x1f   : > { %315 = vmatpush1.bf16.msra.mxu0 %v682_v8 }
  0x20   : > { %316 = vmatprep.subr.bf16.mxu0 %v683_v9 }
  0x23   : > { %317 = vmatpush1.bf16.msra.mxu0 %v685_v10 }
  0x24   : > { %318 = vmatprep.subr.bf16.mxu0 %v686_v11 }
  0x27   : > { %319 = vmatpush1.bf16.msra.mxu0 %v688_v12 }
  0x28   : > { %320 = vmatprep.subr.bf16.mxu0 %v689_v13 }
  0x2b   : > { %321 = vmatpush1.bf16.msra.mxu0 %v691_v14 }
  0x2c   : > { %322 = vmatprep.subr.bf16.mxu0 %v692_v15 }
  0x2f   : > { %323 = vmatpush1.bf16.msra.mxu0 %v694_v16 }
  0x32   : > { %341 = vmatmul.mubr.bf16.vlgmr.msra.gmra.mrb[0].mxu0 %v695_v17 }
 0x103   : > { %361 = sbr.rel (%p637_p4) target bundleno = 266 (0x10a), region = 40 }
 0x105   : > { %v342_v18 = vpop.f32.mrb[0].mxu0 }
 0x106   : > { %354 = vst [vmem:[%s353_s27] sm:$0xff] %v342_v18  ;;  %v344_v19 = vpop.f32.mrb[1].mxu0 }
 0x107   : > { %355 = vst [vmem:[%s353_s27 + $0x8] sm:$0xff] %v344_v19  ;;  %v346_v20 = vpop.f32.mrb[2].mxu0 }
 0x108   : > { %356 = vst [vmem:[%s353_s27 + $0x10] sm:$0xff] %v346_v20  ;;  %v348_v21 = vpop.f32.mrb[3].mxu0 }
 0x109   : > { %357 = vst [vmem:[%s353_s27 + $0x18] sm:$0xff] %v348_v21 }
 0x10a PF: > { %v382_v23 = vmul.f32 %v342_v18, %v342_v18  ;;  %v383_v24 = vmul.f32 %v344_v19, %v344_v19  ;;  %v369_v25 = vadd.f32 %v344_v19, %v342_v18  ;;  %v384_v26 = vmul.f32 %v346_v20, %v346_v20  ;;  %v367_v31 = vld [vmem:[#allocation3] sm:$0xff]  ;;  %v380_v32 = vld [vmem:[#allocation4] sm:$0xff]  ;;  %v368_v36 = vld [vmem:[#allocation3 + $0x8] sm:$0xff]  ;;  %p638_p5 = scmp.ne.s32.totalorder %s744_s16, 3 }
 0x10b   : > { %v385_v27 = vmul.f32 %v348_v21, %v348_v21  ;;  %v372_v29 = vadd.f32 %v348_v21, %v346_v20  ;;  %vm377_vm1 = vcmask 7168   ;;  %v381_v38 = vld [vmem:[#allocation4 + $0x8] sm:$0xff]  ;;  %v712_v45 = vmov (!%p638_p5), 0   ;;  %v418_v60 = vld [vmem:[%s818_s2] sm:$0xff] (!%p638_p5)  ;;  %v419_v61 = vld [vmem:[%s818_s2 + $0x8] sm:$0xff] (!%p638_p5) }
 0x10c   : > { %v386_v28 = vadd.f32 %v383_v24, %v382_v23  ;;  %370 = vadd.xlane.f32.xlu0 %v369_v25  ;;  %697 = vset.pattern.permute.xlu1 (!%p638_p5), %v712_v45  ;;  %v422_v2 = vld [vmem:[%s819_s3] sm:$0xff] (!%p638_p5)  ;;  %v423_v4 = vld [vmem:[%s819_s3 + $0x8] sm:$0xff] (!%p638_p5) }
 0x10d   : > { %v389_v30 = vadd.f32 %v385_v27, %v384_v26  ;;  %696 = vset.pattern.permute.xlu0 (!%p638_p5), %v712_v45 }
 0x10e   : > { %387 = vadd.xlane.f32.xlu1 %v386_v28 }
 0x110   : > { %373 = vadd.xlane.f32.xlu0 %v372_v29  ;;  %v428_v8 = vld [vmem:[#allocation2] sm:$0xff] (!%p638_p5)  ;;  %v429_v9 = vld [vmem:[#allocation2 + $0x8] sm:$0xff] (!%p638_p5)  ;;  %v430_v17 = vld [vmem:[#allocation2 + $0x10] sm:$0xff] (!%p638_p5) }
 0x111   : > { %v432_v10 = vld [vmem:[#allocation2 + $0x20] sm:$0xff] (!%p638_p5)  ;;  %v433_v11 = vld [vmem:[#allocation2 + $0x28] sm:$0xff] (!%p638_p5)  ;;  %v431_v18 = vld [vmem:[#allocation2 + $0x18] sm:$0xff] (!%p638_p5) }
 0x112   : > { %390 = vadd.xlane.f32.xlu1 %v389_v30  ;;  %v436_v12 = vld [vmem:[#allocation2 + $0x40] sm:$0xff] (!%p638_p5)  ;;  %v437_v13 = vld [vmem:[#allocation2 + $0x48] sm:$0xff] (!%p638_p5)  ;;  %v434_v19 = vld [vmem:[#allocation2 + $0x30] sm:$0xff] (!%p638_p5) }
 0x113   : > { %v440_v14 = vld [vmem:[#allocation2 + $0x60] sm:$0xff] (!%p638_p5)  ;;  %v441_v16 = vld [vmem:[#allocation2 + $0x68] sm:$0xff] (!%p638_p5)  ;;  %v435_v20 = vld [vmem:[#allocation2 + $0x38] sm:$0xff] (!%p638_p5) }
 0x114   : > { %v438_v21 = vld [vmem:[#allocation2 + $0x50] sm:$0xff] (!%p638_p5)  ;;  %v439_v26 = vld [vmem:[#allocation2 + $0x58] sm:$0xff] (!%p638_p5) }
 0x115   : > { %v442_v27 = vld [vmem:[#allocation2 + $0x70] sm:$0xff] (!%p638_p5)  ;;  %v443_v28 = vld [vmem:[#allocation2 + $0x78] sm:$0xff] (!%p638_p5) }
 0x199   : > { %v371_v33 = vpop.xlane.xlu0 %370 }
 0x19a   : > { %v375_v34 = vadd.f32 %v371_v33, %v367_v31 }
 0x19b   : > { %v388_v35 = vpop.xlane.xlu1 %387 }
 0x19c   : > { %v392_v37 = vadd.f32 %v388_v35, %v380_v32  ;;  %378 = vst.msk [vmem:[#allocation3] sm:$0xff] %vm377_vm1, %v375_v34  ;;  %399 = sbr.rel (%p638_p5) target bundleno = 591 (0x24f), region = 44 }
 0x19d   : > { %v374_v39 = vpop.xlane.xlu0 %373 }
 0x19e   : > { %394 = vst.msk [vmem:[#allocation4] sm:$0xff] %vm377_vm1, %v392_v37  ;;  %v376_v40 = vadd.f32 %v374_v39, %v368_v36 }
 0x19f   : > { %v391_v41 = vpop.xlane.xlu1 %390 }
 0x1a0   : > { %v393_v42 = vadd.f32 %v391_v41, %v381_v38  ;;  %379 = vst.msk [vmem:[#allocation3 + $0x8] sm:$0xff] %vm377_vm1, %v376_v40 }
 0x1a2   : > { %395 = vst.msk [vmem:[#allocation4 + $0x8] sm:$0xff] %vm377_vm1, %v393_v42 }
 0x1a3   : > { %v400_v43 = vld [vmem:[#allocation3] sm:$0xff] }
 0x1a4   : > { %v402_v46 = vmul.f32 0.0009765625, %v400_v43 }
 0x1a5   : > { %v404_v44 = vld [vmem:[#allocation4] sm:$0xff] }
 0x1a6   : > { %v406_v47 = vmul.f32 0.0009765625, %v404_v44  ;;  %v408_v52 = vmul.f32 %v402_v46, %v402_v46 }
 0x1a7   : > { %v401_v48 = vld [vmem:[#allocation3 + $0x8] sm:$0xff] }
 0x1a8   : > { %v403_v50 = vmul.f32 0.0009765625, %v401_v48  ;;  %v410_v54 = vsub.f32 %v406_v47, %v408_v52 }
 0x1a9   : > { %v405_v49 = vld [vmem:[#allocation4 + $0x8] sm:$0xff] }
 0x1aa   : > { %v407_v51 = vmul.f32 0.0009765625, %v405_v49  ;;  %v409_v53 = vmul.f32 %v403_v50, %v403_v50  ;;  %v412_v56 = vmax.f32 %v410_v54, 0.0 }
 0x1ac   : > { %v411_v55 = vsub.f32 %v407_v51, %v409_v53  ;;  %v414_v58 = vadd.f32 1e-05, %v412_v56 }
 0x1ae   : > { %v413_v57 = vmax.f32 %v411_v55, 0.0  ;;  %698 = vrsqrt.f32 %v414_v58 }
 0x1b0   : > { %v415_v59 = vadd.f32 1e-05, %v413_v57 }
 0x1b2   : > { %700 = vrsqrt.f32 %v415_v59 }
 0x1b8   : > { %v699_v62 = vpop.eup %698 }
 0x1b9   : > { %v420_v0 = vmul.f32 %v699_v62, %v418_v60 }
 0x1bb   : > { %446 = vperm.xlu0 %696, %v420_v0   ;;  %v424_v3 = vmul.f32 %v420_v0, %v402_v46 }
 0x1bc   : > { %v701_v63 = vpop.eup %700 }
 0x1bd   : > { %v421_v1 = vmul.f32 %v701_v63, %v419_v61  ;;  %v426_v6 = vsub.f32 %v422_v2, %v424_v3 }
 0x1bf   : > { %v425_v5 = vmul.f32 %v421_v1, %v403_v50  ;;  %451 = vperm.xlu0 %696, %v421_v1   ;;  %472 = vperm.xlu1 %697, %v426_v6  }
 0x1c1   : > { %v427_v7 = vsub.f32 %v423_v4, %v425_v5 }
 0x1c3   : > { %477 = vperm.xlu1 %697, %v427_v7  }
 0x23a   : > { %v447_v15 = vpop.permute.xlu0 %446 }
 0x23b   : > { %v454_v22 = vmul.f32 %v447_v15, %v428_v8  ;;  %v455_v23 = vmul.f32 %v447_v15, %v429_v9  ;;  %v458_v24 = vmul.f32 %v447_v15, %v432_v10  ;;  %v459_v25 = vmul.f32 %v447_v15, %v433_v11 }
 0x23c   : > { %v462_v29 = vmul.f32 %v447_v15, %v436_v12  ;;  %v463_v30 = vmul.f32 %v447_v15, %v437_v13  ;;  %v466_v31 = vmul.f32 %v447_v15, %v440_v14  ;;  %v467_v32 = vmul.f32 %v447_v15, %v441_v16 }
 0x23e   : > { %v452_v33 = vpop.permute.xlu0 %451  ;;  %v473_v34 = vpop.permute.xlu1 %472 }
 0x23f   : > { %v456_v35 = vmul.f32 %v452_v33, %v430_v17  ;;  %v457_v36 = vmul.f32 %v452_v33, %v431_v18  ;;  %v460_v37 = vmul.f32 %v452_v33, %v434_v19  ;;  %v461_v38 = vmul.f32 %v452_v33, %v435_v20 }
 0x240   : > { %v464_v39 = vmul.f32 %v452_v33, %v438_v21  ;;  %v465_v40 = vmul.f32 %v452_v33, %v439_v26  ;;  %v468_v41 = vmul.f32 %v452_v33, %v442_v27  ;;  %v469_v42 = vmul.f32 %v452_v33, %v443_v28 }
 0x241   : > { %v480_v43 = vadd.f32 %v473_v34, %v454_v22  ;;  %v481_v44 = vadd.f32 %v473_v34, %v455_v23  ;;  %v484_v45 = vadd.f32 %v473_v34, %v458_v24  ;;  %v485_v46 = vadd.f32 %v473_v34, %v459_v25 }
 0x242   : > { %v488_v47 = vadd.f32 %v473_v34, %v462_v29  ;;  %v489_v48 = vadd.f32 %v473_v34, %v463_v30  ;;  %v492_v49 = vadd.f32 %v473_v34, %v466_v31  ;;  %v493_v50 = vadd.f32 %v473_v34, %v467_v32  ;;  %v478_v51 = vpop.permute.xlu1 %477 }
 0x243   : > { %v496_v52 = vmax.f32 %v480_v43, 0.0  ;;  %v497_v53 = vmax.f32 %v481_v44, 0.0  ;;  %v500_v54 = vmax.f32 %v484_v45, 0.0  ;;  %v501_v55 = vmax.f32 %v485_v46, 0.0 }
 0x244   : > { %v504_v56 = vmax.f32 %v488_v47, 0.0  ;;  %v505_v57 = vmax.f32 %v489_v48, 0.0  ;;  %v508_v58 = vmax.f32 %v492_v49, 0.0  ;;  %v509_v59 = vmax.f32 %v493_v50, 0.0 }
 0x245   : > { %v652_v60 = vpack.c.bf16 %v497_v53, %v496_v52  ;;  %v654_v61 = vpack.c.bf16 %v501_v55, %v500_v54  ;;  %v482_v62 = vadd.f32 %v478_v51, %v456_v35  ;;  %v483_v63 = vadd.f32 %v478_v51, %v457_v36 }
 0x246   : > { %v656_v0 = vpack.c.bf16 %v505_v57, %v504_v56  ;;  %v658_v1 = vpack.c.bf16 %v509_v59, %v508_v58  ;;  %v486_v2 = vadd.f32 %v478_v51, %v460_v37  ;;  %v487_v3 = vadd.f32 %v478_v51, %v461_v38 }
 0x247   : > { %560 = vst [vmem:[%s820_s4] sm:$0xff] %v652_v60  ;;  %562 = vst [vmem:[%s820_s4 + $0x10] sm:$0xff] %v654_v61  ;;  %v490_v4 = vadd.f32 %v478_v51, %v464_v39  ;;  %v491_v5 = vadd.f32 %v478_v51, %v465_v40  ;;  %v494_v6 = vadd.f32 %v478_v51, %v468_v41  ;;  %v498_v8 = vmax.f32 %v482_v62, 0.0 }
 0x248   : > { %v495_v7 = vadd.f32 %v478_v51, %v469_v42  ;;  %564 = vst [vmem:[%s820_s4 + $0x20] sm:$0xff] %v656_v0  ;;  %566 = vst [vmem:[%s820_s4 + $0x30] sm:$0xff] %v658_v1  ;;  %v499_v9 = vmax.f32 %v483_v63, 0.0  ;;  %v502_v10 = vmax.f32 %v486_v2, 0.0  ;;  %v503_v11 = vmax.f32 %v487_v3, 0.0 }
 0x249   : > { %v506_v12 = vmax.f32 %v490_v4, 0.0  ;;  %v507_v13 = vmax.f32 %v491_v5, 0.0  ;;  %v510_v14 = vmax.f32 %v494_v6, 0.0 }
 0x24a   : > { %v511_v15 = vmax.f32 %v495_v7, 0.0  ;;  %v653_v16 = vpack.c.bf16 %v499_v9, %v498_v8  ;;  %v655_v17 = vpack.c.bf16 %v503_v11, %v502_v10 }
 0x24b   : > { %v657_v18 = vpack.c.bf16 %v507_v13, %v506_v12 }
 0x24c   : > { %v659_v19 = vpack.c.bf16 %v511_v15, %v510_v14  ;;  %561 = vst [vmem:[%s820_s4 + $0x8] sm:$0xff] %v653_v16  ;;  %563 = vst [vmem:[%s820_s4 + $0x18] sm:$0xff] %v655_v17 }
 0x24d   : > { %565 = vst [vmem:[%s820_s4 + $0x28] sm:$0xff] %v657_v18 }
 0x24e   : > { %567 = vst [vmem:[%s820_s4 + $0x38] sm:$0xff] %v659_v19 }
 0x24f PF: > { %s14_s15 = sadd.s32 1, %s708_s15  }
 0x250   : > { %p11_p6 = scmp.ge.s32.totalorder %s14_s15, 6  }
 0x252   :  { %13 = sbr.rel (!%p11_p6) target bundleno = 1 (0x1), region = 74 }

// kernel: stven_forward.19
= control target key start
LH: loop header
LB: loop body
LE: loop exit
PB: predicated region body
PF: predicated region fallthrough
CT: control target
= control target key end

     0   :  { %s3220_s1 = inlined_call_operand.vmem [shape: bf16[512,1024], index: 1, kind: input, shape index: {}]   ;;  %s3221_s0 = inlined_call_operand.vmem [shape: bf16[16,512], index: 0, kind: input, shape index: {}]   ;;  %s3222_s2 = inlined_call_operand.vmem [shape: f32[16,1024], index: 2, kind: input, shape index: {}]   ;;  %s3223_s3 = inlined_call_operand.vmem [shape: f32[16,1024], index: 3, kind: output, shape index: {}]  }
   0x1   :  { %v18_v0 = vld [vmem:[%s3220_s1] sm:$0xff]  ;;  %v19_v2 = vld [vmem:[%s3220_s1 + $0x8] sm:$0xff] }
   0x2   :  { %v22_v1 = vld [vmem:[%s3220_s1 + $0x20] sm:$0xff]  ;;  %v23_v4 = vld [vmem:[%s3220_s1 + $0x28] sm:$0xff] }
   0x3   :  { %v1991_v3 = vcombine.high %v18_v0, %v22_v1  ;;  %v1990_v5 = vcombine.low %v18_v0, %v22_v1  ;;  %v26_v6 = vld [vmem:[%s3220_s1 + $0x40] sm:$0xff]  ;;  %v1993_v8 = vcombine.high %v19_v2, %v23_v4  ;;  %v1992_v9 = vcombine.low %v19_v2, %v23_v4  ;;  %v27_v11 = vld [vmem:[%s3220_s1 + $0x48] sm:$0xff] }
   0x4   :  { %v30_v7 = vld [vmem:[%s3220_s1 + $0x60] sm:$0xff]  ;;  %v31_v12 = vld [vmem:[%s3220_s1 + $0x68] sm:$0xff] }
   0x5   :  { %v1999_v10 = vcombine.high %v26_v6, %v30_v7  ;;  %v34_v13 = vld [vmem:[%s3220_s1 + $0x80] sm:$0xff]  ;;  %1574 = vmatprep.subr.bf16.mxu0 %v1991_v3  ;;  %v2001_v14 = vcombine.high %v27_v11, %v31_v12  ;;  %v35_v16 = vld [vmem:[%s3220_s1 + $0x88] sm:$0xff]  ;;  %1660 = vmatprep.subr.bf16.mxu1 %v1993_v8  ;;  %v1998_v18 = vcombine.low %v26_v6, %v30_v7 }
   0x6   :  { %v38_v15 = vld [vmem:[%s3220_s1 + $0xa0] sm:$0xff]  ;;  %v39_v17 = vld [vmem:[%s3220_s1 + $0xa8] sm:$0xff]  ;;  %1575 = vmatpush1.bf16.msra.mxu0 %v1990_v5  ;;  %1661 = vmatpush1.bf16.msra.mxu1 %v1992_v9  ;;  %v2000_v19 = vcombine.low %v27_v11, %v31_v12 }
   0x7   :  { %1576 = vmatprep.subr.bf16.mxu0 %v1999_v10  ;;  %v2007_v20 = vcombine.high %v34_v13, %v38_v15  ;;  %1662 = vmatprep.subr.bf16.mxu1 %v2001_v14  ;;  %v2009_v21 = vcombine.high %v35_v16, %v39_v17  ;;  %v42_v22 = vld [vmem:[%s3220_s1 + $0xc0] sm:$0xff]  ;;  %v43_v24 = vld [vmem:[%s3220_s1 + $0xc8] sm:$0xff]  ;;  %v2006_v26 = vcombine.low %v34_v13, %v38_v15 }
   0x8   :  { %v46_v23 = vld [vmem:[%s3220_s1 + $0xe0] sm:$0xff]  ;;  %v47_v25 = vld [vmem:[%s3220_s1 + $0xe8] sm:$0xff]  ;;  %v2008_v27 = vcombine.low %v35_v16, %v39_v17 }
   0x9   :  { %v2015_v28 = vcombine.high %v42_v22, %v46_v23  ;;  %v2017_v29 = vcombine.high %v43_v24, %v47_v25  ;;  %v50_v30 = vld [vmem:[%s3220_s1 + $0x100] sm:$0xff]  ;;  %v51_v32 = vld [vmem:[%s3220_s1 + $0x108] sm:$0xff]  ;;  %v2014_v34 = vcombine.low %v42_v22, %v46_v23  ;;  %v2016_v35 = vcombine.low %v43_v24, %v47_v25 }
   0xa   :  { %1577 = vmatpush1.bf16.msra.mxu0 %v1998_v18  ;;  %1663 = vmatpush1.bf16.msra.mxu1 %v2000_v19  ;;  %v54_v31 = vld [vmem:[%s3220_s1 + $0x120] sm:$0xff]  ;;  %v55_v33 = vld [vmem:[%s3220_s1 + $0x128] sm:$0xff] }
   0xb   :  { %1578 = vmatprep.subr.bf16.mxu0 %v2007_v20  ;;  %1664 = vmatprep.subr.bf16.mxu1 %v2009_v21  ;;  %v2023_v36 = vcombine.high %v50_v30, %v54_v31  ;;  %v2025_v37 = vcombine.high %v51_v32, %v55_v33  ;;  %v58_v38 = vld [vmem:[%s3220_s1 + $0x140] sm:$0xff]  ;;  %v59_v40 = vld [vmem:[%s3220_s1 + $0x148] sm:$0xff]  ;;  %v2022_v42 = vcombine.low %v50_v30, %v54_v31 }
   0xc   :  { %v62_v39 = vld [vmem:[%s3220_s1 + $0x160] sm:$0xff]  ;;  %v63_v41 = vld [vmem:[%s3220_s1 + $0x168] sm:$0xff]  ;;  %v2024_v43 = vcombine.low %v51_v32, %v55_v33 }
   0xd   :  { %v2031_v44 = vcombine.high %v58_v38, %v62_v39  ;;  %v2033_v45 = vcombine.high %v59_v40, %v63_v41  ;;  %v66_v46 = vld [vmem:[%s3220_s1 + $0x180] sm:$0xff]  ;;  %v67_v48 = vld [vmem:[%s3220_s1 + $0x188] sm:$0xff]  ;;  %v2030_v50 = vcombine.low %v58_v38, %v62_v39  ;;  %v2032_v51 = vcombine.low %v59_v40, %v63_v41 }
   0xe   :  { %1579 = vmatpush1.bf16.msra.mxu0 %v2006_v26  ;;  %1665 = vmatpush1.bf16.msra.mxu1 %v2008_v27  ;;  %v70_v47 = vld [vmem:[%s3220_s1 + $0x1a0] sm:$0xff]  ;;  %v71_v49 = vld [vmem:[%s3220_s1 + $0x1a8] sm:$0xff] }
   0xf   :  { %1580 = vmatprep.subr.bf16.mxu0 %v2015_v28  ;;  %1666 = vmatprep.subr.bf16.mxu1 %v2017_v29  ;;  %v2039_v52 = vcombine.high %v66_v46, %v70_v47  ;;  %v2041_v53 = vcombine.high %v67_v48, %v71_v49  ;;  %v74_v54 = vld [vmem:[%s3220_s1 + $0x1c0] sm:$0xff]  ;;  %v75_v57 = vld [vmem:[%s3220_s1 + $0x1c8] sm:$0xff]  ;;  %v2038_v59 = vcombine.low %v66_v46, %v70_v47 }
  0x10   :  { %v78_v55 = vld [vmem:[%s3220_s1 + $0x1e0] sm:$0xff]  ;;  %v79_v58 = vld [vmem:[%s3220_s1 + $0x1e8] sm:$0xff]  ;;  %v2040_v60 = vcombine.low %v67_v48, %v71_v49 }
  0x11   :  { %v2413_v56 = vld [vmem:[%s3221_s0 + $0x4] ss:$16 sps:$4 sm:$0xff]   ;;  %v2047_v61 = vcombine.high %v74_v54, %v78_v55  ;;  %v2049_v62 = vcombine.high %v75_v57, %v79_v58  ;;  %v83_v1 = vld [vmem:[%s3220_s1 + $0x208] sm:$0xff]  ;;  %v2046_v3 = vcombine.low %v74_v54, %v78_v55  ;;  %v2048_v4 = vcombine.low %v75_v57, %v79_v58 }
  0x12   :  { %1581 = vmatpush1.bf16.msra.mxu0 %v2014_v34  ;;  %1667 = vmatpush1.bf16.msra.mxu1 %v2016_v35  ;;  %v82_v63 = vld [vmem:[%s3220_s1 + $0x200] sm:$0xff]  ;;  %v87_v2 = vld [vmem:[%s3220_s1 + $0x228] sm:$0xff] }
  0x13   :  { %1582 = vmatprep.subr.bf16.mxu0 %v2023_v36  ;;  %1668 = vmatprep.subr.bf16.mxu1 %v2025_v37  ;;  %v86_v0 = vld [vmem:[%s3220_s1 + $0x220] sm:$0xff]  ;;  %v2057_v6 = vcombine.high %v83_v1, %v87_v2  ;;  %v91_v9 = vld [vmem:[%s3220_s1 + $0x248] sm:$0xff]  ;;  %v2056_v12 = vcombine.low %v83_v1, %v87_v2 }
  0x14   :  { %1606 = vmatprep.mubr.bf16.mxu0 %v2413_v56  ;;  %1692 = vmatprep.mubr.bf16.mxu1 %v2413_v56  ;;  %v2055_v5 = vcombine.high %v82_v63, %v86_v0  ;;  %v90_v7 = vld [vmem:[%s3220_s1 + $0x240] sm:$0xff]  ;;  %v95_v10 = vld [vmem:[%s3220_s1 + $0x268] sm:$0xff]  ;;  %v2054_v11 = vcombine.low %v82_v63, %v86_v0 }
  0x15   :  { %v94_v8 = vld [vmem:[%s3220_s1 + $0x260] sm:$0xff]  ;;  %v2065_v14 = vcombine.high %v91_v9, %v95_v10  ;;  %v99_v17 = vld [vmem:[%s3220_s1 + $0x288] sm:$0xff]  ;;  %v2064_v20 = vcombine.low %v91_v9, %v95_v10 }
  0x16   :  { %1583 = vmatpush1.bf16.msra.mxu0 %v2022_v42  ;;  %1669 = vmatpush1.bf16.msra.mxu1 %v2024_v43  ;;  %v2063_v13 = vcombine.high %v90_v7, %v94_v8  ;;  %v98_v15 = vld [vmem:[%s3220_s1 + $0x280] sm:$0xff]  ;;  %v103_v18 = vld [vmem:[%s3220_s1 + $0x2a8] sm:$0xff]  ;;  %v2062_v19 = vcombine.low %v90_v7, %v94_v8 }
  0x17   :  { %1584 = vmatprep.subr.bf16.mxu0 %v2031_v44  ;;  %1670 = vmatprep.subr.bf16.mxu1 %v2033_v45  ;;  %v102_v16 = vld [vmem:[%s3220_s1 + $0x2a0] sm:$0xff]  ;;  %v2073_v22 = vcombine.high %v99_v17, %v103_v18  ;;  %v107_v25 = vld [vmem:[%s3220_s1 + $0x2c8] sm:$0xff]  ;;  %v2072_v28 = vcombine.low %v99_v17, %v103_v18 }
  0x18   :  { %v2071_v21 = vcombine.high %v98_v15, %v102_v16  ;;  %v106_v23 = vld [vmem:[%s3220_s1 + $0x2c0] sm:$0xff]  ;;  %v111_v26 = vld [vmem:[%s3220_s1 + $0x2e8] sm:$0xff]  ;;  %v2070_v27 = vcombine.low %v98_v15, %v102_v16 }
  0x19   :  { %v110_v24 = vld [vmem:[%s3220_s1 + $0x2e0] sm:$0xff]  ;;  %v2081_v30 = vcombine.high %v107_v25, %v111_v26  ;;  %v115_v33 = vld [vmem:[%s3220_s1 + $0x308] sm:$0xff]  ;;  %v2080_v36 = vcombine.low %v107_v25, %v111_v26 }
  0x1a   :  { %1585 = vmatpush1.bf16.msra.mxu0 %v2030_v50  ;;  %1671 = vmatpush1.bf16.msra.mxu1 %v2032_v51  ;;  %v2079_v29 = vcombine.high %v106_v23, %v110_v24  ;;  %v114_v31 = vld [vmem:[%s3220_s1 + $0x300] sm:$0xff]  ;;  %v119_v34 = vld [vmem:[%s3220_s1 + $0x328] sm:$0xff]  ;;  %v2078_v35 = vcombine.low %v106_v23, %v110_v24 }
  0x1b   :  { %1586 = vmatprep.subr.bf16.mxu0 %v2039_v52  ;;  %1672 = vmatprep.subr.bf16.mxu1 %v2041_v53  ;;  %v118_v32 = vld [vmem:[%s3220_s1 + $0x320] sm:$0xff]  ;;  %v2089_v38 = vcombine.high %v115_v33, %v119_v34  ;;  %v123_v41 = vld [vmem:[%s3220_s1 + $0x348] sm:$0xff]  ;;  %v2088_v44 = vcombine.low %v115_v33, %v119_v34 }
  0x1c   :  { %v2087_v37 = vcombine.high %v114_v31, %v118_v32  ;;  %v122_v39 = vld [vmem:[%s3220_s1 + $0x340] sm:$0xff]  ;;  %v127_v42 = vld [vmem:[%s3220_s1 + $0x368] sm:$0xff]  ;;  %v2086_v43 = vcombine.low %v114_v31, %v118_v32 }
  0x1d   :  { %v126_v40 = vld [vmem:[%s3220_s1 + $0x360] sm:$0xff]  ;;  %v2097_v46 = vcombine.high %v123_v41, %v127_v42  ;;  %v131_v49 = vld [vmem:[%s3220_s1 + $0x388] sm:$0xff]  ;;  %v2096_v52 = vcombine.low %v123_v41, %v127_v42 }
  0x1e   :  { %1587 = vmatpush1.bf16.msra.mxu0 %v2038_v59  ;;  %1673 = vmatpush1.bf16.msra.mxu1 %v2040_v60  ;;  %v2095_v45 = vcombine.high %v122_v39, %v126_v40  ;;  %v130_v47 = vld [vmem:[%s3220_s1 + $0x380] sm:$0xff]  ;;  %v135_v50 = vld [vmem:[%s3220_s1 + $0x3a8] sm:$0xff]  ;;  %v2094_v51 = vcombine.low %v122_v39, %v126_v40 }
  0x1f   :  { %1588 = vmatprep.subr.bf16.mxu0 %v2047_v61  ;;  %1674 = vmatprep.subr.bf16.mxu1 %v2049_v62  ;;  %v134_v48 = vld [vmem:[%s3220_s1 + $0x3a0] sm:$0xff]  ;;  %v2105_v54 = vcombine.high %v131_v49, %v135_v50  ;;  %v139_v58 = vld [vmem:[%s3220_s1 + $0x3c8] sm:$0xff]  ;;  %v2104_v61 = vcombine.low %v131_v49, %v135_v50 }
  0x20   :  { %v2103_v53 = vcombine.high %v130_v47, %v134_v48  ;;  %v138_v55 = vld [vmem:[%s3220_s1 + $0x3c0] sm:$0xff]  ;;  %v143_v59 = vld [vmem:[%s3220_s1 + $0x3e8] sm:$0xff]  ;;  %v2102_v60 = vcombine.low %v130_v47, %v134_v48 }
  0x21   :  { %v142_v57 = vld [vmem:[%s3220_s1 + $0x3e0] sm:$0xff]  ;;  %v2113_v63 = vcombine.high %v139_v58, %v143_v59  ;;  %v147_v2 = vld [vmem:[%s3220_s1 + $0x408] sm:$0xff] }
  0x22   :  { %1589 = vmatpush1.bf16.msra.mxu0 %v2046_v3  ;;  %1675 = vmatpush1.bf16.msra.mxu1 %v2048_v4  ;;  %v2111_v62 = vcombine.high %v138_v55, %v142_v57  ;;  %v146_v0 = vld [vmem:[%s3220_s1 + $0x400] sm:$0xff]  ;;  %v151_v3 = vld [vmem:[%s3220_s1 + $0x428] sm:$0xff]  ;;  %v2110_v4 = vcombine.low %v138_v55, %v142_v57 }
  0x23   :  { %1590 = vmatprep.subr.bf16.mxu0 %v2055_v5  ;;  %1676 = vmatprep.subr.bf16.mxu1 %v2057_v6  ;;  %v150_v1 = vld [vmem:[%s3220_s1 + $0x420] sm:$0xff]  ;;  %v2112_v5 = vcombine.low %v139_v58, %v143_v59  ;;  %v2121_v7 = vcombine.high %v147_v2, %v151_v3 }
  0x24   :  { %v2119_v6 = vcombine.high %v146_v0, %v150_v1  ;;  %v154_v8 = vld [vmem:[%s3220_s1 + $0x440] sm:$0xff] }
  0x25   :  { %v158_v9 = vld [vmem:[%s3220_s1 + $0x460] sm:$0xff] }
  0x26   :  { %1591 = vmatpush1.bf16.msra.mxu0 %v2054_v11  ;;  %1677 = vmatpush1.bf16.msra.mxu1 %v2056_v12  ;;  %v2540_v10 = vld [vmem:[%s3221_s0] ss:$16 sps:$4 sm:$0xff]   ;;  %v155_v11 = vld [vmem:[%s3220_s1 + $0x448] sm:$0xff]  ;;  %v2127_v15 = vcombine.high %v154_v8, %v158_v9 }
  0x27   :  { %1592 = vmatprep.subr.bf16.mxu0 %v2063_v13  ;;  %1678 = vmatprep.subr.bf16.mxu1 %v2065_v14  ;;  %v159_v12 = vld [vmem:[%s3220_s1 + $0x468] sm:$0xff]  ;;  %v2118_v13 = vcombine.low %v146_v0, %v150_v1  ;;  %v2120_v14 = vcombine.low %v147_v2, %v151_v3  ;;  %v162_v17 = vld [vmem:[%s3220_s1 + $0x480] sm:$0xff] }
  0x28   :  { %v2129_v16 = vcombine.high %v155_v11, %v159_v12  ;;  %v166_v18 = vld [vmem:[%s3220_s1 + $0x4a0] sm:$0xff]  ;;  %v2128_v23 = vcombine.low %v155_v11, %v159_v12 }
  0x29   :  { %v2135_v24 = vcombine.high %v162_v17, %v166_v18  ;;  %v170_v26 = vld [vmem:[%s3220_s1 + $0x4c0] sm:$0xff] }
  0x2a   :  { %1593 = vmatpush1.bf16.msra.mxu0 %v2062_v19  ;;  %1679 = vmatpush1.bf16.msra.mxu1 %v2064_v20  ;;  %v2557_v19 = vld [vmem:[%s3221_s0 + $0xc] ss:$16 sps:$4 sm:$0xff]   ;;  %v178_v34 = vld [vmem:[%s3220_s1 + $0x500] sm:$0xff] }
  0x2b   :  { %1594 = vmatprep.subr.bf16.mxu0 %v2071_v21  ;;  %1680 = vmatprep.subr.bf16.mxu1 %v2073_v22  ;;  %v163_v20 = vld [vmem:[%s3220_s1 + $0x488] sm:$0xff]  ;;  %v2126_v22 = vcombine.low %v154_v8, %v158_v9  ;;  %v186_v42 = vld [vmem:[%s3220_s1 + $0x540] sm:$0xff] }
  0x2c   :  { %v167_v21 = vld [vmem:[%s3220_s1 + $0x4a8] sm:$0xff]  ;;  %v194_v50 = vld [vmem:[%s3220_s1 + $0x580] sm:$0xff] }
  0x2d   :  { %v2137_v25 = vcombine.high %v163_v20, %v167_v21  ;;  %v2136_v31 = vcombine.low %v163_v20, %v167_v21  ;;  %v202_v59 = vld [vmem:[%s3220_s1 + $0x5c0] sm:$0xff] }
  0x2e   :  { %1595 = vmatpush1.bf16.msra.mxu0 %v2070_v27  ;;  %1681 = vmatpush1.bf16.msra.mxu1 %v2072_v28  ;;  %v174_v27 = vld [vmem:[%s3220_s1 + $0x4e0] sm:$0xff]  ;;  %v171_v28 = vld [vmem:[%s3220_s1 + $0x4c8] sm:$0xff] }
  0x2f   :  { %1596 = vmatprep.subr.bf16.mxu0 %v2079_v29  ;;  %1682 = vmatprep.subr.bf16.mxu1 %v2081_v30  ;;  %v175_v29 = vld [vmem:[%s3220_s1 + $0x4e8] sm:$0xff]  ;;  %v2134_v30 = vcombine.low %v162_v17, %v166_v18  ;;  %v2143_v32 = vcombine.high %v170_v26, %v174_v27  ;;  %v210_v3 = vld [vmem:[%s3220_s1 + $0x600] sm:$0xff] }
  0x30   :  { %v2145_v33 = vcombine.high %v171_v28, %v175_v29  ;;  %v2144_v39 = vcombine.low %v171_v28, %v175_v29  ;;  %v218_v12 = vld [vmem:[%s3220_s1 + $0x640] sm:$0xff] }
  0x31   :  { %v226_v21 = vld [vmem:[%s3220_s1 + $0x680] sm:$0xff] }
  0x32   :  { %1597 = vmatpush1.bf16.msra.mxu0 %v2078_v35  ;;  %1683 = vmatpush1.bf16.msra.mxu1 %v2080_v36  ;;  %v182_v35 = vld [vmem:[%s3220_s1 + $0x520] sm:$0xff]  ;;  %v179_v36 = vld [vmem:[%s3220_s1 + $0x508] sm:$0xff] }
  0x33   :  { %1598 = vmatprep.subr.bf16.mxu0 %v2087_v37  ;;  %1684 = vmatprep.subr.bf16.mxu1 %v2089_v38  ;;  %v183_v37 = vld [vmem:[%s3220_s1 + $0x528] sm:$0xff]  ;;  %v2142_v38 = vcombine.low %v170_v26, %v174_v27  ;;  %v2151_v40 = vcombine.high %v178_v34, %v182_v35  ;;  %v234_v29 = vld [vmem:[%s3220_s1 + $0x6c0] sm:$0xff] }
  0x34   :  { %v2153_v41 = vcombine.high %v179_v36, %v183_v37  ;;  %v2152_v47 = vcombine.low %v179_v36, %v183_v37  ;;  %v242_v37 = vld [vmem:[%s3220_s1 + $0x700] sm:$0xff] }
  0x36   :  { %1599 = vmatpush1.bf16.msra.mxu0 %v2086_v43  ;;  %1685 = vmatpush1.bf16.msra.mxu1 %v2088_v44  ;;  %v190_v43 = vld [vmem:[%s3220_s1 + $0x560] sm:$0xff]  ;;  %v187_v44 = vld [vmem:[%s3220_s1 + $0x548] sm:$0xff] }
  0x37   :  { %1600 = vmatprep.subr.bf16.mxu0 %v2095_v45  ;;  %1686 = vmatprep.subr.bf16.mxu1 %v2097_v46  ;;  %v191_v45 = vld [vmem:[%s3220_s1 + $0x568] sm:$0xff]  ;;  %v2150_v46 = vcombine.low %v178_v34, %v182_v35  ;;  %v2159_v48 = vcombine.high %v186_v42, %v190_v43 }
  0x38   :  { %v2161_v49 = vcombine.high %v187_v44, %v191_v45  ;;  %v2160_v55 = vcombine.low %v187_v44, %v191_v45  ;;  %v250_v45 = vld [vmem:[%s3220_s1 + $0x740] sm:$0xff] }
  0x3a   :  { %1601 = vmatpush1.bf16.msra.mxu0 %v2094_v51  ;;  %1687 = vmatpush1.bf16.msra.mxu1 %v2096_v52  ;;  %v198_v51 = vld [vmem:[%s3220_s1 + $0x5a0] sm:$0xff]  ;;  %v195_v52 = vld [vmem:[%s3220_s1 + $0x588] sm:$0xff] }
  0x3b   :  { %1602 = vmatprep.subr.bf16.mxu0 %v2103_v53  ;;  %1688 = vmatprep.subr.bf16.mxu1 %v2105_v54  ;;  %v199_v53 = vld [vmem:[%s3220_s1 + $0x5a8] sm:$0xff]  ;;  %v2158_v54 = vcombine.low %v186_v42, %v190_v43  ;;  %v2167_v57 = vcombine.high %v194_v50, %v198_v51 }
  0x3c   :  { %v2169_v58 = vcombine.high %v195_v52, %v199_v53  ;;  %v2168_v0 = vcombine.low %v195_v52, %v199_v53  ;;  %v258_v53 = vld [vmem:[%s3220_s1 + $0x780] sm:$0xff] }
  0x3e   :  { %1603 = vmatpush1.bf16.msra.mxu0 %v2102_v60  ;;  %1689 = vmatpush1.bf16.msra.mxu1 %v2104_v61  ;;  %v206_v60 = vld [vmem:[%s3220_s1 + $0x5e0] sm:$0xff]  ;;  %v203_v61 = vld [vmem:[%s3220_s1 + $0x5c8] sm:$0xff] }
  0x3f   :  { %1604 = vmatprep.subr.bf16.mxu0 %v2111_v62  ;;  %1690 = vmatprep.subr.bf16.mxu1 %v2113_v63  ;;  %v207_v62 = vld [vmem:[%s3220_s1 + $0x5e8] sm:$0xff]  ;;  %v2166_v63 = vcombine.low %v194_v50, %v198_v51  ;;  %v2175_v1 = vcombine.high %v202_v59, %v206_v60 }
  0x40   :  { %v2177_v2 = vcombine.high %v203_v61, %v207_v62  ;;  %v2176_v8 = vcombine.low %v203_v61, %v207_v62  ;;  %v266_v62 = vld [vmem:[%s3220_s1 + $0x7c0] sm:$0xff] }
  0x42   :  { %1605 = vmatpush1.bf16.msra.mxu0 %v2110_v4  ;;  %1691 = vmatpush1.bf16.msra.mxu1 %v2112_v5  ;;  %v214_v4 = vld [vmem:[%s3220_s1 + $0x620] sm:$0xff]  ;;  %v211_v5 = vld [vmem:[%s3220_s1 + $0x608] sm:$0xff] }
  0x43   :  { %1617 = vmatprep.subr.bf16.mxu0 %v2119_v6  ;;  %1703 = vmatprep.subr.bf16.mxu1 %v2121_v7  ;;  %v215_v6 = vld [vmem:[%s3220_s1 + $0x628] sm:$0xff]  ;;  %v2174_v7 = vcombine.low %v202_v59, %v206_v60  ;;  %v2183_v9 = vcombine.high %v210_v3, %v214_v4 }
  0x44   :  { %v2185_v11 = vcombine.high %v211_v5, %v215_v6  ;;  %v2184_v17 = vcombine.low %v211_v5, %v215_v6  ;;  %v20_v6 = vld [vmem:[%s3220_s1 + $0x10] sm:$0xff] }
  0x45   :  { %1607 = vmatmul.mubr.bf16.vlgmr.msra.gmra.mrb[0].mxu0 %v2540_v10  ;;  %1693 = vmatmul.mubr.bf16.vlgmr.msra.gmra.mrb[0].mxu1 %v2540_v10 }
  0x46   :  { %1618 = vmatpush1.bf16.msra.mxu0 %v2118_v13  ;;  %1704 = vmatpush1.bf16.msra.mxu1 %v2120_v14  ;;  %v222_v13 = vld [vmem:[%s3220_s1 + $0x660] sm:$0xff]  ;;  %v219_v14 = vld [vmem:[%s3220_s1 + $0x648] sm:$0xff] }
  0x47   :  { %1619 = vmatprep.subr.bf16.mxu0 %v2127_v15  ;;  %1705 = vmatprep.subr.bf16.mxu1 %v2129_v16  ;;  %v223_v15 = vld [vmem:[%s3220_s1 + $0x668] sm:$0xff]  ;;  %v2182_v16 = vcombine.low %v210_v3, %v214_v4  ;;  %v2191_v18 = vcombine.high %v218_v12, %v222_v13 }
  0x48   :  { %1649 = vmatprep.mubr.bf16.mxu0 %v2557_v19  ;;  %1735 = vmatprep.mubr.bf16.mxu1 %v2557_v19  ;;  %v2193_v20 = vcombine.high %v219_v14, %v223_v15  ;;  %v2192_v26 = vcombine.low %v219_v14, %v223_v15  ;;  %v28_v15 = vld [vmem:[%s3220_s1 + $0x50] sm:$0xff] }
  0x4a   :  { %1620 = vmatpush1.bf16.msra.mxu0 %v2126_v22  ;;  %1706 = vmatpush1.bf16.msra.mxu1 %v2128_v23  ;;  %v230_v22 = vld [vmem:[%s3220_s1 + $0x6a0] sm:$0xff]  ;;  %v227_v23 = vld [vmem:[%s3220_s1 + $0x688] sm:$0xff] }
  0x4b   :  { %1621 = vmatprep.subr.bf16.mxu0 %v2135_v24  ;;  %1707 = vmatprep.subr.bf16.mxu1 %v2137_v25  ;;  %v231_v24 = vld [vmem:[%s3220_s1 + $0x6a8] sm:$0xff]  ;;  %v2190_v25 = vcombine.low %v218_v12, %v222_v13  ;;  %v2199_v27 = vcombine.high %v226_v21, %v230_v22 }
  0x4c   :  { %v2201_v28 = vcombine.high %v227_v23, %v231_v24  ;;  %v2200_v34 = vcombine.low %v227_v23, %v231_v24 }
  0x4e   :  { %1622 = vmatpush1.bf16.msra.mxu0 %v2134_v30  ;;  %1708 = vmatpush1.bf16.msra.mxu1 %v2136_v31  ;;  %v238_v30 = vld [vmem:[%s3220_s1 + $0x6e0] sm:$0xff]  ;;  %v235_v31 = vld [vmem:[%s3220_s1 + $0x6c8] sm:$0xff] }
  0x4f   :  { %1623 = vmatprep.subr.bf16.mxu0 %v2143_v32  ;;  %1709 = vmatprep.subr.bf16.mxu1 %v2145_v33  ;;  %v239_v32 = vld [vmem:[%s3220_s1 + $0x6e8] sm:$0xff]  ;;  %v2198_v33 = vcombine.low %v226_v21, %v230_v22  ;;  %v2207_v35 = vcombine.high %v234_v29, %v238_v30 }
  0x50   :  { %v2209_v36 = vcombine.high %v235_v31, %v239_v32  ;;  %v2208_v42 = vcombine.low %v235_v31, %v239_v32 }
  0x52   :  { %1624 = vmatpush1.bf16.msra.mxu0 %v2142_v38  ;;  %1710 = vmatpush1.bf16.msra.mxu1 %v2144_v39  ;;  %v246_v38 = vld [vmem:[%s3220_s1 + $0x720] sm:$0xff]  ;;  %v243_v39 = vld [vmem:[%s3220_s1 + $0x708] sm:$0xff] }
  0x53   :  { %1625 = vmatprep.subr.bf16.mxu0 %v2151_v40  ;;  %1711 = vmatprep.subr.bf16.mxu1 %v2153_v41  ;;  %v247_v40 = vld [vmem:[%s3220_s1 + $0x728] sm:$0xff]  ;;  %v2206_v41 = vcombine.low %v234_v29, %v238_v30  ;;  %v2215_v43 = vcombine.high %v242_v37, %v246_v38 }
  0x54   :  { %v2217_v44 = vcombine.high %v243_v39, %v247_v40  ;;  %v2216_v50 = vcombine.low %v243_v39, %v247_v40 }
  0x56   :  { %1626 = vmatpush1.bf16.msra.mxu0 %v2150_v46  ;;  %1712 = vmatpush1.bf16.msra.mxu1 %v2152_v47  ;;  %v254_v46 = vld [vmem:[%s3220_s1 + $0x760] sm:$0xff]  ;;  %v251_v47 = vld [vmem:[%s3220_s1 + $0x748] sm:$0xff] }
  0x57   :  { %1627 = vmatprep.subr.bf16.mxu0 %v2159_v48  ;;  %1713 = vmatprep.subr.bf16.mxu1 %v2161_v49  ;;  %v255_v48 = vld [vmem:[%s3220_s1 + $0x768] sm:$0xff]  ;;  %v2214_v49 = vcombine.low %v242_v37, %v246_v38  ;;  %v2223_v51 = vcombine.high %v250_v45, %v254_v46 }
  0x58   :  { %v2225_v52 = vcombine.high %v251_v47, %v255_v48  ;;  %v2224_v59 = vcombine.low %v251_v47, %v255_v48  ;;  %v60_v48 = vld [vmem:[%s3220_s1 + $0x150] sm:$0xff] }
  0x5a   :  { %1628 = vmatpush1.bf16.msra.mxu0 %v2158_v54  ;;  %1714 = vmatpush1.bf16.msra.mxu1 %v2160_v55  ;;  %v262_v54 = vld [vmem:[%s3220_s1 + $0x7a0] sm:$0xff]  ;;  %v259_v55 = vld [vmem:[%s3220_s1 + $0x788] sm:$0xff] }
  0x5b   :  { %1629 = vmatprep.subr.bf16.mxu0 %v2167_v57  ;;  %1715 = vmatprep.subr.bf16.mxu1 %v2169_v58  ;;  %v263_v57 = vld [vmem:[%s3220_s1 + $0x7a8] sm:$0xff]  ;;  %v2222_v58 = vcombine.low %v250_v45, %v254_v46  ;;  %v2231_v60 = vcombine.high %v258_v53, %v262_v54 }
  0x5c   :  { %v2233_v61 = vcombine.high %v259_v55, %v263_v57  ;;  %v2232_v3 = vcombine.low %v259_v55, %v263_v57  ;;  %v68_v57 = vld [vmem:[%s3220_s1 + $0x190] sm:$0xff] }
  0x5e   :  { %1630 = vmatpush1.bf16.msra.mxu0 %v2166_v63  ;;  %1716 = vmatpush1.bf16.msra.mxu1 %v2168_v0  ;;  %v270_v63 = vld [vmem:[%s3220_s1 + $0x7e0] sm:$0xff]  ;;  %v267_v0 = vld [vmem:[%s3220_s1 + $0x7c8] sm:$0xff] }
  0x5f   :  { %1631 = vmatprep.subr.bf16.mxu0 %v2175_v1  ;;  %1717 = vmatprep.subr.bf16.mxu1 %v2177_v2  ;;  %v271_v1 = vld [vmem:[%s3220_s1 + $0x7e8] sm:$0xff]  ;;  %v2230_v2 = vcombine.low %v258_v53, %v262_v54  ;;  %v2239_v4 = vcombine.high %v266_v62, %v270_v63 }
  0x60   :  { %v2241_v5 = vcombine.high %v267_v0, %v271_v1  ;;  %v2240_v12 = vcombine.low %v267_v0, %v271_v1  ;;  %v76_v1 = vld [vmem:[%s3220_s1 + $0x1d0] sm:$0xff] }
  0x62   :  { %1632 = vmatpush1.bf16.msra.mxu0 %v2174_v7  ;;  %1718 = vmatpush1.bf16.msra.mxu1 %v2176_v8  ;;  %v24_v7 = vld [vmem:[%s3220_s1 + $0x30] sm:$0xff]  ;;  %v21_v8 = vld [vmem:[%s3220_s1 + $0x18] sm:$0xff] }
  0x63   :  { %1633 = vmatprep.subr.bf16.mxu0 %v2183_v9  ;;  %1719 = vmatprep.subr.bf16.mxu1 %v2185_v11  ;;  %v25_v9 = vld [vmem:[%s3220_s1 + $0x38] sm:$0xff]  ;;  %v2238_v11 = vcombine.low %v266_v62, %v270_v63  ;;  %v1995_v13 = vcombine.high %v20_v6, %v24_v7  ;;  %v1994_v21 = vcombine.low %v20_v6, %v24_v7 }
  0x64   :  { %v1997_v14 = vcombine.high %v21_v8, %v25_v9  ;;  %v1996_v22 = vcombine.low %v21_v8, %v25_v9  ;;  %v84_v9 = vld [vmem:[%s3220_s1 + $0x210] sm:$0xff] }
  0x66   :  { %1634 = vmatpush1.bf16.msra.mxu0 %v2182_v16  ;;  %1720 = vmatpush1.bf16.msra.mxu1 %v2184_v17  ;;  %v32_v16 = vld [vmem:[%s3220_s1 + $0x70] sm:$0xff]  ;;  %v2746_v17 = vld [vmem:[%s3221_s0 + $0x8] ss:$16 sps:$4 sm:$0xff]  }
  0x67   :  { %1635 = vmatprep.subr.bf16.mxu0 %v2191_v18  ;;  %1721 = vmatprep.subr.bf16.mxu1 %v2193_v20  ;;  %v29_v18 = vld [vmem:[%s3220_s1 + $0x58] sm:$0xff]  ;;  %v2003_v23 = vcombine.high %v28_v15, %v32_v16  ;;  %v2002_v29 = vcombine.low %v28_v15, %v32_v16 }
  0x68   :  { %v33_v20 = vld [vmem:[%s3220_s1 + $0x78] sm:$0xff] }
  0x69   :  { %v2005_v24 = vcombine.high %v29_v18, %v33_v20  ;;  %v2004_v30 = vcombine.low %v29_v18, %v33_v20  ;;  %v92_v20 = vld [vmem:[%s3220_s1 + $0x250] sm:$0xff] }
  0x6a   :  { %1636 = vmatpush1.bf16.msra.mxu0 %v2190_v25  ;;  %1722 = vmatpush1.bf16.msra.mxu1 %v2192_v26  ;;  %v36_v25 = vld [vmem:[%s3220_s1 + $0x90] sm:$0xff] }
  0x6b   :  { %1637 = vmatprep.subr.bf16.mxu0 %v2199_v27  ;;  %1723 = vmatprep.subr.bf16.mxu1 %v2201_v28  ;;  %v40_v26 = vld [vmem:[%s3220_s1 + $0xb0] sm:$0xff]  ;;  %v37_v27 = vld [vmem:[%s3220_s1 + $0x98] sm:$0xff] }
  0x6c   :  { %v41_v28 = vld [vmem:[%s3220_s1 + $0xb8] sm:$0xff]  ;;  %v2011_v31 = vcombine.high %v36_v25, %v40_v26  ;;  %v2010_v37 = vcombine.low %v36_v25, %v40_v26 }
  0x6d   :  { %v2013_v32 = vcombine.high %v37_v27, %v41_v28  ;;  %v2012_v38 = vcombine.low %v37_v27, %v41_v28  ;;  %v100_v28 = vld [vmem:[%s3220_s1 + $0x290] sm:$0xff] }
  0x6e   :  { %1638 = vmatpush1.bf16.msra.mxu0 %v2198_v33  ;;  %1724 = vmatpush1.bf16.msra.mxu1 %v2200_v34  ;;  %v44_v33 = vld [vmem:[%s3220_s1 + $0xd0] sm:$0xff] }
  0x6f   :  { %1639 = vmatprep.subr.bf16.mxu0 %v2207_v35  ;;  %1725 = vmatprep.subr.bf16.mxu1 %v2209_v36  ;;  %v48_v34 = vld [vmem:[%s3220_s1 + $0xf0] sm:$0xff]  ;;  %v45_v35 = vld [vmem:[%s3220_s1 + $0xd8] sm:$0xff] }
  0x70   :  { %v49_v36 = vld [vmem:[%s3220_s1 + $0xf8] sm:$0xff]  ;;  %v2019_v39 = vcombine.high %v44_v33, %v48_v34 }
  0x71   :  { %v2021_v40 = vcombine.high %v45_v35, %v49_v36  ;;  %v2020_v45 = vcombine.low %v45_v35, %v49_v36  ;;  %v108_v36 = vld [vmem:[%s3220_s1 + $0x2d0] sm:$0xff] }
  0x72   :  { %1640 = vmatpush1.bf16.msra.mxu0 %v2206_v41  ;;  %1726 = vmatpush1.bf16.msra.mxu1 %v2208_v42  ;;  %v52_v41 = vld [vmem:[%s3220_s1 + $0x110] sm:$0xff] }
  0x73   :  { %1641 = vmatprep.subr.bf16.mxu0 %v2215_v43  ;;  %1727 = vmatprep.subr.bf16.mxu1 %v2217_v44  ;;  %v56_v42 = vld [vmem:[%s3220_s1 + $0x130] sm:$0xff]  ;;  %v57_v43 = vld [vmem:[%s3220_s1 + $0x138] sm:$0xff]  ;;  %v2018_v44 = vcombine.low %v44_v33, %v48_v34 }
  0x74   :  { %v2027_v46 = vcombine.high %v52_v41, %v56_v42 }
  0x76   :  { %1642 = vmatpush1.bf16.msra.mxu0 %v2214_v49  ;;  %1728 = vmatpush1.bf16.msra.mxu1 %v2216_v50  ;;  %v64_v49 = vld [vmem:[%s3220_s1 + $0x170] sm:$0xff]  ;;  %v61_v50 = vld [vmem:[%s3220_s1 + $0x158] sm:$0xff] }
  0x77   :  { %1643 = vmatprep.subr.bf16.mxu0 %v2223_v51  ;;  %1729 = vmatprep.subr.bf16.mxu1 %v2225_v52  ;;  %v65_v51 = vld [vmem:[%s3220_s1 + $0x178] sm:$0xff]  ;;  %v2026_v52 = vcombine.low %v52_v41, %v56_v42  ;;  %v2035_v54 = vcombine.high %v60_v48, %v64_v49 }
  0x78   :  { %v2037_v55 = vcombine.high %v61_v50, %v65_v51  ;;  %v2036_v62 = vcombine.low %v61_v50, %v65_v51  ;;  %v124_v51 = vld [vmem:[%s3220_s1 + $0x350] sm:$0xff] }
  0x7a   :  { %1644 = vmatpush1.bf16.msra.mxu0 %v2222_v58  ;;  %1730 = vmatpush1.bf16.msra.mxu1 %v2224_v59  ;;  %v72_v58 = vld [vmem:[%s3220_s1 + $0x1b0] sm:$0xff]  ;;  %v69_v59 = vld [vmem:[%s3220_s1 + $0x198] sm:$0xff] }
  0x7b   :  { %1645 = vmatprep.subr.bf16.mxu0 %v2231_v60  ;;  %1731 = vmatprep.subr.bf16.mxu1 %v2233_v61  ;;  %v73_v60 = vld [vmem:[%s3220_s1 + $0x1b8] sm:$0xff]  ;;  %v2034_v61 = vcombine.low %v60_v48, %v64_v49  ;;  %v2043_v63 = vcombine.high %v68_v57, %v72_v58 }
  0x7c   :  { %v2045_v0 = vcombine.high %v69_v59, %v73_v60  ;;  %v2044_v6 = vcombine.low %v69_v59, %v73_v60  ;;  %v132_v60 = vld [vmem:[%s3220_s1 + $0x390] sm:$0xff] }
  0x7e   :  { %1646 = vmatpush1.bf16.msra.mxu0 %v2230_v2  ;;  %1732 = vmatpush1.bf16.msra.mxu1 %v2232_v3  ;;  %v80_v2 = vld [vmem:[%s3220_s1 + $0x1f0] sm:$0xff]  ;;  %v77_v3 = vld [vmem:[%s3220_s1 + $0x1d8] sm:$0xff] }
  0x7f   :  { %1647 = vmatprep.subr.bf16.mxu0 %v2239_v4  ;;  %1733 = vmatprep.subr.bf16.mxu1 %v2241_v5  ;;  %v81_v4 = vld [vmem:[%s3220_s1 + $0x1f8] sm:$0xff]  ;;  %v2042_v5 = vcombine.low %v68_v57, %v72_v58  ;;  %v2051_v7 = vcombine.high %v76_v1, %v80_v2 }
  0x80   :  { %v2053_v8 = vcombine.high %v77_v3, %v81_v4  ;;  %v2052_v15 = vcombine.low %v77_v3, %v81_v4  ;;  %v140_v4 = vld [vmem:[%s3220_s1 + $0x3d0] sm:$0xff] }
  0x82   :  { %1648 = vmatpush1.bf16.msra.mxu0 %v2238_v11  ;;  %1734 = vmatpush1.bf16.msra.mxu1 %v2240_v12  ;;  %v88_v11 = vld [vmem:[%s3220_s1 + $0x230] sm:$0xff]  ;;  %v85_v12 = vld [vmem:[%s3220_s1 + $0x218] sm:$0xff] }
  0x83   :  { %1746 = vmatprep.subr.bf16.mxu0 %v1995_v13  ;;  %1832 = vmatprep.subr.bf16.mxu1 %v1997_v14  ;;  %v89_v13 = vld [vmem:[%s3220_s1 + $0x238] sm:$0xff]  ;;  %v2050_v14 = vcombine.low %v76_v1, %v80_v2  ;;  %v2059_v16 = vcombine.high %v84_v9, %v88_v11 }
  0x84   :  { %v2061_v18 = vcombine.high %v85_v12, %v89_v13  ;;  %v2060_v25 = vcombine.low %v85_v12, %v89_v13  ;;  %v148_v13 = vld [vmem:[%s3220_s1 + $0x410] sm:$0xff] }
  0x85   :  { %1650 = vmatmul.mubr.bf16.vlgmr.msra.gmra.mrb[0].mxu0 %v2746_v17  ;;  %1736 = vmatmul.mubr.bf16.vlgmr.msra.gmra.mrb[0].mxu1 %v2746_v17 }
  0x86   :  { %1747 = vmatpush1.bf16.msra.mxu0 %v1994_v21  ;;  %1833 = vmatpush1.bf16.msra.mxu1 %v1996_v22  ;;  %v96_v21 = vld [vmem:[%s3220_s1 + $0x270] sm:$0xff]  ;;  %v93_v22 = vld [vmem:[%s3220_s1 + $0x258] sm:$0xff] }
  0x87   :  { %1748 = vmatprep.subr.bf16.mxu0 %v2003_v23  ;;  %1834 = vmatprep.subr.bf16.mxu1 %v2005_v24  ;;  %v97_v23 = vld [vmem:[%s3220_s1 + $0x278] sm:$0xff]  ;;  %v2058_v24 = vcombine.low %v84_v9, %v88_v11  ;;  %v2067_v26 = vcombine.high %v92_v20, %v96_v21 }
  0x88   :  { %1778 = vmatprep.mubr.bf16.mxu0 %v2413_v56  ;;  %1864 = vmatprep.mubr.bf16.mxu1 %v2413_v56  ;;  %v53_v56 = vld [vmem:[%s3220_s1 + $0x118] sm:$0xff]  ;;  %v2069_v27 = vcombine.high %v93_v22, %v97_v23  ;;  %v2068_v33 = vcombine.low %v93_v22, %v97_v23  ;;  %v156_v23 = vld [vmem:[%s3220_s1 + $0x450] sm:$0xff] }
  0x89   :  { %v2029_v47 = vcombine.high %v53_v56, %v57_v43  ;;  %v2028_v53 = vcombine.low %v53_v56, %v57_v43  ;;  %v116_v43 = vld [vmem:[%s3220_s1 + $0x310] sm:$0xff] }
  0x8a   :  { %1749 = vmatpush1.bf16.msra.mxu0 %v2002_v29  ;;  %1835 = vmatpush1.bf16.msra.mxu1 %v2004_v30  ;;  %v104_v29 = vld [vmem:[%s3220_s1 + $0x2b0] sm:$0xff]  ;;  %v101_v30 = vld [vmem:[%s3220_s1 + $0x298] sm:$0xff] }
  0x8b   :  { %1750 = vmatprep.subr.bf16.mxu0 %v2011_v31  ;;  %1836 = vmatprep.subr.bf16.mxu1 %v2013_v32  ;;  %v105_v31 = vld [vmem:[%s3220_s1 + $0x2b8] sm:$0xff]  ;;  %v2066_v32 = vcombine.low %v92_v20, %v96_v21  ;;  %v2075_v34 = vcombine.high %v100_v28, %v104_v29 }
  0x8c   :  { %v2077_v35 = vcombine.high %v101_v30, %v105_v31  ;;  %v2076_v41 = vcombine.low %v101_v30, %v105_v31  ;;  %v164_v31 = vld [vmem:[%s3220_s1 + $0x490] sm:$0xff] }
  0x8e   :  { %1751 = vmatpush1.bf16.msra.mxu0 %v2010_v37  ;;  %1837 = vmatpush1.bf16.msra.mxu1 %v2012_v38  ;;  %v112_v37 = vld [vmem:[%s3220_s1 + $0x2f0] sm:$0xff]  ;;  %v109_v38 = vld [vmem:[%s3220_s1 + $0x2d8] sm:$0xff] }
  0x8f   :  { %1752 = vmatprep.subr.bf16.mxu0 %v2019_v39  ;;  %1838 = vmatprep.subr.bf16.mxu1 %v2021_v40  ;;  %v113_v39 = vld [vmem:[%s3220_s1 + $0x2f8] sm:$0xff]  ;;  %v2074_v40 = vcombine.low %v100_v28, %v104_v29  ;;  %v2083_v42 = vcombine.high %v108_v36, %v112_v37 }
  0x90   :  { %v2085_v56 = vcombine.high %v109_v38, %v113_v39  ;;  %v2084_v48 = vcombine.low %v109_v38, %v113_v39  ;;  %v172_v39 = vld [vmem:[%s3220_s1 + $0x4d0] sm:$0xff] }
  0x92   :  { %1753 = vmatpush1.bf16.msra.mxu0 %v2018_v44  ;;  %1839 = vmatpush1.bf16.msra.mxu1 %v2020_v45  ;;  %v120_v44 = vld [vmem:[%s3220_s1 + $0x330] sm:$0xff]  ;;  %v117_v45 = vld [vmem:[%s3220_s1 + $0x318] sm:$0xff] }
  0x93   :  { %1754 = vmatprep.subr.bf16.mxu0 %v2027_v46  ;;  %1840 = vmatprep.subr.bf16.mxu1 %v2029_v47  ;;  %v121_v46 = vld [vmem:[%s3220_s1 + $0x338] sm:$0xff]  ;;  %v2082_v47 = vcombine.low %v108_v36, %v112_v37  ;;  %v2091_v49 = vcombine.high %v116_v43, %v120_v44 }
  0x94   :  { %v2093_v50 = vcombine.high %v117_v45, %v121_v46  ;;  %v2092_v57 = vcombine.low %v117_v45, %v121_v46  ;;  %v180_v45 = vld [vmem:[%s3220_s1 + $0x510] sm:$0xff] }
  0x95   :  { %v184_v46 = vld [vmem:[%s3220_s1 + $0x530] sm:$0xff] }
  0x96   :  { %1755 = vmatpush1.bf16.msra.mxu0 %v2026_v52  ;;  %1841 = vmatpush1.bf16.msra.mxu1 %v2028_v53  ;;  %v128_v52 = vld [vmem:[%s3220_s1 + $0x370] sm:$0xff]  ;;  %v125_v53 = vld [vmem:[%s3220_s1 + $0x358] sm:$0xff] }
  0x97   :  { %1756 = vmatprep.subr.bf16.mxu0 %v2035_v54  ;;  %1842 = vmatprep.subr.bf16.mxu1 %v2037_v55  ;;  %v129_v54 = vld [vmem:[%s3220_s1 + $0x378] sm:$0xff]  ;;  %v2090_v55 = vcombine.low %v116_v43, %v120_v44  ;;  %v2099_v58 = vcombine.high %v124_v51, %v128_v52 }
  0x98   :  { %v2101_v59 = vcombine.high %v125_v53, %v129_v54  ;;  %v2100_v1 = vcombine.low %v125_v53, %v129_v54  ;;  %v192_v53 = vld [vmem:[%s3220_s1 + $0x570] sm:$0xff]  ;;  %v189_v54 = vld [vmem:[%s3220_s1 + $0x558] sm:$0xff] }
  0x9a   :  { %1757 = vmatpush1.bf16.msra.mxu0 %v2034_v61  ;;  %1843 = vmatpush1.bf16.msra.mxu1 %v2036_v62  ;;  %v136_v61 = vld [vmem:[%s3220_s1 + $0x3b0] sm:$0xff]  ;;  %v133_v62 = vld [vmem:[%s3220_s1 + $0x398] sm:$0xff] }
  0x9b   :  { %1758 = vmatprep.subr.bf16.mxu0 %v2043_v63  ;;  %1844 = vmatprep.subr.bf16.mxu1 %v2045_v0  ;;  %v137_v63 = vld [vmem:[%s3220_s1 + $0x3b8] sm:$0xff]  ;;  %v2098_v0 = vcombine.low %v124_v51, %v128_v52  ;;  %v2107_v2 = vcombine.high %v132_v60, %v136_v61  ;;  %v188_v52 = vld [vmem:[%s3220_s1 + $0x550] sm:$0xff] }
  0x9c   :  { %v2109_v3 = vcombine.high %v133_v62, %v137_v63  ;;  %v2108_v9 = vcombine.low %v133_v62, %v137_v63  ;;  %v200_v62 = vld [vmem:[%s3220_s1 + $0x5b0] sm:$0xff]  ;;  %v197_v63 = vld [vmem:[%s3220_s1 + $0x598] sm:$0xff] }
  0x9e   :  { %1759 = vmatpush1.bf16.msra.mxu0 %v2042_v5  ;;  %1845 = vmatpush1.bf16.msra.mxu1 %v2044_v6  ;;  %v144_v5 = vld [vmem:[%s3220_s1 + $0x3f0] sm:$0xff]  ;;  %v141_v6 = vld [vmem:[%s3220_s1 + $0x3d8] sm:$0xff] }
  0x9f   :  { %1760 = vmatprep.subr.bf16.mxu0 %v2051_v7  ;;  %1846 = vmatprep.subr.bf16.mxu1 %v2053_v8  ;;  %v145_v7 = vld [vmem:[%s3220_s1 + $0x3f8] sm:$0xff]  ;;  %v2106_v8 = vcombine.low %v132_v60, %v136_v61  ;;  %v2115_v11 = vcombine.high %v140_v4, %v144_v5  ;;  %v196_v61 = vld [vmem:[%s3220_s1 + $0x590] sm:$0xff] }
  0xa0   :  { %v2117_v12 = vcombine.high %v141_v6, %v145_v7  ;;  %v2116_v20 = vcombine.low %v141_v6, %v145_v7  ;;  %v208_v6 = vld [vmem:[%s3220_s1 + $0x5f0] sm:$0xff]  ;;  %v205_v7 = vld [vmem:[%s3220_s1 + $0x5d8] sm:$0xff] }
  0xa2   :  { %1761 = vmatpush1.bf16.msra.mxu0 %v2050_v14  ;;  %1847 = vmatpush1.bf16.msra.mxu1 %v2052_v15  ;;  %v152_v14 = vld [vmem:[%s3220_s1 + $0x430] sm:$0xff]  ;;  %v149_v15 = vld [vmem:[%s3220_s1 + $0x418] sm:$0xff] }
  0xa3   :  { %1762 = vmatprep.subr.bf16.mxu0 %v2059_v16  ;;  %1848 = vmatprep.subr.bf16.mxu1 %v2061_v18  ;;  %v153_v16 = vld [vmem:[%s3220_s1 + $0x438] sm:$0xff]  ;;  %v2114_v18 = vcombine.low %v140_v4, %v144_v5  ;;  %v2123_v21 = vcombine.high %v148_v13, %v152_v14  ;;  %v204_v5 = vld [vmem:[%s3220_s1 + $0x5d0] sm:$0xff] }
  0xa4   :  { %v2125_v22 = vcombine.high %v149_v15, %v153_v16  ;;  %v2124_v28 = vcombine.low %v149_v15, %v153_v16  ;;  %v216_v15 = vld [vmem:[%s3220_s1 + $0x630] sm:$0xff]  ;;  %v213_v16 = vld [vmem:[%s3220_s1 + $0x618] sm:$0xff] }
  0xa6   :  { %1763 = vmatpush1.bf16.msra.mxu0 %v2058_v24  ;;  %1849 = vmatpush1.bf16.msra.mxu1 %v2060_v25  ;;  %v160_v24 = vld [vmem:[%s3220_s1 + $0x470] sm:$0xff]  ;;  %v157_v25 = vld [vmem:[%s3220_s1 + $0x458] sm:$0xff] }
  0xa7   :  { %1764 = vmatprep.subr.bf16.mxu0 %v2067_v26  ;;  %1850 = vmatprep.subr.bf16.mxu1 %v2069_v27  ;;  %v161_v26 = vld [vmem:[%s3220_s1 + $0x478] sm:$0xff]  ;;  %v2122_v27 = vcombine.low %v148_v13, %v152_v14  ;;  %v2131_v29 = vcombine.high %v156_v23, %v160_v24  ;;  %v212_v14 = vld [vmem:[%s3220_s1 + $0x610] sm:$0xff] }
  0xa8   :  { %v2133_v30 = vcombine.high %v157_v25, %v161_v26  ;;  %v2132_v36 = vcombine.low %v157_v25, %v161_v26  ;;  %v224_v25 = vld [vmem:[%s3220_s1 + $0x670] sm:$0xff]  ;;  %v221_v26 = vld [vmem:[%s3220_s1 + $0x658] sm:$0xff] }
  0xaa   :  { %1765 = vmatpush1.bf16.msra.mxu0 %v2066_v32  ;;  %1851 = vmatpush1.bf16.msra.mxu1 %v2068_v33  ;;  %v168_v32 = vld [vmem:[%s3220_s1 + $0x4b0] sm:$0xff]  ;;  %v165_v33 = vld [vmem:[%s3220_s1 + $0x498] sm:$0xff] }
  0xab   :  { %1766 = vmatprep.subr.bf16.mxu0 %v2075_v34  ;;  %1852 = vmatprep.subr.bf16.mxu1 %v2077_v35  ;;  %v169_v34 = vld [vmem:[%s3220_s1 + $0x4b8] sm:$0xff]  ;;  %v2130_v35 = vcombine.low %v156_v23, %v160_v24  ;;  %v2139_v37 = vcombine.high %v164_v31, %v168_v32  ;;  %v220_v24 = vld [vmem:[%s3220_s1 + $0x650] sm:$0xff] }
  0xac   :  { %v2141_v38 = vcombine.high %v165_v33, %v169_v34 }
  0xae   :  { %1767 = vmatpush1.bf16.msra.mxu0 %v2074_v40  ;;  %1853 = vmatpush1.bf16.msra.mxu1 %v2076_v41  ;;  %v176_v40 = vld [vmem:[%s3220_s1 + $0x4f0] sm:$0xff]  ;;  %v177_v41 = vld [vmem:[%s3220_s1 + $0x4f8] sm:$0xff] }
  0xaf   :  { %1768 = vmatprep.subr.bf16.mxu0 %v2083_v42  ;;  %1854 = vmatprep.subr.bf16.mxu1 %v2085_v56  ;;  %v2138_v42 = vcombine.low %v164_v31, %v168_v32  ;;  %v2140_v56 = vcombine.low %v165_v33, %v169_v34  ;;  %v2147_v43 = vcombine.high %v172_v39, %v176_v40  ;;  %v228_v32 = vld [vmem:[%s3220_s1 + $0x690] sm:$0xff]  ;;  %v229_v34 = vld [vmem:[%s3220_s1 + $0x698] sm:$0xff] }
  0xb0   :  { %v232_v33 = vld [vmem:[%s3220_s1 + $0x6b0] sm:$0xff] }
  0xb2   :  { %1769 = vmatpush1.bf16.msra.mxu0 %v2082_v47  ;;  %1855 = vmatpush1.bf16.msra.mxu1 %v2084_v48  ;;  %v185_v47 = vld [vmem:[%s3220_s1 + $0x538] sm:$0xff]  ;;  %v2146_v48 = vcombine.low %v172_v39, %v176_v40  ;;  %v236_v40 = vld [vmem:[%s3220_s1 + $0x6d0] sm:$0xff] }
  0xb3   :  { %1770 = vmatprep.subr.bf16.mxu0 %v2091_v49  ;;  %1856 = vmatprep.subr.bf16.mxu1 %v2093_v50  ;;  %v2155_v50 = vcombine.high %v180_v45, %v184_v46 }
  0xb6   :  { %1771 = vmatpush1.bf16.msra.mxu0 %v2090_v55  ;;  %1857 = vmatpush1.bf16.msra.mxu1 %v2092_v57  ;;  %v193_v55 = vld [vmem:[%s3220_s1 + $0x578] sm:$0xff]  ;;  %v2154_v57 = vcombine.low %v180_v45, %v184_v46  ;;  %v244_v46 = vld [vmem:[%s3220_s1 + $0x710] sm:$0xff] }
  0xb7   :  { %1772 = vmatprep.subr.bf16.mxu0 %v2099_v58  ;;  %1858 = vmatprep.subr.bf16.mxu1 %v2101_v59  ;;  %v2163_v59 = vcombine.high %v188_v52, %v192_v53  ;;  %v2165_v60 = vcombine.high %v189_v54, %v193_v55 }
  0xba   :  { %1773 = vmatpush1.bf16.msra.mxu0 %v2098_v0  ;;  %1859 = vmatpush1.bf16.msra.mxu1 %v2100_v1  ;;  %v201_v0 = vld [vmem:[%s3220_s1 + $0x5b8] sm:$0xff]  ;;  %v2162_v1 = vcombine.low %v188_v52, %v192_v53  ;;  %v252_v53 = vld [vmem:[%s3220_s1 + $0x750] sm:$0xff] }
  0xbb   :  { %1774 = vmatprep.subr.bf16.mxu0 %v2107_v2  ;;  %1860 = vmatprep.subr.bf16.mxu1 %v2109_v3  ;;  %v2164_v2 = vcombine.low %v189_v54, %v193_v55  ;;  %v2171_v3 = vcombine.high %v196_v61, %v200_v62  ;;  %v2173_v4 = vcombine.high %v197_v63, %v201_v0  ;;  %v256_v54 = vld [vmem:[%s3220_s1 + $0x770] sm:$0xff]  ;;  %v253_v55 = vld [vmem:[%s3220_s1 + $0x758] sm:$0xff] }
  0xbe   :  { %1775 = vmatpush1.bf16.msra.mxu0 %v2106_v8  ;;  %1861 = vmatpush1.bf16.msra.mxu1 %v2108_v9  ;;  %v209_v8 = vld [vmem:[%s3220_s1 + $0x5f8] sm:$0xff]  ;;  %v2170_v9 = vcombine.low %v196_v61, %v200_v62  ;;  %v260_v62 = vld [vmem:[%s3220_s1 + $0x790] sm:$0xff] }
  0xbf   :  { %1776 = vmatprep.subr.bf16.mxu0 %v2115_v11  ;;  %1862 = vmatprep.subr.bf16.mxu1 %v2117_v12  ;;  %v2172_v11 = vcombine.low %v197_v63, %v201_v0  ;;  %v2179_v12 = vcombine.high %v204_v5, %v208_v6  ;;  %v2181_v13 = vcombine.high %v205_v7, %v209_v8  ;;  %v264_v63 = vld [vmem:[%s3220_s1 + $0x7b0] sm:$0xff]  ;;  %v261_v0 = vld [vmem:[%s3220_s1 + $0x798] sm:$0xff] }
  0xc2   :  { %1777 = vmatpush1.bf16.msra.mxu0 %v2114_v18  ;;  %1863 = vmatpush1.bf16.msra.mxu1 %v2116_v20  ;;  %v217_v18 = vld [vmem:[%s3220_s1 + $0x638] sm:$0xff]  ;;  %v2178_v20 = vcombine.low %v204_v5, %v208_v6  ;;  %v268_v6 = vld [vmem:[%s3220_s1 + $0x7d0] sm:$0xff] }
  0xc3   :  { %1789 = vmatprep.subr.bf16.mxu0 %v2123_v21  ;;  %1875 = vmatprep.subr.bf16.mxu1 %v2125_v22  ;;  %v2180_v21 = vcombine.low %v205_v7, %v209_v8  ;;  %v2187_v22 = vcombine.high %v212_v14, %v216_v15  ;;  %v2189_v23 = vcombine.high %v213_v16, %v217_v18  ;;  %v272_v7 = vld [vmem:[%s3220_s1 + $0x7f0] sm:$0xff]  ;;  %v269_v8 = vld [vmem:[%s3220_s1 + $0x7d8] sm:$0xff] }
  0xc5   :  { %1779 = vmatmul.mubr.bf16.vlgmr.msra.gmra.mrb[4].mxu0 %v2540_v10  ;;  %1865 = vmatmul.mubr.bf16.vlgmr.msra.gmra.mrb[4].mxu1 %v2540_v10  ;;  %v173_v10 = vld [vmem:[%s3220_s1 + $0x4d8] sm:$0xff] }
  0xc6   :  { %1790 = vmatpush1.bf16.msra.mxu0 %v2122_v27  ;;  %1876 = vmatpush1.bf16.msra.mxu1 %v2124_v28  ;;  %v2149_v44 = vcombine.high %v173_v10, %v177_v41  ;;  %v2148_v49 = vcombine.low %v173_v10, %v177_v41  ;;  %v225_v27 = vld [vmem:[%s3220_s1 + $0x678] sm:$0xff]  ;;  %v2186_v28 = vcombine.low %v212_v14, %v216_v15  ;;  %v240_v10 = vld [vmem:[%s3220_s1 + $0x6f0] sm:$0xff] }
  0xc7   :  { %1791 = vmatprep.subr.bf16.mxu0 %v2131_v29  ;;  %1877 = vmatprep.subr.bf16.mxu1 %v2133_v30  ;;  %v2188_v29 = vcombine.low %v213_v16, %v217_v18  ;;  %v2195_v30 = vcombine.high %v220_v24, %v224_v25  ;;  %v2197_v31 = vcombine.high %v221_v26, %v225_v27  ;;  %v237_v41 = vld [vmem:[%s3220_s1 + $0x6d8] sm:$0xff] }
  0xc8   :  { %1821 = vmatprep.mubr.bf16.mxu0 %v2557_v19  ;;  %1907 = vmatprep.mubr.bf16.mxu1 %v2557_v19  ;;  %v181_v19 = vld [vmem:[%s3220_s1 + $0x518] sm:$0xff]  ;;  %v2242_v15 = vcombine.low %v268_v6, %v272_v7 }
  0xc9   :  { %v2157_v51 = vcombine.high %v181_v19, %v185_v47  ;;  %v2156_v58 = vcombine.low %v181_v19, %v185_v47  ;;  %v248_v19 = vld [vmem:[%s3220_s1 + $0x730] sm:$0xff]  ;;  %v245_v47 = vld [vmem:[%s3220_s1 + $0x718] sm:$0xff] }
  0xca   :  { %1792 = vmatpush1.bf16.msra.mxu0 %v2130_v35  ;;  %1878 = vmatpush1.bf16.msra.mxu1 %v2132_v36  ;;  %v233_v35 = vld [vmem:[%s3220_s1 + $0x6b8] sm:$0xff]  ;;  %v2194_v36 = vcombine.low %v220_v24, %v224_v25 }
  0xcb   :  { %1793 = vmatprep.subr.bf16.mxu0 %v2139_v37  ;;  %1879 = vmatprep.subr.bf16.mxu1 %v2141_v38  ;;  %v2196_v37 = vcombine.low %v221_v26, %v225_v27  ;;  %v2203_v38 = vcombine.high %v228_v32, %v232_v33  ;;  %v2205_v39 = vcombine.high %v229_v34, %v233_v35  ;;  %v1936_v27 = vld [vmem:[%s3222_s2 + $0x10] sm:$0xff] }
  0xce   :  { %1794 = vmatpush1.bf16.msra.mxu0 %v2138_v42  ;;  %1880 = vmatpush1.bf16.msra.mxu1 %v2140_v56  ;;  %v241_v42 = vld [vmem:[%s3220_s1 + $0x6f8] sm:$0xff]  ;;  %v2202_v56 = vcombine.low %v228_v32, %v232_v33 }
  0xcf   :  { %1795 = vmatprep.subr.bf16.mxu0 %v2147_v43  ;;  %1881 = vmatprep.subr.bf16.mxu1 %v2149_v44  ;;  %v2204_v43 = vcombine.low %v229_v34, %v233_v35  ;;  %v2211_v44 = vcombine.high %v236_v40, %v240_v10  ;;  %v2213_v45 = vcombine.high %v237_v41, %v241_v42  ;;  %v1937_v32 = vld [vmem:[%s3222_s2 + $0x18] sm:$0xff]  ;;  %v1942_v35 = vld [vmem:[%s3222_s2 + $0x40] sm:$0xff] }
  0xd2   :  { %1796 = vmatpush1.bf16.msra.mxu0 %v2146_v48  ;;  %1882 = vmatpush1.bf16.msra.mxu1 %v2148_v49  ;;  %v249_v48 = vld [vmem:[%s3220_s1 + $0x738] sm:$0xff]  ;;  %v2210_v49 = vcombine.low %v236_v40, %v240_v10  ;;  %v1943_v10 = vld [vmem:[%s3222_s2 + $0x48] sm:$0xff] }
  0xd3   :  { %1797 = vmatprep.subr.bf16.mxu0 %v2155_v50  ;;  %1883 = vmatprep.subr.bf16.mxu1 %v2157_v51  ;;  %v2212_v50 = vcombine.low %v237_v41, %v241_v42  ;;  %v2219_v51 = vcombine.high %v244_v46, %v248_v19  ;;  %v2221_v52 = vcombine.high %v245_v47, %v249_v48 }
  0xd6   :  { %1798 = vmatpush1.bf16.msra.mxu0 %v2154_v57  ;;  %1884 = vmatpush1.bf16.msra.mxu1 %v2156_v58  ;;  %v257_v57 = vld [vmem:[%s3220_s1 + $0x778] sm:$0xff]  ;;  %v2218_v58 = vcombine.low %v244_v46, %v248_v19 }
  0xd7   :  { %1799 = vmatprep.subr.bf16.mxu0 %v2163_v59  ;;  %1885 = vmatprep.subr.bf16.mxu1 %v2165_v60  ;;  %v2220_v59 = vcombine.low %v245_v47, %v249_v48  ;;  %v2227_v60 = vcombine.high %v252_v53, %v256_v54  ;;  %v2229_v61 = vcombine.high %v253_v55, %v257_v57 }
  0xda   :  { %1800 = vmatpush1.bf16.msra.mxu0 %v2162_v1  ;;  %1886 = vmatpush1.bf16.msra.mxu1 %v2164_v2  ;;  %v265_v1 = vld [vmem:[%s3220_s1 + $0x7b8] sm:$0xff]  ;;  %v2226_v2 = vcombine.low %v252_v53, %v256_v54 }
  0xdb   :  { %1801 = vmatprep.subr.bf16.mxu0 %v2171_v3  ;;  %1887 = vmatprep.subr.bf16.mxu1 %v2173_v4  ;;  %v2228_v3 = vcombine.low %v253_v55, %v257_v57  ;;  %v2235_v4 = vcombine.high %v260_v62, %v264_v63  ;;  %v2237_v5 = vcombine.high %v261_v0, %v265_v1  ;;  %v1938_v55 = vld [vmem:[%s3222_s2 + $0x20] sm:$0xff]  ;;  %v1940_v57 = vld [vmem:[%s3222_s2 + $0x30] sm:$0xff] }
  0xde   :  { %1802 = vmatpush1.bf16.msra.mxu0 %v2170_v9  ;;  %1888 = vmatpush1.bf16.msra.mxu1 %v2172_v11  ;;  %v273_v9 = vld [vmem:[%s3220_s1 + $0x7f8] sm:$0xff]  ;;  %v2234_v11 = vcombine.low %v260_v62, %v264_v63 }
  0xdf   :  { %1803 = vmatprep.subr.bf16.mxu0 %v2179_v12  ;;  %1889 = vmatprep.subr.bf16.mxu1 %v2181_v13  ;;  %v2236_v12 = vcombine.low %v261_v0, %v265_v1  ;;  %v2243_v13 = vcombine.high %v268_v6, %v272_v7  ;;  %v2245_v14 = vcombine.high %v269_v8, %v273_v9  ;;  %v1941_v62 = vld [vmem:[%s3222_s2 + $0x38] sm:$0xff]  ;;  %v1946_v1 = vld [vmem:[%s3222_s2 + $0x60] sm:$0xff]  ;;  %v1947_v7 = vld [vmem:[%s3222_s2 + $0x68] sm:$0xff] }
  0xe0   :  { %v2244_v16 = vcombine.low %v269_v8, %v273_v9 }
  0xe2   :  { %1804 = vmatpush1.bf16.msra.mxu0 %v2178_v20  ;;  %1890 = vmatpush1.bf16.msra.mxu1 %v2180_v21 }
  0xe3   :  { %1805 = vmatprep.subr.bf16.mxu0 %v2187_v22  ;;  %1891 = vmatprep.subr.bf16.mxu1 %v2189_v23 }
  0xe6   :  { %1806 = vmatpush1.bf16.msra.mxu0 %v2186_v28  ;;  %1892 = vmatpush1.bf16.msra.mxu1 %v2188_v29  ;;  %v1935_v29 = vld [vmem:[%s3222_s2 + $0x8] sm:$0xff] }
  0xe7   :  { %1807 = vmatprep.subr.bf16.mxu0 %v2195_v30  ;;  %1893 = vmatprep.subr.bf16.mxu1 %v2197_v31 }
  0xea   :  { %1808 = vmatpush1.bf16.msra.mxu0 %v2194_v36  ;;  %1894 = vmatpush1.bf16.msra.mxu1 %v2196_v37 }
  0xeb   :  { %1809 = vmatprep.subr.bf16.mxu0 %v2203_v38  ;;  %1895 = vmatprep.subr.bf16.mxu1 %v2205_v39  ;;  %v1944_v38 = vld [vmem:[%s3222_s2 + $0x50] sm:$0xff] }
  0xee   :  { %1810 = vmatpush1.bf16.msra.mxu0 %v2202_v56  ;;  %1896 = vmatpush1.bf16.msra.mxu1 %v2204_v43  ;;  %v1945_v56 = vld [vmem:[%s3222_s2 + $0x58] sm:$0xff] }
  0xef   :  { %1811 = vmatprep.subr.bf16.mxu0 %v2211_v44  ;;  %1897 = vmatprep.subr.bf16.mxu1 %v2213_v45 }
  0xf2   :  { %1812 = vmatpush1.bf16.msra.mxu0 %v2210_v49  ;;  %1898 = vmatpush1.bf16.msra.mxu1 %v2212_v50 }
  0xf3   :  { %1813 = vmatprep.subr.bf16.mxu0 %v2219_v51  ;;  %1899 = vmatprep.subr.bf16.mxu1 %v2221_v52 }
  0xf6   :  { %1814 = vmatpush1.bf16.msra.mxu0 %v2218_v58  ;;  %1900 = vmatpush1.bf16.msra.mxu1 %v2220_v59  ;;  %v1939_v59 = vld [vmem:[%s3222_s2 + $0x28] sm:$0xff] }
  0xf7   :  { %1815 = vmatprep.subr.bf16.mxu0 %v2227_v60  ;;  %1901 = vmatprep.subr.bf16.mxu1 %v2229_v61 }
  0xfa   :  { %1816 = vmatpush1.bf16.msra.mxu0 %v2226_v2  ;;  %1902 = vmatpush1.bf16.msra.mxu1 %v2228_v3 }
  0xfb   :  { %1817 = vmatprep.subr.bf16.mxu0 %v2235_v4  ;;  %1903 = vmatprep.subr.bf16.mxu1 %v2237_v5  ;;  %v1948_v4 = vld [vmem:[%s3222_s2 + $0x70] sm:$0xff] }
  0xfe   :  { %1818 = vmatpush1.bf16.msra.mxu0 %v2234_v11  ;;  %1904 = vmatpush1.bf16.msra.mxu1 %v2236_v12  ;;  %v1949_v11 = vld [vmem:[%s3222_s2 + $0x78] sm:$0xff] }
  0xff   :  { %1819 = vmatprep.subr.bf16.mxu0 %v2243_v13  ;;  %1905 = vmatprep.subr.bf16.mxu1 %v2245_v14 }
 0x102   :  { %1820 = vmatpush1.bf16.msra.mxu0 %v2242_v15  ;;  %1906 = vmatpush1.bf16.msra.mxu1 %v2244_v16 }
 0x105   :  { %1822 = vmatmul.mubr.bf16.vlgmr.msra.gmra.mrb[4].mxu0 %v2746_v17  ;;  %1908 = vmatmul.mubr.bf16.vlgmr.msra.gmra.mrb[4].mxu1 %v2746_v17  ;;  %v1934_v17 = vld [vmem:[%s3222_s2] sm:$0xff] }
 0x158   :  { %v1651_v18 = vpop.f32.mrb[0].mxu0  ;;  %v1737_v20 = vpop.f32.mrb[0].mxu1 }
 0x159   :  { %2268 = vtanh.f32 %v1651_v18  ;;  %v1653_v21 = vpop.f32.mrb[1].mxu0  ;;  %v1739_v22 = vpop.f32.mrb[1].mxu1 }
 0x15a   :  { %2270 = vtanh.f32 %v1737_v20  ;;  %v1655_v23 = vpop.f32.mrb[2].mxu0  ;;  %v1741_v24 = vpop.f32.mrb[2].mxu1 }
 0x15b   :  { %2272 = vtanh.f32 %v1653_v21  ;;  %v1657_v25 = vpop.f32.mrb[3].mxu0  ;;  %v1743_v26 = vpop.f32.mrb[3].mxu1 }
 0x15c   :  { %2274 = vtanh.f32 %v1739_v22 }
 0x15d   :  { %2276 = vtanh.f32 %v1655_v23 }
 0x15e   :  { %2278 = vtanh.f32 %v1741_v24 }
 0x15f   :  { %2280 = vtanh.f32 %v1657_v25 }
 0x160   :  { %2282 = vtanh.f32 %v1743_v26 }
 0x163   :  { %v2269_v28 = vpop.eup %2268 }
 0x164   :  { %v2271_v30 = vpop.eup %2270  ;;  %v1950_v31 = vadd.f32 %v2269_v28, %v1934_v17 }
 0x165   :  { %v2273_v33 = vpop.eup %2272  ;;  %v1952_v34 = vadd.f32 %v2271_v30, %v1936_v27 }
 0x166   :  { %v2275_v36 = vpop.eup %2274  ;;  %1966 = vst [vmem:[%s3223_s3] sm:$0xff] %v1950_v31  ;;  %v1951_v37 = vadd.f32 %v2273_v33, %v1935_v29 }
 0x167   :  { %v2277_v39 = vpop.eup %2276  ;;  %1968 = vst [vmem:[%s3223_s3 + $0x10] sm:$0xff] %v1952_v34  ;;  %v1953_v40 = vadd.f32 %v2275_v36, %v1937_v32 }
 0x168   :  { %v2279_v41 = vpop.eup %2278  ;;  %1967 = vst [vmem:[%s3223_s3 + $0x8] sm:$0xff] %v1951_v37  ;;  %v1958_v42 = vadd.f32 %v2277_v39, %v1942_v35 }
 0x169   :  { %v2281_v43 = vpop.eup %2280  ;;  %1969 = vst [vmem:[%s3223_s3 + $0x18] sm:$0xff] %v1953_v40  ;;  %v1960_v44 = vadd.f32 %v2279_v41, %v1944_v38 }
 0x16a   :  { %v2283_v45 = vpop.eup %2282  ;;  %1974 = vst [vmem:[%s3223_s3 + $0x40] sm:$0xff] %v1958_v42  ;;  %v1959_v46 = vadd.f32 %v2281_v43, %v1943_v10 }
 0x16b   :  { %1976 = vst [vmem:[%s3223_s3 + $0x50] sm:$0xff] %v1960_v44  ;;  %v1961_v19 = vadd.f32 %v2283_v45, %v1945_v56 }
 0x16c   :  { %1975 = vst [vmem:[%s3223_s3 + $0x48] sm:$0xff] %v1959_v46 }
 0x16d   :  { %1977 = vst [vmem:[%s3223_s3 + $0x58] sm:$0xff] %v1961_v19 }
 0x1d8   :  { %v1823_v47 = vpop.f32.mrb[4].mxu0  ;;  %v1909_v48 = vpop.f32.mrb[4].mxu1 }
 0x1d9   :  { %2284 = vtanh.f32 %v1823_v47  ;;  %v1825_v49 = vpop.f32.mrb[5].mxu0  ;;  %v1911_v50 = vpop.f32.mrb[5].mxu1 }
 0x1da   :  { %2286 = vtanh.f32 %v1909_v48  ;;  %v1827_v51 = vpop.f32.mrb[6].mxu0  ;;  %v1913_v52 = vpop.f32.mrb[6].mxu1 }
 0x1db   :  { %2288 = vtanh.f32 %v1825_v49  ;;  %v1829_v53 = vpop.f32.mrb[7].mxu0  ;;  %v1915_v54 = vpop.f32.mrb[7].mxu1 }
 0x1dc   :  { %2290 = vtanh.f32 %v1911_v50 }
 0x1dd   :  { %2292 = vtanh.f32 %v1827_v51 }
 0x1de   :  { %2294 = vtanh.f32 %v1913_v52 }
 0x1df   :  { %2296 = vtanh.f32 %v1829_v53 }
 0x1e0   :  { %2298 = vtanh.f32 %v1915_v54 }
 0x1e3   :  { %v2285_v58 = vpop.eup %2284 }
 0x1e4   :  { %v2287_v60 = vpop.eup %2286  ;;  %v1954_v61 = vadd.f32 %v2285_v58, %v1938_v55 }
 0x1e5   :  { %v2289_v63 = vpop.eup %2288  ;;  %v1956_v0 = vadd.f32 %v2287_v60, %v1940_v57 }
 0x1e6   :  { %v2291_v2 = vpop.eup %2290  ;;  %1970 = vst [vmem:[%s3223_s3 + $0x20] sm:$0xff] %v1954_v61  ;;  %v1955_v3 = vadd.f32 %v2289_v63, %v1939_v59 }
 0x1e7   :  { %v2293_v5 = vpop.eup %2292  ;;  %1972 = vst [vmem:[%s3223_s3 + $0x30] sm:$0xff] %v1956_v0  ;;  %v1957_v6 = vadd.f32 %v2291_v2, %v1941_v62 }
 0x1e8   :  { %v2295_v8 = vpop.eup %2294  ;;  %1971 = vst [vmem:[%s3223_s3 + $0x28] sm:$0xff] %v1955_v3  ;;  %v1962_v9 = vadd.f32 %v2293_v5, %v1946_v1 }
 0x1e9   :  { %v2297_v12 = vpop.eup %2296  ;;  %1973 = vst [vmem:[%s3223_s3 + $0x38] sm:$0xff] %v1957_v6  ;;  %v1964_v13 = vadd.f32 %v2295_v8, %v1948_v4 }
 0x1ea   :  { %v2299_v14 = vpop.eup %2298  ;;  %1978 = vst [vmem:[%s3223_s3 + $0x60] sm:$0xff] %v1962_v9  ;;  %v1963_v15 = vadd.f32 %v2297_v12, %v1947_v7 }
 0x1eb   :  { %1980 = vst [vmem:[%s3223_s3 + $0x70] sm:$0xff] %v1964_v13  ;;  %v1965_v16 = vadd.f32 %v2299_v14, %v1949_v11 }
 0x1ec   :  { %1979 = vst [vmem:[%s3223_s3 + $0x68] sm:$0xff] %v1963_v15 }
 0x1ed   :  { %1981 = vst [vmem:[%s3223_s3 + $0x78] sm:$0xff] %v1965_v16 }

</bundles_post_ra>
